<compile_context>
chip_gen: v7x
topology: tpu7x:2x2x1
jax: 0.10.0
libtpu: 0.0.40
codegen_flags: <defaults>
</compile_context>

<pallas_src>
import math

import jax
import jax.numpy as jnp
from jax import lax
from jax.experimental import pallas as pl
from jax.experimental.pallas import tpu as pltpu

# ---------------- synthetic model config ----------------
HIDDEN = 32
N_LAYERS = 2
N_HEADS = 4
HEAD_SIZE = HIDDEN // N_HEADS
VOCAB = 50
VOCAB_PAD = 128          # lm-head / logits padded to a full 128-lane width
MLP = 64
LEN_PREFIX = 4
N_PREFIXES = 3
NEG_INF = -1e30
ATTN_SCALE = 1.0 / math.sqrt(HEAD_SIZE)


# ---------------- single fused pipeline kernel ----------------
def _make_pipeline_kernel(seq_len):
    """One grid step == one batch element.  Runs embed -> stage1 -> stage2 ->
    decode -> lm-head -> masked-NLL partial, all on register values."""
    T_ENC = seq_len
    T_DEC = seq_len - 1

    def kernel(in_ids_ref, tgt_ids_ref, im_row_ref, tm_row_ref, tm_col_ref,
               rep_ref, pref_ref, wte_ref,
               ln1_g, ln1_b, wq, wk, wv, bq, bk, bv, wo, bo,
               ln2_g, ln2_b, w1, b1, w2, b2, lnf_g, lnf_b, lm_w, lm_b,
               loss_ref):
        rep = jnp.maximum(rep_ref[...], 1.0)         # Prefix reparam scale [P,1]
        wte = wte_ref[...]                           # [V, H]
        im_row = im_row_ref[0]                       # [1, SEQ] input mask (cols)
        tm_row = tm_row_ref[0]                       # [1, SEQ] target mask (cols)

        def embed(ids_col):
            # one-hot @ wte gather (MXU is otherwise idle); ids_col: [t,1] int32
            t = ids_col.shape[0]
            onehot = (lax.broadcasted_iota(jnp.int32, (t, VOCAB), 1)
                      == ids_col).astype(jnp.float32)
            return jnp.dot(onehot, wte, preferred_element_type=jnp.float32)

        def layer_norm(x, g, b):
            mu = jnp.mean(x, axis=-1, keepdims=True)
            var = jnp.mean(jnp.square(x - mu), axis=-1, keepdims=True)
            return (x - mu) * lax.rsqrt(var + 1e-5) * g + b

        def attention(q, kv_blocks, wo_l, t):
            # kv_blocks: list of (k [Sb,H], v [Sb,H], allowed [.,Sb] or None).
            # Joint (flash-style) softmax across blocks; per-head static loop;
            # output projection folded per head: concat_h(o_h)@wo == sum_h o_h@wo[rows_h].
            out = jnp.zeros((t, HIDDEN), jnp.float32)
            for hd in range(N_HEADS):
                sl = slice(hd * HEAD_SIZE, (hd + 1) * HEAD_SIZE)
                q_h = q[:, sl]
                scores = []
                for k_blk, _, allowed in kv_blocks:
                    s = lax.dot_general(q_h, k_blk[:, sl],
                                        (((1,), (1,)), ((), ())),
                                        preferred_element_type=jnp.float32)
                    s = s * ATTN_SCALE
                    if allowed is not None:
                        s = jnp.where(allowed, s, NEG_INF)
                    scores.append(s)
                m = scores[0].max(axis=-1, keepdims=True)
                for s in scores[1:]:
                    m = jnp.maximum(m, s.max(axis=-1, keepdims=True))
                denom = jnp.zeros((t, 1), jnp.float32)
                o_h = jnp.zeros((t, HEAD_SIZE), jnp.float32)
                for s, (_, v_blk, _) in zip(scores, kv_blocks):
                    p = jnp.exp(s - m)
                    denom = denom + jnp.sum(p, axis=-1, keepdims=True)
                    o_h = o_h + jnp.dot(p, v_blk[:, sl],
                                        preferred_element_type=jnp.float32)
                o_h = o_h * pl.reciprocal(denom, approx=True)      # EUP divide
                out = out + jnp.dot(o_h, wo_l[sl, :],
                                    preferred_element_type=jnp.float32)
            return out

        def run_stage(x, stage, carry_k, carry_v, carry_mask, new_mask, t):
            # x: [t,H]; carry_k/v: per-layer [SEQ,H] register values (or None)
            row = lax.broadcasted_iota(jnp.int32, (t, t), 0)
            col = lax.broadcasted_iota(jnp.int32, (t, t), 1)
            allowed_new = jnp.logical_and(col <= row, new_mask > 0.5)
            allowed_carry = None if carry_mask is None else carry_mask > 0.5
            new_k, new_v = [], []
            for l in range(N_LAYERS):
                # Prefix.forward: keys = prefixes[:,0::2], values = prefixes[:,1::2],
                # scaled by max(1, reparams) along len_prefix.
                pk = pref_ref[stage, 2 * l] * rep
                pv = pref_ref[stage, 2 * l + 1] * rep
                h = layer_norm(x, ln1_g[l], ln1_b[l])
                q = jnp.dot(h, wq[l], preferred_element_type=jnp.float32) + bq[l]
                k = jnp.dot(h, wk[l], preferred_element_type=jnp.float32) + bk[l]
                v = jnp.dot(h, wv[l], preferred_element_type=jnp.float32) + bv[l]
                new_k.append(k)
                new_v.append(v)
                blocks = [(pk, pv, None)]                 # prefix: never masked
                if carry_k is not None:
                    blocks.append((carry_k[l], carry_v[l], allowed_carry))
                blocks.append((k, v, allowed_new))
                o = attention(q, blocks, wo[l], t)
                x = x + o + bo[l]
                h2 = layer_norm(x, ln2_g[l], ln2_b[l])
                mlp_h = jax.nn.gelu(
                    jnp.dot(h2, w1[l], preferred_element_type=jnp.float32) + b1[l],
                    approximate=True)
                x = x + jnp.dot(mlp_h, w2[l],
                                preferred_element_type=jnp.float32) + b2[l]
            return x, new_k, new_v

        # ---- stage 1: past = prefix 0
        x_in = embed(in_ids_ref[0])                              # [SEQ, H]
        _, c1k, c1v = run_stage(x_in, 0, None, None, None, im_row, T_ENC)

        # ---- stage 2: past = [prefix 1 | stage-1 K/V]
        _, c2k, c2v = run_stage(x_in, 1, c1k, c1v, im_row, im_row, T_ENC)

        # ---- decode: past = [prefix 2 | stage-2 K/V], inputs = shifted targets
        tgt_ids = tgt_ids_ref[0]                                 # [SEQ, 1]
        x_tgt = embed(tgt_ids[:T_DEC])                           # [T_DEC, H]
        x_out, _, _ = run_stage(x_tgt, 2, c2k, c2v, im_row,
                                tm_row[:, :T_DEC], T_DEC)

        # ---- lm-head + masked-NLL partials (fused)
        xf = layer_norm(x_out, lnf_g[...], lnf_b[...])
        logits = jnp.dot(xf, lm_w[...],
                         preferred_element_type=jnp.float32) + lm_b[...]
        m = jnp.max(logits, axis=-1, keepdims=True)
        lse = jnp.log(jnp.sum(jnp.exp(logits - m), axis=-1, keepdims=True)) + m
        labels = tgt_ids[1:]                                     # [T_DEC, 1]
        colv = lax.broadcasted_iota(jnp.int32, (T_DEC, VOCAB_PAD), 1)
        picked = jnp.sum(logits * (colv == labels).astype(jnp.float32),
                         axis=-1, keepdims=True)
        logprob = picked - lse
        w = tm_col_ref[0][:T_DEC]                                # [T_DEC, 1]
        num = jnp.sum(-logprob * w, axis=0, keepdims=True)       # [1, 1]
        den = jnp.sum(w, axis=0, keepdims=True)                  # [1, 1]
        lane = lax.broadcasted_iota(jnp.int32, (1, VOCAB_PAD), 1)
        loss_ref[0] = (jnp.where(lane == 0, num, 0.0)
                       + jnp.where(lane == 1, den, 0.0))         # lane-dense store

    return kernel


# ---------------- wrapper: one pallas_call for the whole forward ----------------
def llm_forward(params, input_ids, input_mask, target_ids, target_mask):
    mp, pp = params['model'], params['prefix']
    B, seq_len = input_ids.shape

    in_ids = input_ids.astype(jnp.int32).reshape(B, seq_len, 1)
    tg_ids = target_ids.astype(jnp.int32).reshape(B, seq_len, 1)
    im_row = input_mask.astype(jnp.float32).reshape(B, 1, seq_len)
    tm_row = target_mask.astype(jnp.float32).reshape(B, 1, seq_len)
    tm_col = target_mask.astype(jnp.float32).reshape(B, seq_len, 1)
    rep = pp['reparams'].reshape(LEN_PREFIX, 1)

    per_batch = [
        (in_ids, pl.BlockSpec((1, seq_len, 1), lambda b: (b, 0, 0))),
        (tg_ids, pl.BlockSpec((1, seq_len, 1), lambda b: (b, 0, 0))),
        (im_row, pl.BlockSpec((1, 1, seq_len), lambda b: (b, 0, 0))),
        (tm_row, pl.BlockSpec((1, 1, seq_len), lambda b: (b, 0, 0))),
        (tm_col, pl.BlockSpec((1, seq_len, 1), lambda b: (b, 0, 0))),
    ]

    def const_spec(a):
        nd = a.ndim
        # constant index_map: grid-invariant operand (revisit-aware pipelining)
        return pl.BlockSpec(a.shape, lambda b, _nd=nd: (0,) * _nd)

    const_inputs = [rep, pp['prefixes'], mp['wte'],
                    mp['ln1_g'], mp['ln1_b'],
                    mp['wq'], mp['wk'], mp['wv'],
                    mp['bq'], mp['bk'], mp['bv'],
                    mp['wo'], mp['bo'],
                    mp['ln2_g'], mp['ln2_b'],
                    mp['w1'], mp['b1'], mp['w2'], mp['b2'],
                    mp['lnf_g'], mp['lnf_b'],
                    mp['lm_head_w'], mp['lm_head_b']]

    inputs = [a for a, _ in per_batch] + const_inputs
    in_specs = [s for _, s in per_batch] + [const_spec(a) for a in const_inputs]

    parts = pl.pallas_call(
        _make_pipeline_kernel(seq_len),
        grid=(B,),
        in_specs=in_specs,
        out_specs=pl.BlockSpec((1, 1, VOCAB_PAD), lambda b: (b, 0, 0)),
        out_shape=jax.ShapeDtypeStruct((B, 1, VOCAB_PAD), jnp.float32),
        compiler_params=pltpu.CompilerParams(
            dimension_semantics=("parallel",)),   # one step per TC on v7x
    )(*inputs)

    num = jnp.sum(parts[:, 0, 0])
    den = jnp.sum(parts[:, 0, 1])
    return num / jnp.maximum(den, 1e-9)            # tiny XLA finalize


# ---------------- deterministic parameter init ----------------
def init_params(key):
    keys = jax.random.split(key, 24)
    kit = iter(keys)

    def nrm(shape, scale=0.02):
        return jax.random.normal(next(kit), shape, jnp.float32) * scale

    model = dict(
        wte=nrm((VOCAB, HIDDEN)),
        ln1_g=jnp.ones((N_LAYERS, 1, HIDDEN), jnp.float32),
        ln1_b=jnp.zeros((N_LAYERS, 1, HIDDEN), jnp.float32),
        wq=nrm((N_LAYERS, HIDDEN, HIDDEN)),
        wk=nrm((N_LAYERS, HIDDEN, HIDDEN)),
        wv=nrm((N_LAYERS, HIDDEN, HIDDEN)),
        bq=jnp.zeros((N_LAYERS, 1, HIDDEN), jnp.float32),
        bk=jnp.zeros((N_LAYERS, 1, HIDDEN), jnp.float32),
        bv=jnp.zeros((N_LAYERS, 1, HIDDEN), jnp.float32),
        wo=nrm((N_LAYERS, HIDDEN, HIDDEN)),
        bo=jnp.zeros((N_LAYERS, 1, HIDDEN), jnp.float32),
        ln2_g=jnp.ones((N_LAYERS, 1, HIDDEN), jnp.float32),
        ln2_b=jnp.zeros((N_LAYERS, 1, HIDDEN), jnp.float32),
        w1=nrm((N_LAYERS, HIDDEN, MLP)),
        b1=jnp.zeros((N_LAYERS, 1, MLP), jnp.float32),
        w2=nrm((N_LAYERS, MLP, HIDDEN)),
        b2=jnp.zeros((N_LAYERS, 1, HIDDEN), jnp.float32),
        lnf_g=jnp.ones((1, HIDDEN), jnp.float32),
        lnf_b=jnp.zeros((1, HIDDEN), jnp.float32),
        # lm head padded to 128 lanes; pad cols get -1e9 bias so they do not
        # change log-softmax / loss.
        lm_head_w=jnp.pad(nrm((HIDDEN, VOCAB)),
                          ((0, 0), (0, VOCAB_PAD - VOCAB))),
        lm_head_b=jnp.concatenate(
            [jnp.zeros((VOCAB,), jnp.float32),
             jnp.full((VOCAB_PAD - VOCAB,), -1e9, jnp.float32)]
        ).reshape(1, VOCAB_PAD),
    )
    # Prefix params: reparams = ones(len_prefix); prefixes = xavier_uniform
    fan_in = 2 * N_LAYERS * LEN_PREFIX * HIDDEN
    fan_out = N_PREFIXES * LEN_PREFIX * HIDDEN
    bound = math.sqrt(6.0 / (fan_in + fan_out))
    prefixes = jax.random.uniform(
        next(kit), (N_PREFIXES, 2 * N_LAYERS, LEN_PREFIX, HIDDEN),
        jnp.float32, -bound, bound)
    prefix = dict(reparams=jnp.ones((LEN_PREFIX,), jnp.float32),
                  prefixes=prefixes)
    return dict(model=model, prefix=prefix)


if __name__ == "__main__":
    key = jax.random.PRNGKey(0)
    pkey, ikey, tkey = jax.random.split(key, 3)
    params = init_params(pkey)

    B, SEQ = 2, 8
    input_ids = jax.random.randint(ikey, (B, SEQ), 0, VOCAB, dtype=jnp.int32)
    target_ids = jax.random.randint(tkey, (B, SEQ), 0, VOCAB, dtype=jnp.int32)
    input_mask = jnp.array([[1.0] * SEQ,
                            [1.0] * (SEQ - 2) + [0.0, 0.0]], dtype=jnp.float32)
    target_mask = jnp.array([[1.0] * SEQ,
                             [1.0] * (SEQ - 1) + [0.0]], dtype=jnp.float32)

    loss = jax.jit(llm_forward)(params, input_ids, input_mask,
                                target_ids, target_mask)
    loss = jax.block_until_ready(loss)
    assert jnp.isfinite(loss), "loss is not finite"
    print("KERNEL_OK")
</pallas_src>

<mosaic_0001>
module attributes {stable_mosaic.version = 11 : i64} {
  func.func @kernel(%arg0: i32, %arg1: memref<1x8x1xi32, #tpu.memory_space<vmem>>, %arg2: memref<1x8x1xi32, #tpu.memory_space<vmem>>, %arg3: memref<1x1x8xf32, #tpu.memory_space<vmem>>, %arg4: memref<1x1x8xf32, #tpu.memory_space<vmem>>, %arg5: memref<1x8x1xf32, #tpu.memory_space<vmem>>, %arg6: memref<4x1xf32, #tpu.memory_space<vmem>>, %arg7: memref<3x4x4x32xf32, #tpu.memory_space<vmem>>, %arg8: memref<50x32xf32, #tpu.memory_space<vmem>>, %arg9: memref<2x1x32xf32, #tpu.memory_space<vmem>>, %arg10: memref<2x1x32xf32, #tpu.memory_space<vmem>>, %arg11: memref<2x32x32xf32, #tpu.memory_space<vmem>>, %arg12: memref<2x32x32xf32, #tpu.memory_space<vmem>>, %arg13: memref<2x32x32xf32, #tpu.memory_space<vmem>>, %arg14: memref<2x1x32xf32, #tpu.memory_space<vmem>>, %arg15: memref<2x1x32xf32, #tpu.memory_space<vmem>>, %arg16: memref<2x1x32xf32, #tpu.memory_space<vmem>>, %arg17: memref<2x32x32xf32, #tpu.memory_space<vmem>>, %arg18: memref<2x1x32xf32, #tpu.memory_space<vmem>>, %arg19: memref<2x1x32xf32, #tpu.memory_space<vmem>>, %arg20: memref<2x1x32xf32, #tpu.memory_space<vmem>>, %arg21: memref<2x32x64xf32, #tpu.memory_space<vmem>>, %arg22: memref<2x1x64xf32, #tpu.memory_space<vmem>>, %arg23: memref<2x64x32xf32, #tpu.memory_space<vmem>>, %arg24: memref<2x1x32xf32, #tpu.memory_space<vmem>>, %arg25: memref<1x32xf32, #tpu.memory_space<vmem>>, %arg26: memref<1x32xf32, #tpu.memory_space<vmem>>, %arg27: memref<32x128xf32, #tpu.memory_space<vmem>>, %arg28: memref<1x128xf32, #tpu.memory_space<vmem>>, %arg29: memref<1x1x128xf32, #tpu.memory_space<vmem>>) attributes {dimension_semantics = [#tpu.dimension_semantics<parallel>], iteration_bounds = array<i64: 2>, scalar_prefetch = 0 : i64, scratch_operands = 0 : i64, tpu.core_type = #tpu.core_type<tc>, window_params = [{transform_indices = @transform_0, window_bounds = array<i64: 1, 8, 1>}, {transform_indices = @transform_1, window_bounds = array<i64: 1, 8, 1>}, {transform_indices = @transform_2, window_bounds = array<i64: 1, 1, 8>}, {transform_indices = @transform_3, window_bounds = array<i64: 1, 1, 8>}, {transform_indices = @transform_4, window_bounds = array<i64: 1, 8, 1>}, {pipeline_mode = #tpu.pipeline_mode<synchronous>, transform_indices = @transform_5, window_bounds = array<i64: 4, 1>}, {pipeline_mode = #tpu.pipeline_mode<synchronous>, transform_indices = @transform_6, window_bounds = array<i64: 3, 4, 4, 32>}, {pipeline_mode = #tpu.pipeline_mode<synchronous>, transform_indices = @transform_7, window_bounds = array<i64: 50, 32>}, {pipeline_mode = #tpu.pipeline_mode<synchronous>, transform_indices = @transform_8, window_bounds = array<i64: 2, 1, 32>}, {pipeline_mode = #tpu.pipeline_mode<synchronous>, transform_indices = @transform_9, window_bounds = array<i64: 2, 1, 32>}, {pipeline_mode = #tpu.pipeline_mode<synchronous>, transform_indices = @transform_10, window_bounds = array<i64: 2, 32, 32>}, {pipeline_mode = #tpu.pipeline_mode<synchronous>, transform_indices = @transform_11, window_bounds = array<i64: 2, 32, 32>}, {pipeline_mode = #tpu.pipeline_mode<synchronous>, transform_indices = @transform_12, window_bounds = array<i64: 2, 32, 32>}, {pipeline_mode = #tpu.pipeline_mode<synchronous>, transform_indices = @transform_13, window_bounds = array<i64: 2, 1, 32>}, {pipeline_mode = #tpu.pipeline_mode<synchronous>, transform_indices = @transform_14, window_bounds = array<i64: 2, 1, 32>}, {pipeline_mode = #tpu.pipeline_mode<synchronous>, transform_indices = @transform_15, window_bounds = array<i64: 2, 1, 32>}, {pipeline_mode = #tpu.pipeline_mode<synchronous>, transform_indices = @transform_16, window_bounds = array<i64: 2, 32, 32>}, {pipeline_mode = #tpu.pipeline_mode<synchronous>, transform_indices = @transform_17, window_bounds = array<i64: 2, 1, 32>}, {pipeline_mode = #tpu.pipeline_mode<synchronous>, transform_indices = @transform_18, window_bounds = array<i64: 2, 1, 32>}, {pipeline_mode = #tpu.pipeline_mode<synchronous>, transform_indices = @transform_19, window_bounds = array<i64: 2, 1, 32>}, {pipeline_mode = #tpu.pipeline_mode<synchronous>, transform_indices = @transform_20, window_bounds = array<i64: 2, 32, 64>}, {pipeline_mode = #tpu.pipeline_mode<synchronous>, transform_indices = @transform_21, window_bounds = array<i64: 2, 1, 64>}, {pipeline_mode = #tpu.pipeline_mode<synchronous>, transform_indices = @transform_22, window_bounds = array<i64: 2, 64, 32>}, {pipeline_mode = #tpu.pipeline_mode<synchronous>, transform_indices = @transform_23, window_bounds = array<i64: 2, 1, 32>}, {pipeline_mode = #tpu.pipeline_mode<synchronous>, transform_indices = @transform_24, window_bounds = array<i64: 1, 32>}, {pipeline_mode = #tpu.pipeline_mode<synchronous>, transform_indices = @transform_25, window_bounds = array<i64: 1, 32>}, {pipeline_mode = #tpu.pipeline_mode<synchronous>, transform_indices = @transform_26, window_bounds = array<i64: 32, 128>}, {pipeline_mode = #tpu.pipeline_mode<synchronous>, transform_indices = @transform_27, window_bounds = array<i64: 1, 128>}, {transform_indices = @transform_28, window_bounds = array<i64: 1, 1, 128>}]} {
    %c0 = arith.constant 0 : index
    %c0_0 = arith.constant 0 : index
    %0 = vector.load %arg6[%c0, %c0_0] : memref<4x1xf32, #tpu.memory_space<vmem>>, vector<4x1xf32>
    %cst = arith.constant 1.000000e+00 : f32
    %1 = vector.broadcast %cst : f32 to vector<4x1xf32>
    %2 = arith.maximumf %0, %1 : vector<4x1xf32>
    %c0_1 = arith.constant 0 : index
    %c0_2 = arith.constant 0 : index
    %3 = vector.load %arg8[%c0_1, %c0_2] : memref<50x32xf32, #tpu.memory_space<vmem>>, vector<50x32xf32>
    %c0_3 = arith.constant 0 : index
    %c0_4 = arith.constant 0 : index
    %c0_5 = arith.constant 0 : index
    %4 = vector.load %arg3[%c0_3, %c0_4, %c0_5] : memref<1x1x8xf32, #tpu.memory_space<vmem>>, vector<1x1x8xf32>
    %5 = vector.shape_cast %4 : vector<1x1x8xf32> to vector<1x8xf32>
    %c0_6 = arith.constant 0 : index
    %c0_7 = arith.constant 0 : index
    %c0_8 = arith.constant 0 : index
    %6 = vector.load %arg4[%c0_6, %c0_7, %c0_8] : memref<1x1x8xf32, #tpu.memory_space<vmem>>, vector<1x1x8xf32>
    %7 = vector.shape_cast %6 : vector<1x1x8xf32> to vector<1x8xf32>
    %c0_9 = arith.constant 0 : index
    %c0_10 = arith.constant 0 : index
    %c0_11 = arith.constant 0 : index
    %8 = vector.load %arg1[%c0_9, %c0_10, %c0_11] : memref<1x8x1xi32, #tpu.memory_space<vmem>>, vector<1x8x1xi32>
    %9 = vector.shape_cast %8 : vector<1x8x1xi32> to vector<8x1xi32>
    %10 = tpu.iota {dimensions = array<i32: 1>} : vector<8x50xi32>
    %11 = vector.broadcast %9 : vector<8x1xi32> to vector<8x50xi32>
    %12 = arith.cmpi eq, %10, %11 : vector<8x50xi32>
    %13 = arith.extui %12 : vector<8x50xi1> to vector<8x50xi32>
    %14 = arith.sitofp %13 : vector<8x50xi32> to vector<8x50xf32>
    %cst_12 = arith.constant dense<0.000000e+00> : vector<8x32xf32>
    %15 = tpu.matmul %14, %3, %cst_12 {dimension_numbers = #tpu.dot_dimension_numbers<[1], [0], [0], [1], [0, 0, 1, 1], [], []>} : vector<8x50xf32>, vector<50x32xf32>, vector<8x32xf32> -> vector<8x32xf32>
    %c0_13 = arith.constant 0 : index
    %c0_14 = arith.constant 0 : index
    %c0_15 = arith.constant 0 : index
    %16 = vector.load %arg9[%c0_13, %c0_14, %c0_15] : memref<2x1x32xf32, #tpu.memory_space<vmem>>, vector<1x1x32xf32>
    %17 = vector.shape_cast %16 : vector<1x1x32xf32> to vector<1x32xf32>
    %c0_16 = arith.constant 0 : index
    %c0_17 = arith.constant 0 : index
    %c0_18 = arith.constant 0 : index
    %18 = vector.load %arg10[%c0_16, %c0_17, %c0_18] : memref<2x1x32xf32, #tpu.memory_space<vmem>>, vector<1x1x32xf32>
    %19 = vector.shape_cast %18 : vector<1x1x32xf32> to vector<1x32xf32>
    %cst_19 = arith.constant dense<0.000000e+00> : vector<8xf32>
    %20 = vector.multi_reduction <add>, %15, %cst_19 [1] : vector<8x32xf32> to vector<8xf32>
    %21 = vector.shape_cast %20 : vector<8xf32> to vector<8x1xf32>
    %cst_20 = arith.constant 3.200000e+01 : f32
    %22 = vector.broadcast %cst_20 : f32 to vector<8x1xf32>
    %23 = arith.divf %21, %22 : vector<8x1xf32>
    %24 = vector.broadcast %23 : vector<8x1xf32> to vector<8x32xf32>
    %25 = arith.subf %15, %24 : vector<8x32xf32>
    %26 = arith.mulf %25, %25 : vector<8x32xf32>
    %cst_21 = arith.constant dense<0.000000e+00> : vector<8xf32>
    %27 = vector.multi_reduction <add>, %26, %cst_21 [1] : vector<8x32xf32> to vector<8xf32>
    %28 = vector.shape_cast %27 : vector<8xf32> to vector<8x1xf32>
    %cst_22 = arith.constant 3.200000e+01 : f32
    %29 = vector.broadcast %cst_22 : f32 to vector<8x1xf32>
    %30 = arith.divf %28, %29 : vector<8x1xf32>
    %31 = vector.broadcast %23 : vector<8x1xf32> to vector<8x32xf32>
    %32 = arith.subf %15, %31 : vector<8x32xf32>
    %cst_23 = arith.constant 9.99999974E-6 : f32
    %33 = vector.broadcast %cst_23 : f32 to vector<8x1xf32>
    %34 = arith.addf %30, %33 : vector<8x1xf32>
    %35 = math.rsqrt %34 : vector<8x1xf32>
    %36 = vector.broadcast %35 : vector<8x1xf32> to vector<8x32xf32>
    %37 = arith.mulf %32, %36 : vector<8x32xf32>
    %38 = vector.broadcast %17 : vector<1x32xf32> to vector<8x32xf32>
    %39 = arith.mulf %37, %38 : vector<8x32xf32>
    %40 = vector.broadcast %19 : vector<1x32xf32> to vector<8x32xf32>
    %41 = arith.addf %39, %40 : vector<8x32xf32>
    %c0_24 = arith.constant 0 : index
    %c0_25 = arith.constant 0 : index
    %c0_26 = arith.constant 0 : index
    %42 = vector.load %arg12[%c0_24, %c0_25, %c0_26] : memref<2x32x32xf32, #tpu.memory_space<vmem>>, vector<1x32x32xf32>
    %43 = vector.shape_cast %42 : vector<1x32x32xf32> to vector<32x32xf32>
    %cst_27 = arith.constant dense<0.000000e+00> : vector<8x32xf32>
    %44 = tpu.matmul %41, %43, %cst_27 {dimension_numbers = #tpu.dot_dimension_numbers<[1], [0], [0], [1], [0, 0, 1, 1], [], []>} : vector<8x32xf32>, vector<32x32xf32>, vector<8x32xf32> -> vector<8x32xf32>
    %c0_28 = arith.constant 0 : index
    %c0_29 = arith.constant 0 : index
    %c0_30 = arith.constant 0 : index
    %45 = vector.load %arg15[%c0_28, %c0_29, %c0_30] : memref<2x1x32xf32, #tpu.memory_space<vmem>>, vector<1x1x32xf32>
    %46 = vector.shape_cast %45 : vector<1x1x32xf32> to vector<1x32xf32>
    %47 = vector.broadcast %46 : vector<1x32xf32> to vector<8x32xf32>
    %48 = arith.addf %44, %47 : vector<8x32xf32>
    %c0_31 = arith.constant 0 : index
    %c0_32 = arith.constant 0 : index
    %c0_33 = arith.constant 0 : index
    %49 = vector.load %arg13[%c0_31, %c0_32, %c0_33] : memref<2x32x32xf32, #tpu.memory_space<vmem>>, vector<1x32x32xf32>
    %50 = vector.shape_cast %49 : vector<1x32x32xf32> to vector<32x32xf32>
    %cst_34 = arith.constant dense<0.000000e+00> : vector<8x32xf32>
    %51 = tpu.matmul %41, %50, %cst_34 {dimension_numbers = #tpu.dot_dimension_numbers<[1], [0], [0], [1], [0, 0, 1, 1], [], []>} : vector<8x32xf32>, vector<32x32xf32>, vector<8x32xf32> -> vector<8x32xf32>
    %c0_35 = arith.constant 0 : index
    %c0_36 = arith.constant 0 : index
    %c0_37 = arith.constant 0 : index
    %52 = vector.load %arg16[%c0_35, %c0_36, %c0_37] : memref<2x1x32xf32, #tpu.memory_space<vmem>>, vector<1x1x32xf32>
    %53 = vector.shape_cast %52 : vector<1x1x32xf32> to vector<1x32xf32>
    %54 = vector.broadcast %53 : vector<1x32xf32> to vector<8x32xf32>
    %55 = arith.addf %51, %54 : vector<8x32xf32>
    %56 = tpu.iota {dimensions = array<i32: 0>} : vector<8x8xi32>
    %57 = tpu.iota {dimensions = array<i32: 1>} : vector<8x8xi32>
    %58 = arith.cmpi sle, %57, %56 : vector<8x8xi32>
    %cst_38 = arith.constant 5.000000e-01 : f32
    %59 = vector.broadcast %cst_38 : f32 to vector<1x8xf32>
    %60 = arith.cmpf ogt, %5, %59 : vector<1x8xf32>
    %61 = vector.broadcast %60 : vector<1x8xi1> to vector<8x8xi1>
    %62 = arith.andi %58, %61 : vector<8x8xi1>
    %cst_39 = arith.constant 5.000000e-01 : f32
    %63 = vector.broadcast %cst_39 : f32 to vector<1x8xf32>
    %64 = arith.cmpf ogt, %5, %63 : vector<1x8xf32>
    %c1 = arith.constant 1 : index
    %c0_40 = arith.constant 0 : index
    %c0_41 = arith.constant 0 : index
    %c0_42 = arith.constant 0 : index
    %65 = vector.load %arg7[%c1, %c0_40, %c0_41, %c0_42] : memref<3x4x4x32xf32, #tpu.memory_space<vmem>>, vector<1x1x4x32xf32>
    %66 = vector.shape_cast %65 : vector<1x1x4x32xf32> to vector<4x32xf32>
    %67 = vector.broadcast %2 : vector<4x1xf32> to vector<4x32xf32>
    %68 = arith.mulf %66, %67 : vector<4x32xf32>
    %c1_43 = arith.constant 1 : index
    %c1_44 = arith.constant 1 : index
    %c0_45 = arith.constant 0 : index
    %c0_46 = arith.constant 0 : index
    %69 = vector.load %arg7[%c1_43, %c1_44, %c0_45, %c0_46] : memref<3x4x4x32xf32, #tpu.memory_space<vmem>>, vector<1x1x4x32xf32>
    %70 = vector.shape_cast %69 : vector<1x1x4x32xf32> to vector<4x32xf32>
    %71 = vector.broadcast %2 : vector<4x1xf32> to vector<4x32xf32>
    %72 = arith.mulf %70, %71 : vector<4x32xf32>
    %c0_47 = arith.constant 0 : index
    %c0_48 = arith.constant 0 : index
    %c0_49 = arith.constant 0 : index
    %73 = vector.load %arg9[%c0_47, %c0_48, %c0_49] : memref<2x1x32xf32, #tpu.memory_space<vmem>>, vector<1x1x32xf32>
    %74 = vector.shape_cast %73 : vector<1x1x32xf32> to vector<1x32xf32>
    %c0_50 = arith.constant 0 : index
    %c0_51 = arith.constant 0 : index
    %c0_52 = arith.constant 0 : index
    %75 = vector.load %arg10[%c0_50, %c0_51, %c0_52] : memref<2x1x32xf32, #tpu.memory_space<vmem>>, vector<1x1x32xf32>
    %76 = vector.shape_cast %75 : vector<1x1x32xf32> to vector<1x32xf32>
    %cst_53 = arith.constant dense<0.000000e+00> : vector<8xf32>
    %77 = vector.multi_reduction <add>, %15, %cst_53 [1] : vector<8x32xf32> to vector<8xf32>
    %78 = vector.shape_cast %77 : vector<8xf32> to vector<8x1xf32>
    %cst_54 = arith.constant 3.200000e+01 : f32
    %79 = vector.broadcast %cst_54 : f32 to vector<8x1xf32>
    %80 = arith.divf %78, %79 : vector<8x1xf32>
    %81 = vector.broadcast %80 : vector<8x1xf32> to vector<8x32xf32>
    %82 = arith.subf %15, %81 : vector<8x32xf32>
    %83 = arith.mulf %82, %82 : vector<8x32xf32>
    %cst_55 = arith.constant dense<0.000000e+00> : vector<8xf32>
    %84 = vector.multi_reduction <add>, %83, %cst_55 [1] : vector<8x32xf32> to vector<8xf32>
    %85 = vector.shape_cast %84 : vector<8xf32> to vector<8x1xf32>
    %cst_56 = arith.constant 3.200000e+01 : f32
    %86 = vector.broadcast %cst_56 : f32 to vector<8x1xf32>
    %87 = arith.divf %85, %86 : vector<8x1xf32>
    %88 = vector.broadcast %80 : vector<8x1xf32> to vector<8x32xf32>
    %89 = arith.subf %15, %88 : vector<8x32xf32>
    %cst_57 = arith.constant 9.99999974E-6 : f32
    %90 = vector.broadcast %cst_57 : f32 to vector<8x1xf32>
    %91 = arith.addf %87, %90 : vector<8x1xf32>
    %92 = math.rsqrt %91 : vector<8x1xf32>
    %93 = vector.broadcast %92 : vector<8x1xf32> to vector<8x32xf32>
    %94 = arith.mulf %89, %93 : vector<8x32xf32>
    %95 = vector.broadcast %74 : vector<1x32xf32> to vector<8x32xf32>
    %96 = arith.mulf %94, %95 : vector<8x32xf32>
    %97 = vector.broadcast %76 : vector<1x32xf32> to vector<8x32xf32>
    %98 = arith.addf %96, %97 : vector<8x32xf32>
    %c0_58 = arith.constant 0 : index
    %c0_59 = arith.constant 0 : index
    %c0_60 = arith.constant 0 : index
    %99 = vector.load %arg11[%c0_58, %c0_59, %c0_60] : memref<2x32x32xf32, #tpu.memory_space<vmem>>, vector<1x32x32xf32>
    %100 = vector.shape_cast %99 : vector<1x32x32xf32> to vector<32x32xf32>
    %cst_61 = arith.constant dense<0.000000e+00> : vector<8x32xf32>
    %101 = tpu.matmul %98, %100, %cst_61 {dimension_numbers = #tpu.dot_dimension_numbers<[1], [0], [0], [1], [0, 0, 1, 1], [], []>} : vector<8x32xf32>, vector<32x32xf32>, vector<8x32xf32> -> vector<8x32xf32>
    %c0_62 = arith.constant 0 : index
    %c0_63 = arith.constant 0 : index
    %c0_64 = arith.constant 0 : index
    %102 = vector.load %arg14[%c0_62, %c0_63, %c0_64] : memref<2x1x32xf32, #tpu.memory_space<vmem>>, vector<1x1x32xf32>
    %103 = vector.shape_cast %102 : vector<1x1x32xf32> to vector<1x32xf32>
    %104 = vector.broadcast %103 : vector<1x32xf32> to vector<8x32xf32>
    %105 = arith.addf %101, %104 : vector<8x32xf32>
    %c0_65 = arith.constant 0 : index
    %c0_66 = arith.constant 0 : index
    %c0_67 = arith.constant 0 : index
    %106 = vector.load %arg12[%c0_65, %c0_66, %c0_67] : memref<2x32x32xf32, #tpu.memory_space<vmem>>, vector<1x32x32xf32>
    %107 = vector.shape_cast %106 : vector<1x32x32xf32> to vector<32x32xf32>
    %cst_68 = arith.constant dense<0.000000e+00> : vector<8x32xf32>
    %108 = tpu.matmul %98, %107, %cst_68 {dimension_numbers = #tpu.dot_dimension_numbers<[1], [0], [0], [1], [0, 0, 1, 1], [], []>} : vector<8x32xf32>, vector<32x32xf32>, vector<8x32xf32> -> vector<8x32xf32>
    %c0_69 = arith.constant 0 : index
    %c0_70 = arith.constant 0 : index
    %c0_71 = arith.constant 0 : index
    %109 = vector.load %arg15[%c0_69, %c0_70, %c0_71] : memref<2x1x32xf32, #tpu.memory_space<vmem>>, vector<1x1x32xf32>
    %110 = vector.shape_cast %109 : vector<1x1x32xf32> to vector<1x32xf32>
    %111 = vector.broadcast %110 : vector<1x32xf32> to vector<8x32xf32>
    %112 = arith.addf %108, %111 : vector<8x32xf32>
    %c0_72 = arith.constant 0 : index
    %c0_73 = arith.constant 0 : index
    %c0_74 = arith.constant 0 : index
    %113 = vector.load %arg13[%c0_72, %c0_73, %c0_74] : memref<2x32x32xf32, #tpu.memory_space<vmem>>, vector<1x32x32xf32>
    %114 = vector.shape_cast %113 : vector<1x32x32xf32> to vector<32x32xf32>
    %cst_75 = arith.constant dense<0.000000e+00> : vector<8x32xf32>
    %115 = tpu.matmul %98, %114, %cst_75 {dimension_numbers = #tpu.dot_dimension_numbers<[1], [0], [0], [1], [0, 0, 1, 1], [], []>} : vector<8x32xf32>, vector<32x32xf32>, vector<8x32xf32> -> vector<8x32xf32>
    %c0_76 = arith.constant 0 : index
    %c0_77 = arith.constant 0 : index
    %c0_78 = arith.constant 0 : index
    %116 = vector.load %arg16[%c0_76, %c0_77, %c0_78] : memref<2x1x32xf32, #tpu.memory_space<vmem>>, vector<1x1x32xf32>
    %117 = vector.shape_cast %116 : vector<1x1x32xf32> to vector<1x32xf32>
    %118 = vector.broadcast %117 : vector<1x32xf32> to vector<8x32xf32>
    %119 = arith.addf %115, %118 : vector<8x32xf32>
    %c0_79 = arith.constant 0 : index
    %c0_80 = arith.constant 0 : index
    %c0_81 = arith.constant 0 : index
    %120 = vector.load %arg17[%c0_79, %c0_80, %c0_81] : memref<2x32x32xf32, #tpu.memory_space<vmem>>, vector<1x32x32xf32>
    %121 = vector.shape_cast %120 : vector<1x32x32xf32> to vector<32x32xf32>
    %cst_82 = arith.constant 0.000000e+00 : f32
    %122 = vector.broadcast %cst_82 : f32 to vector<8x32xf32>
    %123 = vector.extract_strided_slice %105 {offsets = [0, 0], sizes = [8, 8], strides = [1, 1]} : vector<8x32xf32> to vector<8x8xf32>
    %124 = vector.extract_strided_slice %68 {offsets = [0, 0], sizes = [4, 8], strides = [1, 1]} : vector<4x32xf32> to vector<4x8xf32>
    %cst_83 = arith.constant dense<0.000000e+00> : vector<8x4xf32>
    %125 = tpu.matmul %123, %124, %cst_83 {dimension_numbers = #tpu.dot_dimension_numbers<[1], [1], [0], [0], [0, 0, 1, 0], [], []>} : vector<8x8xf32>, vector<4x8xf32>, vector<8x4xf32> -> vector<8x4xf32>
    %cst_84 = arith.constant 0.353553385 : f32
    %126 = vector.broadcast %cst_84 : f32 to vector<8x4xf32>
    %127 = arith.mulf %125, %126 : vector<8x4xf32>
    %128 = vector.extract_strided_slice %48 {offsets = [0, 0], sizes = [8, 8], strides = [1, 1]} : vector<8x32xf32> to vector<8x8xf32>
    %cst_85 = arith.constant dense<0.000000e+00> : vector<8x8xf32>
    %129 = tpu.matmul %123, %128, %cst_85 {dimension_numbers = #tpu.dot_dimension_numbers<[1], [1], [0], [0], [0, 0, 1, 0], [], []>} : vector<8x8xf32>, vector<8x8xf32>, vector<8x8xf32> -> vector<8x8xf32>
    %cst_86 = arith.constant 0.353553385 : f32
    %130 = vector.broadcast %cst_86 : f32 to vector<8x8xf32>
    %131 = arith.mulf %129, %130 : vector<8x8xf32>
    %cst_87 = arith.constant -1.000000e+30 : f32
    %132 = vector.shape_cast %64 : vector<1x8xi1> to vector<1x8xi1>
    %133 = vector.broadcast %132 : vector<1x8xi1> to vector<8x8xi1>
    %134 = vector.broadcast %cst_87 : f32 to vector<8x8xf32>
    %135 = arith.select %133, %131, %134 : vector<8x8xi1>, vector<8x8xf32>
    %136 = vector.extract_strided_slice %112 {offsets = [0, 0], sizes = [8, 8], strides = [1, 1]} : vector<8x32xf32> to vector<8x8xf32>
    %cst_88 = arith.constant dense<0.000000e+00> : vector<8x8xf32>
    %137 = tpu.matmul %123, %136, %cst_88 {dimension_numbers = #tpu.dot_dimension_numbers<[1], [1], [0], [0], [0, 0, 1, 0], [], []>} : vector<8x8xf32>, vector<8x8xf32>, vector<8x8xf32> -> vector<8x8xf32>
    %cst_89 = arith.constant 0.353553385 : f32
    %138 = vector.broadcast %cst_89 : f32 to vector<8x8xf32>
    %139 = arith.mulf %137, %138 : vector<8x8xf32>
    %cst_90 = arith.constant -1.000000e+30 : f32
    %140 = vector.broadcast %cst_90 : f32 to vector<8x8xf32>
    %141 = arith.select %62, %139, %140 : vector<8x8xi1>, vector<8x8xf32>
    %cst_91 = arith.constant dense<0xFF800000> : vector<8xf32>
    %142 = vector.multi_reduction <maximumf>, %127, %cst_91 [1] : vector<8x4xf32> to vector<8xf32>
    %143 = vector.shape_cast %142 : vector<8xf32> to vector<8x1xf32>
    %cst_92 = arith.constant dense<0xFF800000> : vector<8xf32>
    %144 = vector.multi_reduction <maximumf>, %135, %cst_92 [1] : vector<8x8xf32> to vector<8xf32>
    %145 = vector.shape_cast %144 : vector<8xf32> to vector<8x1xf32>
    %146 = arith.maximumf %143, %145 : vector<8x1xf32>
    %cst_93 = arith.constant dense<0xFF800000> : vector<8xf32>
    %147 = vector.multi_reduction <maximumf>, %141, %cst_93 [1] : vector<8x8xf32> to vector<8xf32>
    %148 = vector.shape_cast %147 : vector<8xf32> to vector<8x1xf32>
    %149 = arith.maximumf %146, %148 : vector<8x1xf32>
    %cst_94 = arith.constant 0.000000e+00 : f32
    %150 = vector.broadcast %cst_94 : f32 to vector<8x1xf32>
    %cst_95 = arith.constant 0.000000e+00 : f32
    %151 = vector.broadcast %cst_95 : f32 to vector<8x8xf32>
    %152 = vector.broadcast %149 : vector<8x1xf32> to vector<8x4xf32>
    %153 = arith.subf %127, %152 : vector<8x4xf32>
    %154 = math.exp %153 : vector<8x4xf32>
    %cst_96 = arith.constant dense<0.000000e+00> : vector<8xf32>
    %155 = vector.multi_reduction <add>, %154, %cst_96 [1] : vector<8x4xf32> to vector<8xf32>
    %156 = vector.shape_cast %155 : vector<8xf32> to vector<8x1xf32>
    %157 = arith.addf %150, %156 : vector<8x1xf32>
    %158 = vector.extract_strided_slice %72 {offsets = [0, 0], sizes = [4, 8], strides = [1, 1]} : vector<4x32xf32> to vector<4x8xf32>
    %cst_97 = arith.constant dense<0.000000e+00> : vector<8x8xf32>
    %159 = tpu.matmul %154, %158, %cst_97 {dimension_numbers = #tpu.dot_dimension_numbers<[1], [0], [0], [1], [0, 0, 1, 1], [], []>} : vector<8x4xf32>, vector<4x8xf32>, vector<8x8xf32> -> vector<8x8xf32>
    %160 = arith.addf %151, %159 : vector<8x8xf32>
    %161 = vector.broadcast %149 : vector<8x1xf32> to vector<8x8xf32>
    %162 = arith.subf %135, %161 : vector<8x8xf32>
    %163 = math.exp %162 : vector<8x8xf32>
    %cst_98 = arith.constant dense<0.000000e+00> : vector<8xf32>
    %164 = vector.multi_reduction <add>, %163, %cst_98 [1] : vector<8x8xf32> to vector<8xf32>
    %165 = vector.shape_cast %164 : vector<8xf32> to vector<8x1xf32>
    %166 = arith.addf %157, %165 : vector<8x1xf32>
    %167 = vector.extract_strided_slice %55 {offsets = [0, 0], sizes = [8, 8], strides = [1, 1]} : vector<8x32xf32> to vector<8x8xf32>
    %cst_99 = arith.constant dense<0.000000e+00> : vector<8x8xf32>
    %168 = tpu.matmul %163, %167, %cst_99 {dimension_numbers = #tpu.dot_dimension_numbers<[1], [0], [0], [1], [0, 0, 1, 1], [], []>} : vector<8x8xf32>, vector<8x8xf32>, vector<8x8xf32> -> vector<8x8xf32>
    %169 = arith.addf %160, %168 : vector<8x8xf32>
    %170 = vector.broadcast %149 : vector<8x1xf32> to vector<8x8xf32>
    %171 = arith.subf %141, %170 : vector<8x8xf32>
    %172 = math.exp %171 : vector<8x8xf32>
    %cst_100 = arith.constant dense<0.000000e+00> : vector<8xf32>
    %173 = vector.multi_reduction <add>, %172, %cst_100 [1] : vector<8x8xf32> to vector<8xf32>
    %174 = vector.shape_cast %173 : vector<8xf32> to vector<8x1xf32>
    %175 = arith.addf %166, %174 : vector<8x1xf32>
    %176 = vector.extract_strided_slice %119 {offsets = [0, 0], sizes = [8, 8], strides = [1, 1]} : vector<8x32xf32> to vector<8x8xf32>
    %cst_101 = arith.constant dense<0.000000e+00> : vector<8x8xf32>
    %177 = tpu.matmul %172, %176, %cst_101 {dimension_numbers = #tpu.dot_dimension_numbers<[1], [0], [0], [1], [0, 0, 1, 1], [], []>} : vector<8x8xf32>, vector<8x8xf32>, vector<8x8xf32> -> vector<8x8xf32>
    %178 = arith.addf %169, %177 : vector<8x8xf32>
    %179 = tpu.reciprocal %175 {approx = true} : vector<8x1xf32> -> vector<8x1xf32>
    %180 = vector.broadcast %179 : vector<8x1xf32> to vector<8x8xf32>
    %181 = arith.mulf %178, %180 : vector<8x8xf32>
    %182 = vector.extract_strided_slice %121 {offsets = [0, 0], sizes = [8, 32], strides = [1, 1]} : vector<32x32xf32> to vector<8x32xf32>
    %cst_102 = arith.constant dense<0.000000e+00> : vector<8x32xf32>
    %183 = tpu.matmul %181, %182, %cst_102 {dimension_numbers = #tpu.dot_dimension_numbers<[1], [0], [0], [1], [0, 0, 1, 1], [], []>} : vector<8x8xf32>, vector<8x32xf32>, vector<8x32xf32> -> vector<8x32xf32>
    %184 = arith.addf %122, %183 : vector<8x32xf32>
    %185 = vector.extract_strided_slice %105 {offsets = [0, 8], sizes = [8, 8], strides = [1, 1]} : vector<8x32xf32> to vector<8x8xf32>
    %186 = vector.extract_strided_slice %68 {offsets = [0, 8], sizes = [4, 8], strides = [1, 1]} : vector<4x32xf32> to vector<4x8xf32>
    %cst_103 = arith.constant dense<0.000000e+00> : vector<8x4xf32>
    %187 = tpu.matmul %185, %186, %cst_103 {dimension_numbers = #tpu.dot_dimension_numbers<[1], [1], [0], [0], [0, 0, 1, 0], [], []>} : vector<8x8xf32>, vector<4x8xf32>, vector<8x4xf32> -> vector<8x4xf32>
    %cst_104 = arith.constant 0.353553385 : f32
    %188 = vector.broadcast %cst_104 : f32 to vector<8x4xf32>
    %189 = arith.mulf %187, %188 : vector<8x4xf32>
    %190 = vector.extract_strided_slice %48 {offsets = [0, 8], sizes = [8, 8], strides = [1, 1]} : vector<8x32xf32> to vector<8x8xf32>
    %cst_105 = arith.constant dense<0.000000e+00> : vector<8x8xf32>
    %191 = tpu.matmul %185, %190, %cst_105 {dimension_numbers = #tpu.dot_dimension_numbers<[1], [1], [0], [0], [0, 0, 1, 0], [], []>} : vector<8x8xf32>, vector<8x8xf32>, vector<8x8xf32> -> vector<8x8xf32>
    %cst_106 = arith.constant 0.353553385 : f32
    %192 = vector.broadcast %cst_106 : f32 to vector<8x8xf32>
    %193 = arith.mulf %191, %192 : vector<8x8xf32>
    %cst_107 = arith.constant -1.000000e+30 : f32
    %194 = vector.shape_cast %64 : vector<1x8xi1> to vector<1x8xi1>
    %195 = vector.broadcast %194 : vector<1x8xi1> to vector<8x8xi1>
    %196 = vector.broadcast %cst_107 : f32 to vector<8x8xf32>
    %197 = arith.select %195, %193, %196 : vector<8x8xi1>, vector<8x8xf32>
    %198 = vector.extract_strided_slice %112 {offsets = [0, 8], sizes = [8, 8], strides = [1, 1]} : vector<8x32xf32> to vector<8x8xf32>
    %cst_108 = arith.constant dense<0.000000e+00> : vector<8x8xf32>
    %199 = tpu.matmul %185, %198, %cst_108 {dimension_numbers = #tpu.dot_dimension_numbers<[1], [1], [0], [0], [0, 0, 1, 0], [], []>} : vector<8x8xf32>, vector<8x8xf32>, vector<8x8xf32> -> vector<8x8xf32>
    %cst_109 = arith.constant 0.353553385 : f32
    %200 = vector.broadcast %cst_109 : f32 to vector<8x8xf32>
    %201 = arith.mulf %199, %200 : vector<8x8xf32>
    %cst_110 = arith.constant -1.000000e+30 : f32
    %202 = vector.broadcast %cst_110 : f32 to vector<8x8xf32>
    %203 = arith.select %62, %201, %202 : vector<8x8xi1>, vector<8x8xf32>
    %cst_111 = arith.constant dense<0xFF800000> : vector<8xf32>
    %204 = vector.multi_reduction <maximumf>, %189, %cst_111 [1] : vector<8x4xf32> to vector<8xf32>
    %205 = vector.shape_cast %204 : vector<8xf32> to vector<8x1xf32>
    %cst_112 = arith.constant dense<0xFF800000> : vector<8xf32>
    %206 = vector.multi_reduction <maximumf>, %197, %cst_112 [1] : vector<8x8xf32> to vector<8xf32>
    %207 = vector.shape_cast %206 : vector<8xf32> to vector<8x1xf32>
    %208 = arith.maximumf %205, %207 : vector<8x1xf32>
    %cst_113 = arith.constant dense<0xFF800000> : vector<8xf32>
    %209 = vector.multi_reduction <maximumf>, %203, %cst_113 [1] : vector<8x8xf32> to vector<8xf32>
    %210 = vector.shape_cast %209 : vector<8xf32> to vector<8x1xf32>
    %211 = arith.maximumf %208, %210 : vector<8x1xf32>
    %cst_114 = arith.constant 0.000000e+00 : f32
    %212 = vector.broadcast %cst_114 : f32 to vector<8x1xf32>
    %cst_115 = arith.constant 0.000000e+00 : f32
    %213 = vector.broadcast %cst_115 : f32 to vector<8x8xf32>
    %214 = vector.broadcast %211 : vector<8x1xf32> to vector<8x4xf32>
    %215 = arith.subf %189, %214 : vector<8x4xf32>
    %216 = math.exp %215 : vector<8x4xf32>
    %cst_116 = arith.constant dense<0.000000e+00> : vector<8xf32>
    %217 = vector.multi_reduction <add>, %216, %cst_116 [1] : vector<8x4xf32> to vector<8xf32>
    %218 = vector.shape_cast %217 : vector<8xf32> to vector<8x1xf32>
    %219 = arith.addf %212, %218 : vector<8x1xf32>
    %220 = vector.extract_strided_slice %72 {offsets = [0, 8], sizes = [4, 8], strides = [1, 1]} : vector<4x32xf32> to vector<4x8xf32>
    %cst_117 = arith.constant dense<0.000000e+00> : vector<8x8xf32>
    %221 = tpu.matmul %216, %220, %cst_117 {dimension_numbers = #tpu.dot_dimension_numbers<[1], [0], [0], [1], [0, 0, 1, 1], [], []>} : vector<8x4xf32>, vector<4x8xf32>, vector<8x8xf32> -> vector<8x8xf32>
    %222 = arith.addf %213, %221 : vector<8x8xf32>
    %223 = vector.broadcast %211 : vector<8x1xf32> to vector<8x8xf32>
    %224 = arith.subf %197, %223 : vector<8x8xf32>
    %225 = math.exp %224 : vector<8x8xf32>
    %cst_118 = arith.constant dense<0.000000e+00> : vector<8xf32>
    %226 = vector.multi_reduction <add>, %225, %cst_118 [1] : vector<8x8xf32> to vector<8xf32>
    %227 = vector.shape_cast %226 : vector<8xf32> to vector<8x1xf32>
    %228 = arith.addf %219, %227 : vector<8x1xf32>
    %229 = vector.extract_strided_slice %55 {offsets = [0, 8], sizes = [8, 8], strides = [1, 1]} : vector<8x32xf32> to vector<8x8xf32>
    %cst_119 = arith.constant dense<0.000000e+00> : vector<8x8xf32>
    %230 = tpu.matmul %225, %229, %cst_119 {dimension_numbers = #tpu.dot_dimension_numbers<[1], [0], [0], [1], [0, 0, 1, 1], [], []>} : vector<8x8xf32>, vector<8x8xf32>, vector<8x8xf32> -> vector<8x8xf32>
    %231 = arith.addf %222, %230 : vector<8x8xf32>
    %232 = vector.broadcast %211 : vector<8x1xf32> to vector<8x8xf32>
    %233 = arith.subf %203, %232 : vector<8x8xf32>
    %234 = math.exp %233 : vector<8x8xf32>
    %cst_120 = arith.constant dense<0.000000e+00> : vector<8xf32>
    %235 = vector.multi_reduction <add>, %234, %cst_120 [1] : vector<8x8xf32> to vector<8xf32>
    %236 = vector.shape_cast %235 : vector<8xf32> to vector<8x1xf32>
    %237 = arith.addf %228, %236 : vector<8x1xf32>
    %238 = vector.extract_strided_slice %119 {offsets = [0, 8], sizes = [8, 8], strides = [1, 1]} : vector<8x32xf32> to vector<8x8xf32>
    %cst_121 = arith.constant dense<0.000000e+00> : vector<8x8xf32>
    %239 = tpu.matmul %234, %238, %cst_121 {dimension_numbers = #tpu.dot_dimension_numbers<[1], [0], [0], [1], [0, 0, 1, 1], [], []>} : vector<8x8xf32>, vector<8x8xf32>, vector<8x8xf32> -> vector<8x8xf32>
    %240 = arith.addf %231, %239 : vector<8x8xf32>
    %241 = tpu.reciprocal %237 {approx = true} : vector<8x1xf32> -> vector<8x1xf32>
    %242 = vector.broadcast %241 : vector<8x1xf32> to vector<8x8xf32>
    %243 = arith.mulf %240, %242 : vector<8x8xf32>
    %244 = vector.extract_strided_slice %121 {offsets = [8, 0], sizes = [8, 32], strides = [1, 1]} : vector<32x32xf32> to vector<8x32xf32>
    %cst_122 = arith.constant dense<0.000000e+00> : vector<8x32xf32>
    %245 = tpu.matmul %243, %244, %cst_122 {dimension_numbers = #tpu.dot_dimension_numbers<[1], [0], [0], [1], [0, 0, 1, 1], [], []>} : vector<8x8xf32>, vector<8x32xf32>, vector<8x32xf32> -> vector<8x32xf32>
    %246 = arith.addf %184, %245 : vector<8x32xf32>
    %247 = vector.extract_strided_slice %105 {offsets = [0, 16], sizes = [8, 8], strides = [1, 1]} : vector<8x32xf32> to vector<8x8xf32>
    %248 = vector.extract_strided_slice %68 {offsets = [0, 16], sizes = [4, 8], strides = [1, 1]} : vector<4x32xf32> to vector<4x8xf32>
    %cst_123 = arith.constant dense<0.000000e+00> : vector<8x4xf32>
    %249 = tpu.matmul %247, %248, %cst_123 {dimension_numbers = #tpu.dot_dimension_numbers<[1], [1], [0], [0], [0, 0, 1, 0], [], []>} : vector<8x8xf32>, vector<4x8xf32>, vector<8x4xf32> -> vector<8x4xf32>
    %cst_124 = arith.constant 0.353553385 : f32
    %250 = vector.broadcast %cst_124 : f32 to vector<8x4xf32>
    %251 = arith.mulf %249, %250 : vector<8x4xf32>
    %252 = vector.extract_strided_slice %48 {offsets = [0, 16], sizes = [8, 8], strides = [1, 1]} : vector<8x32xf32> to vector<8x8xf32>
    %cst_125 = arith.constant dense<0.000000e+00> : vector<8x8xf32>
    %253 = tpu.matmul %247, %252, %cst_125 {dimension_numbers = #tpu.dot_dimension_numbers<[1], [1], [0], [0], [0, 0, 1, 0], [], []>} : vector<8x8xf32>, vector<8x8xf32>, vector<8x8xf32> -> vector<8x8xf32>
    %cst_126 = arith.constant 0.353553385 : f32
    %254 = vector.broadcast %cst_126 : f32 to vector<8x8xf32>
    %255 = arith.mulf %253, %254 : vector<8x8xf32>
    %cst_127 = arith.constant -1.000000e+30 : f32
    %256 = vector.shape_cast %64 : vector<1x8xi1> to vector<1x8xi1>
    %257 = vector.broadcast %256 : vector<1x8xi1> to vector<8x8xi1>
    %258 = vector.broadcast %cst_127 : f32 to vector<8x8xf32>
    %259 = arith.select %257, %255, %258 : vector<8x8xi1>, vector<8x8xf32>
    %260 = vector.extract_strided_slice %112 {offsets = [0, 16], sizes = [8, 8], strides = [1, 1]} : vector<8x32xf32> to vector<8x8xf32>
    %cst_128 = arith.constant dense<0.000000e+00> : vector<8x8xf32>
    %261 = tpu.matmul %247, %260, %cst_128 {dimension_numbers = #tpu.dot_dimension_numbers<[1], [1], [0], [0], [0, 0, 1, 0], [], []>} : vector<8x8xf32>, vector<8x8xf32>, vector<8x8xf32> -> vector<8x8xf32>
    %cst_129 = arith.constant 0.353553385 : f32
    %262 = vector.broadcast %cst_129 : f32 to vector<8x8xf32>
    %263 = arith.mulf %261, %262 : vector<8x8xf32>
    %cst_130 = arith.constant -1.000000e+30 : f32
    %264 = vector.broadcast %cst_130 : f32 to vector<8x8xf32>
    %265 = arith.select %62, %263, %264 : vector<8x8xi1>, vector<8x8xf32>
    %cst_131 = arith.constant dense<0xFF800000> : vector<8xf32>
    %266 = vector.multi_reduction <maximumf>, %251, %cst_131 [1] : vector<8x4xf32> to vector<8xf32>
    %267 = vector.shape_cast %266 : vector<8xf32> to vector<8x1xf32>
    %cst_132 = arith.constant dense<0xFF800000> : vector<8xf32>
    %268 = vector.multi_reduction <maximumf>, %259, %cst_132 [1] : vector<8x8xf32> to vector<8xf32>
    %269 = vector.shape_cast %268 : vector<8xf32> to vector<8x1xf32>
    %270 = arith.maximumf %267, %269 : vector<8x1xf32>
    %cst_133 = arith.constant dense<0xFF800000> : vector<8xf32>
    %271 = vector.multi_reduction <maximumf>, %265, %cst_133 [1] : vector<8x8xf32> to vector<8xf32>
    %272 = vector.shape_cast %271 : vector<8xf32> to vector<8x1xf32>
    %273 = arith.maximumf %270, %272 : vector<8x1xf32>
    %cst_134 = arith.constant 0.000000e+00 : f32
    %274 = vector.broadcast %cst_134 : f32 to vector<8x1xf32>
    %cst_135 = arith.constant 0.000000e+00 : f32
    %275 = vector.broadcast %cst_135 : f32 to vector<8x8xf32>
    %276 = vector.broadcast %273 : vector<8x1xf32> to vector<8x4xf32>
    %277 = arith.subf %251, %276 : vector<8x4xf32>
    %278 = math.exp %277 : vector<8x4xf32>
    %cst_136 = arith.constant dense<0.000000e+00> : vector<8xf32>
    %279 = vector.multi_reduction <add>, %278, %cst_136 [1] : vector<8x4xf32> to vector<8xf32>
    %280 = vector.shape_cast %279 : vector<8xf32> to vector<8x1xf32>
    %281 = arith.addf %274, %280 : vector<8x1xf32>
    %282 = vector.extract_strided_slice %72 {offsets = [0, 16], sizes = [4, 8], strides = [1, 1]} : vector<4x32xf32> to vector<4x8xf32>
    %cst_137 = arith.constant dense<0.000000e+00> : vector<8x8xf32>
    %283 = tpu.matmul %278, %282, %cst_137 {dimension_numbers = #tpu.dot_dimension_numbers<[1], [0], [0], [1], [0, 0, 1, 1], [], []>} : vector<8x4xf32>, vector<4x8xf32>, vector<8x8xf32> -> vector<8x8xf32>
    %284 = arith.addf %275, %283 : vector<8x8xf32>
    %285 = vector.broadcast %273 : vector<8x1xf32> to vector<8x8xf32>
    %286 = arith.subf %259, %285 : vector<8x8xf32>
    %287 = math.exp %286 : vector<8x8xf32>
    %cst_138 = arith.constant dense<0.000000e+00> : vector<8xf32>
    %288 = vector.multi_reduction <add>, %287, %cst_138 [1] : vector<8x8xf32> to vector<8xf32>
    %289 = vector.shape_cast %288 : vector<8xf32> to vector<8x1xf32>
    %290 = arith.addf %281, %289 : vector<8x1xf32>
    %291 = vector.extract_strided_slice %55 {offsets = [0, 16], sizes = [8, 8], strides = [1, 1]} : vector<8x32xf32> to vector<8x8xf32>
    %cst_139 = arith.constant dense<0.000000e+00> : vector<8x8xf32>
    %292 = tpu.matmul %287, %291, %cst_139 {dimension_numbers = #tpu.dot_dimension_numbers<[1], [0], [0], [1], [0, 0, 1, 1], [], []>} : vector<8x8xf32>, vector<8x8xf32>, vector<8x8xf32> -> vector<8x8xf32>
    %293 = arith.addf %284, %292 : vector<8x8xf32>
    %294 = vector.broadcast %273 : vector<8x1xf32> to vector<8x8xf32>
    %295 = arith.subf %265, %294 : vector<8x8xf32>
    %296 = math.exp %295 : vector<8x8xf32>
    %cst_140 = arith.constant dense<0.000000e+00> : vector<8xf32>
    %297 = vector.multi_reduction <add>, %296, %cst_140 [1] : vector<8x8xf32> to vector<8xf32>
    %298 = vector.shape_cast %297 : vector<8xf32> to vector<8x1xf32>
    %299 = arith.addf %290, %298 : vector<8x1xf32>
    %300 = vector.extract_strided_slice %119 {offsets = [0, 16], sizes = [8, 8], strides = [1, 1]} : vector<8x32xf32> to vector<8x8xf32>
    %cst_141 = arith.constant dense<0.000000e+00> : vector<8x8xf32>
    %301 = tpu.matmul %296, %300, %cst_141 {dimension_numbers = #tpu.dot_dimension_numbers<[1], [0], [0], [1], [0, 0, 1, 1], [], []>} : vector<8x8xf32>, vector<8x8xf32>, vector<8x8xf32> -> vector<8x8xf32>
    %302 = arith.addf %293, %301 : vector<8x8xf32>
    %303 = tpu.reciprocal %299 {approx = true} : vector<8x1xf32> -> vector<8x1xf32>
    %304 = vector.broadcast %303 : vector<8x1xf32> to vector<8x8xf32>
    %305 = arith.mulf %302, %304 : vector<8x8xf32>
    %306 = vector.extract_strided_slice %121 {offsets = [16, 0], sizes = [8, 32], strides = [1, 1]} : vector<32x32xf32> to vector<8x32xf32>
    %cst_142 = arith.constant dense<0.000000e+00> : vector<8x32xf32>
    %307 = tpu.matmul %305, %306, %cst_142 {dimension_numbers = #tpu.dot_dimension_numbers<[1], [0], [0], [1], [0, 0, 1, 1], [], []>} : vector<8x8xf32>, vector<8x32xf32>, vector<8x32xf32> -> vector<8x32xf32>
    %308 = arith.addf %246, %307 : vector<8x32xf32>
    %309 = vector.extract_strided_slice %105 {offsets = [0, 24], sizes = [8, 8], strides = [1, 1]} : vector<8x32xf32> to vector<8x8xf32>
    %310 = vector.extract_strided_slice %68 {offsets = [0, 24], sizes = [4, 8], strides = [1, 1]} : vector<4x32xf32> to vector<4x8xf32>
    %cst_143 = arith.constant dense<0.000000e+00> : vector<8x4xf32>
    %311 = tpu.matmul %309, %310, %cst_143 {dimension_numbers = #tpu.dot_dimension_numbers<[1], [1], [0], [0], [0, 0, 1, 0], [], []>} : vector<8x8xf32>, vector<4x8xf32>, vector<8x4xf32> -> vector<8x4xf32>
    %cst_144 = arith.constant 0.353553385 : f32
    %312 = vector.broadcast %cst_144 : f32 to vector<8x4xf32>
    %313 = arith.mulf %311, %312 : vector<8x4xf32>
    %314 = vector.extract_strided_slice %48 {offsets = [0, 24], sizes = [8, 8], strides = [1, 1]} : vector<8x32xf32> to vector<8x8xf32>
    %cst_145 = arith.constant dense<0.000000e+00> : vector<8x8xf32>
    %315 = tpu.matmul %309, %314, %cst_145 {dimension_numbers = #tpu.dot_dimension_numbers<[1], [1], [0], [0], [0, 0, 1, 0], [], []>} : vector<8x8xf32>, vector<8x8xf32>, vector<8x8xf32> -> vector<8x8xf32>
    %cst_146 = arith.constant 0.353553385 : f32
    %316 = vector.broadcast %cst_146 : f32 to vector<8x8xf32>
    %317 = arith.mulf %315, %316 : vector<8x8xf32>
    %cst_147 = arith.constant -1.000000e+30 : f32
    %318 = vector.shape_cast %64 : vector<1x8xi1> to vector<1x8xi1>
    %319 = vector.broadcast %318 : vector<1x8xi1> to vector<8x8xi1>
    %320 = vector.broadcast %cst_147 : f32 to vector<8x8xf32>
    %321 = arith.select %319, %317, %320 : vector<8x8xi1>, vector<8x8xf32>
    %322 = vector.extract_strided_slice %112 {offsets = [0, 24], sizes = [8, 8], strides = [1, 1]} : vector<8x32xf32> to vector<8x8xf32>
    %cst_148 = arith.constant dense<0.000000e+00> : vector<8x8xf32>
    %323 = tpu.matmul %309, %322, %cst_148 {dimension_numbers = #tpu.dot_dimension_numbers<[1], [1], [0], [0], [0, 0, 1, 0], [], []>} : vector<8x8xf32>, vector<8x8xf32>, vector<8x8xf32> -> vector<8x8xf32>
    %cst_149 = arith.constant 0.353553385 : f32
    %324 = vector.broadcast %cst_149 : f32 to vector<8x8xf32>
    %325 = arith.mulf %323, %324 : vector<8x8xf32>
    %cst_150 = arith.constant -1.000000e+30 : f32
    %326 = vector.broadcast %cst_150 : f32 to vector<8x8xf32>
    %327 = arith.select %62, %325, %326 : vector<8x8xi1>, vector<8x8xf32>
    %cst_151 = arith.constant dense<0xFF800000> : vector<8xf32>
    %328 = vector.multi_reduction <maximumf>, %313, %cst_151 [1] : vector<8x4xf32> to vector<8xf32>
    %329 = vector.shape_cast %328 : vector<8xf32> to vector<8x1xf32>
    %cst_152 = arith.constant dense<0xFF800000> : vector<8xf32>
    %330 = vector.multi_reduction <maximumf>, %321, %cst_152 [1] : vector<8x8xf32> to vector<8xf32>
    %331 = vector.shape_cast %330 : vector<8xf32> to vector<8x1xf32>
    %332 = arith.maximumf %329, %331 : vector<8x1xf32>
    %cst_153 = arith.constant dense<0xFF800000> : vector<8xf32>
    %333 = vector.multi_reduction <maximumf>, %327, %cst_153 [1] : vector<8x8xf32> to vector<8xf32>
    %334 = vector.shape_cast %333 : vector<8xf32> to vector<8x1xf32>
    %335 = arith.maximumf %332, %334 : vector<8x1xf32>
    %cst_154 = arith.constant 0.000000e+00 : f32
    %336 = vector.broadcast %cst_154 : f32 to vector<8x1xf32>
    %cst_155 = arith.constant 0.000000e+00 : f32
    %337 = vector.broadcast %cst_155 : f32 to vector<8x8xf32>
    %338 = vector.broadcast %335 : vector<8x1xf32> to vector<8x4xf32>
    %339 = arith.subf %313, %338 : vector<8x4xf32>
    %340 = math.exp %339 : vector<8x4xf32>
    %cst_156 = arith.constant dense<0.000000e+00> : vector<8xf32>
    %341 = vector.multi_reduction <add>, %340, %cst_156 [1] : vector<8x4xf32> to vector<8xf32>
    %342 = vector.shape_cast %341 : vector<8xf32> to vector<8x1xf32>
    %343 = arith.addf %336, %342 : vector<8x1xf32>
    %344 = vector.extract_strided_slice %72 {offsets = [0, 24], sizes = [4, 8], strides = [1, 1]} : vector<4x32xf32> to vector<4x8xf32>
    %cst_157 = arith.constant dense<0.000000e+00> : vector<8x8xf32>
    %345 = tpu.matmul %340, %344, %cst_157 {dimension_numbers = #tpu.dot_dimension_numbers<[1], [0], [0], [1], [0, 0, 1, 1], [], []>} : vector<8x4xf32>, vector<4x8xf32>, vector<8x8xf32> -> vector<8x8xf32>
    %346 = arith.addf %337, %345 : vector<8x8xf32>
    %347 = vector.broadcast %335 : vector<8x1xf32> to vector<8x8xf32>
    %348 = arith.subf %321, %347 : vector<8x8xf32>
    %349 = math.exp %348 : vector<8x8xf32>
    %cst_158 = arith.constant dense<0.000000e+00> : vector<8xf32>
    %350 = vector.multi_reduction <add>, %349, %cst_158 [1] : vector<8x8xf32> to vector<8xf32>
    %351 = vector.shape_cast %350 : vector<8xf32> to vector<8x1xf32>
    %352 = arith.addf %343, %351 : vector<8x1xf32>
    %353 = vector.extract_strided_slice %55 {offsets = [0, 24], sizes = [8, 8], strides = [1, 1]} : vector<8x32xf32> to vector<8x8xf32>
    %cst_159 = arith.constant dense<0.000000e+00> : vector<8x8xf32>
    %354 = tpu.matmul %349, %353, %cst_159 {dimension_numbers = #tpu.dot_dimension_numbers<[1], [0], [0], [1], [0, 0, 1, 1], [], []>} : vector<8x8xf32>, vector<8x8xf32>, vector<8x8xf32> -> vector<8x8xf32>
    %355 = arith.addf %346, %354 : vector<8x8xf32>
    %356 = vector.broadcast %335 : vector<8x1xf32> to vector<8x8xf32>
    %357 = arith.subf %327, %356 : vector<8x8xf32>
    %358 = math.exp %357 : vector<8x8xf32>
    %cst_160 = arith.constant dense<0.000000e+00> : vector<8xf32>
    %359 = vector.multi_reduction <add>, %358, %cst_160 [1] : vector<8x8xf32> to vector<8xf32>
    %360 = vector.shape_cast %359 : vector<8xf32> to vector<8x1xf32>
    %361 = arith.addf %352, %360 : vector<8x1xf32>
    %362 = vector.extract_strided_slice %119 {offsets = [0, 24], sizes = [8, 8], strides = [1, 1]} : vector<8x32xf32> to vector<8x8xf32>
    %cst_161 = arith.constant dense<0.000000e+00> : vector<8x8xf32>
    %363 = tpu.matmul %358, %362, %cst_161 {dimension_numbers = #tpu.dot_dimension_numbers<[1], [0], [0], [1], [0, 0, 1, 1], [], []>} : vector<8x8xf32>, vector<8x8xf32>, vector<8x8xf32> -> vector<8x8xf32>
    %364 = arith.addf %355, %363 : vector<8x8xf32>
    %365 = tpu.reciprocal %361 {approx = true} : vector<8x1xf32> -> vector<8x1xf32>
    %366 = vector.broadcast %365 : vector<8x1xf32> to vector<8x8xf32>
    %367 = arith.mulf %364, %366 : vector<8x8xf32>
    %368 = vector.extract_strided_slice %121 {offsets = [24, 0], sizes = [8, 32], strides = [1, 1]} : vector<32x32xf32> to vector<8x32xf32>
    %cst_162 = arith.constant dense<0.000000e+00> : vector<8x32xf32>
    %369 = tpu.matmul %367, %368, %cst_162 {dimension_numbers = #tpu.dot_dimension_numbers<[1], [0], [0], [1], [0, 0, 1, 1], [], []>} : vector<8x8xf32>, vector<8x32xf32>, vector<8x32xf32> -> vector<8x32xf32>
    %370 = arith.addf %308, %369 : vector<8x32xf32>
    %371 = arith.addf %15, %370 : vector<8x32xf32>
    %c0_163 = arith.constant 0 : index
    %c0_164 = arith.constant 0 : index
    %c0_165 = arith.constant 0 : index
    %372 = vector.load %arg18[%c0_163, %c0_164, %c0_165] : memref<2x1x32xf32, #tpu.memory_space<vmem>>, vector<1x1x32xf32>
    %373 = vector.shape_cast %372 : vector<1x1x32xf32> to vector<1x32xf32>
    %374 = vector.broadcast %373 : vector<1x32xf32> to vector<8x32xf32>
    %375 = arith.addf %371, %374 : vector<8x32xf32>
    %c0_166 = arith.constant 0 : index
    %c0_167 = arith.constant 0 : index
    %c0_168 = arith.constant 0 : index
    %376 = vector.load %arg19[%c0_166, %c0_167, %c0_168] : memref<2x1x32xf32, #tpu.memory_space<vmem>>, vector<1x1x32xf32>
    %377 = vector.shape_cast %376 : vector<1x1x32xf32> to vector<1x32xf32>
    %c0_169 = arith.constant 0 : index
    %c0_170 = arith.constant 0 : index
    %c0_171 = arith.constant 0 : index
    %378 = vector.load %arg20[%c0_169, %c0_170, %c0_171] : memref<2x1x32xf32, #tpu.memory_space<vmem>>, vector<1x1x32xf32>
    %379 = vector.shape_cast %378 : vector<1x1x32xf32> to vector<1x32xf32>
    %cst_172 = arith.constant dense<0.000000e+00> : vector<8xf32>
    %380 = vector.multi_reduction <add>, %375, %cst_172 [1] : vector<8x32xf32> to vector<8xf32>
    %381 = vector.shape_cast %380 : vector<8xf32> to vector<8x1xf32>
    %cst_173 = arith.constant 3.200000e+01 : f32
    %382 = vector.broadcast %cst_173 : f32 to vector<8x1xf32>
    %383 = arith.divf %381, %382 : vector<8x1xf32>
    %384 = vector.broadcast %383 : vector<8x1xf32> to vector<8x32xf32>
    %385 = arith.subf %375, %384 : vector<8x32xf32>
    %386 = arith.mulf %385, %385 : vector<8x32xf32>
    %cst_174 = arith.constant dense<0.000000e+00> : vector<8xf32>
    %387 = vector.multi_reduction <add>, %386, %cst_174 [1] : vector<8x32xf32> to vector<8xf32>
    %388 = vector.shape_cast %387 : vector<8xf32> to vector<8x1xf32>
    %cst_175 = arith.constant 3.200000e+01 : f32
    %389 = vector.broadcast %cst_175 : f32 to vector<8x1xf32>
    %390 = arith.divf %388, %389 : vector<8x1xf32>
    %391 = vector.broadcast %383 : vector<8x1xf32> to vector<8x32xf32>
    %392 = arith.subf %375, %391 : vector<8x32xf32>
    %cst_176 = arith.constant 9.99999974E-6 : f32
    %393 = vector.broadcast %cst_176 : f32 to vector<8x1xf32>
    %394 = arith.addf %390, %393 : vector<8x1xf32>
    %395 = math.rsqrt %394 : vector<8x1xf32>
    %396 = vector.broadcast %395 : vector<8x1xf32> to vector<8x32xf32>
    %397 = arith.mulf %392, %396 : vector<8x32xf32>
    %398 = vector.broadcast %377 : vector<1x32xf32> to vector<8x32xf32>
    %399 = arith.mulf %397, %398 : vector<8x32xf32>
    %400 = vector.broadcast %379 : vector<1x32xf32> to vector<8x32xf32>
    %401 = arith.addf %399, %400 : vector<8x32xf32>
    %c0_177 = arith.constant 0 : index
    %c0_178 = arith.constant 0 : index
    %c0_179 = arith.constant 0 : index
    %402 = vector.load %arg21[%c0_177, %c0_178, %c0_179] : memref<2x32x64xf32, #tpu.memory_space<vmem>>, vector<1x32x64xf32>
    %403 = vector.shape_cast %402 : vector<1x32x64xf32> to vector<32x64xf32>
    %cst_180 = arith.constant dense<0.000000e+00> : vector<8x64xf32>
    %404 = tpu.matmul %401, %403, %cst_180 {dimension_numbers = #tpu.dot_dimension_numbers<[1], [0], [0], [1], [0, 0, 1, 1], [], []>} : vector<8x32xf32>, vector<32x64xf32>, vector<8x64xf32> -> vector<8x64xf32>
    %c0_181 = arith.constant 0 : index
    %c0_182 = arith.constant 0 : index
    %c0_183 = arith.constant 0 : index
    %405 = vector.load %arg22[%c0_181, %c0_182, %c0_183] : memref<2x1x64xf32, #tpu.memory_space<vmem>>, vector<1x1x64xf32>
    %406 = vector.shape_cast %405 : vector<1x1x64xf32> to vector<1x64xf32>
    %407 = vector.broadcast %406 : vector<1x64xf32> to vector<8x64xf32>
    %408 = arith.addf %404, %407 : vector<8x64xf32>
    %409 = arith.mulf %408, %408 : vector<8x64xf32>
    %410 = arith.mulf %408, %409 : vector<8x64xf32>
    %cst_184 = arith.constant 4.471500e-02 : f32
    %411 = vector.broadcast %cst_184 : f32 to vector<8x64xf32>
    %412 = arith.mulf %411, %410 : vector<8x64xf32>
    %413 = arith.addf %408, %412 : vector<8x64xf32>
    %cst_185 = arith.constant 0.797884583 : f32
    %414 = vector.broadcast %cst_185 : f32 to vector<8x64xf32>
    %415 = arith.mulf %414, %413 : vector<8x64xf32>
    %416 = math.tanh %415 : vector<8x64xf32>
    %cst_186 = arith.constant 1.000000e+00 : f32
    %417 = vector.broadcast %cst_186 : f32 to vector<8x64xf32>
    %418 = arith.addf %417, %416 : vector<8x64xf32>
    %cst_187 = arith.constant 5.000000e-01 : f32
    %419 = vector.broadcast %cst_187 : f32 to vector<8x64xf32>
    %420 = arith.mulf %419, %418 : vector<8x64xf32>
    %421 = arith.mulf %408, %420 : vector<8x64xf32>
    %c0_188 = arith.constant 0 : index
    %c0_189 = arith.constant 0 : index
    %c0_190 = arith.constant 0 : index
    %422 = vector.load %arg23[%c0_188, %c0_189, %c0_190] : memref<2x64x32xf32, #tpu.memory_space<vmem>>, vector<1x64x32xf32>
    %423 = vector.shape_cast %422 : vector<1x64x32xf32> to vector<64x32xf32>
    %cst_191 = arith.constant dense<0.000000e+00> : vector<8x32xf32>
    %424 = tpu.matmul %421, %423, %cst_191 {dimension_numbers = #tpu.dot_dimension_numbers<[1], [0], [0], [1], [0, 0, 1, 1], [], []>} : vector<8x64xf32>, vector<64x32xf32>, vector<8x32xf32> -> vector<8x32xf32>
    %425 = arith.addf %375, %424 : vector<8x32xf32>
    %c0_192 = arith.constant 0 : index
    %c0_193 = arith.constant 0 : index
    %c0_194 = arith.constant 0 : index
    %426 = vector.load %arg24[%c0_192, %c0_193, %c0_194] : memref<2x1x32xf32, #tpu.memory_space<vmem>>, vector<1x1x32xf32>
    %427 = vector.shape_cast %426 : vector<1x1x32xf32> to vector<1x32xf32>
    %428 = vector.broadcast %427 : vector<1x32xf32> to vector<8x32xf32>
    %429 = arith.addf %425, %428 : vector<8x32xf32>
    %c1_195 = arith.constant 1 : index
    %c0_196 = arith.constant 0 : index
    %c0_197 = arith.constant 0 : index
    %430 = vector.load %arg9[%c1_195, %c0_196, %c0_197] : memref<2x1x32xf32, #tpu.memory_space<vmem>>, vector<1x1x32xf32>
    %431 = vector.shape_cast %430 : vector<1x1x32xf32> to vector<1x32xf32>
    %c1_198 = arith.constant 1 : index
    %c0_199 = arith.constant 0 : index
    %c0_200 = arith.constant 0 : index
    %432 = vector.load %arg10[%c1_198, %c0_199, %c0_200] : memref<2x1x32xf32, #tpu.memory_space<vmem>>, vector<1x1x32xf32>
    %433 = vector.shape_cast %432 : vector<1x1x32xf32> to vector<1x32xf32>
    %cst_201 = arith.constant dense<0.000000e+00> : vector<8xf32>
    %434 = vector.multi_reduction <add>, %429, %cst_201 [1] : vector<8x32xf32> to vector<8xf32>
    %435 = vector.shape_cast %434 : vector<8xf32> to vector<8x1xf32>
    %cst_202 = arith.constant 3.200000e+01 : f32
    %436 = vector.broadcast %cst_202 : f32 to vector<8x1xf32>
    %437 = arith.divf %435, %436 : vector<8x1xf32>
    %438 = vector.broadcast %437 : vector<8x1xf32> to vector<8x32xf32>
    %439 = arith.subf %429, %438 : vector<8x32xf32>
    %440 = arith.mulf %439, %439 : vector<8x32xf32>
    %cst_203 = arith.constant dense<0.000000e+00> : vector<8xf32>
    %441 = vector.multi_reduction <add>, %440, %cst_203 [1] : vector<8x32xf32> to vector<8xf32>
    %442 = vector.shape_cast %441 : vector<8xf32> to vector<8x1xf32>
    %cst_204 = arith.constant 3.200000e+01 : f32
    %443 = vector.broadcast %cst_204 : f32 to vector<8x1xf32>
    %444 = arith.divf %442, %443 : vector<8x1xf32>
    %445 = vector.broadcast %437 : vector<8x1xf32> to vector<8x32xf32>
    %446 = arith.subf %429, %445 : vector<8x32xf32>
    %cst_205 = arith.constant 9.99999974E-6 : f32
    %447 = vector.broadcast %cst_205 : f32 to vector<8x1xf32>
    %448 = arith.addf %444, %447 : vector<8x1xf32>
    %449 = math.rsqrt %448 : vector<8x1xf32>
    %450 = vector.broadcast %449 : vector<8x1xf32> to vector<8x32xf32>
    %451 = arith.mulf %446, %450 : vector<8x32xf32>
    %452 = vector.broadcast %431 : vector<1x32xf32> to vector<8x32xf32>
    %453 = arith.mulf %451, %452 : vector<8x32xf32>
    %454 = vector.broadcast %433 : vector<1x32xf32> to vector<8x32xf32>
    %455 = arith.addf %453, %454 : vector<8x32xf32>
    %c1_206 = arith.constant 1 : index
    %c0_207 = arith.constant 0 : index
    %c0_208 = arith.constant 0 : index
    %456 = vector.load %arg12[%c1_206, %c0_207, %c0_208] : memref<2x32x32xf32, #tpu.memory_space<vmem>>, vector<1x32x32xf32>
    %457 = vector.shape_cast %456 : vector<1x32x32xf32> to vector<32x32xf32>
    %cst_209 = arith.constant dense<0.000000e+00> : vector<8x32xf32>
    %458 = tpu.matmul %455, %457, %cst_209 {dimension_numbers = #tpu.dot_dimension_numbers<[1], [0], [0], [1], [0, 0, 1, 1], [], []>} : vector<8x32xf32>, vector<32x32xf32>, vector<8x32xf32> -> vector<8x32xf32>
    %c1_210 = arith.constant 1 : index
    %c0_211 = arith.constant 0 : index
    %c0_212 = arith.constant 0 : index
    %459 = vector.load %arg15[%c1_210, %c0_211, %c0_212] : memref<2x1x32xf32, #tpu.memory_space<vmem>>, vector<1x1x32xf32>
    %460 = vector.shape_cast %459 : vector<1x1x32xf32> to vector<1x32xf32>
    %461 = vector.broadcast %460 : vector<1x32xf32> to vector<8x32xf32>
    %462 = arith.addf %458, %461 : vector<8x32xf32>
    %c1_213 = arith.constant 1 : index
    %c0_214 = arith.constant 0 : index
    %c0_215 = arith.constant 0 : index
    %463 = vector.load %arg13[%c1_213, %c0_214, %c0_215] : memref<2x32x32xf32, #tpu.memory_space<vmem>>, vector<1x32x32xf32>
    %464 = vector.shape_cast %463 : vector<1x32x32xf32> to vector<32x32xf32>
    %cst_216 = arith.constant dense<0.000000e+00> : vector<8x32xf32>
    %465 = tpu.matmul %455, %464, %cst_216 {dimension_numbers = #tpu.dot_dimension_numbers<[1], [0], [0], [1], [0, 0, 1, 1], [], []>} : vector<8x32xf32>, vector<32x32xf32>, vector<8x32xf32> -> vector<8x32xf32>
    %c1_217 = arith.constant 1 : index
    %c0_218 = arith.constant 0 : index
    %c0_219 = arith.constant 0 : index
    %466 = vector.load %arg16[%c1_217, %c0_218, %c0_219] : memref<2x1x32xf32, #tpu.memory_space<vmem>>, vector<1x1x32xf32>
    %467 = vector.shape_cast %466 : vector<1x1x32xf32> to vector<1x32xf32>
    %468 = vector.broadcast %467 : vector<1x32xf32> to vector<8x32xf32>
    %469 = arith.addf %465, %468 : vector<8x32xf32>
    %c0_220 = arith.constant 0 : index
    %c0_221 = arith.constant 0 : index
    %c0_222 = arith.constant 0 : index
    %470 = vector.load %arg2[%c0_220, %c0_221, %c0_222] : memref<1x8x1xi32, #tpu.memory_space<vmem>>, vector<1x8x1xi32>
    %471 = vector.shape_cast %470 : vector<1x8x1xi32> to vector<8x1xi32>
    %472 = vector.extract_strided_slice %471 {offsets = [0, 0], sizes = [7, 1], strides = [1, 1]} : vector<8x1xi32> to vector<7x1xi32>
    %473 = tpu.iota {dimensions = array<i32: 1>} : vector<7x50xi32>
    %474 = vector.broadcast %472 : vector<7x1xi32> to vector<7x50xi32>
    %475 = arith.cmpi eq, %473, %474 : vector<7x50xi32>
    %476 = arith.extui %475 : vector<7x50xi1> to vector<7x50xi32>
    %477 = arith.sitofp %476 : vector<7x50xi32> to vector<7x50xf32>
    %cst_223 = arith.constant dense<0.000000e+00> : vector<7x32xf32>
    %478 = tpu.matmul %477, %3, %cst_223 {dimension_numbers = #tpu.dot_dimension_numbers<[1], [0], [0], [1], [0, 0, 1, 1], [], []>} : vector<7x50xf32>, vector<50x32xf32>, vector<7x32xf32> -> vector<7x32xf32>
    %479 = vector.extract_strided_slice %7 {offsets = [0, 0], sizes = [1, 7], strides = [1, 1]} : vector<1x8xf32> to vector<1x7xf32>
    %480 = tpu.iota {dimensions = array<i32: 0>} : vector<7x7xi32>
    %481 = tpu.iota {dimensions = array<i32: 1>} : vector<7x7xi32>
    %482 = arith.cmpi sle, %481, %480 : vector<7x7xi32>
    %cst_224 = arith.constant 5.000000e-01 : f32
    %483 = vector.broadcast %cst_224 : f32 to vector<1x7xf32>
    %484 = arith.cmpf ogt, %479, %483 : vector<1x7xf32>
    %485 = vector.broadcast %484 : vector<1x7xi1> to vector<7x7xi1>
    %486 = arith.andi %482, %485 : vector<7x7xi1>
    %cst_225 = arith.constant 5.000000e-01 : f32
    %487 = vector.broadcast %cst_225 : f32 to vector<1x8xf32>
    %488 = arith.cmpf ogt, %5, %487 : vector<1x8xf32>
    %c2 = arith.constant 2 : index
    %c0_226 = arith.constant 0 : index
    %c0_227 = arith.constant 0 : index
    %c0_228 = arith.constant 0 : index
    %489 = vector.load %arg7[%c2, %c0_226, %c0_227, %c0_228] : memref<3x4x4x32xf32, #tpu.memory_space<vmem>>, vector<1x1x4x32xf32>
    %490 = vector.shape_cast %489 : vector<1x1x4x32xf32> to vector<4x32xf32>
    %491 = vector.broadcast %2 : vector<4x1xf32> to vector<4x32xf32>
    %492 = arith.mulf %490, %491 : vector<4x32xf32>
    %c2_229 = arith.constant 2 : index
    %c1_230 = arith.constant 1 : index
    %c0_231 = arith.constant 0 : index
    %c0_232 = arith.constant 0 : index
    %493 = vector.load %arg7[%c2_229, %c1_230, %c0_231, %c0_232] : memref<3x4x4x32xf32, #tpu.memory_space<vmem>>, vector<1x1x4x32xf32>
    %494 = vector.shape_cast %493 : vector<1x1x4x32xf32> to vector<4x32xf32>
    %495 = vector.broadcast %2 : vector<4x1xf32> to vector<4x32xf32>
    %496 = arith.mulf %494, %495 : vector<4x32xf32>
    %c0_233 = arith.constant 0 : index
    %c0_234 = arith.constant 0 : index
    %c0_235 = arith.constant 0 : index
    %497 = vector.load %arg9[%c0_233, %c0_234, %c0_235] : memref<2x1x32xf32, #tpu.memory_space<vmem>>, vector<1x1x32xf32>
    %498 = vector.shape_cast %497 : vector<1x1x32xf32> to vector<1x32xf32>
    %c0_236 = arith.constant 0 : index
    %c0_237 = arith.constant 0 : index
    %c0_238 = arith.constant 0 : index
    %499 = vector.load %arg10[%c0_236, %c0_237, %c0_238] : memref<2x1x32xf32, #tpu.memory_space<vmem>>, vector<1x1x32xf32>
    %500 = vector.shape_cast %499 : vector<1x1x32xf32> to vector<1x32xf32>
    %cst_239 = arith.constant dense<0.000000e+00> : vector<7xf32>
    %501 = vector.multi_reduction <add>, %478, %cst_239 [1] : vector<7x32xf32> to vector<7xf32>
    %502 = vector.shape_cast %501 : vector<7xf32> to vector<7x1xf32>
    %cst_240 = arith.constant 3.200000e+01 : f32
    %503 = vector.broadcast %cst_240 : f32 to vector<7x1xf32>
    %504 = arith.divf %502, %503 : vector<7x1xf32>
    %505 = vector.broadcast %504 : vector<7x1xf32> to vector<7x32xf32>
    %506 = arith.subf %478, %505 : vector<7x32xf32>
    %507 = arith.mulf %506, %506 : vector<7x32xf32>
    %cst_241 = arith.constant dense<0.000000e+00> : vector<7xf32>
    %508 = vector.multi_reduction <add>, %507, %cst_241 [1] : vector<7x32xf32> to vector<7xf32>
    %509 = vector.shape_cast %508 : vector<7xf32> to vector<7x1xf32>
    %cst_242 = arith.constant 3.200000e+01 : f32
    %510 = vector.broadcast %cst_242 : f32 to vector<7x1xf32>
    %511 = arith.divf %509, %510 : vector<7x1xf32>
    %512 = vector.broadcast %504 : vector<7x1xf32> to vector<7x32xf32>
    %513 = arith.subf %478, %512 : vector<7x32xf32>
    %cst_243 = arith.constant 9.99999974E-6 : f32
    %514 = vector.broadcast %cst_243 : f32 to vector<7x1xf32>
    %515 = arith.addf %511, %514 : vector<7x1xf32>
    %516 = math.rsqrt %515 : vector<7x1xf32>
    %517 = vector.broadcast %516 : vector<7x1xf32> to vector<7x32xf32>
    %518 = arith.mulf %513, %517 : vector<7x32xf32>
    %519 = vector.broadcast %498 : vector<1x32xf32> to vector<7x32xf32>
    %520 = arith.mulf %518, %519 : vector<7x32xf32>
    %521 = vector.broadcast %500 : vector<1x32xf32> to vector<7x32xf32>
    %522 = arith.addf %520, %521 : vector<7x32xf32>
    %c0_244 = arith.constant 0 : index
    %c0_245 = arith.constant 0 : index
    %c0_246 = arith.constant 0 : index
    %523 = vector.load %arg11[%c0_244, %c0_245, %c0_246] : memref<2x32x32xf32, #tpu.memory_space<vmem>>, vector<1x32x32xf32>
    %524 = vector.shape_cast %523 : vector<1x32x32xf32> to vector<32x32xf32>
    %cst_247 = arith.constant dense<0.000000e+00> : vector<7x32xf32>
    %525 = tpu.matmul %522, %524, %cst_247 {dimension_numbers = #tpu.dot_dimension_numbers<[1], [0], [0], [1], [0, 0, 1, 1], [], []>} : vector<7x32xf32>, vector<32x32xf32>, vector<7x32xf32> -> vector<7x32xf32>
    %c0_248 = arith.constant 0 : index
    %c0_249 = arith.constant 0 : index
    %c0_250 = arith.constant 0 : index
    %526 = vector.load %arg14[%c0_248, %c0_249, %c0_250] : memref<2x1x32xf32, #tpu.memory_space<vmem>>, vector<1x1x32xf32>
    %527 = vector.shape_cast %526 : vector<1x1x32xf32> to vector<1x32xf32>
    %528 = vector.broadcast %527 : vector<1x32xf32> to vector<7x32xf32>
    %529 = arith.addf %525, %528 : vector<7x32xf32>
    %c0_251 = arith.constant 0 : index
    %c0_252 = arith.constant 0 : index
    %c0_253 = arith.constant 0 : index
    %530 = vector.load %arg12[%c0_251, %c0_252, %c0_253] : memref<2x32x32xf32, #tpu.memory_space<vmem>>, vector<1x32x32xf32>
    %531 = vector.shape_cast %530 : vector<1x32x32xf32> to vector<32x32xf32>
    %cst_254 = arith.constant dense<0.000000e+00> : vector<7x32xf32>
    %532 = tpu.matmul %522, %531, %cst_254 {dimension_numbers = #tpu.dot_dimension_numbers<[1], [0], [0], [1], [0, 0, 1, 1], [], []>} : vector<7x32xf32>, vector<32x32xf32>, vector<7x32xf32> -> vector<7x32xf32>
    %c0_255 = arith.constant 0 : index
    %c0_256 = arith.constant 0 : index
    %c0_257 = arith.constant 0 : index
    %533 = vector.load %arg15[%c0_255, %c0_256, %c0_257] : memref<2x1x32xf32, #tpu.memory_space<vmem>>, vector<1x1x32xf32>
    %534 = vector.shape_cast %533 : vector<1x1x32xf32> to vector<1x32xf32>
    %535 = vector.broadcast %534 : vector<1x32xf32> to vector<7x32xf32>
    %536 = arith.addf %532, %535 : vector<7x32xf32>
    %c0_258 = arith.constant 0 : index
    %c0_259 = arith.constant 0 : index
    %c0_260 = arith.constant 0 : index
    %537 = vector.load %arg13[%c0_258, %c0_259, %c0_260] : memref<2x32x32xf32, #tpu.memory_space<vmem>>, vector<1x32x32xf32>
    %538 = vector.shape_cast %537 : vector<1x32x32xf32> to vector<32x32xf32>
    %cst_261 = arith.constant dense<0.000000e+00> : vector<7x32xf32>
    %539 = tpu.matmul %522, %538, %cst_261 {dimension_numbers = #tpu.dot_dimension_numbers<[1], [0], [0], [1], [0, 0, 1, 1], [], []>} : vector<7x32xf32>, vector<32x32xf32>, vector<7x32xf32> -> vector<7x32xf32>
    %c0_262 = arith.constant 0 : index
    %c0_263 = arith.constant 0 : index
    %c0_264 = arith.constant 0 : index
    %540 = vector.load %arg16[%c0_262, %c0_263, %c0_264] : memref<2x1x32xf32, #tpu.memory_space<vmem>>, vector<1x1x32xf32>
    %541 = vector.shape_cast %540 : vector<1x1x32xf32> to vector<1x32xf32>
    %542 = vector.broadcast %541 : vector<1x32xf32> to vector<7x32xf32>
    %543 = arith.addf %539, %542 : vector<7x32xf32>
    %c0_265 = arith.constant 0 : index
    %c0_266 = arith.constant 0 : index
    %c0_267 = arith.constant 0 : index
    %544 = vector.load %arg17[%c0_265, %c0_266, %c0_267] : memref<2x32x32xf32, #tpu.memory_space<vmem>>, vector<1x32x32xf32>
    %545 = vector.shape_cast %544 : vector<1x32x32xf32> to vector<32x32xf32>
    %cst_268 = arith.constant 0.000000e+00 : f32
    %546 = vector.broadcast %cst_268 : f32 to vector<7x32xf32>
    %547 = vector.extract_strided_slice %529 {offsets = [0, 0], sizes = [7, 8], strides = [1, 1]} : vector<7x32xf32> to vector<7x8xf32>
    %548 = vector.extract_strided_slice %492 {offsets = [0, 0], sizes = [4, 8], strides = [1, 1]} : vector<4x32xf32> to vector<4x8xf32>
    %cst_269 = arith.constant dense<0.000000e+00> : vector<7x4xf32>
    %549 = tpu.matmul %547, %548, %cst_269 {dimension_numbers = #tpu.dot_dimension_numbers<[1], [1], [0], [0], [0, 0, 1, 0], [], []>} : vector<7x8xf32>, vector<4x8xf32>, vector<7x4xf32> -> vector<7x4xf32>
    %cst_270 = arith.constant 0.353553385 : f32
    %550 = vector.broadcast %cst_270 : f32 to vector<7x4xf32>
    %551 = arith.mulf %549, %550 : vector<7x4xf32>
    %552 = vector.extract_strided_slice %112 {offsets = [0, 0], sizes = [8, 8], strides = [1, 1]} : vector<8x32xf32> to vector<8x8xf32>
    %cst_271 = arith.constant dense<0.000000e+00> : vector<7x8xf32>
    %553 = tpu.matmul %547, %552, %cst_271 {dimension_numbers = #tpu.dot_dimension_numbers<[1], [1], [0], [0], [0, 0, 1, 0], [], []>} : vector<7x8xf32>, vector<8x8xf32>, vector<7x8xf32> -> vector<7x8xf32>
    %cst_272 = arith.constant 0.353553385 : f32
    %554 = vector.broadcast %cst_272 : f32 to vector<7x8xf32>
    %555 = arith.mulf %553, %554 : vector<7x8xf32>
    %cst_273 = arith.constant -1.000000e+30 : f32
    %556 = vector.shape_cast %488 : vector<1x8xi1> to vector<1x8xi1>
    %557 = vector.broadcast %556 : vector<1x8xi1> to vector<7x8xi1>
    %558 = vector.broadcast %cst_273 : f32 to vector<7x8xf32>
    %559 = arith.select %557, %555, %558 : vector<7x8xi1>, vector<7x8xf32>
    %560 = vector.extract_strided_slice %536 {offsets = [0, 0], sizes = [7, 8], strides = [1, 1]} : vector<7x32xf32> to vector<7x8xf32>
    %cst_274 = arith.constant dense<0.000000e+00> : vector<7x7xf32>
    %561 = tpu.matmul %547, %560, %cst_274 {dimension_numbers = #tpu.dot_dimension_numbers<[1], [1], [0], [0], [0, 0, 1, 0], [], []>} : vector<7x8xf32>, vector<7x8xf32>, vector<7x7xf32> -> vector<7x7xf32>
    %cst_275 = arith.constant 0.353553385 : f32
    %562 = vector.broadcast %cst_275 : f32 to vector<7x7xf32>
    %563 = arith.mulf %561, %562 : vector<7x7xf32>
    %cst_276 = arith.constant -1.000000e+30 : f32
    %564 = vector.broadcast %cst_276 : f32 to vector<7x7xf32>
    %565 = arith.select %486, %563, %564 : vector<7x7xi1>, vector<7x7xf32>
    %cst_277 = arith.constant dense<0xFF800000> : vector<7xf32>
    %566 = vector.multi_reduction <maximumf>, %551, %cst_277 [1] : vector<7x4xf32> to vector<7xf32>
    %567 = vector.shape_cast %566 : vector<7xf32> to vector<7x1xf32>
    %cst_278 = arith.constant dense<0xFF800000> : vector<7xf32>
    %568 = vector.multi_reduction <maximumf>, %559, %cst_278 [1] : vector<7x8xf32> to vector<7xf32>
    %569 = vector.shape_cast %568 : vector<7xf32> to vector<7x1xf32>
    %570 = arith.maximumf %567, %569 : vector<7x1xf32>
    %cst_279 = arith.constant dense<0xFF800000> : vector<7xf32>
    %571 = vector.multi_reduction <maximumf>, %565, %cst_279 [1] : vector<7x7xf32> to vector<7xf32>
    %572 = vector.shape_cast %571 : vector<7xf32> to vector<7x1xf32>
    %573 = arith.maximumf %570, %572 : vector<7x1xf32>
    %cst_280 = arith.constant 0.000000e+00 : f32
    %574 = vector.broadcast %cst_280 : f32 to vector<7x1xf32>
    %cst_281 = arith.constant 0.000000e+00 : f32
    %575 = vector.broadcast %cst_281 : f32 to vector<7x8xf32>
    %576 = vector.broadcast %573 : vector<7x1xf32> to vector<7x4xf32>
    %577 = arith.subf %551, %576 : vector<7x4xf32>
    %578 = math.exp %577 : vector<7x4xf32>
    %cst_282 = arith.constant dense<0.000000e+00> : vector<7xf32>
    %579 = vector.multi_reduction <add>, %578, %cst_282 [1] : vector<7x4xf32> to vector<7xf32>
    %580 = vector.shape_cast %579 : vector<7xf32> to vector<7x1xf32>
    %581 = arith.addf %574, %580 : vector<7x1xf32>
    %582 = vector.extract_strided_slice %496 {offsets = [0, 0], sizes = [4, 8], strides = [1, 1]} : vector<4x32xf32> to vector<4x8xf32>
    %cst_283 = arith.constant dense<0.000000e+00> : vector<7x8xf32>
    %583 = tpu.matmul %578, %582, %cst_283 {dimension_numbers = #tpu.dot_dimension_numbers<[1], [0], [0], [1], [0, 0, 1, 1], [], []>} : vector<7x4xf32>, vector<4x8xf32>, vector<7x8xf32> -> vector<7x8xf32>
    %584 = arith.addf %575, %583 : vector<7x8xf32>
    %585 = vector.broadcast %573 : vector<7x1xf32> to vector<7x8xf32>
    %586 = arith.subf %559, %585 : vector<7x8xf32>
    %587 = math.exp %586 : vector<7x8xf32>
    %cst_284 = arith.constant dense<0.000000e+00> : vector<7xf32>
    %588 = vector.multi_reduction <add>, %587, %cst_284 [1] : vector<7x8xf32> to vector<7xf32>
    %589 = vector.shape_cast %588 : vector<7xf32> to vector<7x1xf32>
    %590 = arith.addf %581, %589 : vector<7x1xf32>
    %591 = vector.extract_strided_slice %119 {offsets = [0, 0], sizes = [8, 8], strides = [1, 1]} : vector<8x32xf32> to vector<8x8xf32>
    %cst_285 = arith.constant dense<0.000000e+00> : vector<7x8xf32>
    %592 = tpu.matmul %587, %591, %cst_285 {dimension_numbers = #tpu.dot_dimension_numbers<[1], [0], [0], [1], [0, 0, 1, 1], [], []>} : vector<7x8xf32>, vector<8x8xf32>, vector<7x8xf32> -> vector<7x8xf32>
    %593 = arith.addf %584, %592 : vector<7x8xf32>
    %594 = vector.broadcast %573 : vector<7x1xf32> to vector<7x7xf32>
    %595 = arith.subf %565, %594 : vector<7x7xf32>
    %596 = math.exp %595 : vector<7x7xf32>
    %cst_286 = arith.constant dense<0.000000e+00> : vector<7xf32>
    %597 = vector.multi_reduction <add>, %596, %cst_286 [1] : vector<7x7xf32> to vector<7xf32>
    %598 = vector.shape_cast %597 : vector<7xf32> to vector<7x1xf32>
    %599 = arith.addf %590, %598 : vector<7x1xf32>
    %600 = vector.extract_strided_slice %543 {offsets = [0, 0], sizes = [7, 8], strides = [1, 1]} : vector<7x32xf32> to vector<7x8xf32>
    %cst_287 = arith.constant dense<0.000000e+00> : vector<7x8xf32>
    %601 = tpu.matmul %596, %600, %cst_287 {dimension_numbers = #tpu.dot_dimension_numbers<[1], [0], [0], [1], [0, 0, 1, 1], [], []>} : vector<7x7xf32>, vector<7x8xf32>, vector<7x8xf32> -> vector<7x8xf32>
    %602 = arith.addf %593, %601 : vector<7x8xf32>
    %603 = tpu.reciprocal %599 {approx = true} : vector<7x1xf32> -> vector<7x1xf32>
    %604 = vector.broadcast %603 : vector<7x1xf32> to vector<7x8xf32>
    %605 = arith.mulf %602, %604 : vector<7x8xf32>
    %606 = vector.extract_strided_slice %545 {offsets = [0, 0], sizes = [8, 32], strides = [1, 1]} : vector<32x32xf32> to vector<8x32xf32>
    %cst_288 = arith.constant dense<0.000000e+00> : vector<7x32xf32>
    %607 = tpu.matmul %605, %606, %cst_288 {dimension_numbers = #tpu.dot_dimension_numbers<[1], [0], [0], [1], [0, 0, 1, 1], [], []>} : vector<7x8xf32>, vector<8x32xf32>, vector<7x32xf32> -> vector<7x32xf32>
    %608 = arith.addf %546, %607 : vector<7x32xf32>
    %609 = vector.extract_strided_slice %529 {offsets = [0, 8], sizes = [7, 8], strides = [1, 1]} : vector<7x32xf32> to vector<7x8xf32>
    %610 = vector.extract_strided_slice %492 {offsets = [0, 8], sizes = [4, 8], strides = [1, 1]} : vector<4x32xf32> to vector<4x8xf32>
    %cst_289 = arith.constant dense<0.000000e+00> : vector<7x4xf32>
    %611 = tpu.matmul %609, %610, %cst_289 {dimension_numbers = #tpu.dot_dimension_numbers<[1], [1], [0], [0], [0, 0, 1, 0], [], []>} : vector<7x8xf32>, vector<4x8xf32>, vector<7x4xf32> -> vector<7x4xf32>
    %cst_290 = arith.constant 0.353553385 : f32
    %612 = vector.broadcast %cst_290 : f32 to vector<7x4xf32>
    %613 = arith.mulf %611, %612 : vector<7x4xf32>
    %614 = vector.extract_strided_slice %112 {offsets = [0, 8], sizes = [8, 8], strides = [1, 1]} : vector<8x32xf32> to vector<8x8xf32>
    %cst_291 = arith.constant dense<0.000000e+00> : vector<7x8xf32>
    %615 = tpu.matmul %609, %614, %cst_291 {dimension_numbers = #tpu.dot_dimension_numbers<[1], [1], [0], [0], [0, 0, 1, 0], [], []>} : vector<7x8xf32>, vector<8x8xf32>, vector<7x8xf32> -> vector<7x8xf32>
    %cst_292 = arith.constant 0.353553385 : f32
    %616 = vector.broadcast %cst_292 : f32 to vector<7x8xf32>
    %617 = arith.mulf %615, %616 : vector<7x8xf32>
    %cst_293 = arith.constant -1.000000e+30 : f32
    %618 = vector.shape_cast %488 : vector<1x8xi1> to vector<1x8xi1>
    %619 = vector.broadcast %618 : vector<1x8xi1> to vector<7x8xi1>
    %620 = vector.broadcast %cst_293 : f32 to vector<7x8xf32>
    %621 = arith.select %619, %617, %620 : vector<7x8xi1>, vector<7x8xf32>
    %622 = vector.extract_strided_slice %536 {offsets = [0, 8], sizes = [7, 8], strides = [1, 1]} : vector<7x32xf32> to vector<7x8xf32>
    %cst_294 = arith.constant dense<0.000000e+00> : vector<7x7xf32>
    %623 = tpu.matmul %609, %622, %cst_294 {dimension_numbers = #tpu.dot_dimension_numbers<[1], [1], [0], [0], [0, 0, 1, 0], [], []>} : vector<7x8xf32>, vector<7x8xf32>, vector<7x7xf32> -> vector<7x7xf32>
    %cst_295 = arith.constant 0.353553385 : f32
    %624 = vector.broadcast %cst_295 : f32 to vector<7x7xf32>
    %625 = arith.mulf %623, %624 : vector<7x7xf32>
    %cst_296 = arith.constant -1.000000e+30 : f32
    %626 = vector.broadcast %cst_296 : f32 to vector<7x7xf32>
    %627 = arith.select %486, %625, %626 : vector<7x7xi1>, vector<7x7xf32>
    %cst_297 = arith.constant dense<0xFF800000> : vector<7xf32>
    %628 = vector.multi_reduction <maximumf>, %613, %cst_297 [1] : vector<7x4xf32> to vector<7xf32>
    %629 = vector.shape_cast %628 : vector<7xf32> to vector<7x1xf32>
    %cst_298 = arith.constant dense<0xFF800000> : vector<7xf32>
    %630 = vector.multi_reduction <maximumf>, %621, %cst_298 [1] : vector<7x8xf32> to vector<7xf32>
    %631 = vector.shape_cast %630 : vector<7xf32> to vector<7x1xf32>
    %632 = arith.maximumf %629, %631 : vector<7x1xf32>
    %cst_299 = arith.constant dense<0xFF800000> : vector<7xf32>
    %633 = vector.multi_reduction <maximumf>, %627, %cst_299 [1] : vector<7x7xf32> to vector<7xf32>
    %634 = vector.shape_cast %633 : vector<7xf32> to vector<7x1xf32>
    %635 = arith.maximumf %632, %634 : vector<7x1xf32>
    %cst_300 = arith.constant 0.000000e+00 : f32
    %636 = vector.broadcast %cst_300 : f32 to vector<7x1xf32>
    %cst_301 = arith.constant 0.000000e+00 : f32
    %637 = vector.broadcast %cst_301 : f32 to vector<7x8xf32>
    %638 = vector.broadcast %635 : vector<7x1xf32> to vector<7x4xf32>
    %639 = arith.subf %613, %638 : vector<7x4xf32>
    %640 = math.exp %639 : vector<7x4xf32>
    %cst_302 = arith.constant dense<0.000000e+00> : vector<7xf32>
    %641 = vector.multi_reduction <add>, %640, %cst_302 [1] : vector<7x4xf32> to vector<7xf32>
    %642 = vector.shape_cast %641 : vector<7xf32> to vector<7x1xf32>
    %643 = arith.addf %636, %642 : vector<7x1xf32>
    %644 = vector.extract_strided_slice %496 {offsets = [0, 8], sizes = [4, 8], strides = [1, 1]} : vector<4x32xf32> to vector<4x8xf32>
    %cst_303 = arith.constant dense<0.000000e+00> : vector<7x8xf32>
    %645 = tpu.matmul %640, %644, %cst_303 {dimension_numbers = #tpu.dot_dimension_numbers<[1], [0], [0], [1], [0, 0, 1, 1], [], []>} : vector<7x4xf32>, vector<4x8xf32>, vector<7x8xf32> -> vector<7x8xf32>
    %646 = arith.addf %637, %645 : vector<7x8xf32>
    %647 = vector.broadcast %635 : vector<7x1xf32> to vector<7x8xf32>
    %648 = arith.subf %621, %647 : vector<7x8xf32>
    %649 = math.exp %648 : vector<7x8xf32>
    %cst_304 = arith.constant dense<0.000000e+00> : vector<7xf32>
    %650 = vector.multi_reduction <add>, %649, %cst_304 [1] : vector<7x8xf32> to vector<7xf32>
    %651 = vector.shape_cast %650 : vector<7xf32> to vector<7x1xf32>
    %652 = arith.addf %643, %651 : vector<7x1xf32>
    %653 = vector.extract_strided_slice %119 {offsets = [0, 8], sizes = [8, 8], strides = [1, 1]} : vector<8x32xf32> to vector<8x8xf32>
    %cst_305 = arith.constant dense<0.000000e+00> : vector<7x8xf32>
    %654 = tpu.matmul %649, %653, %cst_305 {dimension_numbers = #tpu.dot_dimension_numbers<[1], [0], [0], [1], [0, 0, 1, 1], [], []>} : vector<7x8xf32>, vector<8x8xf32>, vector<7x8xf32> -> vector<7x8xf32>
    %655 = arith.addf %646, %654 : vector<7x8xf32>
    %656 = vector.broadcast %635 : vector<7x1xf32> to vector<7x7xf32>
    %657 = arith.subf %627, %656 : vector<7x7xf32>
    %658 = math.exp %657 : vector<7x7xf32>
    %cst_306 = arith.constant dense<0.000000e+00> : vector<7xf32>
    %659 = vector.multi_reduction <add>, %658, %cst_306 [1] : vector<7x7xf32> to vector<7xf32>
    %660 = vector.shape_cast %659 : vector<7xf32> to vector<7x1xf32>
    %661 = arith.addf %652, %660 : vector<7x1xf32>
    %662 = vector.extract_strided_slice %543 {offsets = [0, 8], sizes = [7, 8], strides = [1, 1]} : vector<7x32xf32> to vector<7x8xf32>
    %cst_307 = arith.constant dense<0.000000e+00> : vector<7x8xf32>
    %663 = tpu.matmul %658, %662, %cst_307 {dimension_numbers = #tpu.dot_dimension_numbers<[1], [0], [0], [1], [0, 0, 1, 1], [], []>} : vector<7x7xf32>, vector<7x8xf32>, vector<7x8xf32> -> vector<7x8xf32>
    %664 = arith.addf %655, %663 : vector<7x8xf32>
    %665 = tpu.reciprocal %661 {approx = true} : vector<7x1xf32> -> vector<7x1xf32>
    %666 = vector.broadcast %665 : vector<7x1xf32> to vector<7x8xf32>
    %667 = arith.mulf %664, %666 : vector<7x8xf32>
    %668 = vector.extract_strided_slice %545 {offsets = [8, 0], sizes = [8, 32], strides = [1, 1]} : vector<32x32xf32> to vector<8x32xf32>
    %cst_308 = arith.constant dense<0.000000e+00> : vector<7x32xf32>
    %669 = tpu.matmul %667, %668, %cst_308 {dimension_numbers = #tpu.dot_dimension_numbers<[1], [0], [0], [1], [0, 0, 1, 1], [], []>} : vector<7x8xf32>, vector<8x32xf32>, vector<7x32xf32> -> vector<7x32xf32>
    %670 = arith.addf %608, %669 : vector<7x32xf32>
    %671 = vector.extract_strided_slice %529 {offsets = [0, 16], sizes = [7, 8], strides = [1, 1]} : vector<7x32xf32> to vector<7x8xf32>
    %672 = vector.extract_strided_slice %492 {offsets = [0, 16], sizes = [4, 8], strides = [1, 1]} : vector<4x32xf32> to vector<4x8xf32>
    %cst_309 = arith.constant dense<0.000000e+00> : vector<7x4xf32>
    %673 = tpu.matmul %671, %672, %cst_309 {dimension_numbers = #tpu.dot_dimension_numbers<[1], [1], [0], [0], [0, 0, 1, 0], [], []>} : vector<7x8xf32>, vector<4x8xf32>, vector<7x4xf32> -> vector<7x4xf32>
    %cst_310 = arith.constant 0.353553385 : f32
    %674 = vector.broadcast %cst_310 : f32 to vector<7x4xf32>
    %675 = arith.mulf %673, %674 : vector<7x4xf32>
    %676 = vector.extract_strided_slice %112 {offsets = [0, 16], sizes = [8, 8], strides = [1, 1]} : vector<8x32xf32> to vector<8x8xf32>
    %cst_311 = arith.constant dense<0.000000e+00> : vector<7x8xf32>
    %677 = tpu.matmul %671, %676, %cst_311 {dimension_numbers = #tpu.dot_dimension_numbers<[1], [1], [0], [0], [0, 0, 1, 0], [], []>} : vector<7x8xf32>, vector<8x8xf32>, vector<7x8xf32> -> vector<7x8xf32>
    %cst_312 = arith.constant 0.353553385 : f32
    %678 = vector.broadcast %cst_312 : f32 to vector<7x8xf32>
    %679 = arith.mulf %677, %678 : vector<7x8xf32>
    %cst_313 = arith.constant -1.000000e+30 : f32
    %680 = vector.shape_cast %488 : vector<1x8xi1> to vector<1x8xi1>
    %681 = vector.broadcast %680 : vector<1x8xi1> to vector<7x8xi1>
    %682 = vector.broadcast %cst_313 : f32 to vector<7x8xf32>
    %683 = arith.select %681, %679, %682 : vector<7x8xi1>, vector<7x8xf32>
    %684 = vector.extract_strided_slice %536 {offsets = [0, 16], sizes = [7, 8], strides = [1, 1]} : vector<7x32xf32> to vector<7x8xf32>
    %cst_314 = arith.constant dense<0.000000e+00> : vector<7x7xf32>
    %685 = tpu.matmul %671, %684, %cst_314 {dimension_numbers = #tpu.dot_dimension_numbers<[1], [1], [0], [0], [0, 0, 1, 0], [], []>} : vector<7x8xf32>, vector<7x8xf32>, vector<7x7xf32> -> vector<7x7xf32>
    %cst_315 = arith.constant 0.353553385 : f32
    %686 = vector.broadcast %cst_315 : f32 to vector<7x7xf32>
    %687 = arith.mulf %685, %686 : vector<7x7xf32>
    %cst_316 = arith.constant -1.000000e+30 : f32
    %688 = vector.broadcast %cst_316 : f32 to vector<7x7xf32>
    %689 = arith.select %486, %687, %688 : vector<7x7xi1>, vector<7x7xf32>
    %cst_317 = arith.constant dense<0xFF800000> : vector<7xf32>
    %690 = vector.multi_reduction <maximumf>, %675, %cst_317 [1] : vector<7x4xf32> to vector<7xf32>
    %691 = vector.shape_cast %690 : vector<7xf32> to vector<7x1xf32>
    %cst_318 = arith.constant dense<0xFF800000> : vector<7xf32>
    %692 = vector.multi_reduction <maximumf>, %683, %cst_318 [1] : vector<7x8xf32> to vector<7xf32>
    %693 = vector.shape_cast %692 : vector<7xf32> to vector<7x1xf32>
    %694 = arith.maximumf %691, %693 : vector<7x1xf32>
    %cst_319 = arith.constant dense<0xFF800000> : vector<7xf32>
    %695 = vector.multi_reduction <maximumf>, %689, %cst_319 [1] : vector<7x7xf32> to vector<7xf32>
    %696 = vector.shape_cast %695 : vector<7xf32> to vector<7x1xf32>
    %697 = arith.maximumf %694, %696 : vector<7x1xf32>
    %cst_320 = arith.constant 0.000000e+00 : f32
    %698 = vector.broadcast %cst_320 : f32 to vector<7x1xf32>
    %cst_321 = arith.constant 0.000000e+00 : f32
    %699 = vector.broadcast %cst_321 : f32 to vector<7x8xf32>
    %700 = vector.broadcast %697 : vector<7x1xf32> to vector<7x4xf32>
    %701 = arith.subf %675, %700 : vector<7x4xf32>
    %702 = math.exp %701 : vector<7x4xf32>
    %cst_322 = arith.constant dense<0.000000e+00> : vector<7xf32>
    %703 = vector.multi_reduction <add>, %702, %cst_322 [1] : vector<7x4xf32> to vector<7xf32>
    %704 = vector.shape_cast %703 : vector<7xf32> to vector<7x1xf32>
    %705 = arith.addf %698, %704 : vector<7x1xf32>
    %706 = vector.extract_strided_slice %496 {offsets = [0, 16], sizes = [4, 8], strides = [1, 1]} : vector<4x32xf32> to vector<4x8xf32>
    %cst_323 = arith.constant dense<0.000000e+00> : vector<7x8xf32>
    %707 = tpu.matmul %702, %706, %cst_323 {dimension_numbers = #tpu.dot_dimension_numbers<[1], [0], [0], [1], [0, 0, 1, 1], [], []>} : vector<7x4xf32>, vector<4x8xf32>, vector<7x8xf32> -> vector<7x8xf32>
    %708 = arith.addf %699, %707 : vector<7x8xf32>
    %709 = vector.broadcast %697 : vector<7x1xf32> to vector<7x8xf32>
    %710 = arith.subf %683, %709 : vector<7x8xf32>
    %711 = math.exp %710 : vector<7x8xf32>
    %cst_324 = arith.constant dense<0.000000e+00> : vector<7xf32>
    %712 = vector.multi_reduction <add>, %711, %cst_324 [1] : vector<7x8xf32> to vector<7xf32>
    %713 = vector.shape_cast %712 : vector<7xf32> to vector<7x1xf32>
    %714 = arith.addf %705, %713 : vector<7x1xf32>
    %715 = vector.extract_strided_slice %119 {offsets = [0, 16], sizes = [8, 8], strides = [1, 1]} : vector<8x32xf32> to vector<8x8xf32>
    %cst_325 = arith.constant dense<0.000000e+00> : vector<7x8xf32>
    %716 = tpu.matmul %711, %715, %cst_325 {dimension_numbers = #tpu.dot_dimension_numbers<[1], [0], [0], [1], [0, 0, 1, 1], [], []>} : vector<7x8xf32>, vector<8x8xf32>, vector<7x8xf32> -> vector<7x8xf32>
    %717 = arith.addf %708, %716 : vector<7x8xf32>
    %718 = vector.broadcast %697 : vector<7x1xf32> to vector<7x7xf32>
    %719 = arith.subf %689, %718 : vector<7x7xf32>
    %720 = math.exp %719 : vector<7x7xf32>
    %cst_326 = arith.constant dense<0.000000e+00> : vector<7xf32>
    %721 = vector.multi_reduction <add>, %720, %cst_326 [1] : vector<7x7xf32> to vector<7xf32>
    %722 = vector.shape_cast %721 : vector<7xf32> to vector<7x1xf32>
    %723 = arith.addf %714, %722 : vector<7x1xf32>
    %724 = vector.extract_strided_slice %543 {offsets = [0, 16], sizes = [7, 8], strides = [1, 1]} : vector<7x32xf32> to vector<7x8xf32>
    %cst_327 = arith.constant dense<0.000000e+00> : vector<7x8xf32>
    %725 = tpu.matmul %720, %724, %cst_327 {dimension_numbers = #tpu.dot_dimension_numbers<[1], [0], [0], [1], [0, 0, 1, 1], [], []>} : vector<7x7xf32>, vector<7x8xf32>, vector<7x8xf32> -> vector<7x8xf32>
    %726 = arith.addf %717, %725 : vector<7x8xf32>
    %727 = tpu.reciprocal %723 {approx = true} : vector<7x1xf32> -> vector<7x1xf32>
    %728 = vector.broadcast %727 : vector<7x1xf32> to vector<7x8xf32>
    %729 = arith.mulf %726, %728 : vector<7x8xf32>
    %730 = vector.extract_strided_slice %545 {offsets = [16, 0], sizes = [8, 32], strides = [1, 1]} : vector<32x32xf32> to vector<8x32xf32>
    %cst_328 = arith.constant dense<0.000000e+00> : vector<7x32xf32>
    %731 = tpu.matmul %729, %730, %cst_328 {dimension_numbers = #tpu.dot_dimension_numbers<[1], [0], [0], [1], [0, 0, 1, 1], [], []>} : vector<7x8xf32>, vector<8x32xf32>, vector<7x32xf32> -> vector<7x32xf32>
    %732 = arith.addf %670, %731 : vector<7x32xf32>
    %733 = vector.extract_strided_slice %529 {offsets = [0, 24], sizes = [7, 8], strides = [1, 1]} : vector<7x32xf32> to vector<7x8xf32>
    %734 = vector.extract_strided_slice %492 {offsets = [0, 24], sizes = [4, 8], strides = [1, 1]} : vector<4x32xf32> to vector<4x8xf32>
    %cst_329 = arith.constant dense<0.000000e+00> : vector<7x4xf32>
    %735 = tpu.matmul %733, %734, %cst_329 {dimension_numbers = #tpu.dot_dimension_numbers<[1], [1], [0], [0], [0, 0, 1, 0], [], []>} : vector<7x8xf32>, vector<4x8xf32>, vector<7x4xf32> -> vector<7x4xf32>
    %cst_330 = arith.constant 0.353553385 : f32
    %736 = vector.broadcast %cst_330 : f32 to vector<7x4xf32>
    %737 = arith.mulf %735, %736 : vector<7x4xf32>
    %738 = vector.extract_strided_slice %112 {offsets = [0, 24], sizes = [8, 8], strides = [1, 1]} : vector<8x32xf32> to vector<8x8xf32>
    %cst_331 = arith.constant dense<0.000000e+00> : vector<7x8xf32>
    %739 = tpu.matmul %733, %738, %cst_331 {dimension_numbers = #tpu.dot_dimension_numbers<[1], [1], [0], [0], [0, 0, 1, 0], [], []>} : vector<7x8xf32>, vector<8x8xf32>, vector<7x8xf32> -> vector<7x8xf32>
    %cst_332 = arith.constant 0.353553385 : f32
    %740 = vector.broadcast %cst_332 : f32 to vector<7x8xf32>
    %741 = arith.mulf %739, %740 : vector<7x8xf32>
    %cst_333 = arith.constant -1.000000e+30 : f32
    %742 = vector.shape_cast %488 : vector<1x8xi1> to vector<1x8xi1>
    %743 = vector.broadcast %742 : vector<1x8xi1> to vector<7x8xi1>
    %744 = vector.broadcast %cst_333 : f32 to vector<7x8xf32>
    %745 = arith.select %743, %741, %744 : vector<7x8xi1>, vector<7x8xf32>
    %746 = vector.extract_strided_slice %536 {offsets = [0, 24], sizes = [7, 8], strides = [1, 1]} : vector<7x32xf32> to vector<7x8xf32>
    %cst_334 = arith.constant dense<0.000000e+00> : vector<7x7xf32>
    %747 = tpu.matmul %733, %746, %cst_334 {dimension_numbers = #tpu.dot_dimension_numbers<[1], [1], [0], [0], [0, 0, 1, 0], [], []>} : vector<7x8xf32>, vector<7x8xf32>, vector<7x7xf32> -> vector<7x7xf32>
    %cst_335 = arith.constant 0.353553385 : f32
    %748 = vector.broadcast %cst_335 : f32 to vector<7x7xf32>
    %749 = arith.mulf %747, %748 : vector<7x7xf32>
    %cst_336 = arith.constant -1.000000e+30 : f32
    %750 = vector.broadcast %cst_336 : f32 to vector<7x7xf32>
    %751 = arith.select %486, %749, %750 : vector<7x7xi1>, vector<7x7xf32>
    %cst_337 = arith.constant dense<0xFF800000> : vector<7xf32>
    %752 = vector.multi_reduction <maximumf>, %737, %cst_337 [1] : vector<7x4xf32> to vector<7xf32>
    %753 = vector.shape_cast %752 : vector<7xf32> to vector<7x1xf32>
    %cst_338 = arith.constant dense<0xFF800000> : vector<7xf32>
    %754 = vector.multi_reduction <maximumf>, %745, %cst_338 [1] : vector<7x8xf32> to vector<7xf32>
    %755 = vector.shape_cast %754 : vector<7xf32> to vector<7x1xf32>
    %756 = arith.maximumf %753, %755 : vector<7x1xf32>
    %cst_339 = arith.constant dense<0xFF800000> : vector<7xf32>
    %757 = vector.multi_reduction <maximumf>, %751, %cst_339 [1] : vector<7x7xf32> to vector<7xf32>
    %758 = vector.shape_cast %757 : vector<7xf32> to vector<7x1xf32>
    %759 = arith.maximumf %756, %758 : vector<7x1xf32>
    %cst_340 = arith.constant 0.000000e+00 : f32
    %760 = vector.broadcast %cst_340 : f32 to vector<7x1xf32>
    %cst_341 = arith.constant 0.000000e+00 : f32
    %761 = vector.broadcast %cst_341 : f32 to vector<7x8xf32>
    %762 = vector.broadcast %759 : vector<7x1xf32> to vector<7x4xf32>
    %763 = arith.subf %737, %762 : vector<7x4xf32>
    %764 = math.exp %763 : vector<7x4xf32>
    %cst_342 = arith.constant dense<0.000000e+00> : vector<7xf32>
    %765 = vector.multi_reduction <add>, %764, %cst_342 [1] : vector<7x4xf32> to vector<7xf32>
    %766 = vector.shape_cast %765 : vector<7xf32> to vector<7x1xf32>
    %767 = arith.addf %760, %766 : vector<7x1xf32>
    %768 = vector.extract_strided_slice %496 {offsets = [0, 24], sizes = [4, 8], strides = [1, 1]} : vector<4x32xf32> to vector<4x8xf32>
    %cst_343 = arith.constant dense<0.000000e+00> : vector<7x8xf32>
    %769 = tpu.matmul %764, %768, %cst_343 {dimension_numbers = #tpu.dot_dimension_numbers<[1], [0], [0], [1], [0, 0, 1, 1], [], []>} : vector<7x4xf32>, vector<4x8xf32>, vector<7x8xf32> -> vector<7x8xf32>
    %770 = arith.addf %761, %769 : vector<7x8xf32>
    %771 = vector.broadcast %759 : vector<7x1xf32> to vector<7x8xf32>
    %772 = arith.subf %745, %771 : vector<7x8xf32>
    %773 = math.exp %772 : vector<7x8xf32>
    %cst_344 = arith.constant dense<0.000000e+00> : vector<7xf32>
    %774 = vector.multi_reduction <add>, %773, %cst_344 [1] : vector<7x8xf32> to vector<7xf32>
    %775 = vector.shape_cast %774 : vector<7xf32> to vector<7x1xf32>
    %776 = arith.addf %767, %775 : vector<7x1xf32>
    %777 = vector.extract_strided_slice %119 {offsets = [0, 24], sizes = [8, 8], strides = [1, 1]} : vector<8x32xf32> to vector<8x8xf32>
    %cst_345 = arith.constant dense<0.000000e+00> : vector<7x8xf32>
    %778 = tpu.matmul %773, %777, %cst_345 {dimension_numbers = #tpu.dot_dimension_numbers<[1], [0], [0], [1], [0, 0, 1, 1], [], []>} : vector<7x8xf32>, vector<8x8xf32>, vector<7x8xf32> -> vector<7x8xf32>
    %779 = arith.addf %770, %778 : vector<7x8xf32>
    %780 = vector.broadcast %759 : vector<7x1xf32> to vector<7x7xf32>
    %781 = arith.subf %751, %780 : vector<7x7xf32>
    %782 = math.exp %781 : vector<7x7xf32>
    %cst_346 = arith.constant dense<0.000000e+00> : vector<7xf32>
    %783 = vector.multi_reduction <add>, %782, %cst_346 [1] : vector<7x7xf32> to vector<7xf32>
    %784 = vector.shape_cast %783 : vector<7xf32> to vector<7x1xf32>
    %785 = arith.addf %776, %784 : vector<7x1xf32>
    %786 = vector.extract_strided_slice %543 {offsets = [0, 24], sizes = [7, 8], strides = [1, 1]} : vector<7x32xf32> to vector<7x8xf32>
    %cst_347 = arith.constant dense<0.000000e+00> : vector<7x8xf32>
    %787 = tpu.matmul %782, %786, %cst_347 {dimension_numbers = #tpu.dot_dimension_numbers<[1], [0], [0], [1], [0, 0, 1, 1], [], []>} : vector<7x7xf32>, vector<7x8xf32>, vector<7x8xf32> -> vector<7x8xf32>
    %788 = arith.addf %779, %787 : vector<7x8xf32>
    %789 = tpu.reciprocal %785 {approx = true} : vector<7x1xf32> -> vector<7x1xf32>
    %790 = vector.broadcast %789 : vector<7x1xf32> to vector<7x8xf32>
    %791 = arith.mulf %788, %790 : vector<7x8xf32>
    %792 = vector.extract_strided_slice %545 {offsets = [24, 0], sizes = [8, 32], strides = [1, 1]} : vector<32x32xf32> to vector<8x32xf32>
    %cst_348 = arith.constant dense<0.000000e+00> : vector<7x32xf32>
    %793 = tpu.matmul %791, %792, %cst_348 {dimension_numbers = #tpu.dot_dimension_numbers<[1], [0], [0], [1], [0, 0, 1, 1], [], []>} : vector<7x8xf32>, vector<8x32xf32>, vector<7x32xf32> -> vector<7x32xf32>
    %794 = arith.addf %732, %793 : vector<7x32xf32>
    %795 = arith.addf %478, %794 : vector<7x32xf32>
    %c0_349 = arith.constant 0 : index
    %c0_350 = arith.constant 0 : index
    %c0_351 = arith.constant 0 : index
    %796 = vector.load %arg18[%c0_349, %c0_350, %c0_351] : memref<2x1x32xf32, #tpu.memory_space<vmem>>, vector<1x1x32xf32>
    %797 = vector.shape_cast %796 : vector<1x1x32xf32> to vector<1x32xf32>
    %798 = vector.broadcast %797 : vector<1x32xf32> to vector<7x32xf32>
    %799 = arith.addf %795, %798 : vector<7x32xf32>
    %c0_352 = arith.constant 0 : index
    %c0_353 = arith.constant 0 : index
    %c0_354 = arith.constant 0 : index
    %800 = vector.load %arg19[%c0_352, %c0_353, %c0_354] : memref<2x1x32xf32, #tpu.memory_space<vmem>>, vector<1x1x32xf32>
    %801 = vector.shape_cast %800 : vector<1x1x32xf32> to vector<1x32xf32>
    %c0_355 = arith.constant 0 : index
    %c0_356 = arith.constant 0 : index
    %c0_357 = arith.constant 0 : index
    %802 = vector.load %arg20[%c0_355, %c0_356, %c0_357] : memref<2x1x32xf32, #tpu.memory_space<vmem>>, vector<1x1x32xf32>
    %803 = vector.shape_cast %802 : vector<1x1x32xf32> to vector<1x32xf32>
    %cst_358 = arith.constant dense<0.000000e+00> : vector<7xf32>
    %804 = vector.multi_reduction <add>, %799, %cst_358 [1] : vector<7x32xf32> to vector<7xf32>
    %805 = vector.shape_cast %804 : vector<7xf32> to vector<7x1xf32>
    %cst_359 = arith.constant 3.200000e+01 : f32
    %806 = vector.broadcast %cst_359 : f32 to vector<7x1xf32>
    %807 = arith.divf %805, %806 : vector<7x1xf32>
    %808 = vector.broadcast %807 : vector<7x1xf32> to vector<7x32xf32>
    %809 = arith.subf %799, %808 : vector<7x32xf32>
    %810 = arith.mulf %809, %809 : vector<7x32xf32>
    %cst_360 = arith.constant dense<0.000000e+00> : vector<7xf32>
    %811 = vector.multi_reduction <add>, %810, %cst_360 [1] : vector<7x32xf32> to vector<7xf32>
    %812 = vector.shape_cast %811 : vector<7xf32> to vector<7x1xf32>
    %cst_361 = arith.constant 3.200000e+01 : f32
    %813 = vector.broadcast %cst_361 : f32 to vector<7x1xf32>
    %814 = arith.divf %812, %813 : vector<7x1xf32>
    %815 = vector.broadcast %807 : vector<7x1xf32> to vector<7x32xf32>
    %816 = arith.subf %799, %815 : vector<7x32xf32>
    %cst_362 = arith.constant 9.99999974E-6 : f32
    %817 = vector.broadcast %cst_362 : f32 to vector<7x1xf32>
    %818 = arith.addf %814, %817 : vector<7x1xf32>
    %819 = math.rsqrt %818 : vector<7x1xf32>
    %820 = vector.broadcast %819 : vector<7x1xf32> to vector<7x32xf32>
    %821 = arith.mulf %816, %820 : vector<7x32xf32>
    %822 = vector.broadcast %801 : vector<1x32xf32> to vector<7x32xf32>
    %823 = arith.mulf %821, %822 : vector<7x32xf32>
    %824 = vector.broadcast %803 : vector<1x32xf32> to vector<7x32xf32>
    %825 = arith.addf %823, %824 : vector<7x32xf32>
    %c0_363 = arith.constant 0 : index
    %c0_364 = arith.constant 0 : index
    %c0_365 = arith.constant 0 : index
    %826 = vector.load %arg21[%c0_363, %c0_364, %c0_365] : memref<2x32x64xf32, #tpu.memory_space<vmem>>, vector<1x32x64xf32>
    %827 = vector.shape_cast %826 : vector<1x32x64xf32> to vector<32x64xf32>
    %cst_366 = arith.constant dense<0.000000e+00> : vector<7x64xf32>
    %828 = tpu.matmul %825, %827, %cst_366 {dimension_numbers = #tpu.dot_dimension_numbers<[1], [0], [0], [1], [0, 0, 1, 1], [], []>} : vector<7x32xf32>, vector<32x64xf32>, vector<7x64xf32> -> vector<7x64xf32>
    %c0_367 = arith.constant 0 : index
    %c0_368 = arith.constant 0 : index
    %c0_369 = arith.constant 0 : index
    %829 = vector.load %arg22[%c0_367, %c0_368, %c0_369] : memref<2x1x64xf32, #tpu.memory_space<vmem>>, vector<1x1x64xf32>
    %830 = vector.shape_cast %829 : vector<1x1x64xf32> to vector<1x64xf32>
    %831 = vector.broadcast %830 : vector<1x64xf32> to vector<7x64xf32>
    %832 = arith.addf %828, %831 : vector<7x64xf32>
    %833 = arith.mulf %832, %832 : vector<7x64xf32>
    %834 = arith.mulf %832, %833 : vector<7x64xf32>
    %cst_370 = arith.constant 4.471500e-02 : f32
    %835 = vector.broadcast %cst_370 : f32 to vector<7x64xf32>
    %836 = arith.mulf %835, %834 : vector<7x64xf32>
    %837 = arith.addf %832, %836 : vector<7x64xf32>
    %cst_371 = arith.constant 0.797884583 : f32
    %838 = vector.broadcast %cst_371 : f32 to vector<7x64xf32>
    %839 = arith.mulf %838, %837 : vector<7x64xf32>
    %840 = math.tanh %839 : vector<7x64xf32>
    %cst_372 = arith.constant 1.000000e+00 : f32
    %841 = vector.broadcast %cst_372 : f32 to vector<7x64xf32>
    %842 = arith.addf %841, %840 : vector<7x64xf32>
    %cst_373 = arith.constant 5.000000e-01 : f32
    %843 = vector.broadcast %cst_373 : f32 to vector<7x64xf32>
    %844 = arith.mulf %843, %842 : vector<7x64xf32>
    %845 = arith.mulf %832, %844 : vector<7x64xf32>
    %c0_374 = arith.constant 0 : index
    %c0_375 = arith.constant 0 : index
    %c0_376 = arith.constant 0 : index
    %846 = vector.load %arg23[%c0_374, %c0_375, %c0_376] : memref<2x64x32xf32, #tpu.memory_space<vmem>>, vector<1x64x32xf32>
    %847 = vector.shape_cast %846 : vector<1x64x32xf32> to vector<64x32xf32>
    %cst_377 = arith.constant dense<0.000000e+00> : vector<7x32xf32>
    %848 = tpu.matmul %845, %847, %cst_377 {dimension_numbers = #tpu.dot_dimension_numbers<[1], [0], [0], [1], [0, 0, 1, 1], [], []>} : vector<7x64xf32>, vector<64x32xf32>, vector<7x32xf32> -> vector<7x32xf32>
    %849 = arith.addf %799, %848 : vector<7x32xf32>
    %c0_378 = arith.constant 0 : index
    %c0_379 = arith.constant 0 : index
    %c0_380 = arith.constant 0 : index
    %850 = vector.load %arg24[%c0_378, %c0_379, %c0_380] : memref<2x1x32xf32, #tpu.memory_space<vmem>>, vector<1x1x32xf32>
    %851 = vector.shape_cast %850 : vector<1x1x32xf32> to vector<1x32xf32>
    %852 = vector.broadcast %851 : vector<1x32xf32> to vector<7x32xf32>
    %853 = arith.addf %849, %852 : vector<7x32xf32>
    %c2_381 = arith.constant 2 : index
    %c2_382 = arith.constant 2 : index
    %c0_383 = arith.constant 0 : index
    %c0_384 = arith.constant 0 : index
    %854 = vector.load %arg7[%c2_381, %c2_382, %c0_383, %c0_384] : memref<3x4x4x32xf32, #tpu.memory_space<vmem>>, vector<1x1x4x32xf32>
    %855 = vector.shape_cast %854 : vector<1x1x4x32xf32> to vector<4x32xf32>
    %856 = vector.broadcast %2 : vector<4x1xf32> to vector<4x32xf32>
    %857 = arith.mulf %855, %856 : vector<4x32xf32>
    %c2_385 = arith.constant 2 : index
    %c3 = arith.constant 3 : index
    %c0_386 = arith.constant 0 : index
    %c0_387 = arith.constant 0 : index
    %858 = vector.load %arg7[%c2_385, %c3, %c0_386, %c0_387] : memref<3x4x4x32xf32, #tpu.memory_space<vmem>>, vector<1x1x4x32xf32>
    %859 = vector.shape_cast %858 : vector<1x1x4x32xf32> to vector<4x32xf32>
    %860 = vector.broadcast %2 : vector<4x1xf32> to vector<4x32xf32>
    %861 = arith.mulf %859, %860 : vector<4x32xf32>
    %c1_388 = arith.constant 1 : index
    %c0_389 = arith.constant 0 : index
    %c0_390 = arith.constant 0 : index
    %862 = vector.load %arg9[%c1_388, %c0_389, %c0_390] : memref<2x1x32xf32, #tpu.memory_space<vmem>>, vector<1x1x32xf32>
    %863 = vector.shape_cast %862 : vector<1x1x32xf32> to vector<1x32xf32>
    %c1_391 = arith.constant 1 : index
    %c0_392 = arith.constant 0 : index
    %c0_393 = arith.constant 0 : index
    %864 = vector.load %arg10[%c1_391, %c0_392, %c0_393] : memref<2x1x32xf32, #tpu.memory_space<vmem>>, vector<1x1x32xf32>
    %865 = vector.shape_cast %864 : vector<1x1x32xf32> to vector<1x32xf32>
    %cst_394 = arith.constant dense<0.000000e+00> : vector<7xf32>
    %866 = vector.multi_reduction <add>, %853, %cst_394 [1] : vector<7x32xf32> to vector<7xf32>
    %867 = vector.shape_cast %866 : vector<7xf32> to vector<7x1xf32>
    %cst_395 = arith.constant 3.200000e+01 : f32
    %868 = vector.broadcast %cst_395 : f32 to vector<7x1xf32>
    %869 = arith.divf %867, %868 : vector<7x1xf32>
    %870 = vector.broadcast %869 : vector<7x1xf32> to vector<7x32xf32>
    %871 = arith.subf %853, %870 : vector<7x32xf32>
    %872 = arith.mulf %871, %871 : vector<7x32xf32>
    %cst_396 = arith.constant dense<0.000000e+00> : vector<7xf32>
    %873 = vector.multi_reduction <add>, %872, %cst_396 [1] : vector<7x32xf32> to vector<7xf32>
    %874 = vector.shape_cast %873 : vector<7xf32> to vector<7x1xf32>
    %cst_397 = arith.constant 3.200000e+01 : f32
    %875 = vector.broadcast %cst_397 : f32 to vector<7x1xf32>
    %876 = arith.divf %874, %875 : vector<7x1xf32>
    %877 = vector.broadcast %869 : vector<7x1xf32> to vector<7x32xf32>
    %878 = arith.subf %853, %877 : vector<7x32xf32>
    %cst_398 = arith.constant 9.99999974E-6 : f32
    %879 = vector.broadcast %cst_398 : f32 to vector<7x1xf32>
    %880 = arith.addf %876, %879 : vector<7x1xf32>
    %881 = math.rsqrt %880 : vector<7x1xf32>
    %882 = vector.broadcast %881 : vector<7x1xf32> to vector<7x32xf32>
    %883 = arith.mulf %878, %882 : vector<7x32xf32>
    %884 = vector.broadcast %863 : vector<1x32xf32> to vector<7x32xf32>
    %885 = arith.mulf %883, %884 : vector<7x32xf32>
    %886 = vector.broadcast %865 : vector<1x32xf32> to vector<7x32xf32>
    %887 = arith.addf %885, %886 : vector<7x32xf32>
    %c1_399 = arith.constant 1 : index
    %c0_400 = arith.constant 0 : index
    %c0_401 = arith.constant 0 : index
    %888 = vector.load %arg11[%c1_399, %c0_400, %c0_401] : memref<2x32x32xf32, #tpu.memory_space<vmem>>, vector<1x32x32xf32>
    %889 = vector.shape_cast %888 : vector<1x32x32xf32> to vector<32x32xf32>
    %cst_402 = arith.constant dense<0.000000e+00> : vector<7x32xf32>
    %890 = tpu.matmul %887, %889, %cst_402 {dimension_numbers = #tpu.dot_dimension_numbers<[1], [0], [0], [1], [0, 0, 1, 1], [], []>} : vector<7x32xf32>, vector<32x32xf32>, vector<7x32xf32> -> vector<7x32xf32>
    %c1_403 = arith.constant 1 : index
    %c0_404 = arith.constant 0 : index
    %c0_405 = arith.constant 0 : index
    %891 = vector.load %arg14[%c1_403, %c0_404, %c0_405] : memref<2x1x32xf32, #tpu.memory_space<vmem>>, vector<1x1x32xf32>
    %892 = vector.shape_cast %891 : vector<1x1x32xf32> to vector<1x32xf32>
    %893 = vector.broadcast %892 : vector<1x32xf32> to vector<7x32xf32>
    %894 = arith.addf %890, %893 : vector<7x32xf32>
    %c1_406 = arith.constant 1 : index
    %c0_407 = arith.constant 0 : index
    %c0_408 = arith.constant 0 : index
    %895 = vector.load %arg12[%c1_406, %c0_407, %c0_408] : memref<2x32x32xf32, #tpu.memory_space<vmem>>, vector<1x32x32xf32>
    %896 = vector.shape_cast %895 : vector<1x32x32xf32> to vector<32x32xf32>
    %cst_409 = arith.constant dense<0.000000e+00> : vector<7x32xf32>
    %897 = tpu.matmul %887, %896, %cst_409 {dimension_numbers = #tpu.dot_dimension_numbers<[1], [0], [0], [1], [0, 0, 1, 1], [], []>} : vector<7x32xf32>, vector<32x32xf32>, vector<7x32xf32> -> vector<7x32xf32>
    %c1_410 = arith.constant 1 : index
    %c0_411 = arith.constant 0 : index
    %c0_412 = arith.constant 0 : index
    %898 = vector.load %arg15[%c1_410, %c0_411, %c0_412] : memref<2x1x32xf32, #tpu.memory_space<vmem>>, vector<1x1x32xf32>
    %899 = vector.shape_cast %898 : vector<1x1x32xf32> to vector<1x32xf32>
    %900 = vector.broadcast %899 : vector<1x32xf32> to vector<7x32xf32>
    %901 = arith.addf %897, %900 : vector<7x32xf32>
    %c1_413 = arith.constant 1 : index
    %c0_414 = arith.constant 0 : index
    %c0_415 = arith.constant 0 : index
    %902 = vector.load %arg13[%c1_413, %c0_414, %c0_415] : memref<2x32x32xf32, #tpu.memory_space<vmem>>, vector<1x32x32xf32>
    %903 = vector.shape_cast %902 : vector<1x32x32xf32> to vector<32x32xf32>
    %cst_416 = arith.constant dense<0.000000e+00> : vector<7x32xf32>
    %904 = tpu.matmul %887, %903, %cst_416 {dimension_numbers = #tpu.dot_dimension_numbers<[1], [0], [0], [1], [0, 0, 1, 1], [], []>} : vector<7x32xf32>, vector<32x32xf32>, vector<7x32xf32> -> vector<7x32xf32>
    %c1_417 = arith.constant 1 : index
    %c0_418 = arith.constant 0 : index
    %c0_419 = arith.constant 0 : index
    %905 = vector.load %arg16[%c1_417, %c0_418, %c0_419] : memref<2x1x32xf32, #tpu.memory_space<vmem>>, vector<1x1x32xf32>
    %906 = vector.shape_cast %905 : vector<1x1x32xf32> to vector<1x32xf32>
    %907 = vector.broadcast %906 : vector<1x32xf32> to vector<7x32xf32>
    %908 = arith.addf %904, %907 : vector<7x32xf32>
    %c1_420 = arith.constant 1 : index
    %c0_421 = arith.constant 0 : index
    %c0_422 = arith.constant 0 : index
    %909 = vector.load %arg17[%c1_420, %c0_421, %c0_422] : memref<2x32x32xf32, #tpu.memory_space<vmem>>, vector<1x32x32xf32>
    %910 = vector.shape_cast %909 : vector<1x32x32xf32> to vector<32x32xf32>
    %cst_423 = arith.constant 0.000000e+00 : f32
    %911 = vector.broadcast %cst_423 : f32 to vector<7x32xf32>
    %912 = vector.extract_strided_slice %894 {offsets = [0, 0], sizes = [7, 8], strides = [1, 1]} : vector<7x32xf32> to vector<7x8xf32>
    %913 = vector.extract_strided_slice %857 {offsets = [0, 0], sizes = [4, 8], strides = [1, 1]} : vector<4x32xf32> to vector<4x8xf32>
    %cst_424 = arith.constant dense<0.000000e+00> : vector<7x4xf32>
    %914 = tpu.matmul %912, %913, %cst_424 {dimension_numbers = #tpu.dot_dimension_numbers<[1], [1], [0], [0], [0, 0, 1, 0], [], []>} : vector<7x8xf32>, vector<4x8xf32>, vector<7x4xf32> -> vector<7x4xf32>
    %cst_425 = arith.constant 0.353553385 : f32
    %915 = vector.broadcast %cst_425 : f32 to vector<7x4xf32>
    %916 = arith.mulf %914, %915 : vector<7x4xf32>
    %917 = vector.extract_strided_slice %462 {offsets = [0, 0], sizes = [8, 8], strides = [1, 1]} : vector<8x32xf32> to vector<8x8xf32>
    %cst_426 = arith.constant dense<0.000000e+00> : vector<7x8xf32>
    %918 = tpu.matmul %912, %917, %cst_426 {dimension_numbers = #tpu.dot_dimension_numbers<[1], [1], [0], [0], [0, 0, 1, 0], [], []>} : vector<7x8xf32>, vector<8x8xf32>, vector<7x8xf32> -> vector<7x8xf32>
    %cst_427 = arith.constant 0.353553385 : f32
    %919 = vector.broadcast %cst_427 : f32 to vector<7x8xf32>
    %920 = arith.mulf %918, %919 : vector<7x8xf32>
    %cst_428 = arith.constant -1.000000e+30 : f32
    %921 = vector.shape_cast %488 : vector<1x8xi1> to vector<1x8xi1>
    %922 = vector.broadcast %921 : vector<1x8xi1> to vector<7x8xi1>
    %923 = vector.broadcast %cst_428 : f32 to vector<7x8xf32>
    %924 = arith.select %922, %920, %923 : vector<7x8xi1>, vector<7x8xf32>
    %925 = vector.extract_strided_slice %901 {offsets = [0, 0], sizes = [7, 8], strides = [1, 1]} : vector<7x32xf32> to vector<7x8xf32>
    %cst_429 = arith.constant dense<0.000000e+00> : vector<7x7xf32>
    %926 = tpu.matmul %912, %925, %cst_429 {dimension_numbers = #tpu.dot_dimension_numbers<[1], [1], [0], [0], [0, 0, 1, 0], [], []>} : vector<7x8xf32>, vector<7x8xf32>, vector<7x7xf32> -> vector<7x7xf32>
    %cst_430 = arith.constant 0.353553385 : f32
    %927 = vector.broadcast %cst_430 : f32 to vector<7x7xf32>
    %928 = arith.mulf %926, %927 : vector<7x7xf32>
    %cst_431 = arith.constant -1.000000e+30 : f32
    %929 = vector.broadcast %cst_431 : f32 to vector<7x7xf32>
    %930 = arith.select %486, %928, %929 : vector<7x7xi1>, vector<7x7xf32>
    %cst_432 = arith.constant dense<0xFF800000> : vector<7xf32>
    %931 = vector.multi_reduction <maximumf>, %916, %cst_432 [1] : vector<7x4xf32> to vector<7xf32>
    %932 = vector.shape_cast %931 : vector<7xf32> to vector<7x1xf32>
    %cst_433 = arith.constant dense<0xFF800000> : vector<7xf32>
    %933 = vector.multi_reduction <maximumf>, %924, %cst_433 [1] : vector<7x8xf32> to vector<7xf32>
    %934 = vector.shape_cast %933 : vector<7xf32> to vector<7x1xf32>
    %935 = arith.maximumf %932, %934 : vector<7x1xf32>
    %cst_434 = arith.constant dense<0xFF800000> : vector<7xf32>
    %936 = vector.multi_reduction <maximumf>, %930, %cst_434 [1] : vector<7x7xf32> to vector<7xf32>
    %937 = vector.shape_cast %936 : vector<7xf32> to vector<7x1xf32>
    %938 = arith.maximumf %935, %937 : vector<7x1xf32>
    %cst_435 = arith.constant 0.000000e+00 : f32
    %939 = vector.broadcast %cst_435 : f32 to vector<7x1xf32>
    %cst_436 = arith.constant 0.000000e+00 : f32
    %940 = vector.broadcast %cst_436 : f32 to vector<7x8xf32>
    %941 = vector.broadcast %938 : vector<7x1xf32> to vector<7x4xf32>
    %942 = arith.subf %916, %941 : vector<7x4xf32>
    %943 = math.exp %942 : vector<7x4xf32>
    %cst_437 = arith.constant dense<0.000000e+00> : vector<7xf32>
    %944 = vector.multi_reduction <add>, %943, %cst_437 [1] : vector<7x4xf32> to vector<7xf32>
    %945 = vector.shape_cast %944 : vector<7xf32> to vector<7x1xf32>
    %946 = arith.addf %939, %945 : vector<7x1xf32>
    %947 = vector.extract_strided_slice %861 {offsets = [0, 0], sizes = [4, 8], strides = [1, 1]} : vector<4x32xf32> to vector<4x8xf32>
    %cst_438 = arith.constant dense<0.000000e+00> : vector<7x8xf32>
    %948 = tpu.matmul %943, %947, %cst_438 {dimension_numbers = #tpu.dot_dimension_numbers<[1], [0], [0], [1], [0, 0, 1, 1], [], []>} : vector<7x4xf32>, vector<4x8xf32>, vector<7x8xf32> -> vector<7x8xf32>
    %949 = arith.addf %940, %948 : vector<7x8xf32>
    %950 = vector.broadcast %938 : vector<7x1xf32> to vector<7x8xf32>
    %951 = arith.subf %924, %950 : vector<7x8xf32>
    %952 = math.exp %951 : vector<7x8xf32>
    %cst_439 = arith.constant dense<0.000000e+00> : vector<7xf32>
    %953 = vector.multi_reduction <add>, %952, %cst_439 [1] : vector<7x8xf32> to vector<7xf32>
    %954 = vector.shape_cast %953 : vector<7xf32> to vector<7x1xf32>
    %955 = arith.addf %946, %954 : vector<7x1xf32>
    %956 = vector.extract_strided_slice %469 {offsets = [0, 0], sizes = [8, 8], strides = [1, 1]} : vector<8x32xf32> to vector<8x8xf32>
    %cst_440 = arith.constant dense<0.000000e+00> : vector<7x8xf32>
    %957 = tpu.matmul %952, %956, %cst_440 {dimension_numbers = #tpu.dot_dimension_numbers<[1], [0], [0], [1], [0, 0, 1, 1], [], []>} : vector<7x8xf32>, vector<8x8xf32>, vector<7x8xf32> -> vector<7x8xf32>
    %958 = arith.addf %949, %957 : vector<7x8xf32>
    %959 = vector.broadcast %938 : vector<7x1xf32> to vector<7x7xf32>
    %960 = arith.subf %930, %959 : vector<7x7xf32>
    %961 = math.exp %960 : vector<7x7xf32>
    %cst_441 = arith.constant dense<0.000000e+00> : vector<7xf32>
    %962 = vector.multi_reduction <add>, %961, %cst_441 [1] : vector<7x7xf32> to vector<7xf32>
    %963 = vector.shape_cast %962 : vector<7xf32> to vector<7x1xf32>
    %964 = arith.addf %955, %963 : vector<7x1xf32>
    %965 = vector.extract_strided_slice %908 {offsets = [0, 0], sizes = [7, 8], strides = [1, 1]} : vector<7x32xf32> to vector<7x8xf32>
    %cst_442 = arith.constant dense<0.000000e+00> : vector<7x8xf32>
    %966 = tpu.matmul %961, %965, %cst_442 {dimension_numbers = #tpu.dot_dimension_numbers<[1], [0], [0], [1], [0, 0, 1, 1], [], []>} : vector<7x7xf32>, vector<7x8xf32>, vector<7x8xf32> -> vector<7x8xf32>
    %967 = arith.addf %958, %966 : vector<7x8xf32>
    %968 = tpu.reciprocal %964 {approx = true} : vector<7x1xf32> -> vector<7x1xf32>
    %969 = vector.broadcast %968 : vector<7x1xf32> to vector<7x8xf32>
    %970 = arith.mulf %967, %969 : vector<7x8xf32>
    %971 = vector.extract_strided_slice %910 {offsets = [0, 0], sizes = [8, 32], strides = [1, 1]} : vector<32x32xf32> to vector<8x32xf32>
    %cst_443 = arith.constant dense<0.000000e+00> : vector<7x32xf32>
    %972 = tpu.matmul %970, %971, %cst_443 {dimension_numbers = #tpu.dot_dimension_numbers<[1], [0], [0], [1], [0, 0, 1, 1], [], []>} : vector<7x8xf32>, vector<8x32xf32>, vector<7x32xf32> -> vector<7x32xf32>
    %973 = arith.addf %911, %972 : vector<7x32xf32>
    %974 = vector.extract_strided_slice %894 {offsets = [0, 8], sizes = [7, 8], strides = [1, 1]} : vector<7x32xf32> to vector<7x8xf32>
    %975 = vector.extract_strided_slice %857 {offsets = [0, 8], sizes = [4, 8], strides = [1, 1]} : vector<4x32xf32> to vector<4x8xf32>
    %cst_444 = arith.constant dense<0.000000e+00> : vector<7x4xf32>
    %976 = tpu.matmul %974, %975, %cst_444 {dimension_numbers = #tpu.dot_dimension_numbers<[1], [1], [0], [0], [0, 0, 1, 0], [], []>} : vector<7x8xf32>, vector<4x8xf32>, vector<7x4xf32> -> vector<7x4xf32>
    %cst_445 = arith.constant 0.353553385 : f32
    %977 = vector.broadcast %cst_445 : f32 to vector<7x4xf32>
    %978 = arith.mulf %976, %977 : vector<7x4xf32>
    %979 = vector.extract_strided_slice %462 {offsets = [0, 8], sizes = [8, 8], strides = [1, 1]} : vector<8x32xf32> to vector<8x8xf32>
    %cst_446 = arith.constant dense<0.000000e+00> : vector<7x8xf32>
    %980 = tpu.matmul %974, %979, %cst_446 {dimension_numbers = #tpu.dot_dimension_numbers<[1], [1], [0], [0], [0, 0, 1, 0], [], []>} : vector<7x8xf32>, vector<8x8xf32>, vector<7x8xf32> -> vector<7x8xf32>
    %cst_447 = arith.constant 0.353553385 : f32
    %981 = vector.broadcast %cst_447 : f32 to vector<7x8xf32>
    %982 = arith.mulf %980, %981 : vector<7x8xf32>
    %cst_448 = arith.constant -1.000000e+30 : f32
    %983 = vector.shape_cast %488 : vector<1x8xi1> to vector<1x8xi1>
    %984 = vector.broadcast %983 : vector<1x8xi1> to vector<7x8xi1>
    %985 = vector.broadcast %cst_448 : f32 to vector<7x8xf32>
    %986 = arith.select %984, %982, %985 : vector<7x8xi1>, vector<7x8xf32>
    %987 = vector.extract_strided_slice %901 {offsets = [0, 8], sizes = [7, 8], strides = [1, 1]} : vector<7x32xf32> to vector<7x8xf32>
    %cst_449 = arith.constant dense<0.000000e+00> : vector<7x7xf32>
    %988 = tpu.matmul %974, %987, %cst_449 {dimension_numbers = #tpu.dot_dimension_numbers<[1], [1], [0], [0], [0, 0, 1, 0], [], []>} : vector<7x8xf32>, vector<7x8xf32>, vector<7x7xf32> -> vector<7x7xf32>
    %cst_450 = arith.constant 0.353553385 : f32
    %989 = vector.broadcast %cst_450 : f32 to vector<7x7xf32>
    %990 = arith.mulf %988, %989 : vector<7x7xf32>
    %cst_451 = arith.constant -1.000000e+30 : f32
    %991 = vector.broadcast %cst_451 : f32 to vector<7x7xf32>
    %992 = arith.select %486, %990, %991 : vector<7x7xi1>, vector<7x7xf32>
    %cst_452 = arith.constant dense<0xFF800000> : vector<7xf32>
    %993 = vector.multi_reduction <maximumf>, %978, %cst_452 [1] : vector<7x4xf32> to vector<7xf32>
    %994 = vector.shape_cast %993 : vector<7xf32> to vector<7x1xf32>
    %cst_453 = arith.constant dense<0xFF800000> : vector<7xf32>
    %995 = vector.multi_reduction <maximumf>, %986, %cst_453 [1] : vector<7x8xf32> to vector<7xf32>
    %996 = vector.shape_cast %995 : vector<7xf32> to vector<7x1xf32>
    %997 = arith.maximumf %994, %996 : vector<7x1xf32>
    %cst_454 = arith.constant dense<0xFF800000> : vector<7xf32>
    %998 = vector.multi_reduction <maximumf>, %992, %cst_454 [1] : vector<7x7xf32> to vector<7xf32>
    %999 = vector.shape_cast %998 : vector<7xf32> to vector<7x1xf32>
    %1000 = arith.maximumf %997, %999 : vector<7x1xf32>
    %cst_455 = arith.constant 0.000000e+00 : f32
    %1001 = vector.broadcast %cst_455 : f32 to vector<7x1xf32>
    %cst_456 = arith.constant 0.000000e+00 : f32
    %1002 = vector.broadcast %cst_456 : f32 to vector<7x8xf32>
    %1003 = vector.broadcast %1000 : vector<7x1xf32> to vector<7x4xf32>
    %1004 = arith.subf %978, %1003 : vector<7x4xf32>
    %1005 = math.exp %1004 : vector<7x4xf32>
    %cst_457 = arith.constant dense<0.000000e+00> : vector<7xf32>
    %1006 = vector.multi_reduction <add>, %1005, %cst_457 [1] : vector<7x4xf32> to vector<7xf32>
    %1007 = vector.shape_cast %1006 : vector<7xf32> to vector<7x1xf32>
    %1008 = arith.addf %1001, %1007 : vector<7x1xf32>
    %1009 = vector.extract_strided_slice %861 {offsets = [0, 8], sizes = [4, 8], strides = [1, 1]} : vector<4x32xf32> to vector<4x8xf32>
    %cst_458 = arith.constant dense<0.000000e+00> : vector<7x8xf32>
    %1010 = tpu.matmul %1005, %1009, %cst_458 {dimension_numbers = #tpu.dot_dimension_numbers<[1], [0], [0], [1], [0, 0, 1, 1], [], []>} : vector<7x4xf32>, vector<4x8xf32>, vector<7x8xf32> -> vector<7x8xf32>
    %1011 = arith.addf %1002, %1010 : vector<7x8xf32>
    %1012 = vector.broadcast %1000 : vector<7x1xf32> to vector<7x8xf32>
    %1013 = arith.subf %986, %1012 : vector<7x8xf32>
    %1014 = math.exp %1013 : vector<7x8xf32>
    %cst_459 = arith.constant dense<0.000000e+00> : vector<7xf32>
    %1015 = vector.multi_reduction <add>, %1014, %cst_459 [1] : vector<7x8xf32> to vector<7xf32>
    %1016 = vector.shape_cast %1015 : vector<7xf32> to vector<7x1xf32>
    %1017 = arith.addf %1008, %1016 : vector<7x1xf32>
    %1018 = vector.extract_strided_slice %469 {offsets = [0, 8], sizes = [8, 8], strides = [1, 1]} : vector<8x32xf32> to vector<8x8xf32>
    %cst_460 = arith.constant dense<0.000000e+00> : vector<7x8xf32>
    %1019 = tpu.matmul %1014, %1018, %cst_460 {dimension_numbers = #tpu.dot_dimension_numbers<[1], [0], [0], [1], [0, 0, 1, 1], [], []>} : vector<7x8xf32>, vector<8x8xf32>, vector<7x8xf32> -> vector<7x8xf32>
    %1020 = arith.addf %1011, %1019 : vector<7x8xf32>
    %1021 = vector.broadcast %1000 : vector<7x1xf32> to vector<7x7xf32>
    %1022 = arith.subf %992, %1021 : vector<7x7xf32>
    %1023 = math.exp %1022 : vector<7x7xf32>
    %cst_461 = arith.constant dense<0.000000e+00> : vector<7xf32>
    %1024 = vector.multi_reduction <add>, %1023, %cst_461 [1] : vector<7x7xf32> to vector<7xf32>
    %1025 = vector.shape_cast %1024 : vector<7xf32> to vector<7x1xf32>
    %1026 = arith.addf %1017, %1025 : vector<7x1xf32>
    %1027 = vector.extract_strided_slice %908 {offsets = [0, 8], sizes = [7, 8], strides = [1, 1]} : vector<7x32xf32> to vector<7x8xf32>
    %cst_462 = arith.constant dense<0.000000e+00> : vector<7x8xf32>
    %1028 = tpu.matmul %1023, %1027, %cst_462 {dimension_numbers = #tpu.dot_dimension_numbers<[1], [0], [0], [1], [0, 0, 1, 1], [], []>} : vector<7x7xf32>, vector<7x8xf32>, vector<7x8xf32> -> vector<7x8xf32>
    %1029 = arith.addf %1020, %1028 : vector<7x8xf32>
    %1030 = tpu.reciprocal %1026 {approx = true} : vector<7x1xf32> -> vector<7x1xf32>
    %1031 = vector.broadcast %1030 : vector<7x1xf32> to vector<7x8xf32>
    %1032 = arith.mulf %1029, %1031 : vector<7x8xf32>
    %1033 = vector.extract_strided_slice %910 {offsets = [8, 0], sizes = [8, 32], strides = [1, 1]} : vector<32x32xf32> to vector<8x32xf32>
    %cst_463 = arith.constant dense<0.000000e+00> : vector<7x32xf32>
    %1034 = tpu.matmul %1032, %1033, %cst_463 {dimension_numbers = #tpu.dot_dimension_numbers<[1], [0], [0], [1], [0, 0, 1, 1], [], []>} : vector<7x8xf32>, vector<8x32xf32>, vector<7x32xf32> -> vector<7x32xf32>
    %1035 = arith.addf %973, %1034 : vector<7x32xf32>
    %1036 = vector.extract_strided_slice %894 {offsets = [0, 16], sizes = [7, 8], strides = [1, 1]} : vector<7x32xf32> to vector<7x8xf32>
    %1037 = vector.extract_strided_slice %857 {offsets = [0, 16], sizes = [4, 8], strides = [1, 1]} : vector<4x32xf32> to vector<4x8xf32>
    %cst_464 = arith.constant dense<0.000000e+00> : vector<7x4xf32>
    %1038 = tpu.matmul %1036, %1037, %cst_464 {dimension_numbers = #tpu.dot_dimension_numbers<[1], [1], [0], [0], [0, 0, 1, 0], [], []>} : vector<7x8xf32>, vector<4x8xf32>, vector<7x4xf32> -> vector<7x4xf32>
    %cst_465 = arith.constant 0.353553385 : f32
    %1039 = vector.broadcast %cst_465 : f32 to vector<7x4xf32>
    %1040 = arith.mulf %1038, %1039 : vector<7x4xf32>
    %1041 = vector.extract_strided_slice %462 {offsets = [0, 16], sizes = [8, 8], strides = [1, 1]} : vector<8x32xf32> to vector<8x8xf32>
    %cst_466 = arith.constant dense<0.000000e+00> : vector<7x8xf32>
    %1042 = tpu.matmul %1036, %1041, %cst_466 {dimension_numbers = #tpu.dot_dimension_numbers<[1], [1], [0], [0], [0, 0, 1, 0], [], []>} : vector<7x8xf32>, vector<8x8xf32>, vector<7x8xf32> -> vector<7x8xf32>
    %cst_467 = arith.constant 0.353553385 : f32
    %1043 = vector.broadcast %cst_467 : f32 to vector<7x8xf32>
    %1044 = arith.mulf %1042, %1043 : vector<7x8xf32>
    %cst_468 = arith.constant -1.000000e+30 : f32
    %1045 = vector.shape_cast %488 : vector<1x8xi1> to vector<1x8xi1>
    %1046 = vector.broadcast %1045 : vector<1x8xi1> to vector<7x8xi1>
    %1047 = vector.broadcast %cst_468 : f32 to vector<7x8xf32>
    %1048 = arith.select %1046, %1044, %1047 : vector<7x8xi1>, vector<7x8xf32>
    %1049 = vector.extract_strided_slice %901 {offsets = [0, 16], sizes = [7, 8], strides = [1, 1]} : vector<7x32xf32> to vector<7x8xf32>
    %cst_469 = arith.constant dense<0.000000e+00> : vector<7x7xf32>
    %1050 = tpu.matmul %1036, %1049, %cst_469 {dimension_numbers = #tpu.dot_dimension_numbers<[1], [1], [0], [0], [0, 0, 1, 0], [], []>} : vector<7x8xf32>, vector<7x8xf32>, vector<7x7xf32> -> vector<7x7xf32>
    %cst_470 = arith.constant 0.353553385 : f32
    %1051 = vector.broadcast %cst_470 : f32 to vector<7x7xf32>
    %1052 = arith.mulf %1050, %1051 : vector<7x7xf32>
    %cst_471 = arith.constant -1.000000e+30 : f32
    %1053 = vector.broadcast %cst_471 : f32 to vector<7x7xf32>
    %1054 = arith.select %486, %1052, %1053 : vector<7x7xi1>, vector<7x7xf32>
    %cst_472 = arith.constant dense<0xFF800000> : vector<7xf32>
    %1055 = vector.multi_reduction <maximumf>, %1040, %cst_472 [1] : vector<7x4xf32> to vector<7xf32>
    %1056 = vector.shape_cast %1055 : vector<7xf32> to vector<7x1xf32>
    %cst_473 = arith.constant dense<0xFF800000> : vector<7xf32>
    %1057 = vector.multi_reduction <maximumf>, %1048, %cst_473 [1] : vector<7x8xf32> to vector<7xf32>
    %1058 = vector.shape_cast %1057 : vector<7xf32> to vector<7x1xf32>
    %1059 = arith.maximumf %1056, %1058 : vector<7x1xf32>
    %cst_474 = arith.constant dense<0xFF800000> : vector<7xf32>
    %1060 = vector.multi_reduction <maximumf>, %1054, %cst_474 [1] : vector<7x7xf32> to vector<7xf32>
    %1061 = vector.shape_cast %1060 : vector<7xf32> to vector<7x1xf32>
    %1062 = arith.maximumf %1059, %1061 : vector<7x1xf32>
    %cst_475 = arith.constant 0.000000e+00 : f32
    %1063 = vector.broadcast %cst_475 : f32 to vector<7x1xf32>
    %cst_476 = arith.constant 0.000000e+00 : f32
    %1064 = vector.broadcast %cst_476 : f32 to vector<7x8xf32>
    %1065 = vector.broadcast %1062 : vector<7x1xf32> to vector<7x4xf32>
    %1066 = arith.subf %1040, %1065 : vector<7x4xf32>
    %1067 = math.exp %1066 : vector<7x4xf32>
    %cst_477 = arith.constant dense<0.000000e+00> : vector<7xf32>
    %1068 = vector.multi_reduction <add>, %1067, %cst_477 [1] : vector<7x4xf32> to vector<7xf32>
    %1069 = vector.shape_cast %1068 : vector<7xf32> to vector<7x1xf32>
    %1070 = arith.addf %1063, %1069 : vector<7x1xf32>
    %1071 = vector.extract_strided_slice %861 {offsets = [0, 16], sizes = [4, 8], strides = [1, 1]} : vector<4x32xf32> to vector<4x8xf32>
    %cst_478 = arith.constant dense<0.000000e+00> : vector<7x8xf32>
    %1072 = tpu.matmul %1067, %1071, %cst_478 {dimension_numbers = #tpu.dot_dimension_numbers<[1], [0], [0], [1], [0, 0, 1, 1], [], []>} : vector<7x4xf32>, vector<4x8xf32>, vector<7x8xf32> -> vector<7x8xf32>
    %1073 = arith.addf %1064, %1072 : vector<7x8xf32>
    %1074 = vector.broadcast %1062 : vector<7x1xf32> to vector<7x8xf32>
    %1075 = arith.subf %1048, %1074 : vector<7x8xf32>
    %1076 = math.exp %1075 : vector<7x8xf32>
    %cst_479 = arith.constant dense<0.000000e+00> : vector<7xf32>
    %1077 = vector.multi_reduction <add>, %1076, %cst_479 [1] : vector<7x8xf32> to vector<7xf32>
    %1078 = vector.shape_cast %1077 : vector<7xf32> to vector<7x1xf32>
    %1079 = arith.addf %1070, %1078 : vector<7x1xf32>
    %1080 = vector.extract_strided_slice %469 {offsets = [0, 16], sizes = [8, 8], strides = [1, 1]} : vector<8x32xf32> to vector<8x8xf32>
    %cst_480 = arith.constant dense<0.000000e+00> : vector<7x8xf32>
    %1081 = tpu.matmul %1076, %1080, %cst_480 {dimension_numbers = #tpu.dot_dimension_numbers<[1], [0], [0], [1], [0, 0, 1, 1], [], []>} : vector<7x8xf32>, vector<8x8xf32>, vector<7x8xf32> -> vector<7x8xf32>
    %1082 = arith.addf %1073, %1081 : vector<7x8xf32>
    %1083 = vector.broadcast %1062 : vector<7x1xf32> to vector<7x7xf32>
    %1084 = arith.subf %1054, %1083 : vector<7x7xf32>
    %1085 = math.exp %1084 : vector<7x7xf32>
    %cst_481 = arith.constant dense<0.000000e+00> : vector<7xf32>
    %1086 = vector.multi_reduction <add>, %1085, %cst_481 [1] : vector<7x7xf32> to vector<7xf32>
    %1087 = vector.shape_cast %1086 : vector<7xf32> to vector<7x1xf32>
    %1088 = arith.addf %1079, %1087 : vector<7x1xf32>
    %1089 = vector.extract_strided_slice %908 {offsets = [0, 16], sizes = [7, 8], strides = [1, 1]} : vector<7x32xf32> to vector<7x8xf32>
    %cst_482 = arith.constant dense<0.000000e+00> : vector<7x8xf32>
    %1090 = tpu.matmul %1085, %1089, %cst_482 {dimension_numbers = #tpu.dot_dimension_numbers<[1], [0], [0], [1], [0, 0, 1, 1], [], []>} : vector<7x7xf32>, vector<7x8xf32>, vector<7x8xf32> -> vector<7x8xf32>
    %1091 = arith.addf %1082, %1090 : vector<7x8xf32>
    %1092 = tpu.reciprocal %1088 {approx = true} : vector<7x1xf32> -> vector<7x1xf32>
    %1093 = vector.broadcast %1092 : vector<7x1xf32> to vector<7x8xf32>
    %1094 = arith.mulf %1091, %1093 : vector<7x8xf32>
    %1095 = vector.extract_strided_slice %910 {offsets = [16, 0], sizes = [8, 32], strides = [1, 1]} : vector<32x32xf32> to vector<8x32xf32>
    %cst_483 = arith.constant dense<0.000000e+00> : vector<7x32xf32>
    %1096 = tpu.matmul %1094, %1095, %cst_483 {dimension_numbers = #tpu.dot_dimension_numbers<[1], [0], [0], [1], [0, 0, 1, 1], [], []>} : vector<7x8xf32>, vector<8x32xf32>, vector<7x32xf32> -> vector<7x32xf32>
    %1097 = arith.addf %1035, %1096 : vector<7x32xf32>
    %1098 = vector.extract_strided_slice %894 {offsets = [0, 24], sizes = [7, 8], strides = [1, 1]} : vector<7x32xf32> to vector<7x8xf32>
    %1099 = vector.extract_strided_slice %857 {offsets = [0, 24], sizes = [4, 8], strides = [1, 1]} : vector<4x32xf32> to vector<4x8xf32>
    %cst_484 = arith.constant dense<0.000000e+00> : vector<7x4xf32>
    %1100 = tpu.matmul %1098, %1099, %cst_484 {dimension_numbers = #tpu.dot_dimension_numbers<[1], [1], [0], [0], [0, 0, 1, 0], [], []>} : vector<7x8xf32>, vector<4x8xf32>, vector<7x4xf32> -> vector<7x4xf32>
    %cst_485 = arith.constant 0.353553385 : f32
    %1101 = vector.broadcast %cst_485 : f32 to vector<7x4xf32>
    %1102 = arith.mulf %1100, %1101 : vector<7x4xf32>
    %1103 = vector.extract_strided_slice %462 {offsets = [0, 24], sizes = [8, 8], strides = [1, 1]} : vector<8x32xf32> to vector<8x8xf32>
    %cst_486 = arith.constant dense<0.000000e+00> : vector<7x8xf32>
    %1104 = tpu.matmul %1098, %1103, %cst_486 {dimension_numbers = #tpu.dot_dimension_numbers<[1], [1], [0], [0], [0, 0, 1, 0], [], []>} : vector<7x8xf32>, vector<8x8xf32>, vector<7x8xf32> -> vector<7x8xf32>
    %cst_487 = arith.constant 0.353553385 : f32
    %1105 = vector.broadcast %cst_487 : f32 to vector<7x8xf32>
    %1106 = arith.mulf %1104, %1105 : vector<7x8xf32>
    %cst_488 = arith.constant -1.000000e+30 : f32
    %1107 = vector.shape_cast %488 : vector<1x8xi1> to vector<1x8xi1>
    %1108 = vector.broadcast %1107 : vector<1x8xi1> to vector<7x8xi1>
    %1109 = vector.broadcast %cst_488 : f32 to vector<7x8xf32>
    %1110 = arith.select %1108, %1106, %1109 : vector<7x8xi1>, vector<7x8xf32>
    %1111 = vector.extract_strided_slice %901 {offsets = [0, 24], sizes = [7, 8], strides = [1, 1]} : vector<7x32xf32> to vector<7x8xf32>
    %cst_489 = arith.constant dense<0.000000e+00> : vector<7x7xf32>
    %1112 = tpu.matmul %1098, %1111, %cst_489 {dimension_numbers = #tpu.dot_dimension_numbers<[1], [1], [0], [0], [0, 0, 1, 0], [], []>} : vector<7x8xf32>, vector<7x8xf32>, vector<7x7xf32> -> vector<7x7xf32>
    %cst_490 = arith.constant 0.353553385 : f32
    %1113 = vector.broadcast %cst_490 : f32 to vector<7x7xf32>
    %1114 = arith.mulf %1112, %1113 : vector<7x7xf32>
    %cst_491 = arith.constant -1.000000e+30 : f32
    %1115 = vector.broadcast %cst_491 : f32 to vector<7x7xf32>
    %1116 = arith.select %486, %1114, %1115 : vector<7x7xi1>, vector<7x7xf32>
    %cst_492 = arith.constant dense<0xFF800000> : vector<7xf32>
    %1117 = vector.multi_reduction <maximumf>, %1102, %cst_492 [1] : vector<7x4xf32> to vector<7xf32>
    %1118 = vector.shape_cast %1117 : vector<7xf32> to vector<7x1xf32>
    %cst_493 = arith.constant dense<0xFF800000> : vector<7xf32>
    %1119 = vector.multi_reduction <maximumf>, %1110, %cst_493 [1] : vector<7x8xf32> to vector<7xf32>
    %1120 = vector.shape_cast %1119 : vector<7xf32> to vector<7x1xf32>
    %1121 = arith.maximumf %1118, %1120 : vector<7x1xf32>
    %cst_494 = arith.constant dense<0xFF800000> : vector<7xf32>
    %1122 = vector.multi_reduction <maximumf>, %1116, %cst_494 [1] : vector<7x7xf32> to vector<7xf32>
    %1123 = vector.shape_cast %1122 : vector<7xf32> to vector<7x1xf32>
    %1124 = arith.maximumf %1121, %1123 : vector<7x1xf32>
    %cst_495 = arith.constant 0.000000e+00 : f32
    %1125 = vector.broadcast %cst_495 : f32 to vector<7x1xf32>
    %cst_496 = arith.constant 0.000000e+00 : f32
    %1126 = vector.broadcast %cst_496 : f32 to vector<7x8xf32>
    %1127 = vector.broadcast %1124 : vector<7x1xf32> to vector<7x4xf32>
    %1128 = arith.subf %1102, %1127 : vector<7x4xf32>
    %1129 = math.exp %1128 : vector<7x4xf32>
    %cst_497 = arith.constant dense<0.000000e+00> : vector<7xf32>
    %1130 = vector.multi_reduction <add>, %1129, %cst_497 [1] : vector<7x4xf32> to vector<7xf32>
    %1131 = vector.shape_cast %1130 : vector<7xf32> to vector<7x1xf32>
    %1132 = arith.addf %1125, %1131 : vector<7x1xf32>
    %1133 = vector.extract_strided_slice %861 {offsets = [0, 24], sizes = [4, 8], strides = [1, 1]} : vector<4x32xf32> to vector<4x8xf32>
    %cst_498 = arith.constant dense<0.000000e+00> : vector<7x8xf32>
    %1134 = tpu.matmul %1129, %1133, %cst_498 {dimension_numbers = #tpu.dot_dimension_numbers<[1], [0], [0], [1], [0, 0, 1, 1], [], []>} : vector<7x4xf32>, vector<4x8xf32>, vector<7x8xf32> -> vector<7x8xf32>
    %1135 = arith.addf %1126, %1134 : vector<7x8xf32>
    %1136 = vector.broadcast %1124 : vector<7x1xf32> to vector<7x8xf32>
    %1137 = arith.subf %1110, %1136 : vector<7x8xf32>
    %1138 = math.exp %1137 : vector<7x8xf32>
    %cst_499 = arith.constant dense<0.000000e+00> : vector<7xf32>
    %1139 = vector.multi_reduction <add>, %1138, %cst_499 [1] : vector<7x8xf32> to vector<7xf32>
    %1140 = vector.shape_cast %1139 : vector<7xf32> to vector<7x1xf32>
    %1141 = arith.addf %1132, %1140 : vector<7x1xf32>
    %1142 = vector.extract_strided_slice %469 {offsets = [0, 24], sizes = [8, 8], strides = [1, 1]} : vector<8x32xf32> to vector<8x8xf32>
    %cst_500 = arith.constant dense<0.000000e+00> : vector<7x8xf32>
    %1143 = tpu.matmul %1138, %1142, %cst_500 {dimension_numbers = #tpu.dot_dimension_numbers<[1], [0], [0], [1], [0, 0, 1, 1], [], []>} : vector<7x8xf32>, vector<8x8xf32>, vector<7x8xf32> -> vector<7x8xf32>
    %1144 = arith.addf %1135, %1143 : vector<7x8xf32>
    %1145 = vector.broadcast %1124 : vector<7x1xf32> to vector<7x7xf32>
    %1146 = arith.subf %1116, %1145 : vector<7x7xf32>
    %1147 = math.exp %1146 : vector<7x7xf32>
    %cst_501 = arith.constant dense<0.000000e+00> : vector<7xf32>
    %1148 = vector.multi_reduction <add>, %1147, %cst_501 [1] : vector<7x7xf32> to vector<7xf32>
    %1149 = vector.shape_cast %1148 : vector<7xf32> to vector<7x1xf32>
    %1150 = arith.addf %1141, %1149 : vector<7x1xf32>
    %1151 = vector.extract_strided_slice %908 {offsets = [0, 24], sizes = [7, 8], strides = [1, 1]} : vector<7x32xf32> to vector<7x8xf32>
    %cst_502 = arith.constant dense<0.000000e+00> : vector<7x8xf32>
    %1152 = tpu.matmul %1147, %1151, %cst_502 {dimension_numbers = #tpu.dot_dimension_numbers<[1], [0], [0], [1], [0, 0, 1, 1], [], []>} : vector<7x7xf32>, vector<7x8xf32>, vector<7x8xf32> -> vector<7x8xf32>
    %1153 = arith.addf %1144, %1152 : vector<7x8xf32>
    %1154 = tpu.reciprocal %1150 {approx = true} : vector<7x1xf32> -> vector<7x1xf32>
    %1155 = vector.broadcast %1154 : vector<7x1xf32> to vector<7x8xf32>
    %1156 = arith.mulf %1153, %1155 : vector<7x8xf32>
    %1157 = vector.extract_strided_slice %910 {offsets = [24, 0], sizes = [8, 32], strides = [1, 1]} : vector<32x32xf32> to vector<8x32xf32>
    %cst_503 = arith.constant dense<0.000000e+00> : vector<7x32xf32>
    %1158 = tpu.matmul %1156, %1157, %cst_503 {dimension_numbers = #tpu.dot_dimension_numbers<[1], [0], [0], [1], [0, 0, 1, 1], [], []>} : vector<7x8xf32>, vector<8x32xf32>, vector<7x32xf32> -> vector<7x32xf32>
    %1159 = arith.addf %1097, %1158 : vector<7x32xf32>
    %1160 = arith.addf %853, %1159 : vector<7x32xf32>
    %c1_504 = arith.constant 1 : index
    %c0_505 = arith.constant 0 : index
    %c0_506 = arith.constant 0 : index
    %1161 = vector.load %arg18[%c1_504, %c0_505, %c0_506] : memref<2x1x32xf32, #tpu.memory_space<vmem>>, vector<1x1x32xf32>
    %1162 = vector.shape_cast %1161 : vector<1x1x32xf32> to vector<1x32xf32>
    %1163 = vector.broadcast %1162 : vector<1x32xf32> to vector<7x32xf32>
    %1164 = arith.addf %1160, %1163 : vector<7x32xf32>
    %c1_507 = arith.constant 1 : index
    %c0_508 = arith.constant 0 : index
    %c0_509 = arith.constant 0 : index
    %1165 = vector.load %arg19[%c1_507, %c0_508, %c0_509] : memref<2x1x32xf32, #tpu.memory_space<vmem>>, vector<1x1x32xf32>
    %1166 = vector.shape_cast %1165 : vector<1x1x32xf32> to vector<1x32xf32>
    %c1_510 = arith.constant 1 : index
    %c0_511 = arith.constant 0 : index
    %c0_512 = arith.constant 0 : index
    %1167 = vector.load %arg20[%c1_510, %c0_511, %c0_512] : memref<2x1x32xf32, #tpu.memory_space<vmem>>, vector<1x1x32xf32>
    %1168 = vector.shape_cast %1167 : vector<1x1x32xf32> to vector<1x32xf32>
    %cst_513 = arith.constant dense<0.000000e+00> : vector<7xf32>
    %1169 = vector.multi_reduction <add>, %1164, %cst_513 [1] : vector<7x32xf32> to vector<7xf32>
    %1170 = vector.shape_cast %1169 : vector<7xf32> to vector<7x1xf32>
    %cst_514 = arith.constant 3.200000e+01 : f32
    %1171 = vector.broadcast %cst_514 : f32 to vector<7x1xf32>
    %1172 = arith.divf %1170, %1171 : vector<7x1xf32>
    %1173 = vector.broadcast %1172 : vector<7x1xf32> to vector<7x32xf32>
    %1174 = arith.subf %1164, %1173 : vector<7x32xf32>
    %1175 = arith.mulf %1174, %1174 : vector<7x32xf32>
    %cst_515 = arith.constant dense<0.000000e+00> : vector<7xf32>
    %1176 = vector.multi_reduction <add>, %1175, %cst_515 [1] : vector<7x32xf32> to vector<7xf32>
    %1177 = vector.shape_cast %1176 : vector<7xf32> to vector<7x1xf32>
    %cst_516 = arith.constant 3.200000e+01 : f32
    %1178 = vector.broadcast %cst_516 : f32 to vector<7x1xf32>
    %1179 = arith.divf %1177, %1178 : vector<7x1xf32>
    %1180 = vector.broadcast %1172 : vector<7x1xf32> to vector<7x32xf32>
    %1181 = arith.subf %1164, %1180 : vector<7x32xf32>
    %cst_517 = arith.constant 9.99999974E-6 : f32
    %1182 = vector.broadcast %cst_517 : f32 to vector<7x1xf32>
    %1183 = arith.addf %1179, %1182 : vector<7x1xf32>
    %1184 = math.rsqrt %1183 : vector<7x1xf32>
    %1185 = vector.broadcast %1184 : vector<7x1xf32> to vector<7x32xf32>
    %1186 = arith.mulf %1181, %1185 : vector<7x32xf32>
    %1187 = vector.broadcast %1166 : vector<1x32xf32> to vector<7x32xf32>
    %1188 = arith.mulf %1186, %1187 : vector<7x32xf32>
    %1189 = vector.broadcast %1168 : vector<1x32xf32> to vector<7x32xf32>
    %1190 = arith.addf %1188, %1189 : vector<7x32xf32>
    %c1_518 = arith.constant 1 : index
    %c0_519 = arith.constant 0 : index
    %c0_520 = arith.constant 0 : index
    %1191 = vector.load %arg21[%c1_518, %c0_519, %c0_520] : memref<2x32x64xf32, #tpu.memory_space<vmem>>, vector<1x32x64xf32>
    %1192 = vector.shape_cast %1191 : vector<1x32x64xf32> to vector<32x64xf32>
    %cst_521 = arith.constant dense<0.000000e+00> : vector<7x64xf32>
    %1193 = tpu.matmul %1190, %1192, %cst_521 {dimension_numbers = #tpu.dot_dimension_numbers<[1], [0], [0], [1], [0, 0, 1, 1], [], []>} : vector<7x32xf32>, vector<32x64xf32>, vector<7x64xf32> -> vector<7x64xf32>
    %c1_522 = arith.constant 1 : index
    %c0_523 = arith.constant 0 : index
    %c0_524 = arith.constant 0 : index
    %1194 = vector.load %arg22[%c1_522, %c0_523, %c0_524] : memref<2x1x64xf32, #tpu.memory_space<vmem>>, vector<1x1x64xf32>
    %1195 = vector.shape_cast %1194 : vector<1x1x64xf32> to vector<1x64xf32>
    %1196 = vector.broadcast %1195 : vector<1x64xf32> to vector<7x64xf32>
    %1197 = arith.addf %1193, %1196 : vector<7x64xf32>
    %1198 = arith.mulf %1197, %1197 : vector<7x64xf32>
    %1199 = arith.mulf %1197, %1198 : vector<7x64xf32>
    %cst_525 = arith.constant 4.471500e-02 : f32
    %1200 = vector.broadcast %cst_525 : f32 to vector<7x64xf32>
    %1201 = arith.mulf %1200, %1199 : vector<7x64xf32>
    %1202 = arith.addf %1197, %1201 : vector<7x64xf32>
    %cst_526 = arith.constant 0.797884583 : f32
    %1203 = vector.broadcast %cst_526 : f32 to vector<7x64xf32>
    %1204 = arith.mulf %1203, %1202 : vector<7x64xf32>
    %1205 = math.tanh %1204 : vector<7x64xf32>
    %cst_527 = arith.constant 1.000000e+00 : f32
    %1206 = vector.broadcast %cst_527 : f32 to vector<7x64xf32>
    %1207 = arith.addf %1206, %1205 : vector<7x64xf32>
    %cst_528 = arith.constant 5.000000e-01 : f32
    %1208 = vector.broadcast %cst_528 : f32 to vector<7x64xf32>
    %1209 = arith.mulf %1208, %1207 : vector<7x64xf32>
    %1210 = arith.mulf %1197, %1209 : vector<7x64xf32>
    %c1_529 = arith.constant 1 : index
    %c0_530 = arith.constant 0 : index
    %c0_531 = arith.constant 0 : index
    %1211 = vector.load %arg23[%c1_529, %c0_530, %c0_531] : memref<2x64x32xf32, #tpu.memory_space<vmem>>, vector<1x64x32xf32>
    %1212 = vector.shape_cast %1211 : vector<1x64x32xf32> to vector<64x32xf32>
    %cst_532 = arith.constant dense<0.000000e+00> : vector<7x32xf32>
    %1213 = tpu.matmul %1210, %1212, %cst_532 {dimension_numbers = #tpu.dot_dimension_numbers<[1], [0], [0], [1], [0, 0, 1, 1], [], []>} : vector<7x64xf32>, vector<64x32xf32>, vector<7x32xf32> -> vector<7x32xf32>
    %1214 = arith.addf %1164, %1213 : vector<7x32xf32>
    %c1_533 = arith.constant 1 : index
    %c0_534 = arith.constant 0 : index
    %c0_535 = arith.constant 0 : index
    %1215 = vector.load %arg24[%c1_533, %c0_534, %c0_535] : memref<2x1x32xf32, #tpu.memory_space<vmem>>, vector<1x1x32xf32>
    %1216 = vector.shape_cast %1215 : vector<1x1x32xf32> to vector<1x32xf32>
    %1217 = vector.broadcast %1216 : vector<1x32xf32> to vector<7x32xf32>
    %1218 = arith.addf %1214, %1217 : vector<7x32xf32>
    %c0_536 = arith.constant 0 : index
    %c0_537 = arith.constant 0 : index
    %1219 = vector.load %arg25[%c0_536, %c0_537] : memref<1x32xf32, #tpu.memory_space<vmem>>, vector<1x32xf32>
    %c0_538 = arith.constant 0 : index
    %c0_539 = arith.constant 0 : index
    %1220 = vector.load %arg26[%c0_538, %c0_539] : memref<1x32xf32, #tpu.memory_space<vmem>>, vector<1x32xf32>
    %cst_540 = arith.constant dense<0.000000e+00> : vector<7xf32>
    %1221 = vector.multi_reduction <add>, %1218, %cst_540 [1] : vector<7x32xf32> to vector<7xf32>
    %1222 = vector.shape_cast %1221 : vector<7xf32> to vector<7x1xf32>
    %cst_541 = arith.constant 3.200000e+01 : f32
    %1223 = vector.broadcast %cst_541 : f32 to vector<7x1xf32>
    %1224 = arith.divf %1222, %1223 : vector<7x1xf32>
    %1225 = vector.broadcast %1224 : vector<7x1xf32> to vector<7x32xf32>
    %1226 = arith.subf %1218, %1225 : vector<7x32xf32>
    %1227 = arith.mulf %1226, %1226 : vector<7x32xf32>
    %cst_542 = arith.constant dense<0.000000e+00> : vector<7xf32>
    %1228 = vector.multi_reduction <add>, %1227, %cst_542 [1] : vector<7x32xf32> to vector<7xf32>
    %1229 = vector.shape_cast %1228 : vector<7xf32> to vector<7x1xf32>
    %cst_543 = arith.constant 3.200000e+01 : f32
    %1230 = vector.broadcast %cst_543 : f32 to vector<7x1xf32>
    %1231 = arith.divf %1229, %1230 : vector<7x1xf32>
    %1232 = vector.broadcast %1224 : vector<7x1xf32> to vector<7x32xf32>
    %1233 = arith.subf %1218, %1232 : vector<7x32xf32>
    %cst_544 = arith.constant 9.99999974E-6 : f32
    %1234 = vector.broadcast %cst_544 : f32 to vector<7x1xf32>
    %1235 = arith.addf %1231, %1234 : vector<7x1xf32>
    %1236 = math.rsqrt %1235 : vector<7x1xf32>
    %1237 = vector.broadcast %1236 : vector<7x1xf32> to vector<7x32xf32>
    %1238 = arith.mulf %1233, %1237 : vector<7x32xf32>
    %1239 = vector.broadcast %1219 : vector<1x32xf32> to vector<7x32xf32>
    %1240 = arith.mulf %1238, %1239 : vector<7x32xf32>
    %1241 = vector.broadcast %1220 : vector<1x32xf32> to vector<7x32xf32>
    %1242 = arith.addf %1240, %1241 : vector<7x32xf32>
    %c0_545 = arith.constant 0 : index
    %c0_546 = arith.constant 0 : index
    %1243 = vector.load %arg27[%c0_545, %c0_546] : memref<32x128xf32, #tpu.memory_space<vmem>>, vector<32x128xf32>
    %cst_547 = arith.constant dense<0.000000e+00> : vector<7x128xf32>
    %1244 = tpu.matmul %1242, %1243, %cst_547 {dimension_numbers = #tpu.dot_dimension_numbers<[1], [0], [0], [1], [0, 0, 1, 1], [], []>} : vector<7x32xf32>, vector<32x128xf32>, vector<7x128xf32> -> vector<7x128xf32>
    %c0_548 = arith.constant 0 : index
    %c0_549 = arith.constant 0 : index
    %1245 = vector.load %arg28[%c0_548, %c0_549] : memref<1x128xf32, #tpu.memory_space<vmem>>, vector<1x128xf32>
    %1246 = vector.broadcast %1245 : vector<1x128xf32> to vector<7x128xf32>
    %1247 = arith.addf %1244, %1246 : vector<7x128xf32>
    %cst_550 = arith.constant dense<0xFF800000> : vector<7xf32>
    %1248 = vector.multi_reduction <maximumf>, %1247, %cst_550 [1] : vector<7x128xf32> to vector<7xf32>
    %1249 = vector.shape_cast %1248 : vector<7xf32> to vector<7x1xf32>
    %1250 = vector.broadcast %1249 : vector<7x1xf32> to vector<7x128xf32>
    %1251 = arith.subf %1247, %1250 : vector<7x128xf32>
    %1252 = math.exp %1251 : vector<7x128xf32>
    %cst_551 = arith.constant dense<0.000000e+00> : vector<7xf32>
    %1253 = vector.multi_reduction <add>, %1252, %cst_551 [1] : vector<7x128xf32> to vector<7xf32>
    %1254 = vector.shape_cast %1253 : vector<7xf32> to vector<7x1xf32>
    %1255 = math.log %1254 : vector<7x1xf32>
    %1256 = arith.addf %1255, %1249 : vector<7x1xf32>
    %1257 = vector.extract_strided_slice %471 {offsets = [1, 0], sizes = [7, 1], strides = [1, 1]} : vector<8x1xi32> to vector<7x1xi32>
    %1258 = tpu.iota {dimensions = array<i32: 1>} : vector<7x128xi32>
    %1259 = vector.broadcast %1257 : vector<7x1xi32> to vector<7x128xi32>
    %1260 = arith.cmpi eq, %1258, %1259 : vector<7x128xi32>
    %1261 = arith.extui %1260 : vector<7x128xi1> to vector<7x128xi32>
    %1262 = arith.sitofp %1261 : vector<7x128xi32> to vector<7x128xf32>
    %1263 = arith.mulf %1247, %1262 : vector<7x128xf32>
    %cst_552 = arith.constant dense<0.000000e+00> : vector<7xf32>
    %1264 = vector.multi_reduction <add>, %1263, %cst_552 [1] : vector<7x128xf32> to vector<7xf32>
    %1265 = vector.shape_cast %1264 : vector<7xf32> to vector<7x1xf32>
    %1266 = arith.subf %1265, %1256 : vector<7x1xf32>
    %c0_553 = arith.constant 0 : index
    %c0_554 = arith.constant 0 : index
    %c0_555 = arith.constant 0 : index
    %1267 = vector.load %arg5[%c0_553, %c0_554, %c0_555] : memref<1x8x1xf32, #tpu.memory_space<vmem>>, vector<1x8x1xf32>
    %1268 = vector.shape_cast %1267 : vector<1x8x1xf32> to vector<8x1xf32>
    %1269 = vector.extract_strided_slice %1268 {offsets = [0, 0], sizes = [7, 1], strides = [1, 1]} : vector<8x1xf32> to vector<7x1xf32>
    %cst_556 = arith.constant 0.000000e+00 : f32
    %1270 = vector.broadcast %cst_556 : f32 to vector<7x1xf32>
    %1271 = arith.subf %1270, %1266 : vector<7x1xf32>
    %1272 = arith.mulf %1271, %1269 : vector<7x1xf32>
    %cst_557 = arith.constant dense<0.000000e+00> : vector<1xf32>
    %1273 = vector.multi_reduction <add>, %1272, %cst_557 [0] : vector<7x1xf32> to vector<1xf32>
    %1274 = vector.shape_cast %1273 : vector<1xf32> to vector<1x1xf32>
    %cst_558 = arith.constant dense<0.000000e+00> : vector<1xf32>
    %1275 = vector.multi_reduction <add>, %1269, %cst_558 [0] : vector<7x1xf32> to vector<1xf32>
    %1276 = vector.shape_cast %1275 : vector<1xf32> to vector<1x1xf32>
    %1277 = tpu.iota {dimensions = array<i32: 1>} : vector<1x128xi32>
    %c0_i32 = arith.constant 0 : i32
    %1278 = vector.broadcast %c0_i32 : i32 to vector<1x128xi32>
    %1279 = arith.cmpi eq, %1277, %1278 : vector<1x128xi32>
    %cst_559 = arith.constant 0.000000e+00 : f32
    %1280 = vector.shape_cast %1274 : vector<1x1xf32> to vector<1x1xf32>
    %1281 = vector.broadcast %1280 : vector<1x1xf32> to vector<1x128xf32>
    %1282 = vector.broadcast %cst_559 : f32 to vector<1x128xf32>
    %1283 = arith.select %1279, %1281, %1282 : vector<1x128xi1>, vector<1x128xf32>
    %c1_i32 = arith.constant 1 : i32
    %1284 = vector.broadcast %c1_i32 : i32 to vector<1x128xi32>
    %1285 = arith.cmpi eq, %1277, %1284 : vector<1x128xi32>
    %cst_560 = arith.constant 0.000000e+00 : f32
    %1286 = vector.shape_cast %1276 : vector<1x1xf32> to vector<1x1xf32>
    %1287 = vector.broadcast %1286 : vector<1x1xf32> to vector<1x128xf32>
    %1288 = vector.broadcast %cst_560 : f32 to vector<1x128xf32>
    %1289 = arith.select %1285, %1287, %1288 : vector<1x128xi1>, vector<1x128xf32>
    %1290 = arith.addf %1283, %1289 : vector<1x128xf32>
    %c0_561 = arith.constant 0 : index
    %c0_562 = arith.constant 0 : index
    %c0_563 = arith.constant 0 : index
    %1291 = vector.load %arg29[%c0_561, %c0_562, %c0_563] : memref<1x1x128xf32, #tpu.memory_space<vmem>>, vector<1x1x128xf32>
    %1292 = vector.shape_cast %1291 : vector<1x1x128xf32> to vector<1x128xf32>
    %1293 = vector.shape_cast %1290 : vector<1x128xf32> to vector<1x1x128xf32>
    tpu.vector_store %arg29[%c0_561, %c0_562, %c0_563], %1293 {strides = array<i32>} : memref<1x1x128xf32, #tpu.memory_space<vmem>>, vector<1x1x128xf32>,
    return
  }
  func.func @transform_0(%arg0: i32) -> (i32, i32, i32) {
    %c0_i32 = arith.constant 0 : i32
    %c0_i32_0 = arith.constant 0 : i32
    %c0_i32_1 = arith.constant 0 : i32
    return %arg0, %c0_i32, %c0_i32_0 : i32, i32, i32
  }
  func.func @transform_1(%arg0: i32) -> (i32, i32, i32) {
    %c0_i32 = arith.constant 0 : i32
    %c0_i32_0 = arith.constant 0 : i32
    %c0_i32_1 = arith.constant 0 : i32
    return %arg0, %c0_i32, %c0_i32_0 : i32, i32, i32
  }
  func.func @transform_2(%arg0: i32) -> (i32, i32, i32) {
    %c0_i32 = arith.constant 0 : i32
    %c0_i32_0 = arith.constant 0 : i32
    %c0_i32_1 = arith.constant 0 : i32
    return %arg0, %c0_i32, %c0_i32_0 : i32, i32, i32
  }
  func.func @transform_3(%arg0: i32) -> (i32, i32, i32) {
    %c0_i32 = arith.constant 0 : i32
    %c0_i32_0 = arith.constant 0 : i32
    %c0_i32_1 = arith.constant 0 : i32
    return %arg0, %c0_i32, %c0_i32_0 : i32, i32, i32
  }
  func.func @transform_4(%arg0: i32) -> (i32, i32, i32) {
    %c0_i32 = arith.constant 0 : i32
    %c0_i32_0 = arith.constant 0 : i32
    %c0_i32_1 = arith.constant 0 : i32
    return %arg0, %c0_i32, %c0_i32_0 : i32, i32, i32
  }
  func.func @transform_5(%arg0: i32) -> (i32, i32) {
    %c0_i32 = arith.constant 0 : i32
    %c0_i32_0 = arith.constant 0 : i32
    %c0_i32_1 = arith.constant 0 : i32
    return %c0_i32, %c0_i32_0 : i32, i32
  }
  func.func @transform_6(%arg0: i32) -> (i32, i32, i32, i32) {
    %c0_i32 = arith.constant 0 : i32
    %c0_i32_0 = arith.constant 0 : i32
    %c0_i32_1 = arith.constant 0 : i32
    %c0_i32_2 = arith.constant 0 : i32
    %c0_i32_3 = arith.constant 0 : i32
    return %c0_i32, %c0_i32_0, %c0_i32_1, %c0_i32_2 : i32, i32, i32, i32
  }
  func.func @transform_7(%arg0: i32) -> (i32, i32) {
    %c0_i32 = arith.constant 0 : i32
    %c0_i32_0 = arith.constant 0 : i32
    %c0_i32_1 = arith.constant 0 : i32
    return %c0_i32, %c0_i32_0 : i32, i32
  }
  func.func @transform_8(%arg0: i32) -> (i32, i32, i32) {
    %c0_i32 = arith.constant 0 : i32
    %c0_i32_0 = arith.constant 0 : i32
    %c0_i32_1 = arith.constant 0 : i32
    %c0_i32_2 = arith.constant 0 : i32
    return %c0_i32, %c0_i32_0, %c0_i32_1 : i32, i32, i32
  }
  func.func @transform_9(%arg0: i32) -> (i32, i32, i32) {
    %c0_i32 = arith.constant 0 : i32
    %c0_i32_0 = arith.constant 0 : i32
    %c0_i32_1 = arith.constant 0 : i32
    %c0_i32_2 = arith.constant 0 : i32
    return %c0_i32, %c0_i32_0, %c0_i32_1 : i32, i32, i32
  }
  func.func @transform_10(%arg0: i32) -> (i32, i32, i32) {
    %c0_i32 = arith.constant 0 : i32
    %c0_i32_0 = arith.constant 0 : i32
    %c0_i32_1 = arith.constant 0 : i32
    %c0_i32_2 = arith.constant 0 : i32
    return %c0_i32, %c0_i32_0, %c0_i32_1 : i32, i32, i32
  }
  func.func @transform_11(%arg0: i32) -> (i32, i32, i32) {
    %c0_i32 = arith.constant 0 : i32
    %c0_i32_0 = arith.constant 0 : i32
    %c0_i32_1 = arith.constant 0 : i32
    %c0_i32_2 = arith.constant 0 : i32
    return %c0_i32, %c0_i32_0, %c0_i32_1 : i32, i32, i32
  }
  func.func @transform_12(%arg0: i32) -> (i32, i32, i32) {
    %c0_i32 = arith.constant 0 : i32
    %c0_i32_0 = arith.constant 0 : i32
    %c0_i32_1 = arith.constant 0 : i32
    %c0_i32_2 = arith.constant 0 : i32
    return %c0_i32, %c0_i32_0, %c0_i32_1 : i32, i32, i32
  }
  func.func @transform_13(%arg0: i32) -> (i32, i32, i32) {
    %c0_i32 = arith.constant 0 : i32
    %c0_i32_0 = arith.constant 0 : i32
    %c0_i32_1 = arith.constant 0 : i32
    %c0_i32_2 = arith.constant 0 : i32
    return %c0_i32, %c0_i32_0, %c0_i32_1 : i32, i32, i32
  }
  func.func @transform_14(%arg0: i32) -> (i32, i32, i32) {
    %c0_i32 = arith.constant 0 : i32
    %c0_i32_0 = arith.constant 0 : i32
    %c0_i32_1 = arith.constant 0 : i32
    %c0_i32_2 = arith.constant 0 : i32
    return %c0_i32, %c0_i32_0, %c0_i32_1 : i32, i32, i32
  }
  func.func @transform_15(%arg0: i32) -> (i32, i32, i32) {
    %c0_i32 = arith.constant 0 : i32
    %c0_i32_0 = arith.constant 0 : i32
    %c0_i32_1 = arith.constant 0 : i32
    %c0_i32_2 = arith.constant 0 : i32
    return %c0_i32, %c0_i32_0, %c0_i32_1 : i32, i32, i32
  }
  func.func @transform_16(%arg0: i32) -> (i32, i32, i32) {
    %c0_i32 = arith.constant 0 : i32
    %c0_i32_0 = arith.constant 0 : i32
    %c0_i32_1 = arith.constant 0 : i32
    %c0_i32_2 = arith.constant 0 : i32
    return %c0_i32, %c0_i32_0, %c0_i32_1 : i32, i32, i32
  }
  func.func @transform_17(%arg0: i32) -> (i32, i32, i32) {
    %c0_i32 = arith.constant 0 : i32
    %c0_i32_0 = arith.constant 0 : i32
    %c0_i32_1 = arith.constant 0 : i32
    %c0_i32_2 = arith.constant 0 : i32
    return %c0_i32, %c0_i32_0, %c0_i32_1 : i32, i32, i32
  }
  func.func @transform_18(%arg0: i32) -> (i32, i32, i32) {
    %c0_i32 = arith.constant 0 : i32
    %c0_i32_0 = arith.constant 0 : i32
    %c0_i32_1 = arith.constant 0 : i32
    %c0_i32_2 = arith.constant 0 : i32
    return %c0_i32, %c0_i32_0, %c0_i32_1 : i32, i32, i32
  }
  func.func @transform_19(%arg0: i32) -> (i32, i32, i32) {
    %c0_i32 = arith.constant 0 : i32
    %c0_i32_0 = arith.constant 0 : i32
    %c0_i32_1 = arith.constant 0 : i32
    %c0_i32_2 = arith.constant 0 : i32
    return %c0_i32, %c0_i32_0, %c0_i32_1 : i32, i32, i32
  }
  func.func @transform_20(%arg0: i32) -> (i32, i32, i32) {
    %c0_i32 = arith.constant 0 : i32
    %c0_i32_0 = arith.constant 0 : i32
    %c0_i32_1 = arith.constant 0 : i32
    %c0_i32_2 = arith.constant 0 : i32
    return %c0_i32, %c0_i32_0, %c0_i32_1 : i32, i32, i32
  }
  func.func @transform_21(%arg0: i32) -> (i32, i32, i32) {
    %c0_i32 = arith.constant 0 : i32
    %c0_i32_0 = arith.constant 0 : i32
    %c0_i32_1 = arith.constant 0 : i32
    %c0_i32_2 = arith.constant 0 : i32
    return %c0_i32, %c0_i32_0, %c0_i32_1 : i32, i32, i32
  }
  func.func @transform_22(%arg0: i32) -> (i32, i32, i32) {
    %c0_i32 = arith.constant 0 : i32
    %c0_i32_0 = arith.constant 0 : i32
    %c0_i32_1 = arith.constant 0 : i32
    %c0_i32_2 = arith.constant 0 : i32
    return %c0_i32, %c0_i32_0, %c0_i32_1 : i32, i32, i32
  }
  func.func @transform_23(%arg0: i32) -> (i32, i32, i32) {
    %c0_i32 = arith.constant 0 : i32
    %c0_i32_0 = arith.constant 0 : i32
    %c0_i32_1 = arith.constant 0 : i32
    %c0_i32_2 = arith.constant 0 : i32
    return %c0_i32, %c0_i32_0, %c0_i32_1 : i32, i32, i32
  }
  func.func @transform_24(%arg0: i32) -> (i32, i32) {
    %c0_i32 = arith.constant 0 : i32
    %c0_i32_0 = arith.constant 0 : i32
    %c0_i32_1 = arith.constant 0 : i32
    return %c0_i32, %c0_i32_0 : i32, i32
  }
  func.func @transform_25(%arg0: i32) -> (i32, i32) {
    %c0_i32 = arith.constant 0 : i32
    %c0_i32_0 = arith.constant 0 : i32
    %c0_i32_1 = arith.constant 0 : i32
    return %c0_i32, %c0_i32_0 : i32, i32
  }
  func.func @transform_26(%arg0: i32) -> (i32, i32) {
    %c0_i32 = arith.constant 0 : i32
    %c0_i32_0 = arith.constant 0 : i32
    %c0_i32_1 = arith.constant 0 : i32
    return %c0_i32, %c0_i32_0 : i32, i32
  }
  func.func @transform_27(%arg0: i32) -> (i32, i32) {
    %c0_i32 = arith.constant 0 : i32
    %c0_i32_0 = arith.constant 0 : i32
    %c0_i32_1 = arith.constant 0 : i32
    return %c0_i32, %c0_i32_0 : i32, i32
  }
  func.func @transform_28(%arg0: i32) -> (i32, i32, i32) {
    %c0_i32 = arith.constant 0 : i32
    %c0_i32_0 = arith.constant 0 : i32
    %c0_i32_1 = arith.constant 0 : i32
    return %arg0, %c0_i32, %c0_i32_0 : i32, i32, i32
  }
}

</mosaic_0001>

<bundles_post_ra>
// kernel: llm_forward.1
= control target key start
LH: loop header
LB: loop body
LE: loop exit
PB: predicated region body
PF: predicated region fallthrough
CT: control target
= control target key end

     0   :  { %s13594_s0 = inlined_call_operand.vmem [shape: s32[2,8,1], index: 0, kind: input, shape index: {}]   ;;  %s13595_s1 = inlined_call_operand.vmem [shape: s32[2,8,1], index: 1, kind: input, shape index: {}]   ;;  %s13596_s2 = inlined_call_operand.vmem [shape: f32[2,1,8], index: 2, kind: input, shape index: {}]   ;;  %s13597_s3 = inlined_call_operand.vmem [shape: f32[2,1,8], index: 3, kind: input, shape index: {}]   ;;  %s13598_s4 = inlined_call_operand.vmem [shape: f32[2,8,1], index: 4, kind: input, shape index: {}]   ;;  %s13599_s5 = inlined_call_operand.vmem [shape: f32[4,1], index: 5, kind: input, shape index: {}]   ;;  %s13600_s6 = inlined_call_operand.vmem [shape: f32[3,4,4,32], index: 6, kind: input, shape index: {}]   ;;  %s13601_s7 = inlined_call_operand.vmem [shape: f32[50,32], index: 7, kind: input, shape index: {}]   ;;  %s13602_s8 = inlined_call_operand.hbm [shape: f32[2,1,32], index: 8, kind: input, shape index: {}]   ;;  %s13603_s9 = inlined_call_operand.hbm [shape: f32[2,1,32], index: 9, kind: input, shape index: {}]   ;;  %s13604_s10 = inlined_call_operand.vmem [shape: f32[2,32,32], index: 10, kind: input, shape index: {}]   ;;  %s13605_s11 = inlined_call_operand.vmem [shape: f32[2,32,32], index: 11, kind: input, shape index: {}]   ;;  %s13606_s12 = inlined_call_operand.vmem [shape: f32[2,32,32], index: 12, kind: input, shape index: {}]   ;;  %s13607_s13 = inlined_call_operand.hbm [shape: f32[2,1,32], index: 13, kind: input, shape index: {}]   ;;  %s13608_s14 = inlined_call_operand.hbm [shape: f32[2,1,32], index: 14, kind: input, shape index: {}]   ;;  %s13609_s15 = inlined_call_operand.hbm [shape: f32[2,1,32], index: 15, kind: input, shape index: {}]   ;;  %s13610_s16 = inlined_call_operand.vmem [shape: f32[2,32,32], index: 16, kind: input, shape index: {}]   ;;  %s13611_s17 = inlined_call_operand.hbm [shape: f32[2,1,32], index: 17, kind: input, shape index: {}]   ;;  %s13612_s18 = inlined_call_operand.hbm [shape: f32[2,1,32], index: 18, kind: input, shape index: {}]   ;;  %s13613_s19 = inlined_call_operand.hbm [shape: f32[2,1,32], index: 19, kind: input, shape index: {}]   ;;  %s13614_s20 = inlined_call_operand.vmem [shape: f32[2,32,64], index: 20, kind: input, shape index: {}]   ;;  %s13615_s21 = inlined_call_operand.hbm [shape: f32[2,1,64], index: 21, kind: input, shape index: {}]   ;;  %s13616_s22 = inlined_call_operand.vmem [shape: f32[2,64,32], index: 22, kind: input, shape index: {}]   ;;  %s13617_s23 = inlined_call_operand.hbm [shape: f32[2,1,32], index: 23, kind: input, shape index: {}]   ;;  %s13618_s24 = inlined_call_operand.vmem [shape: f32[1,32], index: 24, kind: input, shape index: {}]   ;;  %s13619_s25 = inlined_call_operand.hbm [shape: f32[1,32], index: 25, kind: input, shape index: {}]   ;;  %s13620_s26 = inlined_call_operand.hbm [shape: f32[32,128], index: 26, kind: input, shape index: {}]   ;;  %s13621_s27 = inlined_call_operand.hbm [shape: f32[1,128], index: 27, kind: input, shape index: {}]   ;;  %s13622_s28 = inlined_call_operand.vmem [shape: f32[2,1,128], index: 28, kind: output, shape index: {}]  }
   0x1   :  { %13641 = sst [smem:[#allocation30_spill]] %s13594_s0 }
   0x2   :  { %13642 = sst [smem:[#allocation31_spill]] %s13595_s1 }
   0x3   :  { %13643 = sst [smem:[#allocation32_spill]] %s13596_s2 }
   0x4   :  { %13644 = sst [smem:[#allocation33_spill]] %s13597_s3 }
   0x5   :  { %13645 = sst [smem:[#allocation34_spill]] %s13598_s4 }
   0x6   :  { %13646 = sst [smem:[#allocation35_spill]] %s13599_s5 }
   0x7   :  { %13647 = sst [smem:[#allocation36_spill]] %s13600_s6 }
   0x8   :  { %13648 = sst [smem:[#allocation37_spill]] %s13601_s7 }
   0x9   :  { %13649 = sst [smem:[#allocation38_spill]] %s13602_s8 }
   0xa   :  { %13650 = sst [smem:[#allocation39_spill]] %s13603_s9 }
   0xb   :  { %13651 = sst [smem:[#allocation40_spill]] %s13604_s10 }
   0xc   :  { %13652 = sst [smem:[#allocation41_spill]] %s13605_s11 }
   0xd   :  { %13653 = sst [smem:[#allocation42_spill]] %s13606_s12 }
   0xe   :  { %13654 = sst [smem:[#allocation43_spill]] %s13608_s14 }
   0xf   :  { %13655 = sst [smem:[#allocation44_spill]] %s13610_s16 }
  0x10   :  { %13656 = sst [smem:[#allocation45_spill]] %s13611_s17 }
  0x11   :  { %13657 = sst [smem:[#allocation46_spill]] %s13614_s20 }
  0x12   :  { %13658 = sst [smem:[#allocation47_spill]] %s13616_s22 }
  0x13   :  { %13659 = sst [smem:[#allocation48_spill]] %s13618_s24 }
  0x14   :  { %13660 = sst [smem:[#allocation49_spill]] %s13622_s28 }
  0x15   :  { %33 = vsyncpa [#allocation3], 0 }
  0x16   :  { %34 = vsyncpa [#allocation5], 0 }
  0x17   :  { %35 = vsyncpa [#allocation8], 0 }
  0x18   :  { %36 = vsyncpa [#allocation11], 0 }
  0x19   :  { %37 = vsyncpa [#allocation14], 0 }
  0x1a   :  { %38 = vsyncpa [#allocation17], 0 }
  0x1b   :  { %39 = vsyncpa [#allocation20], 0  ;;  %s11975_s8 = smov 0  }
  0x1c LB: > { %13661 = sst [smem:[#allocation29_spill]] %s11804_s8  ;;  %s11981_s5 = sadd.s32 4294967295, %s11804_s8   ;;  %s11804_s8 = sphi %s11975_s8, %s45_s8  }
  0x1d   : > { %p9748_p0 = scmp.ge.s32.totalorder %s11804_s8, 1  ;;  %p689_p1 = scmp.lt.s32.totalorder %s11804_s8, 3 }
  0x1e   : > { %p13634_p2 = scmp.eq.s32.totalorder %s11981_s5, 0  ;;  %s11806_s30 = smov [#allocation4]  }
  0x1f   : > { %p11986_p3 = pnand %p9748_p0, %p689_p1  ;;  %s723_s3 = sshll.u32 %s11806_s30, 4  ;;  %s11990_s3 = int_to_ptr.vmem [resolvable:$true] %s723_s3 }
  0x20   : > { %s11807_s6 = smov [#allocation7]   ;;  %s11808_s11 = smov [#allocation10]  }
  0x21   : > { %s13662_s9 = scalar_select %p11986_p3, 1, 0 }
  0x22   : > { %p11173_p4 = pneg %p11986_p3  ;;  %s758_s10 = sshll.u32 %s11807_s6, 4  ;;  %s11994_s10 = int_to_ptr.vmem [resolvable:$true] %s758_s10 }
  0x23   : > { %s787_s29 = sshll.u32 %s11808_s11, 4  ;;  %s11809_s2 = smov [#allocation13]   ;;  %s12002_s29 = int_to_ptr.vmem [resolvable:$true] %s787_s29 }
  0x24   : > { %p11998_p5 = pnand %p13634_p2, %p11173_p4  ;;  %s12004_s7 = sshll.u32 %s11809_s2, 4  ;;  %s814_s7 = int_to_ptr.vmem [resolvable:$true] %s12004_s7 }
  0x25   : > { %s13664_s4 = sld [smem:[#allocation39_spill]] }
  0x26   : > { %p12014_p7 = pneg %p11998_p5 }
  0x2b   : > { %s11406_s30 = scalar_lea.hbm %s13664_s4, 32 }
  0x2c   : > { %p11407_p6 = scmp.ne.s32.totalorder %s13664_s4, %s11406_s30  ;;  %p11413_p10 = scmp.lt.u32.totalorder %s11406_s30, %s13664_s4 }
  0x2e   : > { %p11409_p8 = pnand %p12014_p7, %p11407_p6 }
  0x30   : > { %p11410_p9 = pneg %p11409_p8 }
  0x32   : > { %p11415_p11 = pnand %p11413_p10, %p11410_p9 }
  0x34   : > { %11418 = shalt.err (!%p11415_p11)
}
  0x35   : > { %s11419_s8 = scalar_lea.vmem %s11990_s3, 32  ;;  %p11427_p1 = scmp.lt.s32.totalorder %s11990_s3, %s11990_s3 }
  0x36   : > { %p11420_p12 = scmp.ne.s32.totalorder %s11990_s3, %s11419_s8  ;;  %p11428_p4 = scmp.lt.s32.totalorder %s11419_s8, %s11419_s8 }
  0x38   : > { %p11422_p13 = pnand %p11420_p12, %p12014_p7  ;;  %p11429_p6 = por %p11428_p4, %p11427_p1 }
  0x3a   : > { %p11423_p0 = pneg %p11422_p13 }
  0x3c   : > { %p11430_p8 = pnand %p11429_p6, %p11423_p0 }
  0x3e   : > { %11433 = shalt.err (!%p11430_p8)
}
  0x3f   : > { %s13636_s12 = smov 16   ;;  %s13638_s1 = smov 1  }
  0x40   : > { %11179 = dma.hbm_to_vmem [thread:$0]  (!%p11998_p5), %s13664_s4, 32, %s11990_s3, [#allocation5], %s13636_s12, %s13636_s12, %s13638_s1  }
  0x41   : > { %s13666_s14 = sld [smem:[#allocation43_spill]] }
  0x47   : > { %s11434_s8 = scalar_lea.hbm %s13666_s14, 32 }
  0x48   : > { %p11435_p9 = scmp.ne.s32.totalorder %s13666_s14, %s11434_s8  ;;  %p11441_p12 = scmp.lt.u32.totalorder %s11434_s8, %s13666_s14 }
  0x4a   : > { %p11437_p10 = pnand %p11435_p9, %p12014_p7 }
  0x4c   : > { %p11438_p11 = pneg %p11437_p10 }
  0x4e   : > { %p11443_p13 = pnand %p11441_p12, %p11438_p11 }
  0x50   : > { %11446 = shalt.err (!%p11443_p13)
}
  0x51   : > { %s11447_s3 = scalar_lea.vmem %s11994_s10, 32  ;;  %p11455_p6 = scmp.lt.s32.totalorder %s11994_s10, %s11994_s10 }
  0x52   : > { %p11448_p0 = scmp.ne.s32.totalorder %s11994_s10, %s11447_s3  ;;  %p11456_p8 = scmp.lt.s32.totalorder %s11447_s3, %s11447_s3 }
  0x54   : > { %p11450_p1 = pnand %p11448_p0, %p12014_p7  ;;  %p11457_p9 = por %p11456_p8, %p11455_p6 }
  0x56   : > { %p11451_p4 = pneg %p11450_p1 }
  0x58   : > { %p11458_p10 = pnand %p11457_p9, %p11451_p4 }
  0x5a   : > { %11461 = shalt.err (!%p11458_p10)
}
  0x5b   : > { %11185 = dma.hbm_to_vmem [thread:$0]  (!%p11998_p5), %s13666_s14, 32, %s11994_s10, [#allocation8], %s13636_s12, %s13636_s12, %s13638_s1  }
  0x5c   : > { %s13667_s17 = sld [smem:[#allocation45_spill]] }
  0x62   : > { %s11462_s30 = scalar_lea.hbm %s13667_s17, 32 }
  0x63   : > { %p11463_p11 = scmp.ne.s32.totalorder %s13667_s17, %s11462_s30  ;;  %p11469_p0 = scmp.lt.u32.totalorder %s11462_s30, %s13667_s17 }
  0x65   : > { %p11465_p12 = pnand %p11463_p11, %p12014_p7 }
  0x67   : > { %p11466_p13 = pneg %p11465_p12 }
  0x69   : > { %p11471_p1 = pnand %p11469_p0, %p11466_p13 }
  0x6b   : > { %11474 = shalt.err (!%p11471_p1)
}
  0x6c   : > { %s11475_s10 = scalar_lea.vmem %s12002_s29, 32  ;;  %p11483_p9 = scmp.lt.s32.totalorder %s12002_s29, %s12002_s29 }
  0x6d   : > { %p11476_p4 = scmp.ne.s32.totalorder %s12002_s29, %s11475_s10  ;;  %p11484_p10 = scmp.lt.s32.totalorder %s11475_s10, %s11475_s10 }
  0x6f   : > { %p11478_p6 = pnand %p11476_p4, %p12014_p7  ;;  %p11485_p11 = por %p11484_p10, %p11483_p9 }
  0x71   : > { %p11479_p8 = pneg %p11478_p6 }
  0x73   : > { %p11486_p12 = pnand %p11485_p11, %p11479_p8 }
  0x75   : > { %11489 = shalt.err (!%p11486_p12)
}
  0x76   : > { %11191 = dma.hbm_to_vmem [thread:$0]  (!%p11998_p5), %s13667_s17, 32, %s12002_s29, [#allocation11], %s13636_s12, %s13636_s12, %s13638_s1  }
  0x77   : > { %s11490_s24 = scalar_lea.hbm %s13613_s19, 32 }
  0x78   : > { %p11491_p13 = scmp.ne.s32.totalorder %s13613_s19, %s11490_s24  ;;  %p11497_p4 = scmp.lt.u32.totalorder %s11490_s24, %s13613_s19 }
  0x7a   : > { %p11493_p0 = pnand %p11491_p13, %p12014_p7 }
  0x7c   : > { %p11494_p1 = pneg %p11493_p0 }
  0x7e   : > { %p11499_p6 = pnand %p11497_p4, %p11494_p1 }
  0x80   : > { %11502 = shalt.err (!%p11499_p6)
}
  0x81   : > { %s11503_s8 = scalar_lea.vmem %s814_s7, 32  ;;  %p11511_p11 = scmp.lt.s32.totalorder %s814_s7, %s814_s7 }
  0x82   : > { %p11504_p8 = scmp.ne.s32.totalorder %s814_s7, %s11503_s8  ;;  %p11512_p12 = scmp.lt.s32.totalorder %s11503_s8, %s11503_s8 }
  0x84   : > { %p11506_p9 = pnand %p11504_p8, %p12014_p7  ;;  %p11513_p2 = por %p11512_p12, %p11511_p11 }
  0x86   : > { %p11507_p10 = pneg %p11506_p9 }
  0x88   : > { %p11514_p3 = pnand %p11513_p2, %p11507_p10 }
  0x8a   : > { %11517 = shalt.err (!%p11514_p3)
}
  0x8b   : > { %11197 = dma.hbm_to_vmem [thread:$0]  (!%p11998_p5), %s13613_s19, 32, %s814_s7, [#allocation14], %s13636_s12, %s13636_s12, %s13638_s1  }
  0x8c   : > { %s11812_s3 = smov [#allocation16]   ;;  %s11813_s20 = smov [#allocation19]  }
  0x8d   : > { %s845_s16 = sshll.u32 %s11812_s3, 4  ;;  %s872_s22 = sshll.u32 %s11813_s20, 4  ;;  %s846_s16 = int_to_ptr.vmem [resolvable:$true] %s845_s16  ;;  %s873_s22 = int_to_ptr.vmem [resolvable:$true] %s872_s22 }
  0x8e   : > { %s11518_s6 = scalar_lea.hbm %s13617_s23, 32 }
  0x8f   : > { %p11519_p2 = scmp.ne.s32.totalorder %s13617_s23, %s11518_s6  ;;  %p11525_p0 = scmp.lt.u32.totalorder %s11518_s6, %s13617_s23 }
  0x91   : > { %p11521_p3 = pnand %p11519_p2, %p12014_p7 }
  0x93   : > { %p11522_p13 = pneg %p11521_p3 }
  0x95   : > { %p11527_p1 = pnand %p11525_p0, %p11522_p13 }
  0x97   : > { %11530 = shalt.err (!%p11527_p1)
}
  0x98   : > { %s11531_s7 = scalar_lea.vmem %s846_s16, 32  ;;  %p11539_p9 = scmp.lt.s32.totalorder %s846_s16, %s846_s16 }
  0x99   : > { %p11532_p4 = scmp.ne.s32.totalorder %s846_s16, %s11531_s7  ;;  %p11540_p10 = scmp.lt.s32.totalorder %s11531_s7, %s11531_s7 }
  0x9b   : > { %p11534_p6 = pnand %p11532_p4, %p12014_p7  ;;  %p11541_p11 = por %p11540_p10, %p11539_p9 }
  0x9d   : > { %p11535_p8 = pneg %p11534_p6 }
  0x9f   : > { %p11542_p12 = pnand %p11541_p11, %p11535_p8 }
  0xa1   : > { %11545 = shalt.err (!%p11542_p12)
}
  0xa2   : > { %11203 = dma.hbm_to_vmem [thread:$0]  (!%p11998_p5), %s13617_s23, 32, %s846_s16, [#allocation17], %s13636_s12, %s13636_s12, %s13638_s1  }
  0xa3   : > { %s11546_s30 = scalar_lea.hbm %s13620_s26, 512 }
  0xa4   : > { %p11547_p2 = scmp.ne.s32.totalorder %s13620_s26, %s11546_s30  ;;  %p11553_p0 = scmp.lt.u32.totalorder %s11546_s30, %s13620_s26 }
  0xa6   : > { %p11549_p3 = pnand %p11547_p2, %p12014_p7 }
  0xa8   : > { %p11550_p13 = pneg %p11549_p3 }
  0xaa   : > { %p11555_p1 = pnand %p11553_p0, %p11550_p13 }
  0xac   : > { %11558 = shalt.err (!%p11555_p1)
}
  0xad   : > { %s11559_s29 = scalar_lea.vmem %s873_s22, 512  ;;  %p11567_p9 = scmp.lt.s32.totalorder %s873_s22, %s873_s22 }
  0xae   : > { %p11560_p4 = scmp.ne.s32.totalorder %s873_s22, %s11559_s29  ;;  %p11568_p10 = scmp.lt.s32.totalorder %s11559_s29, %s11559_s29 }
  0xb0   : > { %p11562_p6 = pnand %p11560_p4, %p12014_p7  ;;  %p11569_p11 = por %p11568_p10, %p11567_p9 }
  0xb2   : > { %p11563_p8 = pneg %p11562_p6 }
  0xb4   : > { %p11570_p12 = pnand %p11569_p11, %p11563_p8 }
  0xb6   : > { %11573 = shalt.err (!%p11570_p12)
}
  0xb7   : > { %s11814_s16 = smov 128   ;;  %s11815_s7 = smov 8  }
  0xb8   : > { %11209 = dma.hbm_to_vmem [thread:$0]  (!%p11998_p5), %s13620_s26, 512, %s873_s22, [#allocation20], %s11814_s16, %s11814_s16, %s11815_s7  }
  0xb9   : > { %s11816_s20 = smov [#allocation2]   ;;  %s11817_s30 = smov [#allocation6]  }
  0xba   : > { %s710_s24 = sshll.u32 %s11816_s20, 4  ;;  %s745_s6 = sshll.u32 %s11817_s30, 4  ;;  %s711_s24 = int_to_ptr.vmem [resolvable:$true] %s710_s24  ;;  %s746_s6 = int_to_ptr.vmem [resolvable:$true] %s745_s6 }
  0xbb   : > { %s13668_s8 = sld [smem:[#allocation38_spill]] }
  0xc1   : > { %s13669_s29 = smov %s13668_s8  ;;  %s11574_s12 = scalar_lea.hbm %s13668_s8, 32 }
  0xc2   : > { %p11575_p2 = scmp.ne.s32.totalorder %s13669_s29, %s11574_s12  ;;  %p11581_p0 = scmp.lt.u32.totalorder %s11574_s12, %s13669_s29 }
  0xc4   : > { %p11577_p3 = pnand %p11575_p2, %p12014_p7 }
  0xc6   : > { %p11578_p13 = pneg %p11577_p3 }
  0xc8   : > { %p11583_p1 = pnand %p11581_p0, %p11578_p13 }
  0xca   : > { %11586 = shalt.err (!%p11583_p1)
}
  0xcb   : > { %s11587_s22 = scalar_lea.vmem %s711_s24, 32  ;;  %p11595_p9 = scmp.lt.s32.totalorder %s711_s24, %s711_s24 }
  0xcc   : > { %p11588_p4 = scmp.ne.s32.totalorder %s711_s24, %s11587_s22  ;;  %p11596_p10 = scmp.lt.s32.totalorder %s11587_s22, %s11587_s22 }
  0xce   : > { %p11590_p6 = pnand %p11588_p4, %p12014_p7  ;;  %p11597_p11 = por %p11596_p10, %p11595_p9 }
  0xd0   : > { %p11591_p8 = pneg %p11590_p6 }
  0xd2   : > { %p11598_p12 = pnand %p11597_p11, %p11591_p8 }
  0xd4   : > { %11601 = shalt.err (!%p11598_p12)
}
  0xd5   : > { %s13670_s4 = smov 1   ;;  %s13671_s1 = smov 16  }
  0xd6   : > { %11176 = dma.hbm_to_vmem [thread:$0]  (!%p11998_p5), %s13669_s29, 32, %s711_s24, [#allocation3], %s13671_s1, %s13671_s1, %s13670_s4  }
  0xd7   : > { %s11602_s7 = scalar_lea.hbm %s13607_s13, 32 }
  0xd8   : > { %p11603_p2 = scmp.ne.s32.totalorder %s13607_s13, %s11602_s7  ;;  %p11609_p0 = scmp.lt.u32.totalorder %s11602_s7, %s13607_s13 }
  0xda   : > { %p11605_p3 = pnand %p11603_p2, %p12014_p7 }
  0xdc   : > { %p11606_p13 = pneg %p11605_p3 }
  0xde   : > { %p11611_p1 = pnand %p11609_p0, %p11606_p13 }
  0xe0   : > { %11614 = shalt.err (!%p11611_p1)
}
  0xe1   : > { %s11615_s11 = scalar_lea.vmem %s746_s6, 32  ;;  %p11623_p9 = scmp.lt.s32.totalorder %s746_s6, %s746_s6 }
  0xe2   : > { %p11616_p4 = scmp.ne.s32.totalorder %s746_s6, %s11615_s11  ;;  %p11624_p10 = scmp.lt.s32.totalorder %s11615_s11, %s11615_s11 }
  0xe4   : > { %p11618_p6 = pnand %p11616_p4, %p12014_p7  ;;  %p11625_p11 = por %p11624_p10, %p11623_p9 }
  0xe6   : > { %p11619_p8 = pneg %p11618_p6 }
  0xe8   : > { %p11626_p12 = pnand %p11625_p11, %p11619_p8 }
  0xea   : > { %11629 = shalt.err (!%p11626_p12)
}
  0xeb   : > { %11182 = dma.hbm_to_vmem [thread:$0]  (!%p11998_p5), %s13607_s13, 32, %s746_s6, [#allocation5], %s13671_s1, %s13671_s1, %s13670_s4  }
  0xec   : > { %s11818_s8 = smov [#allocation9]   ;;  %s11819_s14 = smov [#allocation12]  }
  0xed   : > { %s771_s22 = sshll.u32 %s11818_s8, 4  ;;  %s800_s17 = sshll.u32 %s11819_s14, 4  ;;  %s772_s22 = int_to_ptr.vmem [resolvable:$true] %s771_s22  ;;  %s801_s17 = int_to_ptr.vmem [resolvable:$true] %s800_s17 }
  0xee   : > { %s11630_s7 = scalar_lea.hbm %s13609_s15, 32 }
  0xef   : > { %p11631_p2 = scmp.ne.s32.totalorder %s13609_s15, %s11630_s7  ;;  %p11637_p0 = scmp.lt.u32.totalorder %s11630_s7, %s13609_s15 }
  0xf1   : > { %p11633_p3 = pnand %p11631_p2, %p12014_p7 }
  0xf3   : > { %p11634_p13 = pneg %p11633_p3 }
  0xf5   : > { %p11639_p1 = pnand %p11637_p0, %p11634_p13 }
  0xf7   : > { %11642 = shalt.err (!%p11639_p1)
}
  0xf8   : > { %s11643_s6 = scalar_lea.vmem %s772_s22, 32  ;;  %p11651_p9 = scmp.lt.s32.totalorder %s772_s22, %s772_s22 }
  0xf9   : > { %p11644_p4 = scmp.ne.s32.totalorder %s772_s22, %s11643_s6  ;;  %p11652_p10 = scmp.lt.s32.totalorder %s11643_s6, %s11643_s6 }
  0xfb   : > { %p11646_p6 = pnand %p11644_p4, %p12014_p7  ;;  %p11653_p11 = por %p11652_p10, %p11651_p9 }
  0xfd   : > { %p11647_p8 = pneg %p11646_p6 }
  0xff   : > { %p11654_p12 = pnand %p11653_p11, %p11647_p8 }
 0x101   : > { %11657 = shalt.err (!%p11654_p12)
}
 0x102   : > { %11188 = dma.hbm_to_vmem [thread:$0]  (!%p11998_p5), %s13609_s15, 32, %s772_s22, [#allocation8], %s13671_s1, %s13671_s1, %s13670_s4  }
 0x103   : > { %s11658_s14 = scalar_lea.hbm %s13612_s18, 32 }
 0x104   : > { %p11659_p2 = scmp.ne.s32.totalorder %s13612_s18, %s11658_s14  ;;  %p11665_p0 = scmp.lt.u32.totalorder %s11658_s14, %s13612_s18 }
 0x106   : > { %p11661_p3 = pnand %p11659_p2, %p12014_p7 }
 0x108   : > { %p11662_p13 = pneg %p11661_p3 }
 0x10a   : > { %p11667_p1 = pnand %p11665_p0, %p11662_p13 }
 0x10c   : > { %11670 = shalt.err (!%p11667_p1)
}
 0x10d   : > { %s11671_s3 = scalar_lea.vmem %s801_s17, 32  ;;  %p11679_p9 = scmp.lt.s32.totalorder %s801_s17, %s801_s17 }
 0x10e   : > { %p11672_p4 = scmp.ne.s32.totalorder %s801_s17, %s11671_s3  ;;  %p11680_p10 = scmp.lt.s32.totalorder %s11671_s3, %s11671_s3 }
 0x110   : > { %p11674_p6 = pnand %p11672_p4, %p12014_p7  ;;  %p11681_p11 = por %p11680_p10, %p11679_p9 }
 0x112   : > { %p11675_p8 = pneg %p11674_p6 }
 0x114   : > { %p11682_p12 = pnand %p11681_p11, %p11675_p8 }
 0x116   : > { %11685 = shalt.err (!%p11682_p12)
}
 0x117   : > { %11194 = dma.hbm_to_vmem [thread:$0]  (!%p11998_p5), %s13612_s18, 32, %s801_s17, [#allocation11], %s13671_s1, %s13671_s1, %s13670_s4  }
 0x118   : > { %s11820_s30 = smov [#allocation15]   ;;  %s11821_s11 = smov [#allocation18]  }
 0x119   : > { %s829_s6 = sshll.u32 %s11820_s30, 4  ;;  %s862_s24 = sshll.u32 %s11821_s11, 4  ;;  %s830_s6 = int_to_ptr.vmem [resolvable:$true] %s829_s6  ;;  %s863_s24 = int_to_ptr.vmem [resolvable:$true] %s862_s24 }
 0x11a   : > { %s11686_s14 = scalar_lea.hbm %s13615_s21, 32 }
 0x11b   : > { %p11687_p2 = scmp.ne.s32.totalorder %s13615_s21, %s11686_s14  ;;  %p11693_p0 = scmp.lt.u32.totalorder %s11686_s14, %s13615_s21 }
 0x11d   : > { %p11689_p3 = pnand %p11687_p2, %p12014_p7 }
 0x11f   : > { %p11690_p13 = pneg %p11689_p3 }
 0x121   : > { %p11695_p1 = pnand %p11693_p0, %p11690_p13 }
 0x123   : > { %11698 = shalt.err (!%p11695_p1)
}
 0x124   : > { %s11699_s17 = scalar_lea.vmem %s830_s6, 32  ;;  %p11707_p9 = scmp.lt.s32.totalorder %s830_s6, %s830_s6 }
 0x125   : > { %p11700_p4 = scmp.ne.s32.totalorder %s830_s6, %s11699_s17  ;;  %p11708_p10 = scmp.lt.s32.totalorder %s11699_s17, %s11699_s17 }
 0x127   : > { %p11702_p6 = pnand %p11700_p4, %p12014_p7  ;;  %p11709_p11 = por %p11708_p10, %p11707_p9 }
 0x129   : > { %p11703_p8 = pneg %p11702_p6 }
 0x12b   : > { %p11710_p12 = pnand %p11709_p11, %p11703_p8 }
 0x12d   : > { %11713 = shalt.err (!%p11710_p12)
}
 0x12e   : > { %11200 = dma.hbm_to_vmem [thread:$0]  (!%p11998_p5), %s13615_s21, 32, %s830_s6, [#allocation14], %s13671_s1, %s13671_s1, %s13670_s4  }
 0x12f   : > { %s11714_s11 = scalar_lea.hbm %s13619_s25, 16 }
 0x130   : > { %p11715_p2 = scmp.ne.s32.totalorder %s13619_s25, %s11714_s11  ;;  %p11721_p0 = scmp.lt.u32.totalorder %s11714_s11, %s13619_s25 }
 0x132   : > { %p11717_p3 = pnand %p11715_p2, %p12014_p7 }
 0x134   : > { %p11718_p13 = pneg %p11717_p3 }
 0x136   : > { %p11723_p1 = pnand %p11721_p0, %p11718_p13 }
 0x138   : > { %11726 = shalt.err (!%p11723_p1)
}
 0x139   : > { %s11727_s16 = scalar_lea.vmem %s863_s24, 16  ;;  %s11734_s4 = scalar_lea.vmem %s863_s24, 32 }
 0x13a   : > { %p11728_p4 = scmp.ne.s32.totalorder %s863_s24, %s11727_s16  ;;  %p11735_p9 = scmp.lt.s32.totalorder %s863_s24, %s863_s24 }
 0x13b   : > { %p11736_p10 = scmp.lt.s32.totalorder %s11734_s4, %s11727_s16 }
 0x13c   : > { %p11730_p6 = pnand %p11728_p4, %p12014_p7 }
 0x13d   : > { %p11737_p11 = por %p11736_p10, %p11735_p9 }
 0x13e   : > { %p11731_p8 = pneg %p11730_p6 }
 0x140   : > { %p11738_p12 = pnand %p11737_p11, %p11731_p8 }
 0x142   : > { %11741 = shalt.err (!%p11738_p12)
}
 0x143   : > { %11206 = dma.hbm_to_vmem [thread:$0]  (!%p11998_p5), %s13619_s25, 16, %s863_s24, [#allocation17]  }
 0x144   : > { %s11822_s7 = smov [#allocation21]   ;;  %s11742_s22 = scalar_lea.hbm %s13621_s27, 16 }
 0x145   : > { %s886_s10 = sshll.u32 %s11822_s7, 4  ;;  %p11743_p2 = scmp.ne.s32.totalorder %s13621_s27, %s11742_s22  ;;  %s887_s10 = int_to_ptr.vmem [resolvable:$true] %s886_s10 }
 0x146   : > { %p11749_p0 = scmp.lt.u32.totalorder %s11742_s22, %s13621_s27 }
 0x147   : > { %p11745_p3 = pnand %p11743_p2, %p12014_p7 }
 0x149   : > { %p11746_p13 = pneg %p11745_p3 }
 0x14b   : > { %p11751_p1 = pnand %p11749_p0, %p11746_p13 }
 0x14d   : > { %11754 = shalt.err (!%p11751_p1)
}
 0x14e   : > { %s11755_s24 = scalar_lea.vmem %s887_s10, 16  ;;  %s11762_s8 = scalar_lea.vmem %s887_s10, 32 }
 0x14f   : > { %p11756_p4 = scmp.ne.s32.totalorder %s887_s10, %s11755_s24  ;;  %p11763_p9 = scmp.lt.s32.totalorder %s887_s10, %s887_s10 }
 0x150   : > { %p11764_p10 = scmp.lt.s32.totalorder %s11762_s8, %s11755_s24 }
 0x151   : > { %p11758_p6 = pnand %p11756_p4, %p12014_p7 }
 0x152   : > { %p11765_p11 = por %p11764_p10, %p11763_p9 }
 0x153   : > { %p11759_p8 = pneg %p11758_p6 }
 0x155   : > { %p11766_p12 = pnand %p11765_p11, %p11759_p8 }
 0x157   : > { %11769 = shalt.err (!%p11766_p12)
}
 0x158   : > { %11212 = dma.hbm_to_vmem [thread:$0]  (!%p11998_p5), %s13621_s27, 16, %s887_s10, [#allocation20]  }
 0x159   : > { %p13672_p2 = scmp.ne.s32.totalorder %s13662_s9, 0 }
 0x15a   : > { %p13673_p3 = scmp.eq.s32.totalorder (!%p13672_p2), %s11981_s5, 0 }
 0x15b   : > { %932 = sbr.rel (%p13672_p2) target bundleno = 12185 (0x2f99), region = 132 }
 0x162   : > { %11775 = dma.done.wait (%p13673_p3), [#allocation3], 32   ;;  %p13674_p7 = pmov %p13673_p3 }
 0x163   : > { %p13675_p13 = pmov %p13673_p3 }
 0x164   : > { %11777 = vsyncadd (%p13674_p7), [#allocation3], 4294967264 }
 0x165   : > { %11779 = dma.done.wait (%p13675_p13), [#allocation5], 64   ;;  %p13676_p0 = pmov %p13673_p3 }
 0x167   : > { %11781 = vsyncadd (%p13676_p0), [#allocation5], 4294967232  ;;  %p13677_p1 = pmov %p13676_p0 }
 0x168   : > { %p13678_p5 = pmov %p13676_p0 }
 0x169   : > { %11783 = dma.done.wait (%p13677_p1), [#allocation8], 64  }
 0x16a   : > { %11785 = vsyncadd (%p13678_p5), [#allocation8], 4294967232  ;;  %p13679_p4 = pmov %p13676_p0 }
 0x16b   : > { %p13680_p6 = pmov %p13676_p0 }
 0x16c   : > { %11787 = dma.done.wait (%p13679_p4), [#allocation11], 64  }
 0x16d   : > { %11789 = vsyncadd (%p13680_p6), [#allocation11], 4294967232  ;;  %p13681_p8 = pmov %p13676_p0 }
 0x16e   : > { %p13682_p9 = pmov %p13676_p0 }
 0x16f   : > { %11791 = dma.done.wait (%p13681_p8), [#allocation14], 64  }
 0x170   : > { %11793 = vsyncadd (%p13682_p9), [#allocation14], 4294967232  ;;  %p13683_p10 = pmov %p13676_p0 }
 0x171   : > { %p13684_p11 = pmov %p13676_p0 }
 0x172   : > { %11795 = dma.done.wait (%p13683_p10), [#allocation17], 48  }
 0x173   : > { %11797 = vsyncadd (%p13684_p11), [#allocation17], 4294967248  ;;  %p13685_p12 = pmov %p13676_p0 }
 0x174   : > { %p13686_p2 = pmov %p13676_p0 }
 0x175   : > { %11799 = dma.done.wait (%p13685_p12), [#allocation20], 528  }
 0x176   : > { %11801 = vsyncadd (%p13686_p2), [#allocation20], 4294966768  ;;  %p1065_p3 = scmp.lt.s32.totalorder %s11981_s5, 1  ;;  %v1098_v0 = vlaneseq  ;;  %v11823_v1 = vmov 0   ;;  %v11824_v2 = vmov 0.0|0.0   ;;  %s13687_s0 = sld [smem:[#allocation32_spill]] }
 0x177   : > { %11271 = vset.pattern.permute.xlu0 %v11823_v1  ;;  %10929 = vmatprep.subr.bf16.mxu0 %v11824_v2  ;;  %s13688_s6 = sld [smem:[#allocation33_spill]]  ;;  %s13689_s22 = sld [smem:[#allocation30_spill]]  ;;  %vm11825_vm2 = vmmov 0   ;;  %v11826_v20 = vmov 0.0   ;;  %vm1110_vm3 = vcmask 1041408   ;;  %vm1106_vm4 = vcmask 408576  }
 0x178   : > { %s13711_s5 = smov (!%p1065_p3, %s11981_s5), 1  ;;  %v12327_v3 = vshrl.u32 %v1098_v0, 7  ;;  %10938 = vmatprep.subr.bf16.mxu1 %v11824_v2  ;;  %11272 = vset.pattern.permute.xlu1 %v11823_v1  ;;  %s13690_s2 = sld [smem:[#allocation37_spill]]  ;;  %v12389_v23 = vand.u32 127, %v1098_v0  ;;  %vm1186_vm6 = vcmask 261120   ;;  %vm1487_vm7 = vcmask 64512  }
 0x179   : > { %s12339_s10 = sshll.u32 %s13711_s5, 3  ;;  %10287 = vmatprep.mubr.msk.f32.mxu0 %vm11825_vm2, %v11826_v20  ;;  %10298 = vmatprep.mubr.msk.f32.mxu1 %vm11825_vm2, %v11826_v20  ;;  %s13692_s8 = sld [smem:[#allocation40_spill]]  ;;  %v9783_v52 = vld [vmem:[#allocation2] ss:$0 sm:$0xff]  ;;  %v9784_v56 = vld [vmem:[#allocation4] ss:$0 sm:$0xff] }
 0x17a   : > { %v1387_v4 = vsub.s32 0, %v12327_v3  ;;  %s13694_s30 = sld [smem:[#allocation35_spill]]  ;;  %s13697_s17 = sld [smem:[#allocation36_spill]]  ;;  %vm1382_vm8 = vcmp.le.s32.totalorder %v12389_v23, %v12327_v3  ;;  %vm1641_vm11 = vcmask 31744   ;;  %vm1743_vm14 = vcmask 1043456  }
 0x17b   : > { %s11827_s3 = smov 120   ;;  %s11828_s11 = smov 112   ;;  %vm3585_vm15 = vcmask 523264  }
 0x17c   : > { %s1075_s16 = scalar_lea.vmem %s13687_s0, %s13711_s5  ;;  %s13702_s28 = sld [smem:[#allocation44_spill]] }
 0x17d   : > { %s1078_s7 = scalar_lea.vmem %s13688_s6, %s13711_s5  ;;  %s1068_s20 = scalar_lea.vmem %s13689_s22, %s12339_s10  ;;  %v1095_v5 = vld [vmem:[%s1075_s16] sm:$0x1] }
 0x17e   : > { %v1096_v6 = vld [vmem:[%s1078_s7] sm:$0x1]  ;;  %vm1383_vm0 = vcmp.gt.f32.partialorder %v1095_v5, 0.5  ;;  %v1089_v9 = vld [vmem:[%s13690_s2 + $0x8] sm:$0xff]  ;;  %v1090_v13 = vld [vmem:[%s13690_s2 + $0x10] sm:$0xff]  ;;  %s13691_s22 = sld [smem:[#allocation41_spill]] }
 0x17f   : > { %v1097_v7 = vld [vmem:[%s1068_s20] sm:$0xff]  ;;  %vm3948_vm1 = vcmp.gt.f32.partialorder %v1096_v6, 0.5  ;;  %v1384_v10 = vsel %vm1383_vm0, 1, %v11823_v1  ;;  %v1091_v14 = vld [vmem:[%s13690_s2 + $0x18] sm:$0xff]  ;;  %v1093_v19 = vld [vmem:[%s13690_s2 + $0x28] sm:$0xff]  ;;  %s13693_s14 = smov %s13692_s8  ;;  %s11829_s16 = smov 104  }
 0x180   : > { %1101 = vperm.xlu0 %11271, %v1097_v7   ;;  %v1088_v8 = vld [vmem:[%s13690_s2] sm:$0xff]  ;;  %v3949_v11 = vsel %vm3948_vm1, 1, %v11823_v1  ;;  %v12360_v15 = vrot.slane %v1384_v10, %v1387_v4  ;;  %v12365_v17 = vpack.c.bf16 %v1091_v14, %v1090_v13  ;;  %v1094_v22 = vld [vmem:[%s13690_s2 + $0x30] sm:$0x3]  ;;  %v1403_v38 = vld [vmem:[%s13693_s14 + $0x8] sm:$0xff]  ;;  %s13703_s24 = sld [smem:[#allocation31_spill]] }
 0x181   : > { %v12352_v12 = vpack.c.bf16 %v1089_v9, %v1088_v8  ;;  %v12362_v16 = vrot.slane %v3949_v11, %v1387_v4  ;;  %v1092_v18 = vld [vmem:[%s13690_s2 + $0x20] sm:$0xff]  ;;  %v1404_v42 = vld [vmem:[%s13693_s14 + $0x10] sm:$0xff]  ;;  %v1405_v43 = vld [vmem:[%s13693_s14 + $0x18] sm:$0xff]  ;;  %s13704_s6 = sld [smem:[#allocation46_spill]]  ;;  %s13705_s1 = sld [smem:[#allocation47_spill]]  ;;  %vm3962_vm1 = vcmask 260096  }
 0x182   : > { %v12379_v21 = vpack.c.bf16 %v1093_v19, %v1092_v18  ;;  %v1402_v36 = vld [vmem:[%s13692_s8] sm:$0xff]  ;;  %v12435_v45 = vpack.c.bf16 %v1405_v43, %v1404_v42  ;;  %s13695_s8 = sld [smem:[#allocation42_spill]]  ;;  %v9789_v63 = vld [vmem:[%s13697_s17 + $0x10] sm:$0xf]  ;;  %v9787_v14 = vld [vmem:[#allocation9] ss:$0 sm:$0xff] }
 0x183   : > { %10931 = vmatpush3.bf16.msra.mxu0 %v12352_v12  ;;  %v12422_v41 = vpack.c.bf16 %v1403_v38, %v1402_v36  ;;  %v1086_v46 = vld [vmem:[%s13694_s30] sm:$0xf]  ;;  %v9785_v4 = vld [vmem:[#allocation7] ss:$0 sm:$0xff]  ;;  %v9791_v5 = vld [vmem:[#allocation6] ss:$0 sm:$0xff] }
 0x184   : > { %10932 = vmatprep.subr.bf16.mxu0 %v11824_v2  ;;  %v1215_v34 = vld [vmem:[%s13691_s22] sm:$0xff]  ;;  %v1216_v35 = vld [vmem:[%s13691_s22 + $0x8] sm:$0xff]  ;;  %v1217_v39 = vld [vmem:[%s13691_s22 + $0x10] sm:$0xff]  ;;  %v1087_v47 = vmax.f32 %v1086_v46, 1.0  ;;  %vm3954_vm9 = vcmp.eq.s32.totalorder %v12362_v16, 1  ;;  %vm1389_vm12 = vcmp.eq.s32.totalorder %v12360_v15, 1 }
 0x185   : > { %v12411_v37 = vpack.c.bf16 %v1216_v35, %v1215_v34  ;;  %v1218_v40 = vld [vmem:[%s13691_s22 + $0x18] sm:$0xff]  ;;  %vm12518_vm10 = vmand %vm1382_vm8, %vm3954_vm9  ;;  %vm4599_vm9 = vcmask 56320   ;;  %s13706_s7 = sld [smem:[#allocation48_spill]] }
 0x186   : > { %v12431_v44 = vpack.c.bf16 %v1218_v40, %v1217_v39  ;;  %vm12540_vm13 = vmand %vm1382_vm8, %vm1389_vm12  ;;  %vm4603_vm8 = vcmask 1046528  }
 0x187   : > { %10934 = vmatpush3.bf16.msra.mxu0 %v12365_v17  ;;  %10940 = vmatpush3.bf16.msra.mxu1 %v12411_v37 }
 0x188   : > { %10935 = vmatprep.subr.bf16.mxu0 %v11824_v2  ;;  %10941 = vmatprep.subr.bf16.mxu1 %v11824_v2  ;;  %s13696_s12 = smov %s13695_s8  ;;  %v1299_v54 = vld [vmem:[%s13695_s8] sm:$0xff]  ;;  %s1072_s8 = scalar_lea.vmem %s13703_s24, %s12339_s10 }
 0x189   : > { %v1300_v55 = vld [vmem:[%s13696_s12 + $0x8] sm:$0xff]  ;;  %v1301_v60 = vld [vmem:[%s13696_s12 + $0x10] sm:$0xff]  ;;  %v1302_v61 = vld [vmem:[%s13696_s12 + $0x18] sm:$0xff] }
 0x18a   : > { %v12451_v58 = vpack.c.bf16 %v1300_v55, %v1299_v54  ;;  %v12462_v62 = vpack.c.bf16 %v1302_v61, %v1301_v60 }
 0x18b   : > { %10937 = vmatpush3.bf16.msra.mxu0 %v12379_v21  ;;  %10943 = vmatpush3.bf16.msra.mxu1 %v12431_v44 }
 0x18c   : > { %10285 = vmatprep.subr.mxu0 %v11826_v20  ;;  %10944 = vmatprep.subr.bf16.mxu1 %v11824_v2 }
 0x18f   : > { %10286 = vmatpush3.msk.msra.mxu0 %vm1110_vm3, %v1094_v22 }
 0x190   : > { %10950 = vmatprep.subr.bf16.mxu0 %v11824_v2 }
 0x1ff   : > { %v1102_v24 = vpop.permute.xlu0 %1101 }
 0x200   : > { %vm1103_vm5 = vcmp.eq.s32.totalorder %v12389_v23, %v1102_v24 }
 0x201   : > { %v9780_v25 = vsel %vm1103_vm5, 1.0, %v11826_v20  ;;  %vm4424_vm5 = vcmask 55296  }
 0x202   : > { %10288 = vmatmul.mubr.msk.f32.vlgmr.msra.gmra.mrb[0].mxu0 %vm1106_vm4, %v9780_v25 }
 0x203   : > { %10320 = vmatprep.mubr.msk.f32.mxu0 %vm11825_vm2, %v11826_v20  ;;  %10952 = vmatpush3.bf16.msra.mxu0 %v12422_v41 }
 0x204   : > { %10953 = vmatprep.subr.bf16.mxu0 %v11824_v2 }
 0x207   : > { %10955 = vmatpush3.bf16.msra.mxu0 %v12435_v45 }
 0x208   : > { %10333 = vmatprep.subr.mxu0 %v11826_v20 }
 0x2d5   : > { %v12396_v26 = vpop.f32.mrb[0].mxu0 }
 0x2d6   : > { %v10289_v27 = vpop.f32.mrb[1].mxu0  ;;  %v1187_v28 = vsel %vm1186_vm6, %v12396_v26, 0.0 }
 0x2d7   : > { %1188 = vadd.xlane.f32.xlu0 %v1187_v28 }
 0x364   : > { %v1189_v29 = vpop.xlane.xlu0 %1188 }
 0x365   : > { %v1191_v30 = vmul.f32 0.03125, %v1189_v29 }
 0x367   : > { %v1192_v31 = vsub.f32 %v12396_v26, %v1191_v30 }
 0x369   : > { %v1193_v32 = vmul.f32 %v1192_v31, %v1192_v31 }
 0x36b   : > { %v1194_v33 = vsel %vm1186_vm6, %v1193_v32, 0.0 }
 0x36c   : > { %1195 = vadd.xlane.f32.xlu1 %v1194_v33 }
 0x37d   : > { %1395 = vperm.xlu1 %11272, %v1087_v47  }
 0x3f9   : > { %v1196_v48 = vpop.xlane.xlu1 %1195 }
 0x3fa   : > { %v1197_v49 = vmul.f32 0.03125, %v1196_v48 }
 0x3fc   : > { %v1198_v50 = vadd.f32 1e-05, %v1197_v49 }
 0x3fd   : > { %v12477_v0 = vpop.permute.xlu1 %1395 }
 0x3fe   : > { %11273 = vrsqrt.f32 %v1198_v50  ;;  %v12480_v1 = vmul.f32 %v9789_v63, %v12477_v0 }
 0x400   : > { %1902 = vrot.lane.b32.xlu1 %v12480_v1, %s11827_s3 }
 0x408   : > { %v11274_v51 = vpop.eup %11273 }
 0x409   : > { %v1200_v53 = vmul.f32 %v11274_v51, %v1192_v31 }
 0x40b   : > { %v1207_v57 = vmul.f32 %v9783_v52, %v1200_v53  ;;  %v9790_v53 = vld [vmem:[%s13697_s17 + $0x14] sm:$0xf] }
 0x40c   : > { %v12561_v54 = vmul.f32 %v9790_v53, %v12477_v0 }
 0x40d   : > { %v1214_v59 = vadd.f32 %v9784_v56, %v1207_v57 }
 0x40f   : > { %10299 = vmatmul.mubr.msk.f32.vlgmr.msra.gmra.mrb[0].mxu1 %vm1186_vm6, %v1214_v59  ;;  %10321 = vmatmul.mubr.msk.f32.vlgmr.msra.gmra.mrb[2].mxu0 %vm1186_vm6, %v1214_v59 }
 0x410   : > { %10946 = vmatpush3.bf16.msra.mxu1 %v12451_v58  ;;  %10309 = vmatprep.mubr.msk.f32.mxu1 %vm11825_vm2, %v11826_v20 }
 0x411   : > { %10947 = vmatprep.subr.bf16.mxu1 %v11824_v2  ;;  %10335 = vmatprep.mubr.msk.f32.mxu0 %vm11825_vm2, %v11826_v20 }
 0x414   : > { %10949 = vmatpush3.bf16.msra.mxu1 %v12462_v62 }
 0x415   : > { %10323 = vmatprep.subr.mxu1 %v11826_v20 }
 0x417   : > { %10310 = vmatmul.mubr.msk.f32.vlgmr.msra.gmra.mrb[2].mxu1 %vm1186_vm6, %v1214_v59 }
 0x418   : > { %10325 = vmatprep.mubr.msk.f32.mxu1 %vm11825_vm2, %v11826_v20 }
 0x41d   : > { %10324 = vmatpush3.xpose.msk.msra.mxu1 %vm1487_vm7, %v12480_v1 }
 0x41e   : > { %10328 = vmatprep.subr.mxu1 %v11826_v20 }
 0x472   : > { %v1903_v13 = vpop.permute.xlu1 %1902 }
 0x4e2   : > { %v1295_v6 = vpop.f32.mrb[0].mxu1  ;;  %v1479_v7 = vpop.f32.mrb[2].mxu0 }
 0x4e3   : > { %v12487_v8 = vadd.f32 %v9785_v4, %v1295_v6  ;;  %v12489_v9 = vadd.f32 %v9791_v5, %v1479_v7  ;;  %v10300_v10 = vpop.f32.mrb[1].mxu1  ;;  %v10322_v11 = vpop.f32.mrb[3].mxu0 }
 0x4e5   : > { %1900 = vrot.lane.b32.xlu1 %v12489_v9, %s11827_s3  ;;  %10326 = vmatmul.mubr.msk.f32.vlgmr.msra.gmra.mrb[4].mxu1 %vm1487_vm7, %v12489_v9 }
 0x4e6   : > { %10329 = vmatpush3.xpose.msk.msra.mxu1 %vm1487_vm7, %v12487_v8  ;;  %10330 = vmatprep.mubr.msk.f32.mxu1 %vm11825_vm2, %v11826_v20 }
 0x4e7   : > { %10348 = vmatprep.subr.mxu1 %v11826_v20 }
 0x4e9   : > { %1979 = vrot.lane.b32.xlu1 %v12487_v8, %s11827_s3  ;;  %10331 = vmatmul.mubr.msk.f32.vlgmr.msra.gmra.mrb[6].mxu1 %vm1487_vm7, %v12489_v9 }
 0x4ea   : > { %v1376_v18 = vpop.f32.mrb[2].mxu1  ;;  %10349 = vmatpush3.xpose.msk.msra.mxu1 %vm1487_vm7, %v1903_v13  ;;  %10350 = vmatprep.mubr.msk.f32.mxu1 %vm11825_vm2, %v11826_v20 }
 0x4eb   : > { %v12507_v19 = vadd.f32 %v9787_v14, %v1376_v18  ;;  %v10311_v22 = vpop.f32.mrb[3].mxu1  ;;  %10353 = vmatprep.subr.mxu1 %v11826_v20 }
 0x4ed   : > { %10334 = vmatpush3.msra.mxu0 %v12507_v19 }
 0x4ee   : > { %10338 = vmatprep.subr.mxu0 %v11826_v20 }
 0x557   : > { %v1901_v25 = vpop.permute.xlu1 %1900 }
 0x558   : > { %10351 = vmatmul.mubr.msk.f32.vlgmr.msra.gmra.mrb[8].mxu1 %vm1487_vm7, %v1901_v25 }
 0x559   : > { %10355 = vmatprep.mubr.msk.f32.mxu1 %vm11825_vm2, %v11826_v20 }
 0x55b   : > { %v12525_v27 = vpop.permute.xlu1 %1979 }
 0x55c   : > { %10354 = vmatpush3.xpose.msk.msra.mxu1 %vm1487_vm7, %v12525_v27 }
 0x55d   : > { %10358 = vmatprep.subr.mxu1 %v11826_v20 }
 0x55f   : > { %10356 = vmatmul.mubr.msk.f32.vlgmr.msra.gmra.mrb[10].mxu1 %vm1487_vm7, %v1901_v25 }
 0x560   : > { %10360 = vmatprep.mubr.msk.f32.mxu1 %vm11825_vm2, %v11826_v20 }
 0x5b8   : > { %v1560_v16 = vpop.f32.mrb[4].mxu1 }
 0x5b9   : > { %v1564_v28 = vmul.f32 0.35355338, %v1560_v16  ;;  %v10327_v29 = vpop.f32.mrb[5].mxu1 }
 0x5bb   : > { %v1642_v30 = vsel %vm1641_vm11, %v1564_v28, -inf }
 0x5bc   : > { %1643 = vmax.xlane.f32.xlu0 %v1642_v30  ;;  %v1634_v31 = vpop.f32.mrb[6].mxu1 }
 0x5bd   : > { %v1638_v32 = vmul.f32 0.35355338, %v1634_v31  ;;  %v10332_v33 = vpop.f32.mrb[7].mxu1 }
 0x5bf   : > { %v1639_v35 = vsel %vm1389_vm12, %v1638_v32, -1e+30  ;;  %v1640_v38 = vsel %vm12540_vm13, %v1638_v32, -1e+30 }
 0x5c0   : > { %v1645_v36 = vsel %vm1487_vm7, %v1639_v35, -inf  ;;  %v1649_v39 = vsel %vm1487_vm7, %v1640_v38, -inf }
 0x5c1   : > { %1646 = vmax.xlane.f32.xlu0 %v1645_v36 }
 0x5c5   : > { %1650 = vmax.xlane.f32.xlu0 %v1649_v39 }
 0x62b   : > { %v1974_v40 = vpop.f32.mrb[8].mxu1 }
 0x62c   : > { %v1978_v42 = vmul.f32 0.35355338, %v1974_v40  ;;  %v10352_v43 = vpop.f32.mrb[9].mxu1 }
 0x62e   : > { %v2056_v3 = vsel %vm1641_vm11, %v1978_v42, -inf }
 0x62f   : > { %2057 = vmax.xlane.f32.xlu1 %v2056_v3 }
 0x632   : > { %v2049_v46 = vpop.f32.mrb[10].mxu1 }
 0x633   : > { %v2053_v47 = vmul.f32 0.35355338, %v2049_v46  ;;  %v10357_v48 = vpop.f32.mrb[11].mxu1 }
 0x635   : > { %v2054_v49 = vsel %vm1389_vm12, %v2053_v47, -1e+30  ;;  %v2055_v51 = vsel %vm12540_vm13, %v2053_v47, -1e+30 }
 0x636   : > { %v2059_v50 = vsel %vm1487_vm7, %v2054_v49, -inf  ;;  %v2063_v52 = vsel %vm1487_vm7, %v2055_v51, -inf }
 0x637   : > { %2060 = vmax.xlane.f32.xlu0 %v2059_v50 }
 0x63b   : > { %2064 = vmax.xlane.f32.xlu0 %v2063_v52 }
 0x640   : > { %2158 = vrot.lane.b32.xlu1 %v12561_v54, %s11827_s3 }
 0x649   : > { %v1644_v55 = vpop.xlane.xlu0 %1643 }
 0x64e   : > { %v1647_v56 = vpop.xlane.xlu0 %1646 }
 0x64f   : > { %v1648_v57 = vmax.f32 %v1644_v55, %v1647_v56 }
 0x651   : > { %2082 = vrot.lane.b32.xlu0 %v12507_v19, %s11827_s3 }
 0x652   : > { %v1651_v59 = vpop.xlane.xlu0 %1650 }
 0x653   : > { %v1652_v60 = vmax.f32 %v1648_v57, %v1651_v59 }
 0x655   : > { %v1660_v61 = vsub.f32 %v1639_v35, %v1652_v60  ;;  %v1653_v4 = vsub.f32 %v1564_v28, %v1652_v60  ;;  %v1817_v6 = vsub.f32 %v1640_v38, %v1652_v60 }
 0x657   : > { %v1661_v63 = vmul.f32 1.442695, %v1660_v61  ;;  %v1654_v5 = vmul.f32 1.442695, %v1653_v4  ;;  %v1818_v10 = vmul.f32 1.442695, %v1817_v6 }
 0x659   : > { %11275 = vpow2.f32 %v1661_v63 }
 0x65a   : > { %11277 = vpow2.f32 %v1654_v5 }
 0x65b   : > { %11279 = vpow2.f32 %v1818_v10 }
 0x663   : > { %v11276_v7 = vpop.eup %11275 }
 0x664   : > { %10336 = vmatmul.mubr.msk.f32.vlgmr.msra.gmra.mrb[4].mxu0 %vm1487_vm7, %v11276_v7  ;;  %v11278_v11 = vpop.eup %11277  ;;  %v1663_v47 = vsel %vm1487_vm7, %v11276_v7, 0.0 }
 0x665   : > { %10339 = vmatpush3.msk.msra.mxu0 %vm1743_vm14, %v12561_v54  ;;  %10340 = vmatprep.mubr.msk.f32.mxu0 %vm11825_vm2, %v11826_v20  ;;  %v1656_v13 = vsel %vm1641_vm11, %v11278_v11, 0.0  ;;  %v11280_v14 = vpop.eup %11279 }
 0x666   : > { %10343 = vmatprep.subr.mxu0 %v11826_v20  ;;  %v1820_v48 = vsel %vm1487_vm7, %v11280_v14, 0.0 }
 0x66c   : > { %10341 = vmatmul.mubr.msk.f32.vlgmr.msra.gmra.mrb[4].mxu0 %vm1641_vm11, %v11278_v11 }
 0x66d   : > { %10344 = vmatpush3.msra.mxu0 %v12507_v19  ;;  %10345 = vmatprep.mubr.msk.f32.mxu0 %vm11825_vm2, %v11826_v20 }
 0x66e   : > { %10373 = vmatprep.subr.mxu0 %v11826_v20 }
 0x670   : > { %1657 = vadd.xlane.f32.xlu0 %v1656_v13 }
 0x674   : > { %10346 = vmatmul.mubr.msk.f32.vlgmr.msra.gmra.mrb[4].mxu0 %vm1487_vm7, %v11280_v14  ;;  %v1483_v14 = vld [vmem:[%s13702_s28] sm:$0xff] }
 0x675   : > { %10375 = vmatprep.mubr.msk.f32.mxu0 %vm11825_vm2, %v11826_v20 }
 0x6bc   : > { %v2058_v22 = vpop.xlane.xlu1 %2057 }
 0x6c4   : > { %v2061_v18 = vpop.xlane.xlu0 %2060 }
 0x6c5   : > { %v2062_v25 = vmax.f32 %v2058_v22, %v2061_v18 }
 0x6c8   : > { %v2065_v16 = vpop.xlane.xlu0 %2064 }
 0x6c9   : > { %v2066_v28 = vmax.f32 %v2062_v25, %v2065_v16 }
 0x6cb   : > { %v2067_v29 = vsub.f32 %v1978_v42, %v2066_v28  ;;  %v2074_v30 = vsub.f32 %v2054_v49, %v2066_v28  ;;  %v2235_v31 = vsub.f32 %v2055_v51, %v2066_v28  ;;  %v2159_v42 = vpop.permute.xlu1 %2158  ;;  %v12613_v49 = vld [vmem:[%s13702_s28 + $0x8] sm:$0xff] }
 0x6cc   : > { %v12582_v32 = vpop.permute.xlu0 %2082  ;;  %10374 = vmatpush3.msra.mxu0 %v12613_v49 }
 0x6cd   : > { %v2068_v33 = vmul.f32 1.442695, %v2067_v29  ;;  %v2075_v35 = vmul.f32 1.442695, %v2074_v30  ;;  %v2236_v36 = vmul.f32 1.442695, %v2235_v31  ;;  %10359 = vmatpush3.msra.mxu1 %v12582_v32  ;;  %10378 = vmatprep.subr.mxu0 %v11826_v20 }
 0x6ce   : > { %10363 = vmatprep.subr.mxu1 %v11826_v20 }
 0x6cf   : > { %11281 = vpow2.f32 %v2068_v33 }
 0x6d0   : > { %11283 = vpow2.f32 %v2075_v35 }
 0x6d1   : > { %11285 = vpow2.f32 %v2236_v36 }
 0x6d9   : > { %v11282_v38 = vpop.eup %11281 }
 0x6da   : > { %v11284_v39 = vpop.eup %11283  ;;  %v2070_v40 = vsel %vm1641_vm11, %v11282_v38, 0.0 }
 0x6db   : > { %v11286_v43 = vpop.eup %11285  ;;  %10361 = vmatmul.mubr.msk.f32.vlgmr.msra.gmra.mrb[12].mxu1 %vm1487_vm7, %v11284_v39  ;;  %v2077_v3 = vsel %vm1487_vm7, %v11284_v39, 0.0  ;;  %2071 = vadd.xlane.f32.xlu0 %v2070_v40 }
 0x6dc   : > { %10364 = vmatpush3.msk.msra.mxu1 %vm1743_vm14, %v2159_v42  ;;  %2078 = vadd.xlane.f32.xlu1 %v2077_v3  ;;  %v2238_v46 = vsel %vm1487_vm7, %v11286_v43, 0.0 }
 0x6dd   : > { %10365 = vmatprep.mubr.msk.f32.mxu1 %vm11825_vm2, %v11826_v20  ;;  %10368 = vmatprep.subr.mxu1 %v11826_v20 }
 0x6df   : > { %2239 = vadd.xlane.f32.xlu0 %v2238_v46 }
 0x6e3   : > { %10366 = vmatmul.mubr.msk.f32.vlgmr.msra.gmra.mrb[12].mxu1 %vm1641_vm11, %v11282_v38  ;;  %1664 = vadd.xlane.f32.xlu0 %v1663_v47 }
 0x6e4   : > { %10369 = vmatpush3.msra.mxu1 %v12582_v32  ;;  %10370 = vmatprep.mubr.msk.f32.mxu1 %vm11825_vm2, %v11826_v20 }
 0x6e5   : > { %10388 = vmatprep.subr.mxu1 %v11826_v20 }
 0x6e7   : > { %1821 = vadd.xlane.f32.xlu0 %v1820_v48 }
 0x6eb   : > { %10371 = vmatmul.mubr.msk.f32.vlgmr.msra.gmra.mrb[12].mxu1 %vm1487_vm7, %v11286_v43 }
 0x6ec   : > { %10390 = vmatprep.mubr.msk.f32.mxu1 %vm11825_vm2, %v11826_v20 }
 0x6ed   : > { %2543 = vrot.lane.b32.xlu1 %v12487_v8, %s11828_s11 }
 0x6f1   : > { %2464 = vrot.lane.b32.xlu1 %v12489_v9, %s11828_s11 }
 0x6fd   : > { %2466 = vrot.lane.b32.xlu0 %v12480_v1, %s11828_s11  ;;  %v1658_v56 = vpop.xlane.xlu0 %1657 }
 0x747   : > { %v1893_v50 = vpop.f32.mrb[4].mxu0 }
 0x748   : > { %v10347_v51 = vpop.f32.mrb[5].mxu0 }
 0x768   : > { %v2072_v57 = vpop.xlane.xlu0 %2071 }
 0x769   : > { %v2079_v52 = vpop.xlane.xlu1 %2078 }
 0x76a   : > { %v2080_v61 = vadd.f32 %v2079_v52, %v2072_v57 }
 0x76c   : > { %v2240_v59 = vpop.xlane.xlu0 %2239 }
 0x76d   : > { %v12617_v53 = vpop.permute.xlu1 %2543  ;;  %v2241_v4 = vadd.f32 %v2240_v59, %v2080_v61 }
 0x76e   : > { %10389 = vmatpush3.xpose.msk.msra.mxu1 %vm1487_vm7, %v12617_v53 }
 0x76f   : > { %10408 = vmatprep.subr.mxu1 %v11826_v20  ;;  %11287 = vrcp.f32 %v2241_v4 }
 0x770   : > { %v1665_v60 = vpop.xlane.xlu0 %1664 }
 0x771   : > { %v2465_v55 = vpop.permute.xlu1 %2464  ;;  %v1666_v5 = vadd.f32 %v1665_v60, %v1658_v56 }
 0x772   : > { %10391 = vmatmul.mubr.msk.f32.vlgmr.msra.gmra.mrb[14].mxu1 %vm1487_vm7, %v2465_v55 }
 0x773   : > { %10410 = vmatprep.mubr.msk.f32.mxu1 %vm11825_vm2, %v11826_v20 }
 0x774   : > { %v1822_v63 = vpop.xlane.xlu0 %1821 }
 0x775   : > { %v1823_v6 = vadd.f32 %v1822_v63, %v1666_v5 }
 0x777   : > { %11289 = vrcp.f32 %v1823_v6 }
 0x778   : > { %v2467_v25 = vpop.permute.xlu0 %2466 }
 0x779   : > { %v11288_v7 = vpop.eup %11287 }
 0x781   : > { %v11290_v18 = vpop.eup %11289 }
 0x782   : > { %v1899_v22 = vmul.f32 %v11290_v18, %v1893_v50  ;;  %v12682_v18 = vld [vmem:[%s13702_s28 + $0x10] sm:$0xff] }
 0x783   : > { %10409 = vmatpush3.msra.mxu1 %v12682_v18 }
 0x784   : > { %10413 = vmatprep.subr.mxu1 %v11826_v20 }
 0x7be   : > { %v2311_v10 = vpop.f32.mrb[12].mxu1 }
 0x7bf   : > { %v2317_v11 = vmul.f32 %v11288_v7, %v2311_v10  ;;  %v10372_v13 = vpop.f32.mrb[13].mxu1 }
 0x7c1   : > { %10376 = vmatmul.mubr.msk.f32.vlgmr.msra.gmra.mrb[6].mxu0 %vm1487_vm7, %v2317_v11 }
 0x7c2   : > { %10379 = vmatpush3.msra.mxu0 %v1483_v14  ;;  %10380 = vmatprep.mubr.msk.f32.mxu0 %vm11825_vm2, %v11826_v20 }
 0x7c3   : > { %10383 = vmatprep.subr.mxu0 %v11826_v20 }
 0x7c5   : > { %10381 = vmatmul.mubr.msk.f32.vlgmr.msra.gmra.mrb[8].mxu0 %vm1487_vm7, %v1899_v22 }
 0x7c6   : > { %10385 = vmatprep.mubr.msk.f32.mxu0 %vm11825_vm2, %v11826_v20 }
 0x7c9   : > { %10384 = vmatpush3.xpose.msk.msra.mxu0 %vm1487_vm7, %v2467_v25 }
 0x7ca   : > { %10393 = vmatprep.subr.mxu0 %v11826_v20 }
 0x7cc   : > { %10386 = vmatmul.mubr.msk.f32.vlgmr.msra.gmra.mrb[10].mxu0 %vm1487_vm7, %v2465_v55 }
 0x7cd   : > { %10395 = vmatprep.mubr.msk.f32.mxu0 %vm11825_vm2, %v11826_v20 }
 0x845   : > { %v2613_v16 = vpop.f32.mrb[14].mxu1 }
 0x846   : > { %v2617_v28 = vmul.f32 0.35355338, %v2613_v16  ;;  %v10392_v29 = vpop.f32.mrb[15].mxu1 }
 0x848   : > { %v2618_v30 = vsel %vm1389_vm12, %v2617_v28, -1e+30  ;;  %v2619_v33 = vsel %vm12540_vm13, %v2617_v28, -1e+30 }
 0x849   : > { %v2623_v31 = vsel %vm1487_vm7, %v2618_v30, -inf  ;;  %v2627_v35 = vsel %vm1487_vm7, %v2619_v33, -inf }
 0x84a   : > { %2624 = vmax.xlane.f32.xlu0 %v2623_v31 }
 0x84e   : > { %2628 = vmax.xlane.f32.xlu0 %v2627_v35 }
 0x864   : > { %2721 = vrot.lane.b32.xlu0 %v12561_v54, %s11828_s11 }
 0x894   : > { %v2387_v36 = vpop.f32.mrb[6].mxu0 }
 0x895   : > { %v10377_v38 = vpop.f32.mrb[7].mxu0 }
 0x898   : > { %v2460_v39 = vpop.f32.mrb[8].mxu0 }
 0x899   : > { %v12648_v40 = vadd.f32 %v2460_v39, %v2387_v36  ;;  %v10382_v43 = vpop.f32.mrb[9].mxu0 }
 0x89f   : > { %v2538_v42 = vpop.f32.mrb[10].mxu0 }
 0x8a0   : > { %v2542_v3 = vmul.f32 0.35355338, %v2538_v42  ;;  %v10387_v46 = vpop.f32.mrb[11].mxu0 }
 0x8a2   : > { %v2620_v47 = vsel %vm1641_vm11, %v2542_v3, -inf }
 0x8a3   : > { %2621 = vmax.xlane.f32.xlu1 %v2620_v47 }
 0x8b4   : > { %2645 = vrot.lane.b32.xlu1 %v12507_v19, %s11828_s11 }
 0x8d7   : > { %v2625_v48 = vpop.xlane.xlu0 %2624 }
 0x8db   : > { %v2629_v52 = vpop.xlane.xlu0 %2628 }
 0x8df   : > { %v2722_v7 = vpop.permute.xlu0 %2721 }
 0x930   : > { %v2622_v50 = vpop.xlane.xlu1 %2621 }
 0x931   : > { %v2626_v51 = vmax.f32 %v2622_v50, %v2625_v48 }
 0x933   : > { %v2630_v55 = vmax.f32 %v2626_v51, %v2629_v52 }
 0x934   : > { %v12653_v56 = vpop.permute.xlu1 %2645 }
 0x935   : > { %v2631_v57 = vsub.f32 %v2542_v3, %v2630_v55  ;;  %v2638_v59 = vsub.f32 %v2618_v30, %v2630_v55  ;;  %10394 = vmatpush3.msra.mxu0 %v12653_v56  ;;  %v2798_v63 = vsub.f32 %v2619_v33, %v2630_v55 }
 0x936   : > { %10398 = vmatprep.subr.mxu0 %v11826_v20 }
 0x937   : > { %v2632_v60 = vmul.f32 1.442695, %v2631_v57  ;;  %v2639_v61 = vmul.f32 1.442695, %v2638_v59  ;;  %v2799_v11 = vmul.f32 1.442695, %v2798_v63 }
 0x939   : > { %11291 = vpow2.f32 %v2632_v60 }
 0x93a   : > { %11293 = vpow2.f32 %v2639_v61 }
 0x93b   : > { %11295 = vpow2.f32 %v2799_v11 }
 0x943   : > { %v11292_v4 = vpop.eup %11291 }
 0x944   : > { %v11294_v5 = vpop.eup %11293  ;;  %v2634_v6 = vsel %vm1641_vm11, %v11292_v4, 0.0 }
 0x945   : > { %10396 = vmatmul.mubr.msk.f32.vlgmr.msra.gmra.mrb[12].mxu0 %vm1487_vm7, %v11294_v5  ;;  %v2641_v10 = vsel %vm1487_vm7, %v11294_v5, 0.0  ;;  %2635 = vadd.xlane.f32.xlu1 %v2634_v6  ;;  %v11296_v13 = vpop.eup %11295 }
 0x946   : > { %10399 = vmatpush3.msk.msra.mxu0 %vm1743_vm14, %v2722_v7  ;;  %2642 = vadd.xlane.f32.xlu0 %v2641_v10  ;;  %v2801_v14 = vsel %vm1487_vm7, %v11296_v13, 0.0 }
 0x947   : > { %10400 = vmatprep.mubr.msk.f32.mxu0 %vm11825_vm2, %v11826_v20  ;;  %10403 = vmatprep.subr.mxu0 %v11826_v20 }
 0x94d   : > { %10401 = vmatmul.mubr.msk.f32.vlgmr.msra.gmra.mrb[12].mxu0 %vm1641_vm11, %v11292_v4 }
 0x94e   : > { %10404 = vmatpush3.msra.mxu0 %v12653_v56  ;;  %10405 = vmatprep.mubr.msk.f32.mxu0 %vm11825_vm2, %v11826_v20 }
 0x94f   : > { %10423 = vmatprep.subr.mxu0 %v11826_v20 }
 0x955   : > { %10406 = vmatmul.mubr.msk.f32.vlgmr.msra.gmra.mrb[12].mxu0 %vm1487_vm7, %v11296_v13 }
 0x956   : > { %2955 = vrot.lane.b32.xlu1 %v12489_v9, %s11829_s16  ;;  %10425 = vmatprep.mubr.msk.f32.mxu0 %vm11825_vm2, %v11826_v20 }
 0x95c   : > { %2957 = vrot.lane.b32.xlu0 %v12480_v1, %s11829_s16 }
 0x97a   : > { %2802 = vadd.xlane.f32.xlu1 %v2801_v14 }
 0x98b   : > { %3034 = vrot.lane.b32.xlu1 %v12487_v8, %s11829_s16 }
 0x9d2   : > { %v2636_v9 = vpop.xlane.xlu1 %2635 }
 0x9d3   : > { %v2643_v25 = vpop.xlane.xlu0 %2642 }
 0x9d4   : > { %v2644_v1 = vadd.f32 %v2643_v25, %v2636_v9 }
 0x9d6   : > { %v2956_v22 = vpop.permute.xlu1 %2955 }
 0x9d7   : > { %v2958_v35 = vpop.permute.xlu0 %2957 }
 0xa07   : > { %v2803_v16 = vpop.xlane.xlu1 %2802 }
 0xa08   : > { %v2804_v28 = vadd.f32 %v2803_v16, %v2644_v1 }
 0xa0a   : > { %11297 = vrcp.f32 %v2804_v28  ;;  %v12739_v28 = vld [vmem:[%s13702_s28 + $0x18] sm:$0xff] }
 0xa0b   : > { %v12691_v36 = vpop.permute.xlu1 %3034 }
 0xa14   : > { %v11298_v29 = vpop.eup %11297 }
 0xa28   : > { %v2874_v30 = vpop.f32.mrb[12].mxu0 }
 0xa29   : > { %v2880_v31 = vmul.f32 %v11298_v29, %v2874_v30  ;;  %v10407_v33 = vpop.f32.mrb[13].mxu0 }
 0xa2b   : > { %10411 = vmatmul.mubr.msk.f32.vlgmr.msra.gmra.mrb[16].mxu1 %vm1487_vm7, %v2880_v31 }
 0xa2c   : > { %10414 = vmatpush3.xpose.msk.msra.mxu1 %vm1487_vm7, %v2958_v35  ;;  %10415 = vmatprep.mubr.msk.f32.mxu1 %vm11825_vm2, %v11826_v20 }
 0xa2d   : > { %10418 = vmatprep.subr.mxu1 %v11826_v20 }
 0xa2f   : > { %10416 = vmatmul.mubr.msk.f32.vlgmr.msra.gmra.mrb[18].mxu1 %vm1487_vm7, %v2956_v22 }
 0xa30   : > { %10419 = vmatpush3.xpose.msk.msra.mxu1 %vm1487_vm7, %v12691_v36  ;;  %10420 = vmatprep.mubr.msk.f32.mxu1 %vm11825_vm2, %v11826_v20 }
 0xa31   : > { %10438 = vmatprep.subr.mxu1 %v11826_v20 }
 0xa33   : > { %10421 = vmatmul.mubr.msk.f32.vlgmr.msra.gmra.mrb[20].mxu1 %vm1487_vm7, %v2956_v22 }
 0xa34   : > { %10440 = vmatprep.mubr.msk.f32.mxu1 %vm11825_vm2, %v11826_v20  ;;  %10439 = vmatpush3.msra.mxu1 %v12739_v28 }
 0xa35   : > { %10956 = vmatprep.subr.bf16.mxu1 %v11824_v2 }
 0xafe   : > { %v2950_v38 = vpop.f32.mrb[16].mxu1 }
 0xaff   : > { %v12703_v39 = vadd.f32 %v2950_v38, %v12648_v40  ;;  %v10412_v43 = vpop.f32.mrb[17].mxu1 }
 0xb02   : > { %v3029_v42 = vpop.f32.mrb[18].mxu1 }
 0xb03   : > { %v3033_v3 = vmul.f32 0.35355338, %v3029_v42  ;;  %v10417_v46 = vpop.f32.mrb[19].mxu1 }
 0xb05   : > { %v3111_v47 = vsel %vm1641_vm11, %v3033_v3, -inf }
 0xb06   : > { %3112 = vmax.xlane.f32.xlu0 %v3111_v47  ;;  %v3104_v48 = vpop.f32.mrb[20].mxu1 }
 0xb07   : > { %v3108_v50 = vmul.f32 0.35355338, %v3104_v48  ;;  %v10422_v51 = vpop.f32.mrb[21].mxu1 }
 0xb09   : > { %v3110_v52 = vsel %vm12540_vm13, %v3108_v50, -1e+30  ;;  %v3109_v55 = vsel %vm1389_vm12, %v3108_v50, -1e+30  ;;  %v9829_v50 = vld [vmem:[#allocation10] ss:$0 sm:$0xff] }
 0xb0a   : > { %v3118_v57 = vsel %vm1487_vm7, %v3110_v52, -inf  ;;  %v3114_v40 = vsel %vm1487_vm7, %v3109_v55, -inf }
 0xb0b   : > { %3119 = vmax.xlane.f32.xlu0 %v3118_v57  ;;  %3115 = vmax.xlane.f32.xlu1 %v3114_v40  ;;  %v3868_v57 = vld [vmem:[%s1072_s8] sm:$0xff]  ;;  %s13708_s8 = sld [smem:[#allocation49_spill]] }
 0xb0c   : > { %v9853_v40 = vld [vmem:[%s13697_s17 + $0x20] sm:$0xf] }
 0xb11   : > { %s1085_s9 = scalar_lea.vmem %s13708_s8, %s13711_s5 }
 0xb1c   : > { %3212 = vrot.lane.b32.xlu1 %v12561_v54, %s11829_s16 }
 0xb21   : > { %3136 = vrot.lane.b32.xlu0 %v12507_v19, %s11829_s16 }
 0xb93   : > { %v3113_v59 = vpop.xlane.xlu0 %3112 }
 0xb98   : > { %v3120_v60 = vpop.xlane.xlu0 %3119  ;;  %v3116_v61 = vpop.xlane.xlu1 %3115 }
 0xb99   : > { %v3117_v34 = vmax.f32 %v3113_v59, %v3116_v61 }
 0xb9b   : > { %v3121_v63 = vmax.f32 %v3117_v34, %v3120_v60 }
 0xb9c   : > { %v12716_v4 = vpop.permute.xlu0 %3136  ;;  %v3213_v22 = vpop.permute.xlu1 %3212 }
 0xb9d   : > { %v3122_v5 = vsub.f32 %v3033_v3, %v3121_v63  ;;  %v3129_v6 = vsub.f32 %v3109_v55, %v3121_v63  ;;  %v3289_v7 = vsub.f32 %v3110_v52, %v3121_v63  ;;  %10424 = vmatpush3.msra.mxu0 %v12716_v4  ;;  %v3484_v63 = vld [vmem:[%s13704_s6] sm:$0xff] }
 0xb9e   : > { %10428 = vmatprep.subr.mxu0 %v11826_v20 }
 0xb9f   : > { %v3123_v10 = vmul.f32 1.442695, %v3122_v5  ;;  %v3130_v11 = vmul.f32 1.442695, %v3129_v6  ;;  %v3290_v54 = vmul.f32 1.442695, %v3289_v7 }
 0xba0   : > { %v3485_v5 = vld [vmem:[%s13704_s6 + $0x8] sm:$0xff]  ;;  %v3486_v7 = vld [vmem:[%s13704_s6 + $0x10] sm:$0xff] }
 0xba1   : > { %11299 = vpow2.f32 %v3123_v10  ;;  %v12772_v6 = vpack.c.bf16 %v3485_v5, %v3484_v63  ;;  %v3487_v10 = vld [vmem:[%s13704_s6 + $0x18] sm:$0xff] }
 0xba2   : > { %11301 = vpow2.f32 %v3130_v11  ;;  %v12782_v11 = vpack.c.bf16 %v3487_v10, %v3486_v7 }
 0xba3   : > { %11303 = vpow2.f32 %v3290_v54 }
 0xbab   : > { %v11300_v13 = vpop.eup %11299 }
 0xbac   : > { %v11302_v14 = vpop.eup %11301  ;;  %v3125_v9 = vsel %vm1641_vm11, %v11300_v13, 0.0 }
 0xbad   : > { %10426 = vmatmul.mubr.msk.f32.vlgmr.msra.gmra.mrb[14].mxu0 %vm1487_vm7, %v11302_v14  ;;  %v3132_v25 = vsel %vm1487_vm7, %v11302_v14, 0.0  ;;  %3126 = vadd.xlane.f32.xlu1 %v3125_v9  ;;  %v11304_v16 = vpop.eup %11303 }
 0xbae   : > { %10429 = vmatpush3.msk.msra.mxu0 %vm1743_vm14, %v3213_v22  ;;  %3133 = vadd.xlane.f32.xlu0 %v3132_v25  ;;  %v3292_v1 = vsel %vm1487_vm7, %v11304_v16, 0.0  ;;  %v9830_v22 = vld [vmem:[#allocation12] ss:$0 sm:$0xff] }
 0xbaf   : > { %10430 = vmatprep.mubr.msk.f32.mxu0 %vm11825_vm2, %v11826_v20  ;;  %10433 = vmatprep.subr.mxu0 %v11826_v20 }
 0xbb2   : > { %3293 = vadd.xlane.f32.xlu0 %v3292_v1 }
 0xbb5   : > { %10431 = vmatmul.mubr.msk.f32.vlgmr.msra.gmra.mrb[14].mxu0 %vm1641_vm11, %v11300_v13 }
 0xbb6   : > { %10434 = vmatpush3.msra.mxu0 %v12716_v4  ;;  %10435 = vmatprep.mubr.msk.f32.mxu0 %vm11825_vm2, %v11826_v20 }
 0xbb7   : > { %10962 = vmatprep.subr.bf16.mxu0 %v11824_v2 }
 0xbbd   : > { %10436 = vmatmul.mubr.msk.f32.vlgmr.msra.gmra.mrb[14].mxu0 %vm1487_vm7, %v11304_v16  ;;  %v9831_v16 = vld [vmem:[#allocation13] ss:$0 sm:$0xff] }
 0xbbe   : > { %10470 = vmatprep.mubr.msk.f32.mxu0 %vm11825_vm2, %v11826_v20 }
 0xc3a   : > { %v3127_v30 = vpop.xlane.xlu1 %3126 }
 0xc3b   : > { %v3134_v29 = vpop.xlane.xlu0 %3133 }
 0xc3c   : > { %v3135_v33 = vadd.f32 %v3134_v29, %v3127_v30  ;;  %v3577_v30 = vld [vmem:[%s13705_s1] sm:$0xff] }
 0xc3f   : > { %v3294_v31 = vpop.xlane.xlu0 %3293 }
 0xc40   : > { %v3295_v35 = vadd.f32 %v3294_v31, %v3135_v33  ;;  %v3578_v31 = vld [vmem:[%s13705_s1 + $0x8] sm:$0xff] }
 0xc41   : > { %v12795_v33 = vpack.c.bf16 %v3578_v31, %v3577_v30 }
 0xc42   : > { %11305 = vrcp.f32 %v3295_v35  ;;  %v3579_v35 = vld [vmem:[%s13705_s1 + $0x10] sm:$0xff] }
 0xc43   : > { %10964 = vmatpush3.bf16.msra.mxu0 %v12795_v33 }
 0xc44   : > { %10965 = vmatprep.subr.bf16.mxu0 %v11824_v2 }
 0xc4c   : > { %v11306_v38 = vpop.eup %11305 }
 0xc90   : > { %v3365_v43 = vpop.f32.mrb[14].mxu0 }
 0xc91   : > { %v3371_v42 = vmul.f32 %v11306_v38, %v3365_v43  ;;  %v10437_v3 = vpop.f32.mrb[15].mxu0  ;;  %v3580_v38 = vld [vmem:[%s13705_s1 + $0x18] sm:$0xff] }
 0xc92   : > { %v12805_v43 = vpack.c.bf16 %v3580_v38, %v3579_v35  ;;  %v3582_v3 = vld [vmem:[%s13705_s1 + $0x28] sm:$0xff] }
 0xc93   : > { %10441 = vmatmul.mubr.msk.f32.vlgmr.msra.gmra.mrb[22].mxu1 %vm1487_vm7, %v3371_v42  ;;  %v3581_v42 = vld [vmem:[%s13705_s1 + $0x20] sm:$0xff] }
 0xc94   : > { %10451 = vmatprep.mubr.msk.f32.mxu1 %vm11825_vm2, %v11826_v20  ;;  %10958 = vmatpush3.bf16.msra.mxu1 %v12772_v6 }
 0xc95   : > { %10959 = vmatprep.subr.bf16.mxu1 %v11824_v2  ;;  %10967 = vmatpush3.bf16.msra.mxu0 %v12805_v43 }
 0xc96   : > { %10968 = vmatprep.subr.bf16.mxu0 %v11824_v2 }
 0xc98   : > { %10961 = vmatpush3.bf16.msra.mxu1 %v12782_v11 }
 0xc99   : > { %10974 = vmatprep.subr.bf16.mxu1 %v11824_v2 }
 0xd66   : > { %v3441_v46 = vpop.f32.mrb[22].mxu1 }
 0xd67   : > { %v3445_v47 = vadd.f32 %v3441_v46, %v12703_v39  ;;  %v10442_v48 = vpop.f32.mrb[23].mxu1  ;;  %v12760_v39 = vmul.f32 %v9853_v40, %v12477_v0  ;;  %v12815_v46 = vpack.c.bf16 %v3582_v3, %v3581_v42 }
 0xd68   : > { %v3584_v48 = vld [vmem:[%s13705_s1 + $0x38] sm:$0xff] }
 0xd69   : > { %v3446_v51 = vadd.f32 %v3445_v47, %v12396_v26  ;;  %10970 = vmatpush3.bf16.msra.mxu0 %v12815_v46  ;;  %v3583_v47 = vld [vmem:[%s13705_s1 + $0x30] sm:$0xff] }
 0xd6a   : > { %10971 = vmatprep.subr.bf16.mxu0 %v11824_v2 }
 0xd6b   : > { %v12748_v52 = vadd.f32 %v9829_v50, %v3446_v51  ;;  %v12825_v50 = vpack.c.bf16 %v3584_v48, %v3583_v47  ;;  %v9832_v51 = vld [vmem:[#allocation15] ss:$0 sm:$0xff]  ;;  %v9838_v48 = vld [vmem:[%s13691_s22 + $0x20] sm:$0xff] }
 0xd6d   : > { %v3457_v55 = vsel %vm1186_vm6, %v12748_v52, 0.0  ;;  %10973 = vmatpush3.bf16.msra.mxu0 %v12825_v50 }
 0xd6e   : > { %3458 = vadd.xlane.f32.xlu1 %v3457_v55  ;;  %10986 = vmatprep.subr.bf16.mxu0 %v11824_v2 }
 0xd7f   : > { %3870 = vperm.xlu1 %11272, %v3868_v57  }
 0xd83   : > { %4682 = vrot.lane.b32.xlu1 %v12760_v39, %s11827_s3 }
 0xdfb   : > { %v3459_v26 = vpop.xlane.xlu1 %3458 }
 0xdfc   : > { %v3460_v59 = vmul.f32 0.03125, %v3459_v26 }
 0xdfe   : > { %v3461_v60 = vsub.f32 %v12748_v52, %v3460_v59 }
 0xe00   : > { %v3462_v61 = vmul.f32 %v3461_v60, %v3461_v60 }
 0xe02   : > { %v3463_v34 = vsel %vm1186_vm6, %v3462_v61, 0.0 }
 0xe03   : > { %3464 = vadd.xlane.f32.xlu0 %v3463_v34 }
 0xe90   : > { %v3465_v54 = vpop.xlane.xlu0 %3464 }
 0xe91   : > { %v3466_v13 = vmul.f32 0.03125, %v3465_v54  ;;  %v3871_v54 = vpop.permute.xlu1 %3870 }
 0xe92   : > { %vm3872_vm0 = vcmp.eq.s32.totalorder %v12389_v23, %v3871_v54 }
 0xe93   : > { %v3467_v14 = vadd.f32 1e-05, %v3466_v13  ;;  %v12840_v13 = vsel %vm3872_vm0, 1.0, %v11826_v20 }
 0xe95   : > { %11307 = vrsqrt.f32 %v3467_v14 }
 0xe9f   : > { %v11308_v9 = vpop.eup %11307 }
 0xea0   : > { %v3469_v25 = vmul.f32 %v11308_v9, %v3461_v60 }
 0xea2   : > { %v3476_v1 = vmul.f32 %v9830_v22, %v3469_v25 }
 0xea4   : > { %v3483_v29 = vadd.f32 %v9831_v16, %v3476_v1 }
 0xea6   : > { %10452 = vmatmul.mubr.msk.f32.vlgmr.msra.gmra.mrb[24].mxu1 %vm1186_vm6, %v3483_v29 }
 0xea7   : > { %10481 = vmatprep.mubr.msk.f32.mxu1 %vm11825_vm2, %v11826_v20 }
 0xf79   : > { %v3564_v55 = vpop.f32.mrb[24].mxu1 }
 0xf7a   : > { %v3565_v57 = vadd.f32 %v9832_v51, %v3564_v55  ;;  %v10453_v40 = vpop.f32.mrb[25].mxu1  ;;  %v9839_v51 = vld [vmem:[%s13691_s22 + $0x28] sm:$0xff] }
 0xf7b   : > { %v12873_v55 = vpack.c.bf16 %v9839_v51, %v9838_v48  ;;  %v9841_v40 = vld [vmem:[%s13691_s22 + $0x38] sm:$0xff] }
 0xf7c   : > { %v3568_v26 = vmul.f32 %v3565_v57, %v3565_v57 }
 0xf7d   : > { %10976 = vmatpush3.bf16.msra.mxu1 %v12873_v55 }
 0xf7e   : > { %v3569_v59 = vmul.f32 %v3568_v26, %v3565_v57  ;;  %10977 = vmatprep.subr.bf16.mxu1 %v11824_v2 }
 0xf80   : > { %v3570_v60 = vmul.f32 0.044715, %v3569_v59 }
 0xf82   : > { %v3571_v61 = vadd.f32 %v3570_v60, %v3565_v57 }
 0xf84   : > { %v3572_v34 = vmul.f32 0.7978846, %v3571_v61 }
 0xf86   : > { %11309 = vtanh.f32 %v3572_v34 }
 0xf90   : > { %v11310_v63 = vpop.eup %11309 }
 0xf91   : > { %v3574_v5 = vadd.f32 1.0, %v11310_v63 }
 0xf93   : > { %v3575_v7 = vmul.f32 0.5, %v3574_v5 }
 0xf95   : > { %v3576_v10 = vmul.f32 %v3575_v7, %v3565_v57  ;;  %v9840_v57 = vld [vmem:[%s13691_s22 + $0x30] sm:$0xff] }
 0xf96   : > { %v12883_v26 = vpack.c.bf16 %v9841_v40, %v9840_v57  ;;  %v11399_v40 = vld [vmem:[#allocation7] ss:$0 sm:$0xff] }
 0xf97   : > { %10471 = vmatmul.mubr.msk.f32.vlgmr.msra.gmra.mrb[16].mxu0 %vm3585_vm15, %v3576_v10  ;;  %v12887_v10 = vld [vmem:[#allocation2 + $0x1] ss:$0 sm:$0xff] }
 0xf98   : > { %10988 = vmatpush3.bf16.msra.mxu0 %v12352_v12  ;;  %10509 = vmatprep.mubr.msk.f32.mxu0 %vm11825_vm2, %v11826_v20  ;;  %v11395_v12 = vld [vmem:[%s13690_s2 + $0x30] sm:$0x3] }
 0xf99   : > { %10989 = vmatprep.subr.bf16.mxu0 %v11824_v2  ;;  %10979 = vmatpush3.bf16.msra.mxu1 %v12883_v26 }
 0xf9a   : > { %10980 = vmatprep.subr.bf16.mxu1 %v11824_v2 }
 0xf9c   : > { %10991 = vmatpush3.bf16.msra.mxu0 %v12365_v17 }
 0xf9d   : > { %10992 = vmatprep.subr.bf16.mxu0 %v11824_v2 }
 0xfa0   : > { %10994 = vmatpush3.bf16.msra.mxu0 %v12379_v21  ;;  %v12855_v21 = vld [vmem:[#allocation16] ss:$0 sm:$0xff] }
 0xfa1   : > { %10507 = vmatprep.subr.mxu0 %v11826_v20 }
 0xfa4   : > { %10508 = vmatpush3.msk.msra.mxu0 %vm1110_vm3, %v11395_v12  ;;  %v9844_v12 = vld [vmem:[%s13696_s12 + $0x20] sm:$0xff]  ;;  %vm4415_vm3 = vcmask 30720  }
 0xfa5   : > { %10510 = vmatmul.mubr.msk.f32.vlgmr.msra.gmra.mrb[18].mxu0 %vm1106_vm4, %v12840_v13  ;;  %11007 = vmatprep.subr.bf16.mxu0 %v11824_v2  ;;  %vm4419_vm4 = vcmask 63488  }
 0xfa6   : > { %11009 = vmatpush3.bf16.msra.mxu0 %v12451_v58  ;;  %10542 = vmatprep.mubr.msk.f32.mxu0 %vm11825_vm2, %v11826_v20 }
 0xfa7   : > { %11010 = vmatprep.subr.bf16.mxu0 %v11824_v2 }
 0xfaa   : > { %11012 = vmatpush3.bf16.msra.mxu0 %v12462_v62 }
 0xfab   : > { %10550 = vmatprep.subr.mxu0 %v11826_v20 }
0x106a   : > { %v3655_v17 = vpop.f32.mrb[16].mxu0 }
0x106b   : > { %v3659_v14 = vadd.f32 %v3655_v17, %v12748_v52  ;;  %v10472_v9 = vpop.f32.mrb[17].mxu0  ;;  %v9845_v17 = vld [vmem:[%s13696_s12 + $0x28] sm:$0xff] }
0x106d   : > { %v3667_v22 = vadd.f32 %v12855_v21, %v3659_v14  ;;  %v12895_v14 = vld [vmem:[#allocation4 + $0x1] ss:$0 sm:$0xff] }
0x106f   : > { %v3672_v25 = vsel %vm1186_vm6, %v3667_v22, 0.0 }
0x1070   : > { %3673 = vadd.xlane.f32.xlu0 %v3672_v25 }
0x1078   : > { %v12860_v58 = vpop.f32.mrb[18].mxu0 }
0x1079   : > { %v10511_v16 = vpop.f32.mrb[19].mxu0  ;;  %v3963_v62 = vsel %vm3962_vm1, %v12860_v58, 0.0 }
0x107a   : > { %3964 = vadd.xlane.f32.xlu0 %v3963_v62  ;;  %v9846_v16 = vld [vmem:[%s13696_s12 + $0x30] sm:$0xff]  ;;  %v9847_v62 = vld [vmem:[%s13696_s12 + $0x38] sm:$0xff] }
0x10fd   : > { %v3674_v1 = vpop.xlane.xlu0 %3673 }
0x10fe   : > { %v3675_v29 = vmul.f32 0.03125, %v3674_v1  ;;  %v12909_v1 = vpack.c.bf16 %v9847_v62, %v9846_v16 }
0x1100   : > { %v3676_v30 = vsub.f32 %v3667_v22, %v3675_v29  ;;  %v12898_v22 = vpack.c.bf16 %v9845_v17, %v9844_v12 }
0x1102   : > { %v3677_v31 = vmul.f32 %v3676_v30, %v3676_v30 }
0x1104   : > { %v3678_v52 = vsel %vm1186_vm6, %v3677_v31, 0.0  ;;  %v11396_v31 = vld [vmem:[#allocation2] ss:$0 sm:$0xff] }
0x1105   : > { %3679 = vadd.xlane.f32.xlu0 %v3678_v52 }
0x1107   : > { %v3965_v35 = vpop.xlane.xlu0 %3964 }
0x1108   : > { %v3966_v38 = vmul.f32 0.03125, %v3965_v35  ;;  %v11397_v35 = vld [vmem:[#allocation4] ss:$0 sm:$0xff] }
0x110a   : > { %v3967_v42 = vsub.f32 %v12860_v58, %v3966_v38 }
0x110c   : > { %v3968_v3 = vmul.f32 %v3967_v42, %v3967_v42 }
0x110e   : > { %v3969_v47 = vsel %vm3962_vm1, %v3968_v3, 0.0 }
0x110f   : > { %3970 = vadd.xlane.f32.xlu0 %v3969_v47  ;;  %v11398_v47 = vld [vmem:[#allocation6] ss:$0 sm:$0xff] }
0x1192   : > { %v3680_v59 = vpop.xlane.xlu0 %3679 }
0x1193   : > { %v3681_v60 = vmul.f32 0.03125, %v3680_v59 }
0x1195   : > { %v3682_v61 = vadd.f32 1e-05, %v3681_v60 }
0x1197   : > { %11311 = vrsqrt.f32 %v3682_v61  ;;  %v4683_v61 = vpop.permute.xlu1 %4682 }
0x119c   : > { %v3971_v34 = vpop.xlane.xlu0 %3970 }
0x119d   : > { %v3972_v63 = vmul.f32 0.03125, %v3971_v34 }
0x119f   : > { %v3973_v5 = vadd.f32 1e-05, %v3972_v63 }
0x11a1   : > { %v11312_v7 = vpop.eup %11311  ;;  %11313 = vrsqrt.f32 %v3973_v5 }
0x11a2   : > { %v3684_v54 = vmul.f32 %v11312_v7, %v3676_v30 }
0x11a4   : > { %v3691_v9 = vmul.f32 %v12887_v10, %v3684_v54 }
0x11a6   : > { %v3698_v25 = vadd.f32 %v12895_v14, %v3691_v9 }
0x11a8   : > { %10482 = vmatmul.mubr.msk.f32.vlgmr.msra.gmra.mrb[26].mxu1 %vm1186_vm6, %v3698_v25 }
0x11a9   : > { %10982 = vmatpush3.bf16.msra.mxu1 %v12898_v22  ;;  %10492 = vmatprep.mubr.msk.f32.mxu1 %vm11825_vm2, %v11826_v20 }
0x11aa   : > { %10983 = vmatprep.subr.bf16.mxu1 %v11824_v2 }
0x11ab   : > { %v11314_v29 = vpop.eup %11313 }
0x11ac   : > { %v3975_v30 = vmul.f32 %v11314_v29, %v3967_v42 }
0x11ad   : > { %10985 = vmatpush3.bf16.msra.mxu1 %v12909_v1 }
0x11ae   : > { %10995 = vmatprep.subr.bf16.mxu1 %v11824_v2  ;;  %v3976_v52 = vmul.f32 %v11396_v31, %v3975_v30 }
0x11b0   : > { %10493 = vmatmul.mubr.msk.f32.vlgmr.msra.gmra.mrb[28].mxu1 %vm1186_vm6, %v3698_v25  ;;  %v3977_v38 = vadd.f32 %v11397_v35, %v3976_v52 }
0x11b1   : > { %10997 = vmatpush3.bf16.msra.mxu1 %v12422_v41  ;;  %10520 = vmatprep.mubr.msk.f32.mxu1 %vm11825_vm2, %v11826_v20 }
0x11b2   : > { %10543 = vmatmul.mubr.msk.f32.vlgmr.msra.gmra.mrb[20].mxu0 %vm1186_vm6, %v3977_v38  ;;  %10998 = vmatprep.subr.bf16.mxu1 %v11824_v2 }
0x11b3   : > { %10551 = vmatpush3.xpose.msk.msra.mxu0 %vm1487_vm7, %v12487_v8  ;;  %10552 = vmatprep.mubr.msk.f32.mxu0 %vm11825_vm2, %v11826_v20 }
0x11b4   : > { %10560 = vmatprep.subr.mxu0 %v11826_v20 }
0x11b5   : > { %11000 = vmatpush3.bf16.msra.mxu1 %v12435_v45 }
0x11b6   : > { %11001 = vmatprep.subr.bf16.mxu1 %v11824_v2 }
0x11b8   : > { %10521 = vmatmul.mubr.msk.f32.vlgmr.msra.gmra.mrb[30].mxu1 %vm1186_vm6, %v3977_v38 }
0x11b9   : > { %11003 = vmatpush3.bf16.msra.mxu1 %v12411_v37  ;;  %10531 = vmatprep.mubr.msk.f32.mxu1 %vm11825_vm2, %v11826_v20 }
0x11ba   : > { %11004 = vmatprep.subr.bf16.mxu1 %v11824_v2 }
0x11bd   : > { %11006 = vmatpush3.bf16.msra.mxu1 %v12431_v44 }
0x11be   : > { %10545 = vmatprep.subr.mxu1 %v11826_v20 }
0x11c0   : > { %10532 = vmatmul.mubr.msk.f32.vlgmr.msra.gmra.mrb[32].mxu1 %vm1186_vm6, %v3977_v38 }
0x11c1   : > { %10547 = vmatprep.mubr.msk.f32.mxu1 %vm11825_vm2, %v11826_v20 }
0x11c6   : > { %10546 = vmatpush3.xpose.msk.msra.mxu1 %vm1487_vm7, %v12760_v39 }
0x11c7   : > { %10555 = vmatprep.subr.mxu1 %v11826_v20 }
0x127b   : > { %v12942_v37 = vpop.f32.mrb[26].mxu1 }
0x127c   : > { %v10483_v41 = vpop.f32.mrb[27].mxu1 }
0x1283   : > { %v12944_v45 = vpop.f32.mrb[28].mxu1 }
0x1284   : > { %v10494_v8 = vpop.f32.mrb[29].mxu1 }
0x1285   : > { %v12946_v42 = vpop.f32.mrb[20].mxu0 }
0x1286   : > { %v10544_v44 = vpop.f32.mrb[21].mxu0 }
0x128b   : > { %v4047_v3 = vpop.f32.mrb[30].mxu1 }
0x128c   : > { %v12948_v48 = vadd.f32 %v11398_v47, %v4047_v3  ;;  %v10522_v51 = vpop.f32.mrb[31].mxu1 }
0x128e   : > { %4680 = vrot.lane.b32.xlu0 %v12948_v48, %s11827_s3  ;;  %10548 = vmatmul.mubr.msk.f32.vlgmr.msra.gmra.mrb[34].mxu1 %vm1487_vm7, %v12948_v48 }
0x128f   : > { %10553 = vmatmul.mubr.msk.f32.vlgmr.msra.gmra.mrb[22].mxu0 %vm1487_vm7, %v12948_v48  ;;  %10557 = vmatprep.mubr.msk.f32.mxu1 %vm11825_vm2, %v11826_v20 }
0x1290   : > { %10561 = vmatpush3.msra.mxu0 %v12507_v19  ;;  %10562 = vmatprep.mubr.msk.f32.mxu0 %vm11825_vm2, %v11826_v20 }
0x1291   : > { %10565 = vmatprep.subr.mxu0 %v11826_v20 }
0x1293   : > { %v4117_v57 = vpop.f32.mrb[32].mxu1 }
0x1294   : > { %v12962_v59 = vadd.f32 %v11399_v40, %v4117_v57  ;;  %v10533_v60 = vpop.f32.mrb[33].mxu1 }
0x1296   : > { %4831 = vrot.lane.b32.xlu1 %v12962_v59, %s11827_s3  ;;  %10556 = vmatpush3.xpose.msk.msra.mxu1 %vm1487_vm7, %v12962_v59 }
0x1297   : > { %10575 = vmatprep.subr.mxu1 %v11826_v20 }
0x1299   : > { %10558 = vmatmul.mubr.msk.f32.vlgmr.msra.gmra.mrb[36].mxu1 %vm1487_vm7, %v12948_v48 }
0x129a   : > { %10576 = vmatpush3.xpose.msk.msra.mxu1 %vm1487_vm7, %v4683_v61  ;;  %10577 = vmatprep.mubr.msk.f32.mxu1 %vm11825_vm2, %v11826_v20 }
0x129b   : > { %10580 = vmatprep.subr.mxu1 %v11826_v20 }
0x1300   : > { %v4681_v19 = vpop.permute.xlu0 %4680 }
0x1301   : > { %10578 = vmatmul.mubr.msk.f32.vlgmr.msra.gmra.mrb[38].mxu1 %vm1487_vm7, %v4681_v19 }
0x1302   : > { %10581 = vmatpush3.xpose.msk.msra.mxu1 %vm1487_vm7, %v12525_v27  ;;  %10582 = vmatprep.mubr.msk.f32.mxu1 %vm11825_vm2, %v11826_v20 }
0x1303   : > { %10585 = vmatprep.subr.mxu1 %v11826_v20 }
0x1305   : > { %10583 = vmatmul.mubr.msk.f32.vlgmr.msra.gmra.mrb[40].mxu1 %vm1487_vm7, %v4681_v19 }
0x1306   : > { %10587 = vmatprep.mubr.msk.f32.mxu1 %vm11825_vm2, %v11826_v20 }
0x1308   : > { %v4832_v34 = vpop.permute.xlu1 %4831 }
0x1309   : > { %10586 = vmatpush3.xpose.msk.msra.mxu1 %vm1487_vm7, %v4832_v34 }
0x130a   : > { %10605 = vmatprep.subr.mxu1 %v11826_v20 }
0x130c   : > { %10588 = vmatmul.mubr.msk.f32.vlgmr.msra.gmra.mrb[42].mxu1 %vm1487_vm7, %v4681_v19  ;;  %v9854_v19 = vld [vmem:[%s13697_s17 + $0x24] sm:$0xf] }
0x130d   : > { %10606 = vmatpush3.msra.mxu1 %v12613_v49  ;;  %10607 = vmatprep.mubr.msk.f32.mxu1 %vm11825_vm2, %v11826_v20  ;;  %v13009_v34 = vmul.f32 %v9854_v19, %v12477_v0 }
0x130e   : > { %10610 = vmatprep.subr.mxu1 %v11826_v20 }
0x1361   : > { %v4263_v27 = vpop.f32.mrb[34].mxu1 }
0x1362   : > { %v4267_v63 = vmul.f32 0.35355338, %v4263_v27  ;;  %v4334_v5 = vpop.f32.mrb[22].mxu0  ;;  %v10549_v7 = vpop.f32.mrb[35].mxu1  ;;  %v11400_v27 = vld [vmem:[#allocation9] ss:$0 sm:$0xff] }
0x1363   : > { %v4338_v54 = vmul.f32 0.35355338, %v4334_v5  ;;  %v10554_v12 = vpop.f32.mrb[23].mxu0  ;;  %v13014_v5 = vadd.f32 %v11400_v27, %v12946_v42 }
0x1364   : > { %v4416_v17 = vsel %vm4415_vm3, %v4267_v63, -inf }
0x1365   : > { %4417 = vmax.xlane.f32.xlu1 %v4416_v17  ;;  %v4339_v9 = vsel %vm1389_vm12, %v4338_v54, -1e+30 }
0x1366   : > { %v4420_v49 = vsel %vm4419_vm4, %v4339_v9, -inf }
0x1367   : > { %4421 = vmax.xlane.f32.xlu0 %v4420_v49 }
0x136c   : > { %v4409_v25 = vpop.f32.mrb[36].mxu1 }
0x136d   : > { %v4413_v16 = vmul.f32 0.35355338, %v4409_v25  ;;  %v10559_v62 = vpop.f32.mrb[37].mxu1 }
0x136f   : > { %v4414_v29 = vsel %vm12518_vm10, %v4413_v16, -1e+30 }
0x1370   : > { %v4425_v30 = vsel %vm4424_vm5, %v4414_v29, -inf }
0x1371   : > { %4426 = vmax.xlane.f32.xlu1 %v4425_v30 }
0x13d4   : > { %v4754_v31 = vpop.f32.mrb[38].mxu1 }
0x13d5   : > { %v4758_v52 = vmul.f32 0.35355338, %v4754_v31  ;;  %v10579_v35 = vpop.f32.mrb[39].mxu1 }
0x13d7   : > { %v4907_v38 = vsel %vm4415_vm3, %v4758_v52, -inf }
0x13d8   : > { %4908 = vmax.xlane.f32.xlu1 %v4907_v38  ;;  %v4825_v41 = vpop.f32.mrb[40].mxu1 }
0x13d9   : > { %v4829_v8 = vmul.f32 0.35355338, %v4825_v41  ;;  %v10584_v44 = vpop.f32.mrb[41].mxu1 }
0x13db   : > { %v4830_v3 = vsel %vm1389_vm12, %v4829_v8, -1e+30 }
0x13dc   : > { %v4910_v47 = vsel %vm4419_vm4, %v4830_v3, -inf }
0x13dd   : > { %4911 = vmax.xlane.f32.xlu1 %v4910_v47 }
0x13df   : > { %v4901_v51 = vpop.f32.mrb[42].mxu1 }
0x13e0   : > { %v4905_v57 = vmul.f32 0.35355338, %v4901_v51  ;;  %v10589_v40 = vpop.f32.mrb[43].mxu1 }
0x13e2   : > { %v4906_v60 = vsel %vm12518_vm10, %v4905_v57, -1e+30 }
0x13e3   : > { %v4914_v61 = vsel %vm4424_vm5, %v4906_v60, -inf }
0x13e4   : > { %4915 = vmax.xlane.f32.xlu0 %v4914_v61 }
0x13ee   : > { %5005 = vrot.lane.b32.xlu1 %v13009_v34, %s11827_s3 }
0x13f2   : > { %v4418_v7 = vpop.xlane.xlu1 %4417 }
0x13f4   : > { %v4422_v54 = vpop.xlane.xlu0 %4421 }
0x13f5   : > { %v4423_v12 = vmax.f32 %v4418_v7, %v4422_v54 }
0x13fa   : > { %5089 = vrot.lane.b32.xlu0 %v13014_v5, %s11827_s3 }
0x13fe   : > { %v4427_v17 = vpop.xlane.xlu1 %4426 }
0x13ff   : > { %v4428_v49 = vmax.f32 %v4423_v12, %v4427_v17 }
0x1401   : > { %v4436_v25 = vsub.f32 %v4339_v9, %v4428_v49  ;;  %v4429_v62 = vsub.f32 %v4267_v63, %v4428_v49  ;;  %v4592_v31 = vsub.f32 %v4414_v29, %v4428_v49 }
0x1403   : > { %v4437_v16 = vmul.f32 1.442695, %v4436_v25  ;;  %v4430_v30 = vmul.f32 1.442695, %v4429_v62  ;;  %v4593_v42 = vmul.f32 1.442695, %v4592_v31 }
0x1405   : > { %11315 = vpow2.f32 %v4437_v16 }
0x1406   : > { %11317 = vpow2.f32 %v4430_v30 }
0x1407   : > { %11319 = vpow2.f32 %v4593_v42 }
0x140f   : > { %v11316_v35 = vpop.eup %11315 }
0x1410   : > { %10563 = vmatmul.mubr.msk.f32.vlgmr.msra.gmra.mrb[24].mxu0 %vm1487_vm7, %v11316_v35  ;;  %v11318_v9 = vpop.eup %11317 }
0x1411   : > { %10566 = vmatpush3.msk.msra.mxu0 %vm1743_vm14, %v13009_v34  ;;  %10567 = vmatprep.mubr.msk.f32.mxu0 %vm11825_vm2, %v11826_v20  ;;  %v11320_v63 = vpop.eup %11319 }
0x1412   : > { %10570 = vmatprep.subr.mxu0 %v11826_v20  ;;  %v4595_v25 = vsel %vm4424_vm5, %v11320_v63, 0.0 }
0x1418   : > { %10568 = vmatmul.mubr.msk.f32.vlgmr.msra.gmra.mrb[24].mxu0 %vm1641_vm11, %v11318_v9 }
0x1419   : > { %10571 = vmatpush3.msk.msra.mxu0 %vm4603_vm8, %v13014_v5  ;;  %10572 = vmatprep.mubr.msk.f32.mxu0 %vm11825_vm2, %v11826_v20 }
0x141a   : > { %10590 = vmatprep.subr.mxu0 %v11826_v20 }
0x1420   : > { %10573 = vmatmul.mubr.msk.f32.vlgmr.msra.gmra.mrb[24].mxu0 %vm4599_vm9, %v11320_v63 }
0x1421   : > { %10591 = vmatpush3.msra.mxu0 %v12582_v32  ;;  %10592 = vmatprep.mubr.msk.f32.mxu0 %vm11825_vm2, %v11826_v20 }
0x1422   : > { %10595 = vmatprep.subr.mxu0 %v11826_v20 }
0x1465   : > { %v4909_v29 = vpop.xlane.xlu1 %4908 }
0x146a   : > { %v4912_v38 = vpop.xlane.xlu1 %4911 }
0x146b   : > { %v4913_v41 = vmax.f32 %v4909_v29, %v4912_v38 }
0x146e   : > { %v5006_v54 = vpop.permute.xlu1 %5005 }
0x1471   : > { %v4916_v8 = vpop.xlane.xlu0 %4915 }
0x1472   : > { %v4917_v44 = vmax.f32 %v4913_v41, %v4916_v8 }
0x1474   : > { %v4918_v47 = vsub.f32 %v4758_v52, %v4917_v44  ;;  %v4925_v51 = vsub.f32 %v4830_v3, %v4917_v44  ;;  %v5082_v61 = vsub.f32 %v4906_v60, %v4917_v44  ;;  %v4439_v52 = vsel %vm4419_vm4, %v11316_v35, 0.0 }
0x1475   : > { %v4432_v60 = vsel %vm4415_vm3, %v11318_v9, 0.0  ;;  %v5090_v49 = vpop.permute.xlu0 %5089 }
0x1476   : > { %v4919_v57 = vmul.f32 1.442695, %v4918_v47  ;;  %v4926_v40 = vmul.f32 1.442695, %v4925_v51  ;;  %v5083_v19 = vmul.f32 1.442695, %v5082_v61 }
0x1478   : > { %11321 = vpow2.f32 %v4919_v57 }
0x1479   : > { %11323 = vpow2.f32 %v4926_v40 }
0x147a   : > { %11325 = vpow2.f32 %v5083_v19 }
0x1482   : > { %v11322_v32 = vpop.eup %11321 }
0x1483   : > { %v11324_v27 = vpop.eup %11323  ;;  %v4921_v7 = vsel %vm4415_vm3, %v11322_v32, 0.0 }
0x1484   : > { %10593 = vmatmul.mubr.msk.f32.vlgmr.msra.gmra.mrb[26].mxu0 %vm1487_vm7, %v11324_v27  ;;  %v4928_v12 = vsel %vm4419_vm4, %v11324_v27, 0.0  ;;  %4922 = vadd.xlane.f32.xlu1 %v4921_v7  ;;  %v11326_v3 = vpop.eup %11325 }
0x1485   : > { %10596 = vmatpush3.msk.msra.mxu0 %vm1743_vm14, %v5006_v54  ;;  %4929 = vadd.xlane.f32.xlu0 %v4928_v12  ;;  %v5085_v17 = vsel %vm4424_vm5, %v11326_v3, 0.0 }
0x1486   : > { %10597 = vmatprep.mubr.msk.f32.mxu0 %vm11825_vm2, %v11826_v20  ;;  %10600 = vmatprep.subr.mxu0 %v11826_v20 }
0x1488   : > { %4440 = vadd.xlane.f32.xlu1 %v4439_v52 }
0x1489   : > { %4433 = vadd.xlane.f32.xlu0 %v4432_v60 }
0x148c   : > { %10598 = vmatmul.mubr.msk.f32.vlgmr.msra.gmra.mrb[26].mxu0 %vm1641_vm11, %v11322_v32  ;;  %5086 = vadd.xlane.f32.xlu1 %v5085_v17 }
0x148d   : > { %10601 = vmatpush3.msk.msra.mxu0 %vm4603_vm8, %v5090_v49  ;;  %4596 = vadd.xlane.f32.xlu0 %v4595_v25 }
0x148e   : > { %10602 = vmatprep.mubr.msk.f32.mxu0 %vm11825_vm2, %v11826_v20  ;;  %10620 = vmatprep.subr.mxu0 %v11826_v20 }
0x1494   : > { %10603 = vmatmul.mubr.msk.f32.vlgmr.msra.gmra.mrb[26].mxu0 %vm4599_vm9, %v11326_v3 }
0x1495   : > { %10621 = vmatpush3.xpose.msk.msra.mxu0 %vm1487_vm7, %v12617_v53  ;;  %10622 = vmatprep.mubr.msk.f32.mxu0 %vm11825_vm2, %v11826_v20 }
0x1496   : > { %10630 = vmatprep.subr.mxu0 %v11826_v20 }
0x149d   : > { %5317 = vrot.lane.b32.xlu1 %v12760_v39, %s11828_s11 }
0x14a1   : > { %5466 = vrot.lane.b32.xlu1 %v12962_v59, %s11828_s11 }
0x14a3   : > { %5315 = vrot.lane.b32.xlu0 %v12948_v48, %s11828_s11 }
0x14f3   : > { %v4673_v16 = vpop.f32.mrb[24].mxu0 }
0x14f4   : > { %v10574_v62 = vpop.f32.mrb[25].mxu0 }
0x1511   : > { %v4923_v30 = vpop.xlane.xlu1 %4922 }
0x1512   : > { %v4930_v31 = vpop.xlane.xlu0 %4929 }
0x1513   : > { %v4931_v44 = vadd.f32 %v4930_v31, %v4923_v30 }
0x1515   : > { %v4441_v35 = vpop.xlane.xlu1 %4440 }
0x1516   : > { %v4434_v53 = vpop.xlane.xlu0 %4433 }
0x1517   : > { %v4442_v42 = vadd.f32 %v4441_v35, %v4434_v53 }
0x1519   : > { %v5087_v8 = vpop.xlane.xlu1 %5086 }
0x151a   : > { %v4597_v9 = vpop.xlane.xlu0 %4596  ;;  %v5088_v47 = vadd.f32 %v5087_v8, %v4931_v44 }
0x151b   : > { %v4598_v63 = vadd.f32 %v4597_v9, %v4442_v42 }
0x151d   : > { %11327 = vrcp.f32 %v4598_v63  ;;  %v5318_v19 = vpop.permute.xlu1 %5317 }
0x151e   : > { %v5316_v29 = vpop.permute.xlu0 %5315  ;;  %11329 = vrcp.f32 %v5088_v47 }
0x151f   : > { %10623 = vmatmul.mubr.msk.f32.vlgmr.msra.gmra.mrb[28].mxu0 %vm1487_vm7, %v5316_v29 }
0x1520   : > { %10631 = vmatpush3.msra.mxu0 %v12653_v56  ;;  %10632 = vmatprep.mubr.msk.f32.mxu0 %vm11825_vm2, %v11826_v20  ;;  %v11401_v56 = vld [vmem:[%s13702_s28] sm:$0xff] }
0x1521   : > { %10635 = vmatprep.subr.mxu0 %v11826_v20  ;;  %v5467_v32 = vpop.permute.xlu1 %5466 }
0x1527   : > { %v11328_v38 = vpop.eup %11327 }
0x1528   : > { %v4679_v41 = vmul.f32 %v11328_v38, %v4673_v16  ;;  %v11330_v51 = vpop.eup %11329 }
0x1567   : > { %v5162_v57 = vpop.f32.mrb[26].mxu0 }
0x1568   : > { %v5168_v40 = vmul.f32 %v11330_v51, %v5162_v57  ;;  %v10604_v61 = vpop.f32.mrb[27].mxu0 }
0x156a   : > { %10608 = vmatmul.mubr.msk.f32.vlgmr.msra.gmra.mrb[44].mxu1 %vm1487_vm7, %v5168_v40 }
0x156b   : > { %10611 = vmatpush3.msra.mxu1 %v11401_v56  ;;  %10612 = vmatprep.mubr.msk.f32.mxu1 %vm11825_vm2, %v11826_v20 }
0x156c   : > { %10615 = vmatprep.subr.mxu1 %v11826_v20 }
0x156e   : > { %10613 = vmatmul.mubr.msk.f32.vlgmr.msra.gmra.mrb[46].mxu1 %vm1487_vm7, %v4679_v41 }
0x156f   : > { %10617 = vmatprep.mubr.msk.f32.mxu1 %vm11825_vm2, %v11826_v20 }
0x1572   : > { %10616 = vmatpush3.xpose.msk.msra.mxu1 %vm1487_vm7, %v5318_v19 }
0x1573   : > { %10625 = vmatprep.subr.mxu1 %v11826_v20 }
0x1575   : > { %10618 = vmatmul.mubr.msk.f32.vlgmr.msra.gmra.mrb[48].mxu1 %vm1487_vm7, %v5316_v29 }
0x1576   : > { %10626 = vmatpush3.xpose.msk.msra.mxu1 %vm1487_vm7, %v5467_v32  ;;  %10627 = vmatprep.mubr.msk.f32.mxu1 %vm11825_vm2, %v11826_v20 }
0x1577   : > { %10645 = vmatprep.subr.mxu1 %v11826_v20 }
0x1579   : > { %10628 = vmatmul.mubr.msk.f32.vlgmr.msra.gmra.mrb[50].mxu1 %vm1487_vm7, %v5316_v29 }
0x157a   : > { %10646 = vmatpush3.msra.mxu1 %v12682_v18  ;;  %10647 = vmatprep.mubr.msk.f32.mxu1 %vm11825_vm2, %v11826_v20 }
0x157b   : > { %10650 = vmatprep.subr.mxu1 %v11826_v20 }
0x15f2   : > { %v5460_v27 = vpop.f32.mrb[28].mxu0 }
0x15f3   : > { %v5464_v7 = vmul.f32 0.35355338, %v5460_v27  ;;  %v10624_v54 = vpop.f32.mrb[29].mxu0 }
0x15f5   : > { %v5465_v12 = vsel %vm1389_vm12, %v5464_v7, -1e+30 }
0x15f6   : > { %v5545_v52 = vsel %vm4419_vm4, %v5465_v12, -inf }
0x15f7   : > { %5546 = vmax.xlane.f32.xlu0 %v5545_v52 }
0x163d   : > { %v5238_v3 = vpop.f32.mrb[44].mxu1 }
0x163e   : > { %v10609_v60 = vpop.f32.mrb[45].mxu1 }
0x1641   : > { %v5311_v17 = vpop.f32.mrb[46].mxu1 }
0x1642   : > { %v13093_v49 = vadd.f32 %v5311_v17, %v5238_v3  ;;  %v10614_v18 = vpop.f32.mrb[47].mxu1 }
0x1648   : > { %v5389_v25 = vpop.f32.mrb[48].mxu1 }
0x1649   : > { %v5393_v16 = vmul.f32 0.35355338, %v5389_v25  ;;  %v10619_v62 = vpop.f32.mrb[49].mxu1 }
0x164b   : > { %v5542_v30 = vsel %vm4415_vm3, %v5393_v16, -inf }
0x164c   : > { %5543 = vmax.xlane.f32.xlu1 %v5542_v30  ;;  %v5536_v31 = vpop.f32.mrb[50].mxu1 }
0x164d   : > { %v5540_v35 = vmul.f32 0.35355338, %v5536_v31  ;;  %v10629_v53 = vpop.f32.mrb[51].mxu1 }
0x164f   : > { %v5541_v42 = vsel %vm12518_vm10, %v5540_v35, -1e+30 }
0x1650   : > { %v5549_v9 = vsel %vm4424_vm5, %v5541_v42, -inf }
0x1651   : > { %5550 = vmax.xlane.f32.xlu0 %v5549_v9 }
0x165d   : > { %5640 = vrot.lane.b32.xlu1 %v13009_v34, %s11828_s11 }
0x1667   : > { %5724 = vrot.lane.b32.xlu0 %v13014_v5, %s11828_s11 }
0x1684   : > { %v5547_v63 = vpop.xlane.xlu0 %5546 }
0x16d9   : > { %v5544_v29 = vpop.xlane.xlu1 %5543 }
0x16da   : > { %v5548_v38 = vmax.f32 %v5544_v29, %v5547_v63 }
0x16dd   : > { %v5641_v32 = vpop.permute.xlu1 %5640 }
0x16de   : > { %v5551_v41 = vpop.xlane.xlu0 %5550 }
0x16df   : > { %v5552_v8 = vmax.f32 %v5548_v38, %v5551_v41 }
0x16e1   : > { %v5553_v44 = vsub.f32 %v5393_v16, %v5552_v8  ;;  %v5560_v47 = vsub.f32 %v5465_v12, %v5552_v8  ;;  %v5717_v40 = vsub.f32 %v5541_v42, %v5552_v8 }
0x16e2   : > { %v5725_v54 = vpop.permute.xlu0 %5724 }
0x16e3   : > { %v5554_v51 = vmul.f32 1.442695, %v5553_v44  ;;  %v5561_v57 = vmul.f32 1.442695, %v5560_v47  ;;  %v5718_v7 = vmul.f32 1.442695, %v5717_v40 }
0x16e5   : > { %11331 = vpow2.f32 %v5554_v51 }
0x16e6   : > { %11333 = vpow2.f32 %v5561_v57 }
0x16e7   : > { %11335 = vpow2.f32 %v5718_v7 }
0x16ef   : > { %v11332_v61 = vpop.eup %11331 }
0x16f0   : > { %v11334_v56 = vpop.eup %11333  ;;  %v5556_v19 = vsel %vm4415_vm3, %v11332_v61, 0.0 }
0x16f1   : > { %10633 = vmatmul.mubr.msk.f32.vlgmr.msra.gmra.mrb[30].mxu0 %vm1487_vm7, %v11334_v56  ;;  %v5563_v27 = vsel %vm4419_vm4, %v11334_v56, 0.0  ;;  %5557 = vadd.xlane.f32.xlu1 %v5556_v19  ;;  %v11336_v12 = vpop.eup %11335 }
0x16f2   : > { %10636 = vmatpush3.msk.msra.mxu0 %vm1743_vm14, %v5641_v32  ;;  %5564 = vadd.xlane.f32.xlu0 %v5563_v27  ;;  %v5720_v52 = vsel %vm4424_vm5, %v11336_v12, 0.0 }
0x16f3   : > { %10637 = vmatprep.mubr.msk.f32.mxu0 %vm11825_vm2, %v11826_v20  ;;  %10640 = vmatprep.subr.mxu0 %v11826_v20 }
0x16f9   : > { %10638 = vmatmul.mubr.msk.f32.vlgmr.msra.gmra.mrb[30].mxu0 %vm1641_vm11, %v11332_v61 }
0x16fa   : > { %10641 = vmatpush3.msk.msra.mxu0 %vm4603_vm8, %v5725_v54  ;;  %10642 = vmatprep.mubr.msk.f32.mxu0 %vm11825_vm2, %v11826_v20 }
0x16fb   : > { %10660 = vmatprep.subr.mxu0 %v11826_v20 }
0x1701   : > { %10643 = vmatmul.mubr.msk.f32.vlgmr.msra.gmra.mrb[30].mxu0 %vm4599_vm9, %v11336_v12 }
0x1702   : > { %5878 = vrot.lane.b32.xlu1 %v12948_v48, %s11829_s16  ;;  %10662 = vmatprep.mubr.msk.f32.mxu0 %vm11825_vm2, %v11826_v20 }
0x1708   : > { %5880 = vrot.lane.b32.xlu0 %v12760_v39, %s11829_s16 }
0x1726   : > { %5721 = vadd.xlane.f32.xlu1 %v5720_v52 }
0x1737   : > { %6029 = vrot.lane.b32.xlu1 %v12962_v59, %s11829_s16 }
0x177e   : > { %v5558_v3 = vpop.xlane.xlu1 %5557 }
0x177f   : > { %v5565_v39 = vpop.xlane.xlu0 %5564 }
0x1780   : > { %v5566_v48 = vadd.f32 %v5565_v39, %v5558_v3 }
0x1782   : > { %v5879_v60 = vpop.permute.xlu1 %5878 }
0x1783   : > { %v5881_v31 = vpop.permute.xlu0 %5880 }
0x17b3   : > { %v5722_v17 = vpop.xlane.xlu1 %5721 }
0x17b4   : > { %v5723_v59 = vadd.f32 %v5722_v17, %v5566_v48 }
0x17b6   : > { %11337 = vrcp.f32 %v5723_v59 }
0x17b7   : > { %v6030_v18 = vpop.permute.xlu1 %6029 }
0x17b8   : > { %10661 = vmatpush3.xpose.msk.msra.mxu0 %vm1487_vm7, %v6030_v18 }
0x17b9   : > { %10680 = vmatprep.subr.mxu0 %v11826_v20 }
0x17bb   : > { %10663 = vmatmul.mubr.msk.f32.vlgmr.msra.gmra.mrb[32].mxu0 %vm1487_vm7, %v5879_v60 }
0x17bc   : > { %10681 = vmatpush3.msra.mxu0 %v12739_v28  ;;  %10682 = vmatprep.mubr.msk.f32.mxu0 %vm11825_vm2, %v11826_v20 }
0x17bd   : > { %11013 = vmatprep.subr.bf16.mxu0 %v11824_v2 }
0x17c0   : > { %v11338_v25 = vpop.eup %11337 }
0x17d4   : > { %v5797_v16 = vpop.f32.mrb[30].mxu0 }
0x17d5   : > { %v5803_v62 = vmul.f32 %v11338_v25, %v5797_v16  ;;  %v10644_v30 = vpop.f32.mrb[31].mxu0 }
0x17d7   : > { %10648 = vmatmul.mubr.msk.f32.vlgmr.msra.gmra.mrb[52].mxu1 %vm1487_vm7, %v5803_v62 }
0x17d8   : > { %10651 = vmatpush3.xpose.msk.msra.mxu1 %vm1487_vm7, %v5881_v31  ;;  %10652 = vmatprep.mubr.msk.f32.mxu1 %vm11825_vm2, %v11826_v20 }
0x17d9   : > { %10655 = vmatprep.subr.mxu1 %v11826_v20 }
0x17db   : > { %10653 = vmatmul.mubr.msk.f32.vlgmr.msra.gmra.mrb[54].mxu1 %vm1487_vm7, %v5879_v60 }
0x17dc   : > { %10656 = vmatpush3.xpose.msk.msra.mxu1 %vm1487_vm7, %v12691_v36  ;;  %10657 = vmatprep.mubr.msk.f32.mxu1 %vm11825_vm2, %v11826_v20 }
0x17dd   : > { %10665 = vmatprep.subr.mxu1 %v11826_v20 }
0x17df   : > { %10658 = vmatmul.mubr.msk.f32.vlgmr.msra.gmra.mrb[56].mxu1 %vm1487_vm7, %v5879_v60 }
0x17e0   : > { %10666 = vmatpush3.msra.mxu1 %v12716_v4  ;;  %10667 = vmatprep.mubr.msk.f32.mxu1 %vm11825_vm2, %v11826_v20 }
0x17e1   : > { %10670 = vmatprep.subr.mxu1 %v11826_v20 }
0x188e   : > { %v6099_v28 = vpop.f32.mrb[32].mxu0 }
0x188f   : > { %v10664_v35 = vpop.f32.mrb[33].mxu0  ;;  %v6103_v9 = vmul.f32 0.35355338, %v6099_v28 }
0x1891   : > { %v6104_v8 = vsel %vm12518_vm10, %v6103_v9, -1e+30  ;;  %v11402_v9 = vld [vmem:[#allocation10] ss:$0 sm:$0xff] }
0x1892   : > { %v6112_v51 = vsel %vm4424_vm5, %v6104_v8, -inf }
0x18aa   : > { %v5873_v53 = vpop.f32.mrb[52].mxu1 }
0x18ab   : > { %v13149_v42 = vadd.f32 %v5873_v53, %v13093_v49  ;;  %v10649_v36 = vpop.f32.mrb[53].mxu1 }
0x18ae   : > { %v5952_v63 = vpop.f32.mrb[54].mxu1 }
0x18af   : > { %v5956_v29 = vmul.f32 0.35355338, %v5952_v63  ;;  %v10654_v38 = vpop.f32.mrb[55].mxu1 }
0x18b1   : > { %v6105_v41 = vsel %vm4415_vm3, %v5956_v29, -inf }
0x18b2   : > { %6106 = vmax.xlane.f32.xlu0 %v6105_v41  ;;  %v6023_v4 = vpop.f32.mrb[56].mxu1 }
0x18b3   : > { %v6027_v44 = vmul.f32 0.35355338, %v6023_v4  ;;  %v10659_v47 = vpop.f32.mrb[57].mxu1 }
0x18b5   : > { %v6028_v49 = vsel %vm1389_vm12, %v6027_v44, -1e+30 }
0x18b6   : > { %6113 = vmax.xlane.f32.xlu0 %v6112_v51  ;;  %v6108_v57 = vsel %vm4419_vm4, %v6028_v49, -inf }
0x18b7   : > { %6109 = vmax.xlane.f32.xlu1 %v6108_v57  ;;  %v11404_v57 = vld [vmem:[#allocation13] ss:$0 sm:$0xff] }
0x18c8   : > { %6287 = vrot.lane.b32.xlu1 %v13014_v5, %s11829_s16 }
0x18cc   : > { %6203 = vrot.lane.b32.xlu0 %v13009_v34, %s11829_s16 }
0x193f   : > { %v6107_v40 = vpop.xlane.xlu0 %6106 }
0x1943   : > { %v6114_v19 = vpop.xlane.xlu0 %6113 }
0x1944   : > { %v6110_v61 = vpop.xlane.xlu1 %6109 }
0x1945   : > { %v6111_v56 = vmax.f32 %v6107_v40, %v6110_v61 }
0x1947   : > { %v6115_v32 = vmax.f32 %v6111_v56, %v6114_v19  ;;  %v6204_v18 = vpop.permute.xlu0 %6203  ;;  %v11405_v56 = vld [vmem:[#allocation15] ss:$0 sm:$0xff] }
0x1948   : > { %v6288_v59 = vpop.permute.xlu1 %6287 }
0x1949   : > { %v6116_v27 = vsub.f32 %v5956_v29, %v6115_v32  ;;  %v6123_v7 = vsub.f32 %v6028_v49, %v6115_v32  ;;  %v6280_v54 = vsub.f32 %v6104_v8, %v6115_v32  ;;  %v11403_v49 = vld [vmem:[#allocation12] ss:$0 sm:$0xff] }
0x194b   : > { %v6117_v12 = vmul.f32 1.442695, %v6116_v27  ;;  %v6124_v52 = vmul.f32 1.442695, %v6123_v7  ;;  %v6281_v3 = vmul.f32 1.442695, %v6280_v54 }
0x194d   : > { %11339 = vpow2.f32 %v6117_v12 }
0x194e   : > { %11341 = vpow2.f32 %v6124_v52 }
0x194f   : > { %11343 = vpow2.f32 %v6281_v3 }
0x1957   : > { %v11340_v60 = vpop.eup %11339 }
0x1958   : > { %v11342_v17 = vpop.eup %11341  ;;  %v6119_v5 = vsel %vm4415_vm3, %v11340_v60, 0.0 }
0x1959   : > { %10668 = vmatmul.mubr.msk.f32.vlgmr.msra.gmra.mrb[58].mxu1 %vm1487_vm7, %v11342_v17  ;;  %v6126_v34 = vsel %vm4419_vm4, %v11342_v17, 0.0  ;;  %6120 = vadd.xlane.f32.xlu1 %v6119_v5  ;;  %v11344_v39 = vpop.eup %11343 }
0x195a   : > { %10671 = vmatpush3.msk.msra.mxu1 %vm1743_vm14, %v6204_v18  ;;  %6127 = vadd.xlane.f32.xlu0 %v6126_v34  ;;  %v6283_v48 = vsel %vm4424_vm5, %v11344_v39, 0.0 }
0x195b   : > { %10672 = vmatprep.mubr.msk.f32.mxu1 %vm11825_vm2, %v11826_v20  ;;  %10675 = vmatprep.subr.mxu1 %v11826_v20 }
0x195e   : > { %6284 = vadd.xlane.f32.xlu0 %v6283_v48 }
0x1961   : > { %10673 = vmatmul.mubr.msk.f32.vlgmr.msra.gmra.mrb[58].mxu1 %vm1641_vm11, %v11340_v60 }
0x1962   : > { %10676 = vmatpush3.msk.msra.mxu1 %vm4603_vm8, %v6288_v59  ;;  %10677 = vmatprep.mubr.msk.f32.mxu1 %vm11825_vm2, %v11826_v20 }
0x1963   : > { %11019 = vmatprep.subr.bf16.mxu1 %v11824_v2 }
0x1969   : > { %10678 = vmatmul.mubr.msk.f32.vlgmr.msra.gmra.mrb[58].mxu1 %vm4599_vm9, %v11344_v39 }
0x196a   : > { %11021 = vmatpush3.bf16.msra.mxu1 %v12795_v33  ;;  %10712 = vmatprep.mubr.msk.f32.mxu1 %vm11825_vm2, %v11826_v20 }
0x196b   : > { %11022 = vmatprep.subr.bf16.mxu1 %v11824_v2 }
0x196e   : > { %11024 = vmatpush3.bf16.msra.mxu1 %v12805_v43 }
0x196f   : > { %11025 = vmatprep.subr.bf16.mxu1 %v11824_v2 }
0x1972   : > { %11027 = vmatpush3.bf16.msra.mxu1 %v12815_v46 }
0x1973   : > { %11028 = vmatprep.subr.bf16.mxu1 %v11824_v2 }
0x1976   : > { %11030 = vmatpush3.bf16.msra.mxu1 %v12825_v50 }
0x1977   : > { %11043 = vmatprep.subr.bf16.mxu1 %v11824_v2 }
0x19e6   : > { %v6121_v16 = vpop.xlane.xlu1 %6120 }
0x19e7   : > { %v6128_v25 = vpop.xlane.xlu0 %6127 }
0x19e8   : > { %v6129_v62 = vadd.f32 %v6128_v25, %v6121_v16 }
0x19eb   : > { %v6285_v33 = vpop.xlane.xlu0 %6284 }
0x19ec   : > { %v6286_v30 = vadd.f32 %v6285_v33, %v6129_v62 }
0x19ee   : > { %11345 = vrcp.f32 %v6286_v30 }
0x19f8   : > { %v11346_v31 = vpop.eup %11345 }
0x1a3c   : > { %v6360_v28 = vpop.f32.mrb[58].mxu1 }
0x1a3d   : > { %v6366_v35 = vmul.f32 %v11346_v31, %v6360_v28  ;;  %v10679_v43 = vpop.f32.mrb[59].mxu1  ;;  %v9910_v28 = vld [vmem:[%s13693_s14 + $0x20] sm:$0xff] }
0x1a3e   : > { %v9912_v43 = vld [vmem:[%s13693_s14 + $0x30] sm:$0xff] }
0x1a3f   : > { %10683 = vmatmul.mubr.msk.f32.vlgmr.msra.gmra.mrb[34].mxu0 %vm1487_vm7, %v6366_v35 }
0x1a40   : > { %11015 = vmatpush3.bf16.msra.mxu0 %v12772_v6  ;;  %10693 = vmatprep.mubr.msk.f32.mxu0 %vm11825_vm2, %v11826_v20 }
0x1a41   : > { %11016 = vmatprep.subr.bf16.mxu0 %v11824_v2 }
0x1a44   : > { %11018 = vmatpush3.bf16.msra.mxu0 %v12782_v11 }
0x1a45   : > { %11031 = vmatprep.subr.bf16.mxu0 %v11824_v2 }
0x1b12   : > { %v6436_v46 = vpop.f32.mrb[34].mxu0 }
0x1b13   : > { %v6440_v50 = vadd.f32 %v6436_v46, %v13149_v42  ;;  %v10684_v53 = vpop.f32.mrb[35].mxu0  ;;  %v9913_v46 = vld [vmem:[%s13693_s14 + $0x38] sm:$0xff] }
0x1b15   : > { %v6441_v36 = vadd.f32 %v6440_v50, %v12860_v58  ;;  %v11035_v50 = vpack.c.bf16 %v9913_v46, %v9912_v43  ;;  %v9909_v43 = vld [vmem:[%s13697_s17 + $0x2c] sm:$0xf] }
0x1b16   : > { %v13336_v46 = vmul.f32 %v9909_v43, %v12477_v0 }
0x1b17   : > { %v6442_v63 = vadd.f32 %v11402_v9, %v6441_v36 }
0x1b19   : > { %v6443_v29 = vsel %vm3962_vm1, %v6442_v63, 0.0 }
0x1b1a   : > { %6444 = vadd.xlane.f32.xlu1 %v6443_v29 }
0x1ba7   : > { %v6445_v6 = vpop.xlane.xlu1 %6444 }
0x1ba8   : > { %v6446_v38 = vmul.f32 0.03125, %v6445_v6 }
0x1baa   : > { %v6447_v41 = vsub.f32 %v6442_v63, %v6446_v38 }
0x1bac   : > { %v6448_v4 = vmul.f32 %v6447_v41, %v6447_v41 }
0x1bae   : > { %v6449_v8 = vsel %vm3962_vm1, %v6448_v4, 0.0 }
0x1baf   : > { %6450 = vadd.xlane.f32.xlu0 %v6449_v8  ;;  %v13263_v8 = vld [vmem:[#allocation9 + $0x1] ss:$0 sm:$0xff] }
0x1c3c   : > { %v6451_v11 = vpop.xlane.xlu0 %6450 }
0x1c3d   : > { %v6452_v44 = vmul.f32 0.03125, %v6451_v11  ;;  %v13276_v11 = vadd.f32 %v13263_v8, %v12944_v45 }
0x1c3f   : > { %v6453_v47 = vadd.f32 1e-05, %v6452_v44 }
0x1c41   : > { %11347 = vrsqrt.f32 %v6453_v47 }
0x1c4b   : > { %v11348_v42 = vpop.eup %11347 }
0x1c4c   : > { %v6455_v51 = vmul.f32 %v11348_v42, %v6447_v41 }
0x1c4e   : > { %v6456_v58 = vmul.f32 %v11403_v49, %v6455_v51 }
0x1c50   : > { %v6457_v40 = vadd.f32 %v11404_v57, %v6456_v58 }
0x1c52   : > { %10694 = vmatmul.mubr.msk.f32.vlgmr.msra.gmra.mrb[36].mxu0 %vm1186_vm6, %v6457_v40 }
0x1c53   : > { %10723 = vmatprep.mubr.msk.f32.mxu0 %vm11825_vm2, %v11826_v20 }
0x1d25   : > { %v6527_v61 = vpop.f32.mrb[36].mxu0 }
0x1d26   : > { %v6528_v19 = vadd.f32 %v11405_v56, %v6527_v61  ;;  %v10695_v32 = vpop.f32.mrb[37].mxu0 }
0x1d28   : > { %v6531_v27 = vmul.f32 %v6528_v19, %v6528_v19 }
0x1d2a   : > { %v6532_v7 = vmul.f32 %v6531_v27, %v6528_v19 }
0x1d2c   : > { %v6533_v54 = vmul.f32 0.044715, %v6532_v7 }
0x1d2e   : > { %v6534_v12 = vadd.f32 %v6533_v54, %v6528_v19 }
0x1d30   : > { %v6535_v52 = vmul.f32 0.7978846, %v6534_v12 }
0x1d32   : > { %11349 = vtanh.f32 %v6535_v52 }
0x1d3c   : > { %v11350_v3 = vpop.eup %11349 }
0x1d3d   : > { %v6537_v60 = vadd.f32 1.0, %v11350_v3 }
0x1d3f   : > { %v6538_v17 = vmul.f32 0.5, %v6537_v60 }
0x1d41   : > { %v6539_v5 = vmul.f32 %v6538_v17, %v6528_v19 }
0x1d43   : > { %10713 = vmatmul.mubr.msk.f32.vlgmr.msra.gmra.mrb[60].mxu1 %vm3585_vm15, %v6539_v5 }
0x1d44   : > { %11045 = vmatpush3.bf16.msra.mxu1 %v12898_v22  ;;  %10745 = vmatprep.mubr.msk.f32.mxu1 %vm11825_vm2, %v11826_v20  ;;  %v9908_v22 = vld [vmem:[%s13697_s17 + $0x28] sm:$0xf] }
0x1d45   : > { %11046 = vmatprep.subr.bf16.mxu1 %v11824_v2  ;;  %v13216_v25 = vmul.f32 %v9908_v22, %v12477_v0 }
0x1d48   : > { %11048 = vmatpush3.bf16.msra.mxu1 %v12909_v1  ;;  %v9842_v1 = vld [vmem:[#allocation7 + $0x1] ss:$0 sm:$0xff] }
0x1d49   : > { %10758 = vmatprep.subr.mxu1 %v11826_v20  ;;  %v13221_v16 = vadd.f32 %v9842_v1, %v12942_v37  ;;  %v9911_v37 = vld [vmem:[%s13693_s14 + $0x28] sm:$0xff] }
0x1d4a   : > { %v11032_v35 = vpack.c.bf16 %v9911_v37, %v9910_v28 }
0x1d4c   : > { %11033 = vmatpush3.bf16.msra.mxu0 %v11032_v35 }
0x1d4d   : > { %11034 = vmatprep.subr.bf16.mxu0 %v11824_v2 }
0x1d50   : > { %11036 = vmatpush3.bf16.msra.mxu0 %v11035_v50 }
0x1d51   : > { %11037 = vmatprep.subr.bf16.mxu0 %v11824_v2 }
0x1e16   : > { %v6609_v18 = vpop.f32.mrb[60].mxu1 }
0x1e17   : > { %v6613_v34 = vadd.f32 %v6609_v18, %v6442_v63  ;;  %v10714_v39 = vpop.f32.mrb[61].mxu1 }
0x1e19   : > { %v13208_v48 = vadd.f32 %v12855_v21, %v6613_v34 }
0x1e1b   : > { %v6621_v59 = vsel %vm3962_vm1, %v13208_v48, 0.0 }
0x1e1c   : > { %6622 = vadd.xlane.f32.xlu1 %v6621_v59 }
0x1e2d   : > { %7356 = vrot.lane.b32.xlu1 %v13216_v25, %s11827_s3 }
0x1e31   : > { %7433 = vrot.lane.b32.xlu1 %v13221_v16, %s11827_s3 }
0x1ea9   : > { %v6623_v21 = vpop.xlane.xlu1 %6622 }
0x1eaa   : > { %v6624_v33 = vmul.f32 0.03125, %v6623_v21 }
0x1eac   : > { %v6625_v62 = vsub.f32 %v13208_v48, %v6624_v33 }
0x1ead   : > { %v7357_v45 = vpop.permute.xlu1 %7356 }
0x1eae   : > { %v6626_v30 = vmul.f32 %v6625_v62, %v6625_v62 }
0x1eb0   : > { %v6627_v31 = vsel %vm3962_vm1, %v6626_v30, 0.0 }
0x1eb1   : > { %6628 = vadd.xlane.f32.xlu0 %v6627_v31  ;;  %v7434_v49 = vpop.permute.xlu1 %7433 }
0x1f3e   : > { %v6629_v53 = vpop.xlane.xlu0 %6628 }
0x1f3f   : > { %v6630_v36 = vmul.f32 0.03125, %v6629_v53 }
0x1f41   : > { %v6631_v9 = vadd.f32 1e-05, %v6630_v36 }
0x1f43   : > { %11351 = vrsqrt.f32 %v6631_v9 }
0x1f4d   : > { %v11352_v63 = vpop.eup %11351 }
0x1f4e   : > { %v6633_v29 = vmul.f32 %v11352_v63, %v6625_v62 }
0x1f50   : > { %v6634_v6 = vmul.f32 %v12887_v10, %v6633_v29 }
0x1f52   : > { %v6635_v38 = vadd.f32 %v12895_v14, %v6634_v6 }
0x1f54   : > { %10724 = vmatmul.mubr.msk.f32.vlgmr.msra.gmra.mrb[38].mxu0 %vm1186_vm6, %v6635_v38  ;;  %10746 = vmatmul.mubr.msk.f32.vlgmr.msra.gmra.mrb[62].mxu1 %vm1186_vm6, %v6635_v38 }
0x1f55   : > { %11039 = vmatpush3.bf16.msra.mxu0 %v12873_v55  ;;  %10734 = vmatprep.mubr.msk.f32.mxu0 %vm11825_vm2, %v11826_v20  ;;  %v9914_v55 = vld [vmem:[#allocation6 + $0x1] ss:$0 sm:$0xff] }
0x1f56   : > { %11040 = vmatprep.subr.bf16.mxu0 %v11824_v2  ;;  %10760 = vmatprep.mubr.msk.f32.mxu1 %vm11825_vm2, %v11826_v20 }
0x1f59   : > { %11042 = vmatpush3.bf16.msra.mxu0 %v12883_v26 }
0x1f5a   : > { %10748 = vmatprep.subr.mxu0 %v11826_v20 }
0x1f5c   : > { %10735 = vmatmul.mubr.msk.f32.vlgmr.msra.gmra.mrb[40].mxu0 %vm1186_vm6, %v6635_v38 }
0x1f5d   : > { %10750 = vmatprep.mubr.msk.f32.mxu0 %vm11825_vm2, %v11826_v20 }
0x1f62   : > { %10749 = vmatpush3.xpose.msk.msra.mxu0 %vm1487_vm7, %v13216_v25 }
0x1f63   : > { %10753 = vmatprep.subr.mxu0 %v11826_v20 }
0x2027   : > { %v6718_v10 = vpop.f32.mrb[38].mxu0  ;;  %v13259_v14 = vpop.f32.mrb[62].mxu1 }
0x2028   : > { %v13261_v41 = vadd.f32 %v9914_v55, %v6718_v10  ;;  %v10725_v4 = vpop.f32.mrb[39].mxu0  ;;  %v10747_v26 = vpop.f32.mrb[63].mxu1  ;;  %v13328_v35 = vadd.f32 %v13263_v8, %v13259_v14 }
0x202a   : > { %7354 = vrot.lane.b32.xlu0 %v13261_v41, %s11827_s3  ;;  %10751 = vmatmul.mubr.msk.f32.vlgmr.msra.gmra.mrb[42].mxu0 %vm1487_vm7, %v13261_v41 }
0x202b   : > { %10754 = vmatpush3.xpose.msk.msra.mxu0 %vm1487_vm7, %v13221_v16  ;;  %10755 = vmatprep.mubr.msk.f32.mxu0 %vm11825_vm2, %v11826_v20 }
0x202c   : > { %10763 = vmatprep.subr.mxu0 %v11826_v20 }
0x202e   : > { %10756 = vmatmul.mubr.msk.f32.vlgmr.msra.gmra.mrb[44].mxu0 %vm1487_vm7, %v13261_v41 }
0x202f   : > { %v6788_v44 = vpop.f32.mrb[40].mxu0  ;;  %10764 = vmatpush3.msra.mxu0 %v13276_v11  ;;  %10765 = vmatprep.mubr.msk.f32.mxu0 %vm11825_vm2, %v11826_v20 }
0x2030   : > { %v13283_v47 = vadd.f32 %v9842_v1, %v6788_v44  ;;  %v10736_v42 = vpop.f32.mrb[41].mxu0  ;;  %10768 = vmatprep.subr.mxu0 %v11826_v20 }
0x2032   : > { %7509 = vrot.lane.b32.xlu1 %v13283_v47, %s11827_s3  ;;  %10759 = vmatpush3.xpose.msk.msra.mxu1 %vm1487_vm7, %v13283_v47 }
0x2033   : > { %10778 = vmatprep.subr.mxu1 %v11826_v20 }
0x2035   : > { %10761 = vmatmul.mubr.msk.f32.vlgmr.msra.gmra.mrb[64].mxu1 %vm1487_vm7, %v13261_v41 }
0x2036   : > { %10779 = vmatpush3.xpose.msk.msra.mxu1 %vm1487_vm7, %v7357_v45  ;;  %10780 = vmatprep.mubr.msk.f32.mxu1 %vm11825_vm2, %v11826_v20 }
0x2037   : > { %10783 = vmatprep.subr.mxu1 %v11826_v20 }
0x209c   : > { %v7355_v51 = vpop.permute.xlu0 %7354 }
0x209d   : > { %10781 = vmatmul.mubr.msk.f32.vlgmr.msra.gmra.mrb[66].mxu1 %vm1487_vm7, %v7355_v51 }
0x209e   : > { %10784 = vmatpush3.xpose.msk.msra.mxu1 %vm1487_vm7, %v7434_v49  ;;  %10785 = vmatprep.mubr.msk.f32.mxu1 %vm11825_vm2, %v11826_v20 }
0x209f   : > { %10788 = vmatprep.subr.mxu1 %v11826_v20 }
0x20a1   : > { %10786 = vmatmul.mubr.msk.f32.vlgmr.msra.gmra.mrb[68].mxu1 %vm1487_vm7, %v7355_v51 }
0x20a2   : > { %10790 = vmatprep.mubr.msk.f32.mxu1 %vm11825_vm2, %v11826_v20 }
0x20a4   : > { %v7510_v58 = vpop.permute.xlu1 %7509 }
0x20a5   : > { %10789 = vmatpush3.xpose.msk.msra.mxu1 %vm1487_vm7, %v7510_v58 }
0x20a6   : > { %10808 = vmatprep.subr.mxu1 %v11826_v20 }
0x20a8   : > { %10791 = vmatmul.mubr.msk.f32.vlgmr.msra.gmra.mrb[70].mxu1 %vm1487_vm7, %v7355_v51 }
0x20a9   : > { %10810 = vmatprep.mubr.msk.f32.mxu1 %vm11825_vm2, %v11826_v20 }
0x20fd   : > { %v6939_v57 = vpop.f32.mrb[42].mxu0 }
0x20fe   : > { %v6943_v40 = vmul.f32 0.35355338, %v6939_v57  ;;  %v10752_v61 = vpop.f32.mrb[43].mxu0 }
0x2100   : > { %v7094_v56 = vsel %vm4415_vm3, %v6943_v40, -inf }
0x2101   : > { %7095 = vmax.xlane.f32.xlu0 %v7094_v56  ;;  %v7013_v19 = vpop.f32.mrb[44].mxu0 }
0x2102   : > { %v7017_v32 = vmul.f32 0.35355338, %v7013_v19  ;;  %v10757_v27 = vpop.f32.mrb[45].mxu0 }
0x2104   : > { %v7018_v7 = vsel %vm1389_vm12, %v7017_v32, -1e+30 }
0x2105   : > { %v7097_v54 = vsel %vm4419_vm4, %v7018_v7, -inf }
0x2106   : > { %7098 = vmax.xlane.f32.xlu1 %v7097_v54 }
0x2108   : > { %v7088_v12 = vpop.f32.mrb[64].mxu1 }
0x2109   : > { %v7092_v52 = vmul.f32 0.35355338, %v7088_v12  ;;  %v10762_v3 = vpop.f32.mrb[65].mxu1 }
0x210b   : > { %v7093_v60 = vsel %vm12518_vm10, %v7092_v52, -1e+30 }
0x210c   : > { %v7101_v17 = vsel %vm4424_vm5, %v7093_v60, -inf }
0x210d   : > { %7102 = vmax.xlane.f32.xlu0 %v7101_v17 }
0x2170   : > { %v7428_v5 = vpop.f32.mrb[66].mxu1 }
0x2171   : > { %v7432_v18 = vmul.f32 0.35355338, %v7428_v5  ;;  %v10782_v34 = vpop.f32.mrb[67].mxu1 }
0x2172   : > { %v9919_v34 = vld [vmem:[%s13702_s28 + $0x28] sm:$0xff] }
0x2173   : > { %v7585_v39 = vsel %vm4415_vm3, %v7432_v18, -inf  ;;  %10809 = vmatpush3.msra.mxu1 %v9919_v34 }
0x2174   : > { %7586 = vmax.xlane.f32.xlu0 %v7585_v39  ;;  %v7503_v59 = vpop.f32.mrb[68].mxu1  ;;  %10813 = vmatprep.subr.mxu1 %v11826_v20 }
0x2175   : > { %v7507_v22 = vmul.f32 0.35355338, %v7503_v59  ;;  %v10787_v1 = vpop.f32.mrb[69].mxu1 }
0x2177   : > { %v7508_v21 = vsel %vm1389_vm12, %v7507_v22, -1e+30 }
0x2178   : > { %v7588_v33 = vsel %vm4419_vm4, %v7508_v21, -inf }
0x2179   : > { %7589 = vmax.xlane.f32.xlu1 %v7588_v33 }
0x217b   : > { %v7579_v62 = vpop.f32.mrb[70].mxu1 }
0x217c   : > { %v7583_v30 = vmul.f32 0.35355338, %v7579_v62  ;;  %v10792_v31 = vpop.f32.mrb[71].mxu1 }
0x217e   : > { %v7584_v28 = vsel %vm12518_vm10, %v7583_v30, -1e+30 }
0x217f   : > { %v7592_v37 = vsel %vm4424_vm5, %v7584_v28, -inf }
0x2180   : > { %7593 = vmax.xlane.f32.xlu0 %v7592_v37 }
0x218a   : > { %7611 = vrot.lane.b32.xlu1 %v13276_v11, %s11827_s3 }
0x218e   : > { %7771 = vrot.lane.b32.xlu1 %v13328_v35, %s11827_s3  ;;  %v7096_v50 = vpop.xlane.xlu0 %7095 }
0x2193   : > { %v7099_v53 = vpop.xlane.xlu1 %7098 }
0x2194   : > { %v7100_v36 = vmax.f32 %v7096_v50, %v7099_v53 }
0x2196   : > { %7687 = vrot.lane.b32.xlu0 %v13336_v46, %s11827_s3 }
0x219a   : > { %v7103_v9 = vpop.xlane.xlu0 %7102 }
0x219b   : > { %v7104_v63 = vmax.f32 %v7100_v36, %v7103_v9 }
0x219d   : > { %v7105_v29 = vsub.f32 %v6943_v40, %v7104_v63  ;;  %v7112_v6 = vsub.f32 %v7018_v7, %v7104_v63  ;;  %v7268_v10 = vsub.f32 %v7093_v60, %v7104_v63 }
0x219f   : > { %v7113_v38 = vmul.f32 1.442695, %v7112_v6  ;;  %v7106_v55 = vmul.f32 1.442695, %v7105_v29  ;;  %v7269_v4 = vmul.f32 1.442695, %v7268_v10 }
0x21a1   : > { %11353 = vpow2.f32 %v7113_v38 }
0x21a2   : > { %11355 = vpow2.f32 %v7106_v55  ;;  %v9918_v55 = vld [vmem:[%s13702_s28 + $0x20] sm:$0xff] }
0x21a3   : > { %11357 = vpow2.f32 %v7269_v4 }
0x21ab   : > { %v11354_v14 = vpop.eup %11353 }
0x21ac   : > { %10766 = vmatmul.mubr.msk.f32.vlgmr.msra.gmra.mrb[46].mxu0 %vm1487_vm7, %v11354_v14  ;;  %v11356_v0 = vpop.eup %11355 }
0x21ad   : > { %10769 = vmatpush3.msk.msra.mxu0 %vm1743_vm14, %v13336_v46  ;;  %10770 = vmatprep.mubr.msk.f32.mxu0 %vm11825_vm2, %v11826_v20  ;;  %v7108_v26 = vsel %vm4415_vm3, %v11356_v0, 0.0  ;;  %v11358_v8 = vpop.eup %11357 }
0x21ae   : > { %10773 = vmatprep.subr.mxu0 %v11826_v20  ;;  %v7271_v60 = vsel %vm4424_vm5, %v11358_v8, 0.0 }
0x21b2   : > { %7109 = vadd.xlane.f32.xlu1 %v7108_v26 }
0x21b4   : > { %10771 = vmatmul.mubr.msk.f32.vlgmr.msra.gmra.mrb[46].mxu0 %vm1641_vm11, %v11356_v0 }
0x21b5   : > { %10774 = vmatpush3.msk.msra.mxu0 %vm4603_vm8, %v13328_v35  ;;  %10775 = vmatprep.mubr.msk.f32.mxu0 %vm11825_vm2, %v11826_v20 }
0x21b6   : > { %10793 = vmatprep.subr.mxu0 %v11826_v20 }
0x21bc   : > { %10776 = vmatmul.mubr.msk.f32.vlgmr.msra.gmra.mrb[46].mxu0 %vm4599_vm9, %v11358_v8 }
0x21bd   : > { %10795 = vmatprep.mubr.msk.f32.mxu0 %vm11825_vm2, %v11826_v20 }
0x2201   : > { %v7587_v42 = vpop.xlane.xlu0 %7586 }
0x2206   : > { %v7590_v44 = vpop.xlane.xlu1 %7589 }
0x2207   : > { %v7591_v51 = vmax.f32 %v7587_v42, %v7590_v44 }
0x220a   : > { %v7612_v45 = vpop.permute.xlu1 %7611 }
0x220b   : > { %10794 = vmatpush3.msra.mxu0 %v7612_v45 }
0x220c   : > { %10798 = vmatprep.subr.mxu0 %v11826_v20 }
0x220d   : > { %v7594_v49 = vpop.xlane.xlu0 %7593 }
0x220e   : > { %v7595_v58 = vmax.f32 %v7591_v51, %v7594_v49  ;;  %v7772_v5 = vpop.permute.xlu1 %7771 }
0x2210   : > { %v7596_v57 = vsub.f32 %v7432_v18, %v7595_v58  ;;  %v7603_v40 = vsub.f32 %v7508_v21, %v7595_v58  ;;  %v7764_v61 = vsub.f32 %v7584_v28, %v7595_v58  ;;  %v7115_v18 = vsel %vm4419_vm4, %v11354_v14, 0.0 }
0x2211   : > { %v7688_v12 = vpop.permute.xlu0 %7687 }
0x2212   : > { %v7597_v56 = vmul.f32 1.442695, %v7596_v57  ;;  %v7604_v19 = vmul.f32 1.442695, %v7603_v40  ;;  %v7765_v32 = vmul.f32 1.442695, %v7764_v61 }
0x2214   : > { %11359 = vpow2.f32 %v7597_v56 }
0x2215   : > { %11361 = vpow2.f32 %v7604_v19 }
0x2216   : > { %11363 = vpow2.f32 %v7765_v32 }
0x221e   : > { %v11360_v27 = vpop.eup %11359 }
0x221f   : > { %v11362_v7 = vpop.eup %11361  ;;  %v7599_v54 = vsel %vm4415_vm3, %v11360_v27, 0.0 }
0x2220   : > { %10796 = vmatmul.mubr.msk.f32.vlgmr.msra.gmra.mrb[48].mxu0 %vm1487_vm7, %v11362_v7  ;;  %v7606_v52 = vsel %vm4419_vm4, %v11362_v7, 0.0  ;;  %7600 = vadd.xlane.f32.xlu1 %v7599_v54  ;;  %v11364_v3 = vpop.eup %11363 }
0x2221   : > { %10799 = vmatpush3.msk.msra.mxu0 %vm1743_vm14, %v7688_v12  ;;  %7607 = vadd.xlane.f32.xlu0 %v7606_v52  ;;  %v7767_v17 = vsel %vm4424_vm5, %v11364_v3, 0.0 }
0x2222   : > { %10800 = vmatprep.mubr.msk.f32.mxu0 %vm11825_vm2, %v11826_v20  ;;  %10803 = vmatprep.subr.mxu0 %v11826_v20 }
0x2224   : > { %7272 = vadd.xlane.f32.xlu1 %v7271_v60 }
0x2225   : > { %7768 = vadd.xlane.f32.xlu0 %v7767_v17 }
0x2228   : > { %10801 = vmatmul.mubr.msk.f32.vlgmr.msra.gmra.mrb[48].mxu0 %vm1641_vm11, %v11360_v27 }
0x2229   : > { %10804 = vmatpush3.msk.msra.mxu0 %vm4603_vm8, %v7772_v5  ;;  %7116 = vadd.xlane.f32.xlu0 %v7115_v18 }
0x222a   : > { %10805 = vmatprep.mubr.msk.f32.mxu0 %vm11825_vm2, %v11826_v20  ;;  %10823 = vmatprep.subr.mxu0 %v11826_v20 }
0x2230   : > { %10806 = vmatmul.mubr.msk.f32.vlgmr.msra.gmra.mrb[48].mxu0 %vm4599_vm9, %v11364_v3 }
0x2231   : > { %10825 = vmatprep.mubr.msk.f32.mxu0 %vm11825_vm2, %v11826_v20 }
0x2235   : > { %8076 = vrot.lane.b32.xlu1 %v13221_v16, %s11828_s11 }
0x2239   : > { %7997 = vrot.lane.b32.xlu1 %v13261_v41, %s11828_s11 }
0x223f   : > { %7999 = vrot.lane.b32.xlu0 %v13216_v25, %s11828_s11  ;;  %v7110_v22 = vpop.xlane.xlu1 %7109 }
0x2243   : > { %8152 = vrot.lane.b32.xlu0 %v13283_v47, %s11828_s11 }
0x228f   : > { %v7347_v39 = vpop.f32.mrb[46].mxu0 }
0x2290   : > { %v10777_v59 = vpop.f32.mrb[47].mxu0 }
0x22ad   : > { %v7601_v1 = vpop.xlane.xlu1 %7600 }
0x22ae   : > { %v7608_v21 = vpop.xlane.xlu0 %7607 }
0x22af   : > { %v7609_v36 = vadd.f32 %v7608_v21, %v7601_v1 }
0x22b1   : > { %v7273_v33 = vpop.xlane.xlu1 %7272 }
0x22b2   : > { %v7769_v62 = vpop.xlane.xlu0 %7768 }
0x22b3   : > { %v7770_v9 = vadd.f32 %v7769_v62, %v7609_v36 }
0x22b5   : > { %v8077_v30 = vpop.permute.xlu1 %8076 }
0x22b6   : > { %v7117_v31 = vpop.xlane.xlu0 %7116  ;;  %10824 = vmatpush3.xpose.msk.msra.mxu0 %vm1487_vm7, %v8077_v30 }
0x22b7   : > { %v7118_v28 = vadd.f32 %v7117_v31, %v7110_v22  ;;  %10833 = vmatprep.subr.mxu0 %v11826_v20 }
0x22b9   : > { %v7274_v37 = vadd.f32 %v7273_v33, %v7118_v28  ;;  %v7998_v43 = vpop.permute.xlu1 %7997 }
0x22ba   : > { %10826 = vmatmul.mubr.msk.f32.vlgmr.msra.gmra.mrb[50].mxu0 %vm1487_vm7, %v7998_v43  ;;  %v8000_v10 = vpop.permute.xlu0 %7999 }
0x22bb   : > { %11365 = vrcp.f32 %v7274_v37  ;;  %10835 = vmatprep.mubr.msk.f32.mxu0 %vm11825_vm2, %v11826_v20 }
0x22bc   : > { %11367 = vrcp.f32 %v7770_v9 }
0x22be   : > { %v8153_v14 = vpop.permute.xlu0 %8152 }
0x22c5   : > { %v11366_v50 = vpop.eup %11365 }
0x22c6   : > { %v7353_v53 = vmul.f32 %v11366_v50, %v7347_v39  ;;  %v11368_v63 = vpop.eup %11367  ;;  %v9920_v50 = vld [vmem:[%s13702_s28 + $0x30] sm:$0xff] }
0x2303   : > { %v7844_v29 = vpop.f32.mrb[48].mxu0 }
0x2304   : > { %v7850_v6 = vmul.f32 %v11368_v63, %v7844_v29  ;;  %v10807_v38 = vpop.f32.mrb[49].mxu0 }
0x2306   : > { %10811 = vmatmul.mubr.msk.f32.vlgmr.msra.gmra.mrb[72].mxu1 %vm1487_vm7, %v7850_v6 }
0x2307   : > { %10814 = vmatpush3.msra.mxu1 %v9918_v55  ;;  %10815 = vmatprep.mubr.msk.f32.mxu1 %vm11825_vm2, %v11826_v20 }
0x2308   : > { %10818 = vmatprep.subr.mxu1 %v11826_v20 }
0x230a   : > { %10816 = vmatmul.mubr.msk.f32.vlgmr.msra.gmra.mrb[74].mxu1 %vm1487_vm7, %v7353_v53 }
0x230b   : > { %10820 = vmatprep.mubr.msk.f32.mxu1 %vm11825_vm2, %v11826_v20 }
0x230e   : > { %10819 = vmatpush3.xpose.msk.msra.mxu1 %vm1487_vm7, %v8000_v10 }
0x230f   : > { %10828 = vmatprep.subr.mxu1 %v11826_v20 }
0x2311   : > { %10821 = vmatmul.mubr.msk.f32.vlgmr.msra.gmra.mrb[76].mxu1 %vm1487_vm7, %v7998_v43 }
0x2312   : > { %10829 = vmatpush3.xpose.msk.msra.mxu1 %vm1487_vm7, %v8153_v14  ;;  %10830 = vmatprep.mubr.msk.f32.mxu1 %vm11825_vm2, %v11826_v20 }
0x2313   : > { %10848 = vmatprep.subr.mxu1 %v11826_v20 }
0x2315   : > { %10831 = vmatmul.mubr.msk.f32.vlgmr.msra.gmra.mrb[78].mxu1 %vm1487_vm7, %v7998_v43 }
0x2316   : > { %10850 = vmatprep.mubr.msk.f32.mxu1 %vm11825_vm2, %v11826_v20  ;;  %10849 = vmatpush3.msra.mxu1 %v9920_v50 }
0x2317   : > { %10853 = vmatprep.subr.mxu1 %v11826_v20 }
0x238d   : > { %v8146_v0 = vpop.f32.mrb[50].mxu0 }
0x238e   : > { %v8150_v4 = vmul.f32 0.35355338, %v8146_v0  ;;  %v10827_v26 = vpop.f32.mrb[51].mxu0 }
0x2390   : > { %v8151_v8 = vsel %vm1389_vm12, %v8150_v4, -1e+30 }
0x2391   : > { %v8231_v44 = vsel %vm4419_vm4, %v8151_v8, -inf }
0x2392   : > { %8232 = vmax.xlane.f32.xlu0 %v8231_v44 }
0x23d9   : > { %v7920_v42 = vpop.f32.mrb[72].mxu1 }
0x23da   : > { %v10812_v45 = vpop.f32.mrb[73].mxu1 }
0x23dd   : > { %v7993_v51 = vpop.f32.mrb[74].mxu1 }
0x23de   : > { %v13415_v49 = vadd.f32 %v7993_v51, %v7920_v42  ;;  %v10817_v58 = vpop.f32.mrb[75].mxu1 }
0x23e4   : > { %v8071_v57 = vpop.f32.mrb[76].mxu1 }
0x23e5   : > { %v8075_v40 = vmul.f32 0.35355338, %v8071_v57  ;;  %v10822_v61 = vpop.f32.mrb[77].mxu1 }
0x23e7   : > { %v8228_v56 = vsel %vm4415_vm3, %v8075_v40, -inf }
0x23e8   : > { %8229 = vmax.xlane.f32.xlu1 %v8228_v56  ;;  %v8222_v19 = vpop.f32.mrb[78].mxu1 }
0x23e9   : > { %v8226_v32 = vmul.f32 0.35355338, %v8222_v19  ;;  %v10832_v27 = vpop.f32.mrb[79].mxu1 }
0x23eb   : > { %v8227_v7 = vsel %vm12518_vm10, %v8226_v32, -1e+30 }
0x23ec   : > { %v8235_v54 = vsel %vm4424_vm5, %v8227_v7, -inf }
0x23ed   : > { %8236 = vmax.xlane.f32.xlu0 %v8235_v54 }
0x23f9   : > { %8253 = vrot.lane.b32.xlu1 %v13276_v11, %s11828_s11 }
0x23fd   : > { %8413 = vrot.lane.b32.xlu1 %v13328_v35, %s11828_s11 }
0x2403   : > { %8329 = vrot.lane.b32.xlu0 %v13336_v46, %s11828_s11  ;;  %s13707_s11 = sld [smem:[#allocation34_spill]] }
0x2409   : > { %s1082_s24 = scalar_lea.vmem %s13707_s11, %s12339_s10 }
0x241f   : > { %v8233_v52 = vpop.xlane.xlu0 %8232 }
0x2475   : > { %v8230_v12 = vpop.xlane.xlu1 %8229 }
0x2476   : > { %v8234_v3 = vmax.f32 %v8230_v12, %v8233_v52 }
0x2479   : > { %v8254_v60 = vpop.permute.xlu1 %8253 }
0x247a   : > { %10834 = vmatpush3.msra.mxu0 %v8254_v60  ;;  %v8237_v17 = vpop.xlane.xlu0 %8236 }
0x247b   : > { %v8238_v5 = vmax.f32 %v8234_v3, %v8237_v17  ;;  %10838 = vmatprep.subr.mxu0 %v11826_v20 }
0x247d   : > { %v8239_v18 = vsub.f32 %v8075_v40, %v8238_v5  ;;  %v8246_v34 = vsub.f32 %v8151_v8, %v8238_v5  ;;  %v8406_v39 = vsub.f32 %v8227_v7, %v8238_v5  ;;  %v8414_v43 = vpop.permute.xlu1 %8413 }
0x247e   : > { %v8330_v30 = vpop.permute.xlu0 %8329 }
0x247f   : > { %v8240_v59 = vmul.f32 1.442695, %v8239_v18  ;;  %v8247_v22 = vmul.f32 1.442695, %v8246_v34  ;;  %v8407_v1 = vmul.f32 1.442695, %v8406_v39 }
0x2481   : > { %11369 = vpow2.f32 %v8240_v59 }
0x2482   : > { %11371 = vpow2.f32 %v8247_v22 }
0x2483   : > { %11373 = vpow2.f32 %v8407_v1 }
0x248b   : > { %v11370_v21 = vpop.eup %11369 }
0x248c   : > { %v11372_v33 = vpop.eup %11371  ;;  %v8242_v62 = vsel %vm4415_vm3, %v11370_v21, 0.0 }
0x248d   : > { %10836 = vmatmul.mubr.msk.f32.vlgmr.msra.gmra.mrb[52].mxu0 %vm1487_vm7, %v11372_v33  ;;  %v8249_v31 = vsel %vm4419_vm4, %v11372_v33, 0.0  ;;  %8243 = vadd.xlane.f32.xlu1 %v8242_v62  ;;  %v11374_v28 = vpop.eup %11373 }
0x248e   : > { %10839 = vmatpush3.msk.msra.mxu0 %vm1743_vm14, %v8330_v30  ;;  %8250 = vadd.xlane.f32.xlu0 %v8249_v31  ;;  %v8409_v37 = vsel %vm4424_vm5, %v11374_v28, 0.0 }
0x248f   : > { %10840 = vmatprep.mubr.msk.f32.mxu0 %vm11825_vm2, %v11826_v20  ;;  %10843 = vmatprep.subr.mxu0 %v11826_v20 }
0x2492   : > { %8410 = vadd.xlane.f32.xlu0 %v8409_v37 }
0x2495   : > { %10841 = vmatmul.mubr.msk.f32.vlgmr.msra.gmra.mrb[52].mxu0 %vm1641_vm11, %v11370_v21  ;;  %v9921_v21 = vld [vmem:[%s13702_s28 + $0x38] sm:$0xff] }
0x2496   : > { %10844 = vmatpush3.msk.msra.mxu0 %vm4603_vm8, %v8414_v43  ;;  %10845 = vmatprep.mubr.msk.f32.mxu0 %vm11825_vm2, %v11826_v20 }
0x2497   : > { %10863 = vmatprep.subr.mxu0 %v11826_v20 }
0x249d   : > { %10846 = vmatmul.mubr.msk.f32.vlgmr.msra.gmra.mrb[52].mxu0 %vm4599_vm9, %v11374_v28 }
0x249e   : > { %8569 = vrot.lane.b32.xlu1 %v13216_v25, %s11829_s16  ;;  %10865 = vmatprep.mubr.msk.f32.mxu0 %vm11825_vm2, %v11826_v20 }
0x24a2   : > { %8646 = vrot.lane.b32.xlu1 %v13221_v16, %s11829_s16 }
0x24a6   : > { %8722 = vrot.lane.b32.xlu1 %v13283_v47, %s11829_s16 }
0x24a8   : > { %8567 = vrot.lane.b32.xlu0 %v13261_v41, %s11829_s16 }
0x251a   : > { %v8244_v25 = vpop.xlane.xlu1 %8243 }
0x251b   : > { %v8251_v53 = vpop.xlane.xlu0 %8250 }
0x251c   : > { %v8252_v36 = vadd.f32 %v8251_v53, %v8244_v25 }
0x251e   : > { %v8570_v9 = vpop.permute.xlu1 %8569 }
0x251f   : > { %v8411_v29 = vpop.xlane.xlu0 %8410 }
0x2520   : > { %v8412_v41 = vadd.f32 %v8411_v29, %v8252_v36 }
0x2522   : > { %v8647_v63 = vpop.permute.xlu1 %8646  ;;  %11375 = vrcp.f32 %v8412_v41 }
0x2523   : > { %v8568_v47 = vpop.permute.xlu0 %8567 }
0x2526   : > { %v8723_v16 = vpop.permute.xlu1 %8722 }
0x2527   : > { %10864 = vmatpush3.xpose.msk.msra.mxu0 %vm1487_vm7, %v8723_v16 }
0x2528   : > { %10883 = vmatprep.subr.mxu0 %v11826_v20 }
0x252a   : > { %10866 = vmatmul.mubr.msk.f32.vlgmr.msra.gmra.mrb[54].mxu0 %vm1487_vm7, %v8568_v47 }
0x252b   : > { %10885 = vmatprep.mubr.msk.f32.mxu0 %vm11825_vm2, %v11826_v20  ;;  %10884 = vmatpush3.msra.mxu0 %v9921_v21 }
0x252c   : > { %v11376_v6 = vpop.eup %11375  ;;  %11049 = vmatprep.subr.bf16.mxu0 %v11824_v2 }
0x2570   : > { %v8486_v38 = vpop.f32.mrb[52].mxu0 }
0x2571   : > { %v8492_v55 = vmul.f32 %v11376_v6, %v8486_v38  ;;  %v10847_v10 = vpop.f32.mrb[53].mxu0 }
0x2573   : > { %10851 = vmatmul.mubr.msk.f32.vlgmr.msra.gmra.mrb[80].mxu1 %vm1487_vm7, %v8492_v55 }
0x2574   : > { %10854 = vmatpush3.xpose.msk.msra.mxu1 %vm1487_vm7, %v8570_v9  ;;  %10855 = vmatprep.mubr.msk.f32.mxu1 %vm11825_vm2, %v11826_v20 }
0x2575   : > { %10858 = vmatprep.subr.mxu1 %v11826_v20 }
0x2577   : > { %10856 = vmatmul.mubr.msk.f32.vlgmr.msra.gmra.mrb[82].mxu1 %vm1487_vm7, %v8568_v47 }
0x2578   : > { %10859 = vmatpush3.xpose.msk.msra.mxu1 %vm1487_vm7, %v8647_v63  ;;  %10860 = vmatprep.mubr.msk.f32.mxu1 %vm11825_vm2, %v11826_v20  ;;  %v9970_v63 = vld [vmem:[#allocation10 + $0x1] ss:$0 sm:$0xff] }
0x2579   : > { %10868 = vmatprep.subr.mxu1 %v11826_v20 }
0x257b   : > { %10861 = vmatmul.mubr.msk.f32.vlgmr.msra.gmra.mrb[84].mxu1 %vm1487_vm7, %v8568_v47 }
0x257c   : > { %10870 = vmatprep.mubr.msk.f32.mxu1 %vm11825_vm2, %v11826_v20 }
0x25fd   : > { %v8792_v14 = vpop.f32.mrb[54].mxu0 }
0x25fe   : > { %v10867_v0 = vpop.f32.mrb[55].mxu0  ;;  %v8796_v44 = vmul.f32 0.35355338, %v8792_v14  ;;  %v9973_v14 = vld [vmem:[%s13704_s6 + $0x20] sm:$0xff] }
0x2600   : > { %v8797_v57 = vsel %vm12518_vm10, %v8796_v44, -1e+30 }
0x2646   : > { %v8562_v4 = vpop.f32.mrb[80].mxu1 }
0x2647   : > { %v13475_v26 = vadd.f32 %v8562_v4, %v13415_v49  ;;  %v10852_v8 = vpop.f32.mrb[81].mxu1  ;;  %v8805_v49 = vsel %vm4424_vm5, %v8797_v57, -inf  ;;  %v9975_v4 = vld [vmem:[%s13704_s6 + $0x30] sm:$0xff] }
0x264a   : > { %v8641_v42 = vpop.f32.mrb[82].mxu1 }
0x264b   : > { %v8645_v45 = vmul.f32 0.35355338, %v8641_v42  ;;  %v10857_v51 = vpop.f32.mrb[83].mxu1 }
0x264d   : > { %v8798_v58 = vsel %vm4415_vm3, %v8645_v45, -inf }
0x264e   : > { %8799 = vmax.xlane.f32.xlu0 %v8798_v58  ;;  %v8716_v40 = vpop.f32.mrb[84].mxu1  ;;  %v9971_v58 = vld [vmem:[#allocation12 + $0x1] ss:$0 sm:$0xff] }
0x264f   : > { %v8720_v61 = vmul.f32 0.35355338, %v8716_v40  ;;  %v10862_v56 = vpop.f32.mrb[85].mxu1  ;;  %v9972_v40 = vld [vmem:[#allocation13 + $0x1] ss:$0 sm:$0xff] }
0x2651   : > { %v8721_v19 = vsel %vm1389_vm12, %v8720_v61, -1e+30 }
0x2652   : > { %8806 = vmax.xlane.f32.xlu0 %v8805_v49  ;;  %v8801_v32 = vsel %vm4419_vm4, %v8721_v19, -inf  ;;  %v9980_v49 = vld [vmem:[%s13705_s1 + $0x48] sm:$0xff] }
0x2653   : > { %8802 = vmax.xlane.f32.xlu1 %v8801_v32 }
0x2664   : > { %8899 = vrot.lane.b32.xlu1 %v13336_v46, %s11829_s16 }
0x2668   : > { %8823 = vrot.lane.b32.xlu0 %v13276_v11, %s11829_s16  ;;  %8983 = vrot.lane.b32.xlu1 %v13328_v35, %s11829_s16 }
0x26db   : > { %v8800_v24 = vpop.xlane.xlu0 %8799 }
0x26df   : > { %v8807_v27 = vpop.xlane.xlu0 %8806 }
0x26e0   : > { %v8803_v7 = vpop.xlane.xlu1 %8802 }
0x26e1   : > { %v8804_v15 = vmax.f32 %v8800_v24, %v8803_v7  ;;  %v9981_v24 = vld [vmem:[%s13705_s1 + $0x50] sm:$0xff]  ;;  %v9983_v7 = vld [vmem:[%s13705_s1 + $0x60] sm:$0xff] }
0x26e3   : > { %v8808_v54 = vmax.f32 %v8804_v15, %v8807_v27  ;;  %v8824_v12 = vpop.permute.xlu0 %8823  ;;  %v9984_v15 = vld [vmem:[%s13705_s1 + $0x68] sm:$0xff] }
0x26e4   : > { %10869 = vmatpush3.msra.mxu1 %v8824_v12  ;;  %v8900_v39 = vpop.permute.xlu1 %8899  ;;  %v9985_v12 = vld [vmem:[%s13705_s1 + $0x70] sm:$0xff] }
0x26e5   : > { %v8809_v52 = vsub.f32 %v8645_v45, %v8808_v54  ;;  %v8816_v3 = vsub.f32 %v8721_v19, %v8808_v54  ;;  %v8976_v60 = vsub.f32 %v8797_v57, %v8808_v54  ;;  %10873 = vmatprep.subr.mxu1 %v11826_v20  ;;  %v9979_v19 = vld [vmem:[%s13705_s1 + $0x40] sm:$0xff]  ;;  %v11062_v54 = vpack.c.bf16 %v9984_v15, %v9983_v7 }
0x26e6   : > { %v11056_v32 = vpack.c.bf16 %v9980_v49, %v9979_v19 }
0x26e7   : > { %v8810_v17 = vmul.f32 1.442695, %v8809_v52  ;;  %v8817_v46 = vmul.f32 1.442695, %v8816_v3  ;;  %v8977_v5 = vmul.f32 1.442695, %v8976_v60 }
0x26e8   : > { %v8984_v1 = vpop.permute.xlu1 %8983  ;;  %v9986_v52 = vld [vmem:[%s13705_s1 + $0x78] sm:$0xff]  ;;  %v9977_v60 = vld [vmem:[#allocation15 + $0x1] ss:$0 sm:$0xff] }
0x26e9   : > { %11377 = vpow2.f32 %v8810_v17  ;;  %v11065_v3 = vpack.c.bf16 %v9986_v52, %v9985_v12 }
0x26ea   : > { %11379 = vpow2.f32 %v8817_v46 }
0x26eb   : > { %11381 = vpow2.f32 %v8977_v5 }
0x26f3   : > { %v11378_v11 = vpop.eup %11377 }
0x26f4   : > { %v11380_v35 = vpop.eup %11379  ;;  %v8812_v18 = vsel %vm4415_vm3, %v11378_v11, 0.0 }
0x26f5   : > { %v11382_v34 = vpop.eup %11381  ;;  %10871 = vmatmul.mubr.msk.f32.vlgmr.msra.gmra.mrb[86].mxu1 %vm1487_vm7, %v11380_v35  ;;  %v8819_v59 = vsel %vm4419_vm4, %v11380_v35, 0.0  ;;  %8813 = vadd.xlane.f32.xlu0 %v8812_v18 }
0x26f6   : > { %10874 = vmatpush3.msk.msra.mxu1 %vm1743_vm14, %v8900_v39  ;;  %8820 = vadd.xlane.f32.xlu1 %v8819_v59  ;;  %v8979_v22 = vsel %vm4424_vm5, %v11382_v34, 0.0 }
0x26f7   : > { %10875 = vmatprep.mubr.msk.f32.mxu1 %vm11825_vm2, %v11826_v20  ;;  %10878 = vmatprep.subr.mxu1 %v11826_v20 }
0x26f9   : > { %8980 = vadd.xlane.f32.xlu0 %v8979_v22 }
0x26fd   : > { %10876 = vmatmul.mubr.msk.f32.vlgmr.msra.gmra.mrb[86].mxu1 %vm1641_vm11, %v11378_v11 }
0x26fe   : > { %10879 = vmatpush3.msk.msra.mxu1 %vm4603_vm8, %v8984_v1  ;;  %10880 = vmatprep.mubr.msk.f32.mxu1 %vm11825_vm2, %v11826_v20 }
0x26ff   : > { %11055 = vmatprep.subr.bf16.mxu1 %v11824_v2 }
0x2705   : > { %10881 = vmatmul.mubr.msk.f32.vlgmr.msra.gmra.mrb[86].mxu1 %vm4599_vm9, %v11382_v34 }
0x2706   : > { %10915 = vmatprep.mubr.msk.f32.mxu1 %vm11825_vm2, %v11826_v20  ;;  %11057 = vmatpush3.bf16.msra.mxu1 %v11056_v32 }
0x2707   : > { %11058 = vmatprep.subr.bf16.mxu1 %v11824_v2 }
0x2782   : > { %v8814_v33 = vpop.xlane.xlu0 %8813 }
0x2783   : > { %v8821_v62 = vpop.xlane.xlu1 %8820 }
0x2784   : > { %v8822_v31 = vadd.f32 %v8821_v62, %v8814_v33  ;;  %v9988_v62 = vld [vmem:[#allocation16 + $0x1] ss:$0 sm:$0xff] }
0x2786   : > { %v8981_v30 = vpop.xlane.xlu0 %8980 }
0x2787   : > { %v8982_v28 = vadd.f32 %v8981_v30, %v8822_v31 }
0x2789   : > { %11383 = vrcp.f32 %v8982_v28 }
0x2793   : > { %v11384_v37 = vpop.eup %11383 }
0x27d8   : > { %v9056_v43 = vpop.f32.mrb[86].mxu1 }
0x27d9   : > { %v9062_v50 = vmul.f32 %v11384_v37, %v9056_v43  ;;  %v10882_v25 = vpop.f32.mrb[87].mxu1 }
0x27db   : > { %10886 = vmatmul.mubr.msk.f32.vlgmr.msra.gmra.mrb[56].mxu0 %vm1487_vm7, %v9062_v50  ;;  %vm9515_vm7 = vcmp.eq.s32.totalorder %v12389_v23, 0 }
0x27dc   : > { %10896 = vmatprep.mubr.msk.f32.mxu0 %vm11825_vm2, %v11826_v20 }
0x28ae   : > { %v9132_v53 = vpop.f32.mrb[56].mxu0 }
0x28af   : > { %v9136_v36 = vadd.f32 %v9132_v53, %v13475_v26  ;;  %v10887_v9 = vpop.f32.mrb[57].mxu0  ;;  %v9976_v26 = vld [vmem:[%s13704_s6 + $0x38] sm:$0xff] }
0x28b0   : > { %v11053_v8 = vpack.c.bf16 %v9976_v26, %v9975_v4  ;;  %v9394_v9 = vld [vmem:[#allocation19] sm:$0xff] }
0x28b1   : > { %v9137_v29 = vadd.f32 %v9136_v36, %v13208_v48  ;;  %v9974_v48 = vld [vmem:[%s13704_s6 + $0x28] sm:$0xff] }
0x28b2   : > { %v11050_v0 = vpack.c.bf16 %v9974_v48, %v9973_v14  ;;  %v9989_v14 = vld [vmem:[%s13706_s7] ss:$0 sm:$0xff] }
0x28b3   : > { %v13516_v16 = vadd.f32 %v9970_v63, %v9137_v29  ;;  %v9395_v63 = vld [vmem:[#allocation19 + $0x8] sm:$0xff] }
0x28b4   : > { %11051 = vmatpush3.bf16.msra.mxu0 %v11050_v0  ;;  %v11068_v29 = vpack.c.bf16 %v9395_v63, %v9394_v9  ;;  %v9990_v0 = vld [vmem:[#allocation18] ss:$0 sm:$0xff] }
0x28b5   : > { %v9151_v47 = vsel %vm3962_vm1, %v13516_v16, 0.0  ;;  %11052 = vmatprep.subr.bf16.mxu0 %v11824_v2 }
0x28b6   : > { %9152 = vadd.xlane.f32.xlu0 %v9151_v47  ;;  %v9396_v47 = vld [vmem:[#allocation19 + $0x10] sm:$0xff] }
0x28b8   : > { %11054 = vmatpush3.bf16.msra.mxu0 %v11053_v8  ;;  %v9497_v8 = vld [vmem:[%s1082_s24] sm:$0xff] }
0x28b9   : > { %11067 = vmatprep.subr.bf16.mxu0 %v11824_v2 }
0x2943   : > { %v9153_v41 = vpop.xlane.xlu0 %9152 }
0x2944   : > { %v9154_v6 = vmul.f32 0.03125, %v9153_v41  ;;  %v9397_v41 = vld [vmem:[#allocation19 + $0x18] sm:$0xff] }
0x2946   : > { %v9155_v38 = vsub.f32 %v13516_v16, %v9154_v6 }
0x2948   : > { %v9156_v55 = vmul.f32 %v9155_v38, %v9155_v38 }
0x294a   : > { %v9157_v10 = vsel %vm3962_vm1, %v9156_v55, 0.0 }
0x294b   : > { %9158 = vadd.xlane.f32.xlu1 %v9157_v10 }
0x29d8   : > { %v9159_v44 = vpop.xlane.xlu1 %9158 }
0x29d9   : > { %v9160_v42 = vmul.f32 0.03125, %v9159_v44 }
0x29db   : > { %v9161_v45 = vadd.f32 1e-05, %v9160_v42  ;;  %v9490_v42 = vrot.slane %v12840_v13, 1 }
0x29dd   : > { %11385 = vrsqrt.f32 %v9161_v45 }
0x29e7   : > { %v11386_v51 = vpop.eup %11385 }
0x29e8   : > { %v9163_v57 = vmul.f32 %v11386_v51, %v9155_v38 }
0x29ea   : > { %v9170_v61 = vmul.f32 %v9971_v58, %v9163_v57 }
0x29ec   : > { %v9177_v56 = vadd.f32 %v9972_v40, %v9170_v61 }
0x29ee   : > { %10897 = vmatmul.mubr.msk.f32.vlgmr.msra.gmra.mrb[58].mxu0 %vm1186_vm6, %v9177_v56 }
0x29ef   : > { %10926 = vmatprep.mubr.msk.f32.mxu0 %vm11825_vm2, %v11826_v20  ;;  %v9982_v20 = vld [vmem:[%s13705_s1 + $0x58] sm:$0xff]  ;;  %11069 = vmatpush3.bf16.msra.mxu0 %v11068_v29  ;;  %vm9500_vm2 = vcmask 6144  }
0x29f0   : > { %v11059_v27 = vpack.c.bf16 %v9982_v20, %v9981_v24  ;;  %11070 = vmatprep.subr.bf16.mxu0 %v11824_v2  ;;  %v9508_v58 = vsel %vm9500_vm2, %v9497_v8, 0.0 }
0x29f1   : > { %v9509_v61 = vrot.slane %v9508_v58, 4 }
0x29f2   : > { %11060 = vmatpush3.bf16.msra.mxu1 %v11059_v27 }
0x29f3   : > { %11061 = vmatprep.subr.bf16.mxu1 %v11824_v2  ;;  %v9510_v19 = vadd.f32 %v9509_v61, %v9508_v58 }
0x29f5   : > { %v9511_v49 = vrot.slane %v9510_v19, 2 }
0x29f6   : > { %11063 = vmatpush3.bf16.msra.mxu1 %v11062_v54 }
0x29f7   : > { %11064 = vmatprep.subr.bf16.mxu1 %v11824_v2  ;;  %v9991_v2 = vld [vmem:[#allocation21] ss:$0 sm:$0xff]  ;;  %v9512_v32 = vadd.f32 %v9511_v49, %v9510_v19 }
0x29f9   : > { %v9513_v24 = vrot.slane %v9512_v32, 1 }
0x29fa   : > { %11066 = vmatpush3.bf16.msra.mxu1 %v11065_v3 }
0x29fb   : > { %v9514_v20 = vadd.f32 %v9513_v24, %v9512_v32 }
0x2ac1   : > { %v9260_v17 = vpop.f32.mrb[58].mxu0 }
0x2ac2   : > { %v9261_v46 = vadd.f32 %v9977_v60, %v9260_v17  ;;  %v10898_v5 = vpop.f32.mrb[59].mxu0 }
0x2ac4   : > { %v9264_v11 = vmul.f32 %v9261_v46, %v9261_v46 }
0x2ac6   : > { %v9265_v35 = vmul.f32 %v9264_v11, %v9261_v46 }
0x2ac8   : > { %v9266_v18 = vmul.f32 0.044715, %v9265_v35 }
0x2aca   : > { %v9267_v34 = vadd.f32 %v9266_v18, %v9261_v46 }
0x2acc   : > { %v9268_v39 = vmul.f32 0.7978846, %v9267_v34 }
0x2ace   : > { %11387 = vtanh.f32 %v9268_v39 }
0x2ad8   : > { %v11388_v59 = vpop.eup %11387 }
0x2ad9   : > { %v9270_v22 = vadd.f32 1.0, %v11388_v59 }
0x2adb   : > { %v9271_v1 = vmul.f32 0.5, %v9270_v22 }
0x2add   : > { %v9272_v21 = vmul.f32 %v9271_v1, %v9261_v46 }
0x2adf   : > { %10916 = vmatmul.mubr.msk.f32.vlgmr.msra.gmra.mrb[88].mxu1 %vm3585_vm15, %v9272_v21 }
0x2bb2   : > { %v9351_v33 = vpop.f32.mrb[88].mxu1 }
0x2bb3   : > { %v9355_v30 = vadd.f32 %v9351_v33, %v13516_v16  ;;  %v10917_v31 = vpop.f32.mrb[89].mxu1  ;;  %v11071_v16 = vpack.c.bf16 %v9397_v41, %v9396_v47 }
0x2bb5   : > { %v9364_v28 = vadd.f32 %v9988_v62, %v9355_v30  ;;  %11072 = vmatpush3.bf16.msra.mxu0 %v11071_v16 }
0x2bb7   : > { %v9367_v37 = vsel %vm3962_vm1, %v9364_v28, 0.0 }
0x2bb8   : > { %9368 = vadd.xlane.f32.xlu0 %v9367_v37 }
0x2c45   : > { %v9369_v43 = vpop.xlane.xlu0 %9368 }
0x2c46   : > { %v9370_v50 = vmul.f32 0.03125, %v9369_v43 }
0x2c48   : > { %v9371_v25 = vsub.f32 %v9364_v28, %v9370_v50 }
0x2c4a   : > { %v9372_v53 = vmul.f32 %v9371_v25, %v9371_v25 }
0x2c4c   : > { %v9373_v36 = vsel %vm3962_vm1, %v9372_v53, 0.0 }
0x2c4d   : > { %9374 = vadd.xlane.f32.xlu1 %v9373_v36 }
0x2cda   : > { %v9375_v6 = vpop.xlane.xlu1 %9374 }
0x2cdb   : > { %v9376_v38 = vmul.f32 0.03125, %v9375_v6 }
0x2cdd   : > { %v9377_v55 = vadd.f32 1e-05, %v9376_v38 }
0x2cdf   : > { %11389 = vrsqrt.f32 %v9377_v55 }
0x2ce9   : > { %v11390_v10 = vpop.eup %11389 }
0x2cea   : > { %v9379_v48 = vmul.f32 %v11390_v10, %v9371_v25 }
0x2cec   : > { %v9386_v4 = vmul.f32 %v9989_v14, %v9379_v48 }
0x2cee   : > { %v9393_v26 = vadd.f32 %v9990_v0, %v9386_v4 }
0x2cf0   : > { %10927 = vmatmul.mubr.msk.f32.vlgmr.msra.gmra.mrb[60].mxu0 %vm1186_vm6, %v9393_v26  ;;  %vm9522_vm6 = vcmp.eq.s32.totalorder %v12389_v23, 1 }
0x2dc3   : > { %v9474_v44 = vpop.f32.mrb[60].mxu0 }
0x2dc4   : > { %v9475_v45 = vadd.f32 %v9991_v2, %v9474_v44  ;;  %v10928_v51 = vpop.f32.mrb[61].mxu0 }
0x2dc6   : > { %v9478_v57 = vsel %vm4603_vm8, %v9475_v45, -inf  ;;  %v9492_v40 = vmul.f32 %v9490_v42, %v9475_v45 }
0x2dc7   : > { %9479 = vmax.xlane.f32.xlu0 %v9478_v57 }
0x2dc8   : > { %v9493_v56 = vsel %vm4603_vm8, %v9492_v40, 0.0 }
0x2dcb   : > { %9494 = vadd.xlane.f32.xlu0 %v9493_v56 }
0x2de1   : > { %9525 = vperm.xlu0 %11271, %v9514_v20  }
0x2e54   : > { %v9480_v27 = vpop.xlane.xlu0 %9479 }
0x2e55   : > { %v9481_v13 = vsub.f32 %v9475_v45, %v9480_v27 }
0x2e57   : > { %v9482_v7 = vmul.f32 1.442695, %v9481_v13 }
0x2e58   : > { %v9495_v17 = vpop.xlane.xlu0 %9494 }
0x2e59   : > { %11391 = vpow2.f32 %v9482_v7 }
0x2e60   : > { %v9526_v21 = vpop.permute.xlu0 %9525 }
0x2e61   : > { %v9528_v62 = vsel %vm9522_vm6, %v9526_v21, 0.0 }
0x2e63   : > { %v11392_v15 = vpop.eup %11391 }
0x2e64   : > { %v9484_v54 = vsel %vm4603_vm8, %v11392_v15, 0.0 }
0x2e65   : > { %9485 = vadd.xlane.f32.xlu1 %v9484_v54 }
0x2ef2   : > { %v9486_v12 = vpop.xlane.xlu1 %9485 }
0x2ef3   : > { %11393 = vlog2.f32 %v9486_v12 }
0x2efd   : > { %v11394_v52 = vpop.eup %11393 }
0x2efe   : > { %v9488_v3 = vmul.f32 0.6931472, %v11394_v52 }
0x2f00   : > { %v9489_v60 = vadd.f32 %v9488_v3, %v9480_v27 }
0x2f02   : > { %v9496_v46 = vsub.f32 %v9495_v17, %v9489_v60 }
0x2f04   : > { %v9498_v5 = vsub.f32 0.0, %v9496_v46 }
0x2f06   : > { %v9499_v11 = vmul.f32 %v9498_v5, %v9497_v8 }
0x2f08   : > { %v9501_v35 = vsel %vm9500_vm2, %v9499_v11, 0.0 }
0x2f09   : > { %v9502_v18 = vrot.slane %v9501_v35, 4 }
0x2f0b   : > { %v9503_v34 = vadd.f32 %v9502_v18, %v9501_v35 }
0x2f0d   : > { %v9504_v39 = vrot.slane %v9503_v34, 2 }
0x2f0f   : > { %v9505_v59 = vadd.f32 %v9504_v39, %v9503_v34 }
0x2f11   : > { %v9506_v22 = vrot.slane %v9505_v59, 1 }
0x2f13   : > { %v9507_v1 = vadd.f32 %v9506_v22, %v9505_v59 }
0x2f15   : > { %9518 = vperm.xlu1 %11272, %v9507_v1  }
0x2f94   : > { %v9519_v33 = vpop.permute.xlu1 %9518 }
0x2f95   : > { %v9521_v30 = vsel %vm9515_vm7, %v9519_v33, 0.0 }
0x2f96   : > { %v9529_v31 = vadd.f32 %v9528_v62, %v9521_v30 }
0x2f98   : > { %9530 = vst [vmem:[%s1085_s9] sm:$0x1] %v9529_v31 }
0x2f99 PF: > { %s13709_s0 = sld [smem:[#allocation29_spill]] }
0x2f9f   : > { %s45_s8 = sadd.s32 1, %s13709_s0  }
0x2fa0   : > { %p42_p7 = scmp.ge.s32.totalorder %s45_s8, 4  }
0x2fa2   :  { %44 = sbr.rel (!%p42_p7) target bundleno = 28 (0x1c), region = 249 }
0x2fa9   :  { %9548 = vsyncpa [#allocation3], 1 }
0x2faa   :  { %9550 = vsyncpa [#allocation3 + $0x1], 1 }
0x2fab   :  { %9551 = vsyncpa [#allocation5], 1 }
0x2fac   :  { %9552 = vsyncpa [#allocation8], 1 }
0x2fad   :  { %9553 = vsyncpa [#allocation11], 1 }
0x2fae   :  { %9554 = vsyncpa [#allocation14], 1 }
0x2faf   :  { %9555 = vsyncpa [#allocation17], 1 }
0x2fb0   :  { %9556 = vsyncpa [#allocation20], 1 }

</bundles_post_ra>
